<compile_context>
chip_gen: v6e
topology: v6e:2x2x1
jax: 0.10.0
libtpu: 0.0.40
codegen_flags: <defaults>
</compile_context>

<pallas_src>
import functools

import jax
import jax.numpy as jnp
from jax.experimental import pallas as pl
from jax.experimental.pallas import tpu as pltpu

N_EMBD = 384          # module-level constant in the reference code
N_HEAD = 6
HEAD_SIZE = N_EMBD // N_HEAD
BLOCK_SIZE = 256      # causal-mask buffer size (T must be <= BLOCK_SIZE)
LN_EPS = 1e-5         # PyTorch nn.LayerNorm default


def _layer_norm(x, gamma, beta):
    mean = jnp.mean(x, axis=-1, keepdims=True)
    var = jnp.mean(jnp.square(x - mean), axis=-1, keepdims=True)
    return (x - mean) * jax.lax.rsqrt(var + LN_EPS) * gamma + beta


def block_kernel(x_ref, g1_ref, b1_ref, wqkv_ref, wo_ref, bo_ref,
                 g2_ref, b2_ref, w1_ref, bfc1_ref, w2_ref, bfc2_ref,
                 o_ref, *, bb, seq):
    C = N_EMBD
    D = HEAD_SIZE
    H = N_HEAD
    T = seq
    MB = bb * T

    x = x_ref[...]                                    # (bb*T, C) f32

    # ---------------- ln1 + multi-head causal self-attention ----------------
    xn = _layer_norm(x, g1_ref[...], b1_ref[...])     # f32

    # Single lane-dense fused QKV matmul: (mb,384) @ (384,1152) -> (mb,1152).
    # Attention scale is already folded into the Wq columns.
    qkv = jnp.dot(xn.astype(jnp.bfloat16), wqkv_ref[...],
                  preferred_element_type=jnp.float32)          # (mb, 3C) f32
    qkvb = qkv.astype(jnp.bfloat16)

    def split_heads(off):
        # (mb, C) lane-slab -> (H, mb, D) -> (H*bb, T, D); g = h*bb + b.
        zs = jnp.stack(
            [qkvb[:, off + h * D: off + (h + 1) * D] for h in range(H)],
            axis=0)
        return zs.reshape(H * bb, T, D)

    q = split_heads(0)          # scale already applied via Wq
    k = split_heads(C)
    v = split_heads(2 * C)

    # Causal mask, hoisted; broadcast over the fused (head, batch) axis.
    row = jax.lax.broadcasted_iota(jnp.int32, (T, T), 0)
    col = jax.lax.broadcasted_iota(jnp.int32, (T, T), 1)
    causal = (row >= col)[None]                       # (1, T, T)

    # Batched scores / softmax / PV over g = H*bb heads-x-batch.
    wei = jnp.einsum("gqd,gkd->gqk", q, k,
                     preferred_element_type=jnp.float32)       # (G, T, T) f32
    wei = jnp.where(causal, wei, -1e30)               # finite mask (NaN-safe)
    wei = wei - jnp.max(wei, axis=-1, keepdims=True)
    p = jnp.exp(wei)                                  # f32 softmax
    p = p * pl.reciprocal(jnp.sum(p, axis=-1, keepdims=True), approx=True)
    # TODO(synk): attention dropout omitted (eval-mode / identity).

    attn = jnp.einsum("gqk,gkd->gqd", p.astype(jnp.bfloat16), v,
                      preferred_element_type=jnp.float32)      # (G, T, D) f32

    # Concat heads (one small lane relayout) then a single K=384 projection.
    attn_b = attn.astype(jnp.bfloat16).reshape(H, MB, D)
    attn2d = jnp.concatenate([attn_b[h] for h in range(H)], axis=-1)  # (mb, C)
    sa = jnp.dot(attn2d, wo_ref[...],
                 preferred_element_type=jnp.float32) + bo_ref[...]
    # TODO(synk): output-projection dropout omitted (eval-mode / identity).
    x1 = x + sa

    # ----------------------- ln2 + feed-forward (MLP) -----------------------
    xn2 = _layer_norm(x1, g2_ref[...], b2_ref[...])
    h1 = jnp.dot(xn2.astype(jnp.bfloat16), w1_ref[...],
                 preferred_element_type=jnp.float32) + bfc1_ref[...]
    h1 = jnp.maximum(h1, 0.0)                                      # ReLU
    ff = jnp.dot(h1.astype(jnp.bfloat16), w2_ref[...],
                 preferred_element_type=jnp.float32) + bfc2_ref[...]
    # TODO(synk): ffwd dropout omitted (eval-mode / identity).
    o_ref[...] = (x1 + ff).astype(o_ref.dtype)


def _pick_vmem_limit():
    """~3/4 of physical VMEM per core, clamped to [48 MiB, 96 MiB]."""
    try:
        cap = pltpu.get_tpu_info().vmem_capacity_bytes
        return max(48 << 20, min(int(cap) * 3 // 4, 96 << 20))
    except Exception:
        return 48 << 20


def transformer_block(x, kparams, *, rows_per_step=512, min_grid_steps=2):
    B, T, C = x.shape
    assert C == N_EMBD and T <= BLOCK_SIZE and T % 8 == 0

    # Batch elements per grid step: as many rows as rows_per_step allows, but
    # keep >= min_grid_steps grid steps when B allows (v7x has 2 TensorCores).
    bb = max(1, min(B, rows_per_step // T if T <= rows_per_step else 1))
    if B >= min_grid_steps:
        bb = min(bb, B // min_grid_steps)
    bb = max(1, bb)
    while B % bb:
        bb -= 1
    mb = bb * T

    x2d = x.reshape(B * T, C)

    def full_spec(a):
        return pl.BlockSpec(a.shape, lambda i, _nd=a.ndim: (0,) * _nd)

    in_specs = [pl.BlockSpec((mb, C), lambda i: (i, 0))]
    in_specs += [full_spec(p) for p in kparams]

    out2d = pl.pallas_call(
        functools.partial(block_kernel, bb=bb, seq=T),
        out_shape=jax.ShapeDtypeStruct((B * T, C), x.dtype),
        grid=(B // bb,),
        in_specs=in_specs,
        out_specs=pl.BlockSpec((mb, C), lambda i: (i, 0)),
        compiler_params=pltpu.CompilerParams(
            dimension_semantics=("parallel",),
            vmem_limit_bytes=_pick_vmem_limit()),
    )(x2d, *kparams)
    return out2d.reshape(B, T, C)


# ----------------------- kernel-side parameter packing -----------------------
def prepare_params(params):
    """f32 PyTorch-layout params -> bf16 fused kernel params.

    wqkv is (C, 3C) = [Wq*scale | Wk | Wv]; columns within each C-wide slab
    are head-blocked (head h owns columns h*D:(h+1)*D), matching the
    concat-of-heads layout of the reference module.
    """
    (g1, b1, wq, wk, wv, wo, bo, g2, b2, w1, bfc1, w2, bfc2) = params
    scale = N_EMBD ** (-0.5)
    wqkv = jnp.concatenate([wq * scale, wk, wv], axis=-1).astype(jnp.bfloat16)
    return (g1, b1, wqkv, wo.astype(jnp.bfloat16), bo, g2, b2,
            w1.astype(jnp.bfloat16), bfc1,
            w2.astype(jnp.bfloat16), bfc2)


# ----------------------------- pure-JAX reference ----------------------------
def reference_block(x, params):
    (g1, b1, wq, wk, wv, wo, bo, g2, b2, w1, bfc1, w2, bfc2) = params
    B, T, C = x.shape

    def ln(z, g, b):
        m = jnp.mean(z, axis=-1, keepdims=True)
        v = jnp.mean(jnp.square(z - m), axis=-1, keepdims=True)
        return (z - m) / jnp.sqrt(v + LN_EPS) * g + b

    xn = ln(x, g1, b1)
    q = xn @ wq
    k = xn @ wk
    v = xn @ wv
    qh = q.reshape(B, T, N_HEAD, HEAD_SIZE).transpose(0, 2, 1, 3)
    kh = k.reshape(B, T, N_HEAD, HEAD_SIZE).transpose(0, 2, 1, 3)
    vh = v.reshape(B, T, N_HEAD, HEAD_SIZE).transpose(0, 2, 1, 3)
    wei = jnp.einsum("bhqd,bhkd->bhqk", qh, kh) * C ** (-0.5)
    mask = jnp.tril(jnp.ones((T, T), dtype=bool))
    wei = jnp.where(mask, wei, -jnp.inf)
    wei = jax.nn.softmax(wei, axis=-1)
    out = jnp.einsum("bhqk,bhkd->bhqd", wei, vh)
    out = out.transpose(0, 2, 1, 3).reshape(B, T, C)
    sa = out @ wo + bo
    x1 = x + sa
    xn2 = ln(x1, g2, b2)
    ff = jnp.maximum(xn2 @ w1 + bfc1, 0.0) @ w2 + bfc2
    return x1 + ff


def init_params(key):
    ks = jax.random.split(key, 8)
    C = N_EMBD
    std = 0.02
    g1 = jnp.ones((1, C), jnp.float32)
    b1 = jnp.zeros((1, C), jnp.float32)
    wq = std * jax.random.normal(ks[0], (C, C), jnp.float32)
    wk = std * jax.random.normal(ks[1], (C, C), jnp.float32)
    wv = std * jax.random.normal(ks[2], (C, C), jnp.float32)
    wo = std * jax.random.normal(ks[3], (C, C), jnp.float32)
    bo = jnp.zeros((1, C), jnp.float32)
    g2 = jnp.ones((1, C), jnp.float32)
    b2 = jnp.zeros((1, C), jnp.float32)
    w1 = std * jax.random.normal(ks[4], (C, 4 * C), jnp.float32)
    bfc1 = jnp.zeros((1, 4 * C), jnp.float32)
    w2 = std * jax.random.normal(ks[5], (4 * C, C), jnp.float32)
    bfc2 = jnp.zeros((1, C), jnp.float32)
    return (g1, b1, wq, wk, wv, wo, bo, g2, b2, w1, bfc1, w2, bfc2)


if __name__ == "__main__":
    key = jax.random.PRNGKey(0)
    k_x, k_p = jax.random.split(key)

    B, T = 2, 64          # small seq length (<= block_size=256), n_embd fixed at 384
    x = jax.random.normal(k_x, (B, T, N_EMBD), jnp.float32)
    params = init_params(k_p)
    kparams = prepare_params(params)

    out = jax.block_until_ready(transformer_block(x, kparams))
    ref = jax.block_until_ready(reference_block(x, params))

    assert out.shape == (B, T, N_EMBD)
    err = jnp.max(jnp.abs(out - ref))
    # bf16 matmul inputs vs pure-f32 reference -> slightly relaxed tolerance.
    assert jnp.allclose(out, ref, rtol=2e-2, atol=2e-2), f"max abs err {err}"

    print("KERNEL_OK")
</pallas_src>

<mosaic_0001>
module attributes {stable_mosaic.version = 11 : i64} {
  func.func @block_kernel(%arg0: i32, %arg1: memref<64x384xf32, #tpu.memory_space<vmem>>, %arg2: memref<1x384xf32, #tpu.memory_space<vmem>>, %arg3: memref<1x384xf32, #tpu.memory_space<vmem>>, %arg4: memref<384x1152xbf16, #tpu.memory_space<vmem>>, %arg5: memref<384x384xbf16, #tpu.memory_space<vmem>>, %arg6: memref<1x384xf32, #tpu.memory_space<vmem>>, %arg7: memref<1x384xf32, #tpu.memory_space<vmem>>, %arg8: memref<1x384xf32, #tpu.memory_space<vmem>>, %arg9: memref<384x1536xbf16, #tpu.memory_space<vmem>>, %arg10: memref<1x1536xf32, #tpu.memory_space<vmem>>, %arg11: memref<1536x384xbf16, #tpu.memory_space<vmem>>, %arg12: memref<1x384xf32, #tpu.memory_space<vmem>>, %arg13: memref<64x384xf32, #tpu.memory_space<vmem>>) attributes {dimension_semantics = [#tpu.dimension_semantics<parallel>], iteration_bounds = array<i64: 2>, scalar_prefetch = 0 : i64, scratch_operands = 0 : i64, tpu.core_type = #tpu.core_type<tc>, window_params = [{transform_indices = @transform_0, window_bounds = array<i64: 64, 384>}, {pipeline_mode = #tpu.pipeline_mode<synchronous>, transform_indices = @transform_1, window_bounds = array<i64: 1, 384>}, {pipeline_mode = #tpu.pipeline_mode<synchronous>, transform_indices = @transform_2, window_bounds = array<i64: 1, 384>}, {pipeline_mode = #tpu.pipeline_mode<synchronous>, transform_indices = @transform_3, window_bounds = array<i64: 384, 1152>}, {pipeline_mode = #tpu.pipeline_mode<synchronous>, transform_indices = @transform_4, window_bounds = array<i64: 384, 384>}, {pipeline_mode = #tpu.pipeline_mode<synchronous>, transform_indices = @transform_5, window_bounds = array<i64: 1, 384>}, {pipeline_mode = #tpu.pipeline_mode<synchronous>, transform_indices = @transform_6, window_bounds = array<i64: 1, 384>}, {pipeline_mode = #tpu.pipeline_mode<synchronous>, transform_indices = @transform_7, window_bounds = array<i64: 1, 384>}, {pipeline_mode = #tpu.pipeline_mode<synchronous>, transform_indices = @transform_8, window_bounds = array<i64: 384, 1536>}, {pipeline_mode = #tpu.pipeline_mode<synchronous>, transform_indices = @transform_9, window_bounds = array<i64: 1, 1536>}, {pipeline_mode = #tpu.pipeline_mode<synchronous>, transform_indices = @transform_10, window_bounds = array<i64: 1536, 384>}, {pipeline_mode = #tpu.pipeline_mode<synchronous>, transform_indices = @transform_11, window_bounds = array<i64: 1, 384>}, {transform_indices = @transform_12, window_bounds = array<i64: 64, 384>}]} {
    %c0 = arith.constant 0 : index
    %c0_0 = arith.constant 0 : index
    %0 = vector.load %arg1[%c0, %c0_0] : memref<64x384xf32, #tpu.memory_space<vmem>>, vector<64x384xf32>
    %c0_1 = arith.constant 0 : index
    %c0_2 = arith.constant 0 : index
    %1 = vector.load %arg2[%c0_1, %c0_2] : memref<1x384xf32, #tpu.memory_space<vmem>>, vector<1x384xf32>
    %c0_3 = arith.constant 0 : index
    %c0_4 = arith.constant 0 : index
    %2 = vector.load %arg3[%c0_3, %c0_4] : memref<1x384xf32, #tpu.memory_space<vmem>>, vector<1x384xf32>
    %cst = arith.constant dense<0.000000e+00> : vector<64xf32>
    %3 = vector.multi_reduction <add>, %0, %cst [1] : vector<64x384xf32> to vector<64xf32>
    %4 = vector.shape_cast %3 : vector<64xf32> to vector<64x1xf32>
    %cst_5 = arith.constant 3.840000e+02 : f32
    %5 = vector.broadcast %cst_5 : f32 to vector<64x1xf32>
    %6 = arith.divf %4, %5 : vector<64x1xf32>
    %7 = vector.broadcast %6 : vector<64x1xf32> to vector<64x384xf32>
    %8 = arith.subf %0, %7 : vector<64x384xf32>
    %9 = arith.mulf %8, %8 : vector<64x384xf32>
    %cst_6 = arith.constant dense<0.000000e+00> : vector<64xf32>
    %10 = vector.multi_reduction <add>, %9, %cst_6 [1] : vector<64x384xf32> to vector<64xf32>
    %11 = vector.shape_cast %10 : vector<64xf32> to vector<64x1xf32>
    %cst_7 = arith.constant 3.840000e+02 : f32
    %12 = vector.broadcast %cst_7 : f32 to vector<64x1xf32>
    %13 = arith.divf %11, %12 : vector<64x1xf32>
    %14 = vector.broadcast %6 : vector<64x1xf32> to vector<64x384xf32>
    %15 = arith.subf %0, %14 : vector<64x384xf32>
    %cst_8 = arith.constant 9.99999974E-6 : f32
    %16 = vector.broadcast %cst_8 : f32 to vector<64x1xf32>
    %17 = arith.addf %13, %16 : vector<64x1xf32>
    %18 = math.rsqrt %17 : vector<64x1xf32>
    %19 = vector.broadcast %18 : vector<64x1xf32> to vector<64x384xf32>
    %20 = arith.mulf %15, %19 : vector<64x384xf32>
    %21 = vector.broadcast %1 : vector<1x384xf32> to vector<64x384xf32>
    %22 = arith.mulf %20, %21 : vector<64x384xf32>
    %23 = vector.broadcast %2 : vector<1x384xf32> to vector<64x384xf32>
    %24 = arith.addf %22, %23 : vector<64x384xf32>
    %25 = arith.truncf %24 : vector<64x384xf32> to vector<64x384xbf16>
    %c0_9 = arith.constant 0 : index
    %c0_10 = arith.constant 0 : index
    %26 = vector.load %arg4[%c0_9, %c0_10] : memref<384x1152xbf16, #tpu.memory_space<vmem>>, vector<384x1152xbf16>
    %cst_11 = arith.constant dense<0.000000e+00> : vector<64x1152xf32>
    %27 = tpu.matmul %25, %26, %cst_11 {dimension_numbers = #tpu.dot_dimension_numbers<[1], [0], [0], [1], [0, 0, 1, 1], [], []>} : vector<64x384xbf16>, vector<384x1152xbf16>, vector<64x1152xf32> -> vector<64x1152xf32>
    %28 = arith.truncf %27 : vector<64x1152xf32> to vector<64x1152xbf16>
    %29 = vector.extract_strided_slice %28 {offsets = [0, 0], sizes = [64, 64], strides = [1, 1]} : vector<64x1152xbf16> to vector<64x64xbf16>
    %30 = vector.extract_strided_slice %28 {offsets = [0, 64], sizes = [64, 64], strides = [1, 1]} : vector<64x1152xbf16> to vector<64x64xbf16>
    %31 = vector.extract_strided_slice %28 {offsets = [0, 128], sizes = [64, 64], strides = [1, 1]} : vector<64x1152xbf16> to vector<64x64xbf16>
    %32 = vector.extract_strided_slice %28 {offsets = [0, 192], sizes = [64, 64], strides = [1, 1]} : vector<64x1152xbf16> to vector<64x64xbf16>
    %33 = vector.extract_strided_slice %28 {offsets = [0, 256], sizes = [64, 64], strides = [1, 1]} : vector<64x1152xbf16> to vector<64x64xbf16>
    %34 = vector.extract_strided_slice %28 {offsets = [0, 320], sizes = [64, 64], strides = [1, 1]} : vector<64x1152xbf16> to vector<64x64xbf16>
    %35 = vector.shape_cast %29 : vector<64x64xbf16> to vector<1x64x64xbf16>
    %36 = vector.shape_cast %30 : vector<64x64xbf16> to vector<1x64x64xbf16>
    %37 = vector.shape_cast %31 : vector<64x64xbf16> to vector<1x64x64xbf16>
    %38 = vector.shape_cast %32 : vector<64x64xbf16> to vector<1x64x64xbf16>
    %39 = vector.shape_cast %33 : vector<64x64xbf16> to vector<1x64x64xbf16>
    %40 = vector.shape_cast %34 : vector<64x64xbf16> to vector<1x64x64xbf16>
    %41 = tpu.concatenate %35, %36, %37, %38, %39, %40 in 0 : vector<1x64x64xbf16>, vector<1x64x64xbf16>, vector<1x64x64xbf16>, vector<1x64x64xbf16>, vector<1x64x64xbf16>, vector<1x64x64xbf16> -> vector<6x64x64xbf16>
    %42 = vector.extract_strided_slice %28 {offsets = [0, 384], sizes = [64, 64], strides = [1, 1]} : vector<64x1152xbf16> to vector<64x64xbf16>
    %43 = vector.extract_strided_slice %28 {offsets = [0, 448], sizes = [64, 64], strides = [1, 1]} : vector<64x1152xbf16> to vector<64x64xbf16>
    %44 = vector.extract_strided_slice %28 {offsets = [0, 512], sizes = [64, 64], strides = [1, 1]} : vector<64x1152xbf16> to vector<64x64xbf16>
    %45 = vector.extract_strided_slice %28 {offsets = [0, 576], sizes = [64, 64], strides = [1, 1]} : vector<64x1152xbf16> to vector<64x64xbf16>
    %46 = vector.extract_strided_slice %28 {offsets = [0, 640], sizes = [64, 64], strides = [1, 1]} : vector<64x1152xbf16> to vector<64x64xbf16>
    %47 = vector.extract_strided_slice %28 {offsets = [0, 704], sizes = [64, 64], strides = [1, 1]} : vector<64x1152xbf16> to vector<64x64xbf16>
    %48 = vector.shape_cast %42 : vector<64x64xbf16> to vector<1x64x64xbf16>
    %49 = vector.shape_cast %43 : vector<64x64xbf16> to vector<1x64x64xbf16>
    %50 = vector.shape_cast %44 : vector<64x64xbf16> to vector<1x64x64xbf16>
    %51 = vector.shape_cast %45 : vector<64x64xbf16> to vector<1x64x64xbf16>
    %52 = vector.shape_cast %46 : vector<64x64xbf16> to vector<1x64x64xbf16>
    %53 = vector.shape_cast %47 : vector<64x64xbf16> to vector<1x64x64xbf16>
    %54 = tpu.concatenate %48, %49, %50, %51, %52, %53 in 0 : vector<1x64x64xbf16>, vector<1x64x64xbf16>, vector<1x64x64xbf16>, vector<1x64x64xbf16>, vector<1x64x64xbf16>, vector<1x64x64xbf16> -> vector<6x64x64xbf16>
    %55 = vector.extract_strided_slice %28 {offsets = [0, 768], sizes = [64, 64], strides = [1, 1]} : vector<64x1152xbf16> to vector<64x64xbf16>
    %56 = vector.extract_strided_slice %28 {offsets = [0, 832], sizes = [64, 64], strides = [1, 1]} : vector<64x1152xbf16> to vector<64x64xbf16>
    %57 = vector.extract_strided_slice %28 {offsets = [0, 896], sizes = [64, 64], strides = [1, 1]} : vector<64x1152xbf16> to vector<64x64xbf16>
    %58 = vector.extract_strided_slice %28 {offsets = [0, 960], sizes = [64, 64], strides = [1, 1]} : vector<64x1152xbf16> to vector<64x64xbf16>
    %59 = vector.extract_strided_slice %28 {offsets = [0, 1024], sizes = [64, 64], strides = [1, 1]} : vector<64x1152xbf16> to vector<64x64xbf16>
    %60 = vector.extract_strided_slice %28 {offsets = [0, 1088], sizes = [64, 64], strides = [1, 1]} : vector<64x1152xbf16> to vector<64x64xbf16>
    %61 = vector.shape_cast %55 : vector<64x64xbf16> to vector<1x64x64xbf16>
    %62 = vector.shape_cast %56 : vector<64x64xbf16> to vector<1x64x64xbf16>
    %63 = vector.shape_cast %57 : vector<64x64xbf16> to vector<1x64x64xbf16>
    %64 = vector.shape_cast %58 : vector<64x64xbf16> to vector<1x64x64xbf16>
    %65 = vector.shape_cast %59 : vector<64x64xbf16> to vector<1x64x64xbf16>
    %66 = vector.shape_cast %60 : vector<64x64xbf16> to vector<1x64x64xbf16>
    %67 = tpu.concatenate %61, %62, %63, %64, %65, %66 in 0 : vector<1x64x64xbf16>, vector<1x64x64xbf16>, vector<1x64x64xbf16>, vector<1x64x64xbf16>, vector<1x64x64xbf16>, vector<1x64x64xbf16> -> vector<6x64x64xbf16>
    %68 = tpu.iota {dimensions = array<i32: 0>} : vector<64x64xi32>
    %69 = tpu.iota {dimensions = array<i32: 1>} : vector<64x64xi32>
    %70 = arith.cmpi sge, %68, %69 : vector<64x64xi32>
    %71 = vector.shape_cast %70 : vector<64x64xi1> to vector<1x64x64xi1>
    "tpu.trace_start"() <{level = 10 : i32, message = "gqd,gkd->gqk"}> : () -> ()
    %cst_12 = arith.constant dense<0.000000e+00> : vector<6x64x64xf32>
    %72 = tpu.matmul %41, %54, %cst_12 {dimension_numbers = #tpu.dot_dimension_numbers<[2], [2], [1], [1], [0, 0, 0, 1, 1, 1], [0], [0]>} : vector<6x64x64xbf16>, vector<6x64x64xbf16>, vector<6x64x64xf32> -> vector<6x64x64xf32>
    %cst_13 = arith.constant -1.000000e+30 : f32
    "tpu.trace_stop"() : () -> ()
    %73 = vector.shape_cast %71 : vector<1x64x64xi1> to vector<1x64x64xi1>
    %74 = vector.broadcast %73 : vector<1x64x64xi1> to vector<6x64x64xi1>
    %75 = vector.broadcast %cst_13 : f32 to vector<6x64x64xf32>
    %76 = arith.select %74, %72, %75 : vector<6x64x64xi1>, vector<6x64x64xf32>
    %cst_14 = arith.constant dense<0xFF800000> : vector<6x64xf32>
    %77 = vector.multi_reduction <maximumf>, %76, %cst_14 [2] : vector<6x64x64xf32> to vector<6x64xf32>
    %78 = vector.shape_cast %77 : vector<6x64xf32> to vector<6x64x1xf32>
    %79 = vector.broadcast %78 : vector<6x64x1xf32> to vector<6x64x64xf32>
    %80 = arith.subf %76, %79 : vector<6x64x64xf32>
    %81 = math.exp %80 : vector<6x64x64xf32>
    %cst_15 = arith.constant dense<0.000000e+00> : vector<6x64xf32>
    %82 = vector.multi_reduction <add>, %81, %cst_15 [2] : vector<6x64x64xf32> to vector<6x64xf32>
    %83 = vector.shape_cast %82 : vector<6x64xf32> to vector<6x64x1xf32>
    %84 = tpu.reciprocal %83 {approx = true} : vector<6x64x1xf32> -> vector<6x64x1xf32>
    %85 = vector.broadcast %84 : vector<6x64x1xf32> to vector<6x64x64xf32>
    %86 = arith.mulf %81, %85 : vector<6x64x64xf32>
    %87 = arith.truncf %86 : vector<6x64x64xf32> to vector<6x64x64xbf16>
    "tpu.trace_start"() <{level = 10 : i32, message = "gqk,gkd->gqd"}> : () -> ()
    %cst_16 = arith.constant dense<0.000000e+00> : vector<6x64x64xf32>
    %88 = tpu.matmul %87, %67, %cst_16 {dimension_numbers = #tpu.dot_dimension_numbers<[2], [1], [1], [2], [0, 0, 0, 1, 1, 2], [0], [0]>} : vector<6x64x64xbf16>, vector<6x64x64xbf16>, vector<6x64x64xf32> -> vector<6x64x64xf32>
    "tpu.trace_stop"() : () -> ()
    %89 = arith.truncf %88 : vector<6x64x64xf32> to vector<6x64x64xbf16>
    %90 = vector.extract_strided_slice %89 {offsets = [0, 0, 0], sizes = [1, 64, 64], strides = [1, 1, 1]} : vector<6x64x64xbf16> to vector<1x64x64xbf16>
    %91 = vector.shape_cast %90 : vector<1x64x64xbf16> to vector<64x64xbf16>
    %92 = vector.extract_strided_slice %89 {offsets = [1, 0, 0], sizes = [1, 64, 64], strides = [1, 1, 1]} : vector<6x64x64xbf16> to vector<1x64x64xbf16>
    %93 = vector.shape_cast %92 : vector<1x64x64xbf16> to vector<64x64xbf16>
    %94 = vector.extract_strided_slice %89 {offsets = [2, 0, 0], sizes = [1, 64, 64], strides = [1, 1, 1]} : vector<6x64x64xbf16> to vector<1x64x64xbf16>
    %95 = vector.shape_cast %94 : vector<1x64x64xbf16> to vector<64x64xbf16>
    %96 = vector.extract_strided_slice %89 {offsets = [3, 0, 0], sizes = [1, 64, 64], strides = [1, 1, 1]} : vector<6x64x64xbf16> to vector<1x64x64xbf16>
    %97 = vector.shape_cast %96 : vector<1x64x64xbf16> to vector<64x64xbf16>
    %98 = vector.extract_strided_slice %89 {offsets = [4, 0, 0], sizes = [1, 64, 64], strides = [1, 1, 1]} : vector<6x64x64xbf16> to vector<1x64x64xbf16>
    %99 = vector.shape_cast %98 : vector<1x64x64xbf16> to vector<64x64xbf16>
    %100 = vector.extract_strided_slice %89 {offsets = [5, 0, 0], sizes = [1, 64, 64], strides = [1, 1, 1]} : vector<6x64x64xbf16> to vector<1x64x64xbf16>
    %101 = vector.shape_cast %100 : vector<1x64x64xbf16> to vector<64x64xbf16>
    %102 = tpu.concatenate %91, %93, %95, %97, %99, %101 in 1 : vector<64x64xbf16>, vector<64x64xbf16>, vector<64x64xbf16>, vector<64x64xbf16>, vector<64x64xbf16>, vector<64x64xbf16> -> vector<64x384xbf16>
    %c0_17 = arith.constant 0 : index
    %c0_18 = arith.constant 0 : index
    %103 = vector.load %arg5[%c0_17, %c0_18] : memref<384x384xbf16, #tpu.memory_space<vmem>>, vector<384x384xbf16>
    %cst_19 = arith.constant dense<0.000000e+00> : vector<64x384xf32>
    %104 = tpu.matmul %102, %103, %cst_19 {dimension_numbers = #tpu.dot_dimension_numbers<[1], [0], [0], [1], [0, 0, 1, 1], [], []>} : vector<64x384xbf16>, vector<384x384xbf16>, vector<64x384xf32> -> vector<64x384xf32>
    %c0_20 = arith.constant 0 : index
    %c0_21 = arith.constant 0 : index
    %105 = vector.load %arg6[%c0_20, %c0_21] : memref<1x384xf32, #tpu.memory_space<vmem>>, vector<1x384xf32>
    %106 = vector.broadcast %105 : vector<1x384xf32> to vector<64x384xf32>
    %107 = arith.addf %104, %106 : vector<64x384xf32>
    %108 = arith.addf %0, %107 : vector<64x384xf32>
    %c0_22 = arith.constant 0 : index
    %c0_23 = arith.constant 0 : index
    %109 = vector.load %arg7[%c0_22, %c0_23] : memref<1x384xf32, #tpu.memory_space<vmem>>, vector<1x384xf32>
    %c0_24 = arith.constant 0 : index
    %c0_25 = arith.constant 0 : index
    %110 = vector.load %arg8[%c0_24, %c0_25] : memref<1x384xf32, #tpu.memory_space<vmem>>, vector<1x384xf32>
    %cst_26 = arith.constant dense<0.000000e+00> : vector<64xf32>
    %111 = vector.multi_reduction <add>, %108, %cst_26 [1] : vector<64x384xf32> to vector<64xf32>
    %112 = vector.shape_cast %111 : vector<64xf32> to vector<64x1xf32>
    %cst_27 = arith.constant 3.840000e+02 : f32
    %113 = vector.broadcast %cst_27 : f32 to vector<64x1xf32>
    %114 = arith.divf %112, %113 : vector<64x1xf32>
    %115 = vector.broadcast %114 : vector<64x1xf32> to vector<64x384xf32>
    %116 = arith.subf %108, %115 : vector<64x384xf32>
    %117 = arith.mulf %116, %116 : vector<64x384xf32>
    %cst_28 = arith.constant dense<0.000000e+00> : vector<64xf32>
    %118 = vector.multi_reduction <add>, %117, %cst_28 [1] : vector<64x384xf32> to vector<64xf32>
    %119 = vector.shape_cast %118 : vector<64xf32> to vector<64x1xf32>
    %cst_29 = arith.constant 3.840000e+02 : f32
    %120 = vector.broadcast %cst_29 : f32 to vector<64x1xf32>
    %121 = arith.divf %119, %120 : vector<64x1xf32>
    %122 = vector.broadcast %114 : vector<64x1xf32> to vector<64x384xf32>
    %123 = arith.subf %108, %122 : vector<64x384xf32>
    %cst_30 = arith.constant 9.99999974E-6 : f32
    %124 = vector.broadcast %cst_30 : f32 to vector<64x1xf32>
    %125 = arith.addf %121, %124 : vector<64x1xf32>
    %126 = math.rsqrt %125 : vector<64x1xf32>
    %127 = vector.broadcast %126 : vector<64x1xf32> to vector<64x384xf32>
    %128 = arith.mulf %123, %127 : vector<64x384xf32>
    %129 = vector.broadcast %109 : vector<1x384xf32> to vector<64x384xf32>
    %130 = arith.mulf %128, %129 : vector<64x384xf32>
    %131 = vector.broadcast %110 : vector<1x384xf32> to vector<64x384xf32>
    %132 = arith.addf %130, %131 : vector<64x384xf32>
    %133 = arith.truncf %132 : vector<64x384xf32> to vector<64x384xbf16>
    %c0_31 = arith.constant 0 : index
    %c0_32 = arith.constant 0 : index
    %134 = vector.load %arg9[%c0_31, %c0_32] : memref<384x1536xbf16, #tpu.memory_space<vmem>>, vector<384x1536xbf16>
    %cst_33 = arith.constant dense<0.000000e+00> : vector<64x1536xf32>
    %135 = tpu.matmul %133, %134, %cst_33 {dimension_numbers = #tpu.dot_dimension_numbers<[1], [0], [0], [1], [0, 0, 1, 1], [], []>} : vector<64x384xbf16>, vector<384x1536xbf16>, vector<64x1536xf32> -> vector<64x1536xf32>
    %c0_34 = arith.constant 0 : index
    %c0_35 = arith.constant 0 : index
    %136 = vector.load %arg10[%c0_34, %c0_35] : memref<1x1536xf32, #tpu.memory_space<vmem>>, vector<1x1536xf32>
    %137 = vector.broadcast %136 : vector<1x1536xf32> to vector<64x1536xf32>
    %138 = arith.addf %135, %137 : vector<64x1536xf32>
    %cst_36 = arith.constant 0.000000e+00 : f32
    %139 = vector.broadcast %cst_36 : f32 to vector<64x1536xf32>
    %140 = arith.maximumf %138, %139 : vector<64x1536xf32>
    %141 = arith.truncf %140 : vector<64x1536xf32> to vector<64x1536xbf16>
    %c0_37 = arith.constant 0 : index
    %c0_38 = arith.constant 0 : index
    %142 = vector.load %arg11[%c0_37, %c0_38] : memref<1536x384xbf16, #tpu.memory_space<vmem>>, vector<1536x384xbf16>
    %cst_39 = arith.constant dense<0.000000e+00> : vector<64x384xf32>
    %143 = tpu.matmul %141, %142, %cst_39 {dimension_numbers = #tpu.dot_dimension_numbers<[1], [0], [0], [1], [0, 0, 1, 1], [], []>} : vector<64x1536xbf16>, vector<1536x384xbf16>, vector<64x384xf32> -> vector<64x384xf32>
    %c0_40 = arith.constant 0 : index
    %c0_41 = arith.constant 0 : index
    %144 = vector.load %arg12[%c0_40, %c0_41] : memref<1x384xf32, #tpu.memory_space<vmem>>, vector<1x384xf32>
    %145 = vector.broadcast %144 : vector<1x384xf32> to vector<64x384xf32>
    %146 = arith.addf %143, %145 : vector<64x384xf32>
    %147 = arith.addf %108, %146 : vector<64x384xf32>
    %c0_42 = arith.constant 0 : index
    %c0_43 = arith.constant 0 : index
    %148 = vector.load %arg13[%c0_42, %c0_43] : memref<64x384xf32, #tpu.memory_space<vmem>>, vector<64x384xf32>
    tpu.vector_store %arg13[%c0_42, %c0_43], %147 {strides = array<i32>} : memref<64x384xf32, #tpu.memory_space<vmem>>, vector<64x384xf32>,
    return
  }
  func.func @transform_0(%arg0: i32) -> (i32, i32) {
    %c0_i32 = arith.constant 0 : i32
    %c0_i32_0 = arith.constant 0 : i32
    return %arg0, %c0_i32 : i32, i32
  }
  func.func @transform_1(%arg0: i32) -> (i32, i32) {
    %c0_i32 = arith.constant 0 : i32
    %c0_i32_0 = arith.constant 0 : i32
    %c0_i32_1 = arith.constant 0 : i32
    return %c0_i32, %c0_i32_0 : i32, i32
  }
  func.func @transform_2(%arg0: i32) -> (i32, i32) {
    %c0_i32 = arith.constant 0 : i32
    %c0_i32_0 = arith.constant 0 : i32
    %c0_i32_1 = arith.constant 0 : i32
    return %c0_i32, %c0_i32_0 : i32, i32
  }
  func.func @transform_3(%arg0: i32) -> (i32, i32) {
    %c0_i32 = arith.constant 0 : i32
    %c0_i32_0 = arith.constant 0 : i32
    %c0_i32_1 = arith.constant 0 : i32
    return %c0_i32, %c0_i32_0 : i32, i32
  }
  func.func @transform_4(%arg0: i32) -> (i32, i32) {
    %c0_i32 = arith.constant 0 : i32
    %c0_i32_0 = arith.constant 0 : i32
    %c0_i32_1 = arith.constant 0 : i32
    return %c0_i32, %c0_i32_0 : i32, i32
  }
  func.func @transform_5(%arg0: i32) -> (i32, i32) {
    %c0_i32 = arith.constant 0 : i32
    %c0_i32_0 = arith.constant 0 : i32
    %c0_i32_1 = arith.constant 0 : i32
    return %c0_i32, %c0_i32_0 : i32, i32
  }
  func.func @transform_6(%arg0: i32) -> (i32, i32) {
    %c0_i32 = arith.constant 0 : i32
    %c0_i32_0 = arith.constant 0 : i32
    %c0_i32_1 = arith.constant 0 : i32
    return %c0_i32, %c0_i32_0 : i32, i32
  }
  func.func @transform_7(%arg0: i32) -> (i32, i32) {
    %c0_i32 = arith.constant 0 : i32
    %c0_i32_0 = arith.constant 0 : i32
    %c0_i32_1 = arith.constant 0 : i32
    return %c0_i32, %c0_i32_0 : i32, i32
  }
  func.func @transform_8(%arg0: i32) -> (i32, i32) {
    %c0_i32 = arith.constant 0 : i32
    %c0_i32_0 = arith.constant 0 : i32
    %c0_i32_1 = arith.constant 0 : i32
    return %c0_i32, %c0_i32_0 : i32, i32
  }
  func.func @transform_9(%arg0: i32) -> (i32, i32) {
    %c0_i32 = arith.constant 0 : i32
    %c0_i32_0 = arith.constant 0 : i32
    %c0_i32_1 = arith.constant 0 : i32
    return %c0_i32, %c0_i32_0 : i32, i32
  }
  func.func @transform_10(%arg0: i32) -> (i32, i32) {
    %c0_i32 = arith.constant 0 : i32
    %c0_i32_0 = arith.constant 0 : i32
    %c0_i32_1 = arith.constant 0 : i32
    return %c0_i32, %c0_i32_0 : i32, i32
  }
  func.func @transform_11(%arg0: i32) -> (i32, i32) {
    %c0_i32 = arith.constant 0 : i32
    %c0_i32_0 = arith.constant 0 : i32
    %c0_i32_1 = arith.constant 0 : i32
    return %c0_i32, %c0_i32_0 : i32, i32
  }
  func.func @transform_12(%arg0: i32) -> (i32, i32) {
    %c0_i32 = arith.constant 0 : i32
    %c0_i32_0 = arith.constant 0 : i32
    return %arg0, %c0_i32 : i32, i32
  }
}

</mosaic_0001>

<bundles_post_ra>
// kernel: tpu_custom_call.1
= control target key start
LH: loop header
LB: loop body
LE: loop exit
PB: predicated region body
PF: predicated region fallthrough
CT: control target
= control target key end

     0   :  { %s19090_s0 = inlined_call_operand.hbm [shape: f32[128,384], index: 0, kind: input, shape index: {}]   ;;  %s19091_s1 = inlined_call_operand.hbm [shape: f32[1,384], index: 1, kind: input, shape index: {}]   ;;  %s19092_s2 = inlined_call_operand.hbm [shape: f32[1,384], index: 2, kind: input, shape index: {}]   ;;  %s19093_s3 = inlined_call_operand.hbm [shape: bf16[384,1152], index: 3, kind: input, shape index: {}]   ;;  %s19094_s4 = inlined_call_operand.hbm [shape: bf16[384,384], index: 4, kind: input, shape index: {}]   ;;  %s19095_s5 = inlined_call_operand.hbm [shape: f32[1,384], index: 5, kind: input, shape index: {}]   ;;  %s19096_s6 = inlined_call_operand.hbm [shape: f32[1,384], index: 6, kind: input, shape index: {}]   ;;  %s19097_s7 = inlined_call_operand.hbm [shape: f32[1,384], index: 7, kind: input, shape index: {}]   ;;  %s19098_s8 = inlined_call_operand.hbm [shape: bf16[384,1536], index: 8, kind: input, shape index: {}]   ;;  %s19099_s9 = inlined_call_operand.hbm [shape: f32[1,1536], index: 9, kind: input, shape index: {}]   ;;  %s19100_s10 = inlined_call_operand.hbm [shape: bf16[1536,384], index: 10, kind: input, shape index: {}]   ;;  %s19101_s11 = inlined_call_operand.hbm [shape: f32[1,384], index: 11, kind: input, shape index: {}]   ;;  %s19102_s12 = inlined_call_operand.hbm [shape: f32[128,384], index: 12, kind: output, shape index: {}]  }
   0x1   :  { %19178 = sst [smem:[#allocation89_spill]] %s19091_s1 }
   0x2   :  { %19179 = sst [smem:[#allocation90_spill]] %s19092_s2 }
   0x3   :  { %19180 = sst [smem:[#allocation91_spill]] %s19093_s3 }
   0x4   :  { %19181 = sst [smem:[#allocation92_spill]] %s19094_s4 }
   0x5   :  { %19182 = sst [smem:[#allocation93_spill]] %s19095_s5 }
   0x6   :  { %19183 = sst [smem:[#allocation94_spill]] %s19096_s6 }
   0x7   :  { %17 = vsyncpa [#allocation3], 0 }
   0x8   :  { %19 = vsyncpa [#allocation3 + $0x1], 0 }
   0x9   :  { %20 = vsyncpa [#allocation6], 0 }
   0xa   :  { %21 = vsyncpa [#allocation9], 0 }
   0xb   :  { %22 = vsyncpa [#allocation12], 0 }
   0xc   :  { %23 = vsyncpa [#allocation15], 0 }
   0xd   :  { %24 = vsyncpa [#allocation18], 0 }
   0xe   :  { %25 = vsyncpa [#allocation21], 0 }
   0xf   :  { %26 = vsyncpa [#allocation4], 0 }
  0x10   :  { %28 = vsyncpa [#allocation4 + $0x1], 0  ;;  %s15502_s21 = smov 0   ;;  %s15504_s22 = smov 0  }
  0x11   :  { %s15506_s23 = smov 0   ;;  %s15508_s24 = smov 0  }
  0x12 LB: > { %s15412_s25 = smov [#allocation5]   ;;  %s15523_s27 = sadd.s32 4294967295, %s15410_s24   ;;  %s15410_s24 = sphi %s15508_s24, %s19485_s24   ;;  %s15406_s23 = sphi %s15506_s23, %s19484_s23   ;;  %s15402_s22 = sphi %s15504_s22, %s19483_s22   ;;  %s15398_s21 = sphi %s15502_s21, %s19482_s21  }
  0x13   : > { %s335_s26 = sshll.u32 %s15412_s25, 4  ;;  %p11701_p0 = scmp.ge.s32.totalorder %s15410_s24, 1  ;;  %s336_s26 = int_to_ptr.vmem [resolvable:$true] %s335_s26 }
  0x14   : > { %p19103_p1 = scmp.eq.s32.totalorder %s15523_s27, 0  ;;  %p322_p2 = scmp.lt.s32.totalorder %s15410_s24, 3 }
  0x15   : > { %s15413_s29 = smov [#allocation8]   ;;  %s15414_s14 = smov [#allocation11]  }
  0x16   : > { %p15528_p3 = pnand %p11701_p0, %p322_p2  ;;  %s356_s30 = sshll.u32 %s15413_s29, 4  ;;  %s15535_s30 = int_to_ptr.vmem [resolvable:$true] %s356_s30 }
  0x17   : > { %s383_s15 = sshll.u32 %s15414_s14, 4  ;;  %s15019_s17 = scalar_lea.vmem %s336_s26, 48  ;;  %s15543_s15 = int_to_ptr.vmem [resolvable:$true] %s383_s15 }
  0x18   : > { %s19184_s28 = scalar_select %p15528_p3, 1, 0 }
  0x19   : > { %p13402_p5 = pneg %p15528_p3  ;;  %p15020_p8 = scmp.ne.s32.totalorder %s336_s26, %s15019_s17 }
  0x1a   : > { %s15026_s18 = scalar_lea.vmem %s336_s26, 64  ;;  %p15027_p11 = scmp.lt.s32.totalorder %s336_s26, %s336_s26 }
  0x1b   : > { %p15539_p6 = pnand %p13402_p5, %p19103_p1  ;;  %p15028_p12 = scmp.lt.s32.totalorder %s15026_s18, %s15019_s17 }
  0x1d   : > { %p15547_p7 = pneg %p15539_p6  ;;  %p15029_p13 = por %p15028_p12, %p15027_p11 }
  0x1f   : > { %p15022_p9 = pnand %p15020_p8, %p15547_p7 }
  0x21   : > { %p15023_p10 = pneg %p15022_p9 }
  0x23   : > { %p15030_p0 = pnand %p15029_p13, %p15023_p10 }
  0x25   : > { %15033 = shalt.err (!%p15030_p0)
}
  0x26   : > { %s19187_s1 = sld [smem:[#allocation89_spill]]  ;;  %s15045_s25 = scalar_lea.vmem %s15535_s30, 27648 }
  0x27   : > { %p15046_p2 = scmp.ne.s32.totalorder %s15535_s30, %s15045_s25  ;;  %p15053_p9 = scmp.lt.s32.totalorder %s15535_s30, %s15535_s30 }
  0x28   : > { %p15054_p11 = scmp.lt.s32.totalorder %s15045_s25, %s15045_s25 }
  0x29   : > { %p15048_p5 = pnand %p15046_p2, %p15547_p7 }
  0x2a   : > { %p15055_p10 = por %p15054_p11, %p15053_p9 }
  0x2b   : > { %p15049_p8 = pneg %p15048_p5 }
  0x2c   : > { %13405 = dma.hbm_to_vmem [thread:$0]  (!%p15539_p6), %s19187_s1, 48, %s336_s26, [#allocation6]  }
  0x2d   : > { %p15056_p12 = pnand %p15055_p10, %p15049_p8 }
  0x2f   : > { %15059 = shalt.err (!%p15056_p12)
}
  0x30   : > { %s15415_s29 = smov 576   ;;  %s15416_s26 = smov 36  }
  0x31   : > { %s19188_s3 = sld [smem:[#allocation91_spill]]  ;;  %s15071_s18 = scalar_lea.vmem %s15543_s15, 48 }
  0x32   : > { %p15072_p13 = scmp.ne.s32.totalorder %s15543_s15, %s15071_s18  ;;  %s15078_s19 = scalar_lea.vmem %s15543_s15, 64 }
  0x33   : > { %p15079_p5 = scmp.lt.s32.totalorder %s15543_s15, %s15543_s15  ;;  %p15080_p8 = scmp.lt.s32.totalorder %s15078_s19, %s15071_s18 }
  0x34   : > { %p15074_p0 = pnand %p15072_p13, %p15547_p7 }
  0x35   : > { %p15081_p9 = por %p15080_p8, %p15079_p5 }
  0x36   : > { %p15075_p2 = pneg %p15074_p0 }
  0x37   : > { %13411 = dma.hbm_to_vmem [thread:$0]  (!%p15539_p6), %s19188_s3, 27648, %s15535_s30, [#allocation9], %s15415_s29, %s15415_s29, %s15416_s26  }
  0x38   : > { %p15082_p11 = pnand %p15081_p9, %p15075_p2 }
  0x3a   : > { %15085 = shalt.err (!%p15082_p11)
}
  0x3b   : > { %s19189_s5 = sld [smem:[#allocation93_spill]]  ;;  %s15417_s30 = smov [#allocation14]  }
  0x3c   : > { %s405_s29 = sshll.u32 %s15417_s30, 4  ;;  %s15418_s26 = smov [#allocation17]   ;;  %s406_s29 = int_to_ptr.vmem [resolvable:$true] %s405_s29 }
  0x3d   : > { %s429_s14 = sshll.u32 %s15418_s26, 4  ;;  %s15097_s17 = scalar_lea.vmem %s406_s29, 48  ;;  %s430_s14 = int_to_ptr.vmem [resolvable:$true] %s429_s14 }
  0x3e   : > { %p15098_p10 = scmp.ne.s32.totalorder %s406_s29, %s15097_s17  ;;  %s15104_s18 = scalar_lea.vmem %s406_s29, 64 }
  0x3f   : > { %p15105_p0 = scmp.lt.s32.totalorder %s406_s29, %s406_s29  ;;  %p15106_p2 = scmp.lt.s32.totalorder %s15104_s18, %s15097_s17 }
  0x40   : > { %p15100_p12 = pnand %p15098_p10, %p15547_p7 }
  0x41   : > { %13417 = dma.hbm_to_vmem [thread:$0]  (!%p15539_p6), %s19189_s5, 48, %s15543_s15, [#allocation12]  }
  0x42   : > { %p15101_p13 = pneg %p15100_p12  ;;  %p15107_p5 = por %p15106_p2, %p15105_p0 }
  0x44   : > { %p15108_p8 = pnand %p15107_p5, %p15101_p13 }
  0x46   : > { %15111 = shalt.err (!%p15108_p8)
}
  0x47   : > { %13423 = dma.hbm_to_vmem [thread:$0]  (!%p15539_p6), %s19097_s7, 48, %s406_s29, [#allocation15]  }
  0x48   : > { %s15123_s20 = scalar_lea.vmem %s430_s14, 192  ;;  %p15131_p12 = scmp.lt.s32.totalorder %s430_s14, %s430_s14 }
  0x49   : > { %p15124_p9 = scmp.ne.s32.totalorder %s430_s14, %s15123_s20  ;;  %p15132_p4 = scmp.lt.s32.totalorder %s15123_s20, %s15123_s20 }
  0x4b   : > { %p15126_p11 = pnand %p15124_p9, %p15547_p7  ;;  %p15133_p1 = por %p15132_p4, %p15131_p12 }
  0x4d   : > { %p15127_p10 = pneg %p15126_p11 }
  0x4f   : > { %p15134_p3 = pnand %p15133_p1, %p15127_p10 }
  0x51   : > { %15137 = shalt.err (!%p15134_p3)
}
  0x52   : > { %13429 = dma.hbm_to_vmem [thread:$0]  (!%p15539_p6), %s19099_s9, 192, %s430_s14, [#allocation18]  }
  0x53   : > { %s15419_s26 = smov [#allocation7]   ;;  %s15420_s17 = smov [#allocation10]  }
  0x54   : > { %s346_s29 = sshll.u32 %s15419_s26, 4  ;;  %s369_s18 = sshll.u32 %s15420_s17, 4  ;;  %s347_s29 = int_to_ptr.vmem [resolvable:$true] %s346_s29  ;;  %s370_s18 = int_to_ptr.vmem [resolvable:$true] %s369_s18 }
  0x55   : > { %s15149_s19 = scalar_lea.vmem %s347_s29, 48  ;;  %s15156_s15 = scalar_lea.vmem %s347_s29, 64 }
  0x56   : > { %p15150_p13 = scmp.ne.s32.totalorder %s347_s29, %s15149_s19  ;;  %p15157_p1 = scmp.lt.s32.totalorder %s347_s29, %s347_s29 }
  0x57   : > { %p15158_p3 = scmp.lt.s32.totalorder %s15156_s15, %s15149_s19 }
  0x58   : > { %p15152_p0 = pnand %p15150_p13, %p15547_p7 }
  0x59   : > { %p15159_p4 = por %p15158_p3, %p15157_p1 }
  0x5a   : > { %p15153_p2 = pneg %p15152_p0 }
  0x5c   : > { %p15160_p5 = pnand %p15159_p4, %p15153_p2 }
  0x5e   : > { %15163 = shalt.err (!%p15160_p5)
}
  0x5f   : > { %s19190_s2 = sld [smem:[#allocation90_spill]]  ;;  %s15175_s25 = scalar_lea.vmem %s370_s18, 9216 }
  0x60   : > { %p15176_p8 = scmp.ne.s32.totalorder %s370_s18, %s15175_s25  ;;  %p15183_p10 = scmp.lt.s32.totalorder %s370_s18, %s370_s18 }
  0x61   : > { %p15184_p12 = scmp.lt.s32.totalorder %s15175_s25, %s15175_s25 }
  0x62   : > { %p15178_p9 = pnand %p15176_p8, %p15547_p7 }
  0x63   : > { %p15185_p13 = por %p15184_p12, %p15183_p10 }
  0x64   : > { %p15179_p11 = pneg %p15178_p9 }
  0x65   : > { %13408 = dma.hbm_to_vmem [thread:$0]  (!%p15539_p6), %s19190_s2, 48, %s347_s29, [#allocation6]  }
  0x66   : > { %p15186_p0 = pnand %p15185_p13, %p15179_p11 }
  0x68   : > { %15189 = shalt.err (!%p15186_p0)
}
  0x69   : > { %s19105_s30 = smov 192   ;;  %s19106_s26 = smov 12  }
  0x6a   : > { %s19191_s4 = sld [smem:[#allocation92_spill]]  ;;  %s15423_s19 = smov [#allocation13]  }
  0x6b   : > { %s394_s15 = sshll.u32 %s15423_s19, 4  ;;  %s15424_s20 = smov [#allocation16]   ;;  %s395_s15 = int_to_ptr.vmem [resolvable:$true] %s394_s15 }
  0x6c   : > { %s415_s14 = sshll.u32 %s15424_s20, 4  ;;  %s15201_s25 = scalar_lea.vmem %s395_s15, 48  ;;  %s416_s14 = int_to_ptr.vmem [resolvable:$true] %s415_s14 }
  0x6d   : > { %p15202_p2 = scmp.ne.s32.totalorder %s395_s15, %s15201_s25  ;;  %s15208_s1 = scalar_lea.vmem %s395_s15, 64 }
  0x6e   : > { %p15209_p4 = scmp.lt.s32.totalorder %s395_s15, %s395_s15  ;;  %p15210_p5 = scmp.lt.s32.totalorder %s15208_s1, %s15201_s25 }
  0x6f   : > { %p15204_p1 = pnand %p15202_p2, %p15547_p7 }
  0x70   : > { %13414 = dma.hbm_to_vmem [thread:$0]  (!%p15539_p6), %s19191_s4, 9216, %s370_s18, [#allocation9], %s19105_s30, %s19105_s30, %s19106_s26  }
  0x71   : > { %p15205_p3 = pneg %p15204_p1  ;;  %p15211_p8 = por %p15210_p5, %p15209_p4 }
  0x73   : > { %p15212_p9 = pnand %p15211_p8, %p15205_p3 }
  0x75   : > { %15215 = shalt.err (!%p15212_p9)
}
  0x76   : > { %s19192_s6 = sld [smem:[#allocation94_spill]]  ;;  %s15227_s17 = scalar_lea.vmem %s416_s14, 36864 }
  0x77   : > { %p15228_p11 = scmp.ne.s32.totalorder %s416_s14, %s15227_s17  ;;  %p15235_p13 = scmp.lt.s32.totalorder %s416_s14, %s416_s14 }
  0x78   : > { %p15236_p0 = scmp.lt.s32.totalorder %s15227_s17, %s15227_s17 }
  0x79   : > { %p15230_p10 = pnand %p15228_p11, %p15547_p7 }
  0x7a   : > { %p15237_p2 = por %p15236_p0, %p15235_p13 }
  0x7b   : > { %p15231_p12 = pneg %p15230_p10 }
  0x7c   : > { %13420 = dma.hbm_to_vmem [thread:$0]  (!%p15539_p6), %s19192_s6, 48, %s395_s15, [#allocation12]  }
  0x7d   : > { %p15238_p1 = pnand %p15237_p2, %p15231_p12 }
  0x7f   : > { %15241 = shalt.err (!%p15238_p1)
}
  0x80   : > { %s15425_s1 = smov 768   ;;  %s15426_s19 = smov 48  }
  0x81   : > { %13426 = dma.hbm_to_vmem [thread:$0]  (!%p15539_p6), %s19098_s8, 36864, %s416_s14, [#allocation15], %s15425_s1, %s15425_s1, %s15426_s19  }
  0x82   : > { %s15427_s15 = smov [#allocation19]   ;;  %s15428_s18 = smov [#allocation20]  }
  0x83   : > { %s439_s29 = sshll.u32 %s15427_s15, 4  ;;  %s453_s30 = sshll.u32 %s15428_s18, 4  ;;  %s440_s29 = int_to_ptr.vmem [resolvable:$true] %s439_s29  ;;  %s454_s30 = int_to_ptr.vmem [resolvable:$true] %s453_s30 }
  0x84   : > { %s15253_s26 = scalar_lea.vmem %s440_s29, 36864  ;;  %p15261_p8 = scmp.lt.s32.totalorder %s440_s29, %s440_s29 }
  0x85   : > { %p15254_p3 = scmp.ne.s32.totalorder %s440_s29, %s15253_s26  ;;  %p15262_p9 = scmp.lt.s32.totalorder %s15253_s26, %s15253_s26 }
  0x87   : > { %p15256_p4 = pnand %p15254_p3, %p15547_p7  ;;  %p15263_p11 = por %p15262_p9, %p15261_p8 }
  0x89   : > { %p15257_p5 = pneg %p15256_p4 }
  0x8b   : > { %p15264_p10 = pnand %p15263_p11, %p15257_p5 }
  0x8d   : > { %15267 = shalt.err (!%p15264_p10)
}
  0x8e   : > { %s19193_s17 = smov 12   ;;  %s19194_s20 = smov 192  }
  0x8f   : > { %13432 = dma.hbm_to_vmem [thread:$0]  (!%p15539_p6), %s19100_s10, 36864, %s440_s29, [#allocation18], %s19194_s20, %s19194_s20, %s19193_s17  }
  0x90   : > { %s15279_s19 = scalar_lea.vmem %s454_s30, 48  ;;  %s15286_s26 = scalar_lea.vmem %s454_s30, 64 }
  0x91   : > { %p15280_p12 = scmp.ne.s32.totalorder %s454_s30, %s15279_s19  ;;  %p15287_p2 = scmp.lt.s32.totalorder %s454_s30, %s454_s30 }
  0x92   : > { %p15288_p1 = scmp.lt.s32.totalorder %s15286_s26, %s15279_s19 }
  0x93   : > { %p15282_p13 = pnand %p15280_p12, %p15547_p7 }
  0x94   : > { %p15289_p3 = por %p15288_p1, %p15287_p2 }
  0x95   : > { %p15283_p0 = pneg %p15282_p13 }
  0x97   : > { %p15290_p4 = pnand %p15289_p3, %p15283_p0 }
  0x99   : > { %15293 = shalt.err (!%p15290_p4)
}
  0x9a   : > { %13435 = dma.hbm_to_vmem [thread:$0]  (!%p15539_p6), %s19101_s11, 48, %s454_s30, [#allocation21]  }
  0x9b   : > { %s11700_s16 = sadd.s32 4294967294, %s15410_s24   ;;  %s15647_s13 = sadd.s32 1, %s15410_s24  }
  0x9c   : > { %s41_s29 = sadd.s32 1, %s15406_s23  ;;  %s38_s18 = ssub.s32 %s15410_s24, %s15647_s13 }
  0x9d   : > { %p48_p7 = scmp.ne.s32.totalorder %s15406_s23, %s15402_s22  ;;  %p39_p5 = scmp.eq.s32.totalorder %s38_s18, 0 }
  0x9e   : > { %p49_p8 = scmp.eq.s32.totalorder %s15410_s24, 0  ;;  %p54_p9 = scmp.ne.s32.totalorder %s15402_s22, %s15398_s21 }
  0x9f   : > { %p309_p11 = scmp.eq.s32.totalorder %s15523_s27, 1  ;;  %p19195_p12 = scmp.eq.s32.totalorder %s15523_s27, 0 }
  0xa0   : > { %s15659_s17 = scalar_select %p39_p5, %s15406_s23, %s41_s29  }
  0xa1   : > { %p50_p10 = por %p49_p8, %p48_p7  ;;  %p15663_p13 = por %p19195_p12, %p54_p9 }
  0xa2   : > { %p15667_p6 = por %p309_p11, %p48_p7  ;;  %p315_p0 = scmp.eq.s32.totalorder %s11700_s16, 1 }
  0xa3   : > { %s19196_s20 = scalar_select %p15663_p13, 1, 0 }
  0xa4   : > { %s19197_s30 = scalar_select %p15667_p6, 1, 0 }
  0xa5   : > { %p13455_p2 = scmp.lt.s32.totalorder %s15410_s24, 2  ;;  %s464_s14 = sand.u32 1, %s15406_s23  }
  0xa6   : > { %p15673_p1 = por %p315_p0, %p54_p9  ;;  %s13350_s19 = smul.u32 192, %s464_s14 }
  0xa7   : > { %p15677_p3 = pnand %p13455_p2, %p50_p10  ;;  %s13351_s25 = smul.u32 3072, %s15410_s24 }
  0xa8   : > { %s19198_s1 = scalar_select %p15673_p1, 1, 0 }
  0xa9   : > { %s15685_s18 = scalar_lea.hbm %s19090_s0, %s13351_s25  ;;  %s468_s16 = scalar_lea.vmem [#allocation2], %s13350_s19 }
  0xaa   : > { %s476_s2 = sshll.u32 %s468_s16, 4  ;;  %s15689_s3 = scalar_lea.sflag [#allocation3], %s464_s14  ;;  %s15687_s2 = int_to_ptr.vmem [resolvable:$true] %s476_s2 }
  0xab   : > { %s15294_s4 = scalar_lea.hbm %s15685_s18, 3072  ;;  %p15296_p7 = pneg %p15677_p3 }
  0xac   : > { %p15295_p4 = scmp.ne.s32.totalorder %s15685_s18, %s15294_s4  ;;  %s15299_s25 = scalar_lea.hbm %s19090_s0, 6144 }
  0xad   : > { %p15300_p9 = scmp.lt.s32.totalorder %s15685_s18, %s19090_s0  ;;  %p15301_p11 = scmp.lt.s32.totalorder %s15299_s25, %s15294_s4 }
  0xae   : > { %p15297_p5 = pnand %p15296_p7, %p15295_p4 }
  0xaf   : > { %p15302_p10 = por %p15301_p11, %p15300_p9 }
  0xb0   : > { %p15298_p8 = pneg %p15297_p5 }
  0xb2   : > { %p15303_p12 = pnand %p15302_p10, %p15298_p8 }
  0xb4   : > { %15306 = shalt.err (!%p15303_p12)
}
  0xb5   : > { %s15307_s14 = scalar_lea.vmem %s15687_s2, 3072  ;;  %s15429_s19 = smov [#allocation2]  }
  0xb6   : > { %p15308_p0 = scmp.ne.s32.totalorder %s15687_s2, %s15307_s14  ;;  %s15312_s16 = sshll.u32 %s15429_s19, 4  ;;  %s15313_s16 = int_to_ptr.vmem [resolvable:$false] %s15312_s16 }
  0xb7   : > { %s15314_s5 = scalar_lea.vmem %s15313_s16, 6144  ;;  %p15315_p5 = scmp.lt.s32.totalorder %s15687_s2, %s15313_s16 }
  0xb8   : > { %p15310_p2 = pnand %p15308_p0, %p15296_p7  ;;  %p15316_p1 = scmp.lt.s32.totalorder %s15314_s5, %s15307_s14 }
  0xba   : > { %p15311_p4 = pneg %p15310_p2  ;;  %p15317_p6 = por %p15316_p1, %p15315_p5 }
  0xbc   : > { %p15318_p13 = pnand %p15317_p6, %p15311_p4 }
  0xbe   : > { %15321 = shalt.err (!%p15318_p13)
}
  0xbf   : > { %s15430_s4 = smov 384   ;;  %s15431_s6 = smov 24  }
  0xc0   : > { %13439 = dma.hbm_to_vmem [thread:$0]  (!%p15677_p3), %s15685_s18, 3072, %s15687_s2, %s15689_s3, %s15430_s4, %s15430_s4, %s15431_s6  }
  0xc1   : > { %p19200_p7 = scmp.ne.s32.totalorder %s19184_s28, 0 }
  0xc3   : > { %488 = sbr.rel (%p19200_p7) target bundleno = 3242 (0xcaa), region = 68 }
  0xc8   : > { %s15713_s25 = sand.u32 1, %s15402_s22   ;;  %p19201_p13 = scmp.ne.s32.totalorder %s19196_s20, 0 }
  0xc9   : > { %s13352_s15 = smul.u32 192, %s15713_s25  ;;  %s491_s29 = scalar_lea.sflag [#allocation3], %s15713_s25 }
  0xcb   : > { %s15719_s14 = scalar_lea.vmem [#allocation2], %s13352_s15 }
  0xcc   : > { %15365 = dma.done.wait (%p19201_p13), %s491_s29, 3072  }
  0xcd   : > { %15367 = vsyncadd (%p19201_p13), %s491_s29, 4294964224  ;;  %p19202_p6 = scmp.eq.s32.totalorder %s15523_s27, 0 }
  0xcf   : > { %15369 = dma.done.wait (%p19202_p6), [#allocation6], 96   ;;  %p19203_p1 = pmov %p19202_p6 }
  0xd1   : > { %15371 = vsyncadd (%p19203_p1), [#allocation6], 4294967200  ;;  %p19204_p3 = pmov %p19203_p1 }
  0xd2   : > { %p19205_p8 = pmov %p19203_p1 }
  0xd3   : > { %15373 = dma.done.wait (%p19204_p3), [#allocation9], 36864  }
  0xd4   : > { %15375 = vsyncadd (%p19205_p8), [#allocation9], 4294930432  ;;  %p19206_p9 = pmov %p19203_p1 }
  0xd5   : > { %p19207_p11 = pmov %p19203_p1 }
  0xd6   : > { %15377 = dma.done.wait (%p19206_p9), [#allocation12], 96  }
  0xd7   : > { %15379 = vsyncadd (%p19207_p11), [#allocation12], 4294967200  ;;  %p19208_p10 = pmov %p19203_p1 }
  0xd8   : > { %p19209_p12 = pmov %p19203_p1 }
  0xd9   : > { %15381 = dma.done.wait (%p19208_p10), [#allocation15], 36912  }
  0xda   : > { %15383 = vsyncadd (%p19209_p12), [#allocation15], 4294930384  ;;  %p19210_p0 = pmov %p19203_p1 }
  0xdc   : > { %15385 = dma.done.wait (%p19210_p0), [#allocation18], 37056   ;;  %p19211_p2 = pmov %p19210_p0 }
  0xdd   : > { %p19212_p4 = pmov %p19210_p0 }
  0xde   : > { %15387 = vsyncadd (%p19211_p2), [#allocation18], 4294930240 }
  0xdf   : > { %15389 = dma.done.wait (%p19212_p4), [#allocation21], 48   ;;  %p19213_p5 = pmov %p19210_p0 }
  0xe0   : > { %v15750_v0 = vld [vmem:[%s15719_s14] sm:$0xff]  ;;  %v15753_v1 = vld [vmem:[%s15719_s14 + $0x8] sm:$0xff]  ;;  %v15756_v2 = vld [vmem:[%s15719_s14 + $0x10] sm:$0xff]  ;;  %vm3102_vm0 = vcmask 523264   ;;  %s15433_s2 = smov 64   ;;  %s18785_s3 = scalar_lea.vmem [#allocation22], %s13352_s15 }
  0xe1   : > { %15391 = vsyncadd (%p19213_p5), [#allocation21], 4294967248  ;;  %v608_v3 = vadd.f32 %v15753_v1, %v15750_v0  ;;  %v15761_v4 = vld [vmem:[%s15719_s14 + $0x30] sm:$0xff]  ;;  %v15764_v5 = vld [vmem:[%s15719_s14 + $0x38] sm:$0xff]  ;;  %s13353_s28 = smul.u32 3072, %s15523_s27  ;;  %s11522_s20 = sshll.u32 %s18785_s3, 4  ;;  %s19046_s20 = int_to_ptr.vmem [resolvable:$true] %s11522_s20 }
  0xe2   : > { %v15767_v6 = vld [vmem:[%s15719_s14 + $0x40] sm:$0xff]  ;;  %v616_v7 = vadd.f32 %v15764_v5, %v15761_v4  ;;  %v15772_v8 = vld [vmem:[%s15719_s14 + $0x18] sm:$0xff]  ;;  %v15778_v10 = vld [vmem:[%s15719_s14 + $0x28] sm:$0xff]  ;;  %s11508_s27 = scalar_lea.sflag [#allocation4], %s15713_s25  ;;  %s15322_s16 = scalar_lea.vmem %s19046_s20, 3072 }
  0xe3   : > { %v15775_v9 = vld [vmem:[%s15719_s14 + $0x20] sm:$0xff]  ;;  %v609_v11 = vadd.f32 %v608_v3, %v15756_v2  ;;  %v15784_v13 = vld [vmem:[%s15719_s14 + $0x48] sm:$0xff]  ;;  %v15787_v14 = vld [vmem:[%s15719_s14 + $0x50] sm:$0xff]  ;;  %s19043_s19 = scalar_lea.hbm %s19102_s12, %s13353_s28  ;;  %p15323_p7 = scmp.ne.s32.totalorder %s19046_s20, %s15322_s16 }
  0xe4   : > { %v612_v12 = vadd.f32 %v15775_v9, %v15772_v8  ;;  %v15790_v15 = vld [vmem:[%s15719_s14 + $0x58] sm:$0xff]  ;;  %v617_v16 = vadd.f32 %v616_v7, %v15767_v6  ;;  %v620_v17 = vadd.f32 %v15787_v14, %v15784_v13  ;;  %v594_v18 = vld [vmem:[%s15719_s14 + $0x60] sm:$0xff]  ;;  %v595_v19 = vld [vmem:[%s15719_s14 + $0x68] sm:$0xff]  ;;  %p19479_p13 = scmp.ne.s32.totalorder %s19197_s30, 0  ;;  %s15434_s5 = smov [#allocation22]  }
  0xe5   : > { %610 = vadd.xlane.f32.xlu0 %v609_v11  ;;  %v624_v21 = vadd.f32 %v595_v19, %v594_v18  ;;  %v597_v22 = vld [vmem:[%s15719_s14 + $0x78] sm:$0xff]  ;;  %v598_v23 = vld [vmem:[%s15719_s14 + $0x80] sm:$0xff]  ;;  %v596_v25 = vld [vmem:[%s15719_s14 + $0x70] sm:$0xff]  ;;  %s15326_s4 = sshll.u32 %s15434_s5, 4  ;;  %s15327_s4 = int_to_ptr.vmem [resolvable:$false] %s15326_s4 }
  0xe6   : > { %v613_v20 = vadd.f32 %v612_v12, %v15778_v10  ;;  %618 = vadd.xlane.f32.xlu1 %v617_v16  ;;  %v621_v24 = vadd.f32 %v620_v17, %v15790_v15  ;;  %v628_v26 = vadd.f32 %v598_v23, %v597_v22  ;;  %v600_v27 = vld [vmem:[%s15719_s14 + $0x90] sm:$0xff]  ;;  %v601_v28 = vld [vmem:[%s15719_s14 + $0x98] sm:$0xff]  ;;  %v599_v29 = vld [vmem:[%s15719_s14 + $0x88] sm:$0xff]  ;;  %p15324_p6 = pnand %p15323_p7, %p19479_p13  ;;  %s15328_s6 = scalar_lea.vmem %s15327_s4, 6144 }
  0xe7   : > { %v603_v30 = vld [vmem:[%s15719_s14 + $0xa8] sm:$0xff]  ;;  %v604_v31 = vld [vmem:[%s15719_s14 + $0xb0] sm:$0xff]  ;;  %v602_v32 = vld [vmem:[%s15719_s14 + $0xa0] sm:$0xff]  ;;  %v625_v33 = vadd.f32 %v624_v21, %v596_v25  ;;  %v632_v34 = vadd.f32 %v601_v28, %v600_v27  ;;  %p15329_p3 = scmp.lt.s32.totalorder %s19046_s20, %s15327_s4  ;;  %p15330_p8 = scmp.lt.s32.totalorder %s15328_s6, %s15322_s16 }
  0xe8   : > { %v605_v35 = vld [vmem:[%s15719_s14 + $0xb8] sm:$0xff]  ;;  %v629_v36 = vadd.f32 %v628_v26, %v599_v29  ;;  %v636_v37 = vadd.f32 %v604_v31, %v603_v30  ;;  %v13523_v40 = vld [vmem:[#allocation8 + $0x1fc] ss:$36 sps:$4 sm:$0xff]   ;;  %v13531_v45 = vld [vmem:[#allocation8 + $0x168] ss:$36 sps:$4 sm:$0xff]   ;;  %p15325_p1 = pneg %p15324_p6 }
  0xe9   : > { %614 = vadd.xlane.f32.xlu0 %v613_v20  ;;  %v633_v38 = vadd.f32 %v632_v34, %v602_v32  ;;  %v13525_v41 = vld [vmem:[#allocation8 + $0x1f8] ss:$36 sps:$4 sm:$0xff]   ;;  %2213 = vmatprep.subr.bf16.mxu0 %v13523_v40  ;;  %v13528_v43 = vld [vmem:[#allocation8 + $0x1b0] ss:$36 sps:$4 sm:$0xff]   ;;  %v13532_v47 = vld [vmem:[#allocation8 + $0x124] ss:$36 sps:$4 sm:$0xff]   ;;  %p15331_p9 = por %p15330_p8, %p15329_p3 }
  0xea   : > { %622 = vadd.xlane.f32.xlu1 %v621_v24  ;;  %v637_v39 = vadd.f32 %v636_v37, %v605_v35  ;;  %v13526_v42 = vld [vmem:[#allocation8 + $0x1b4] ss:$36 sps:$4 sm:$0xff]   ;;  %2214 = vmatpush1.bf16.msra.mxu0 %v13525_v41  ;;  %v13529_v44 = vld [vmem:[#allocation8 + $0x16c] ss:$36 sps:$4 sm:$0xff]   ;;  %v13547_v46 = vld [vmem:[#allocation8 + $0x67c] ss:$36 sps:$4 sm:$0xff]  }
  0xeb   : > { %2215 = vmatprep.subr.bf16.mxu0 %v13526_v42  ;;  %v13551_v48 = vld [vmem:[#allocation8 + $0x678] ss:$36 sps:$4 sm:$0xff]   ;;  %2286 = vmatprep.subr.bf16.mxu1 %v13547_v46  ;;  %v13534_v49 = vld [vmem:[#allocation8 + $0x120] ss:$36 sps:$4 sm:$0xff]   ;;  %v13540_v53 = vld [vmem:[#allocation8 + $0x90] ss:$36 sps:$4 sm:$0xff]   ;;  %p15332_p11 = pnand %p15331_p9, %p15325_p1 }
  0xec   : > { %2287 = vmatpush1.bf16.msra.mxu1 %v13551_v48  ;;  %v13535_v50 = vld [vmem:[#allocation8 + $0xdc] ss:$36 sps:$4 sm:$0xff]   ;;  %v13538_v52 = vld [vmem:[#allocation8 + $0x94] ss:$36 sps:$4 sm:$0xff]   ;;  %v13541_v54 = vld [vmem:[#allocation8 + $0x4c] ss:$36 sps:$4 sm:$0xff]  }
  0xed   : > { %626 = vadd.xlane.f32.xlu0 %v625_v33  ;;  %v13537_v51 = vld [vmem:[#allocation8 + $0xd8] ss:$36 sps:$4 sm:$0xff]   ;;  %v13543_v55 = vld [vmem:[#allocation8 + $0x48] ss:$36 sps:$4 sm:$0xff]   ;;  %v13546_v57 = vld [vmem:[#allocation8] ss:$36 sps:$4 sm:$0xff]  }
  0xee   : > { %630 = vadd.xlane.f32.xlu1 %v629_v36  ;;  %2216 = vmatpush1.bf16.msra.mxu0 %v13528_v43  ;;  %v13544_v56 = vld [vmem:[#allocation8 + $0x4] ss:$36 sps:$4 sm:$0xff]   ;;  %v13549_v58 = vld [vmem:[#allocation8 + $0x43c] ss:$36 sps:$4 sm:$0xff]   ;;  %v14973_v40 = vld [vmem:[%s15719_s14 + $0x78] sm:$0xff] }
  0xef   : > { %2217 = vmatprep.subr.bf16.mxu0 %v13529_v44  ;;  %v13552_v59 = vld [vmem:[#allocation8 + $0x438] ss:$36 sps:$4 sm:$0xff]   ;;  %v14972_v36 = vld [vmem:[%s15719_s14 + $0x68] sm:$0xff]  ;;  %v14975_v46 = vld [vmem:[%s15719_s14 + $0x70] sm:$0xff] }
  0xf0   : > { %v14971_v34 = vld [vmem:[%s15719_s14 + $0x60] sm:$0xff] }
  0xf1   : > { %634 = vadd.xlane.f32.xlu0 %v633_v38  ;;  %v14974_v42 = vld [vmem:[%s15719_s14 + $0x80] sm:$0xff] }
  0xf2   : > { %638 = vadd.xlane.f32.xlu1 %v637_v39  ;;  %2218 = vmatpush1.bf16.msra.mxu0 %v13531_v45 }
  0xf3   : > { %2219 = vmatprep.subr.bf16.mxu0 %v13532_v47 }
  0xf6   : > { %2220 = vmatpush1.bf16.msra.mxu0 %v13534_v49 }
  0xf7   : > { %2221 = vmatprep.subr.bf16.mxu0 %v13535_v50 }
  0xfa   : > { %2222 = vmatpush1.bf16.msra.mxu0 %v13537_v51 }
  0xfb   : > { %2223 = vmatprep.subr.bf16.mxu0 %v13538_v52 }
  0xfe   : > { %2224 = vmatpush1.bf16.msra.mxu0 %v13540_v53 }
  0xff   : > { %2225 = vmatprep.subr.bf16.mxu0 %v13541_v54 }
 0x102   : > { %2226 = vmatpush1.bf16.msra.mxu0 %v13543_v55 }
 0x103   : > { %2227 = vmatprep.subr.bf16.mxu0 %v13544_v56  ;;  %v14976_v56 = vld [vmem:[%s15719_s14 + $0x88] sm:$0xff] }
 0x106   : > { %2228 = vmatpush1.bf16.msra.mxu0 %v13546_v57 }
 0x107   : > { %2229 = vmatprep.subr.bf16.mxu0 %v13549_v58  ;;  %v14977_v58 = vld [vmem:[%s15719_s14 + $0x90] sm:$0xff] }
 0x10a   : > { %2230 = vmatpush2.bf16.msra.mxu0 %v13552_v59 }
 0x16e   : > { %v611_v60 = vpop.xlane.xlu0 %610 }
 0x16f   : > { %v641_v61 = vmul.f32 0.0026041667, %v611_v60  ;;  %v619_v62 = vpop.xlane.xlu1 %618  ;;  %v14978_v60 = vld [vmem:[%s15719_s14 + $0x98] sm:$0xff] }
 0x170   : > { %v643_v63 = vmul.f32 0.0026041667, %v619_v62 }
 0x171   : > { %v15810_v3 = vsub.f32 %v15750_v0, %v641_v61  ;;  %v15813_v7 = vsub.f32 %v15753_v1, %v641_v61  ;;  %v15816_v11 = vsub.f32 %v15756_v2, %v641_v61 }
 0x172   : > { %v15819_v12 = vsub.f32 %v15761_v4, %v643_v63  ;;  %v15822_v16 = vsub.f32 %v15764_v5, %v643_v63  ;;  %v615_v17 = vpop.xlane.xlu0 %614  ;;  %v15825_v18 = vsub.f32 %v15767_v6, %v643_v63  ;;  %v14979_v63 = vld [vmem:[%s15719_s14 + $0xa8] sm:$0xff] }
 0x173   : > { %v642_v19 = vmul.f32 0.0026041667, %v615_v17  ;;  %v623_v20 = vpop.xlane.xlu1 %622  ;;  %v673_v0 = vmul.f32 %v15810_v3, %v15810_v3  ;;  %v674_v1 = vmul.f32 %v15813_v7, %v15813_v7  ;;  %v675_v2 = vmul.f32 %v15816_v11, %v15816_v11 }
 0x174   : > { %v644_v4 = vmul.f32 0.0026041667, %v623_v20  ;;  %v679_v5 = vmul.f32 %v15819_v12, %v15819_v12  ;;  %v680_v21 = vmul.f32 %v15822_v16, %v15822_v16  ;;  %v681_v6 = vmul.f32 %v15825_v18, %v15825_v18 }
 0x175   : > { %v15840_v22 = vsub.f32 %v15772_v8, %v642_v19  ;;  %v15843_v23 = vsub.f32 %v15775_v9, %v642_v19  ;;  %v697_v24 = vadd.f32 %v674_v1, %v673_v0  ;;  %v15846_v25 = vsub.f32 %v15778_v10, %v642_v19  ;;  %v14980_v19 = vld [vmem:[%s15719_s14 + $0xb0] sm:$0xff] }
 0x176   : > { %v15849_v26 = vsub.f32 %v15784_v13, %v644_v4  ;;  %v15852_v27 = vsub.f32 %v15787_v14, %v644_v4  ;;  %v627_v28 = vpop.xlane.xlu0 %626  ;;  %v705_v29 = vadd.f32 %v680_v21, %v679_v5  ;;  %v15855_v8 = vsub.f32 %v15790_v15, %v644_v4  ;;  %v14981_v5 = vld [vmem:[%s15719_s14 + $0xa0] sm:$0xff] }
 0x177   : > { %v645_v30 = vmul.f32 0.0026041667, %v627_v28  ;;  %v698_v9 = vadd.f32 %v697_v24, %v675_v2  ;;  %v631_v31 = vpop.xlane.xlu1 %630  ;;  %v676_v10 = vmul.f32 %v15840_v22, %v15840_v22  ;;  %v677_v13 = vmul.f32 %v15843_v23, %v15843_v23 }
 0x178   : > { %v646_v32 = vmul.f32 0.0026041667, %v631_v31  ;;  %v706_v33 = vadd.f32 %v705_v29, %v681_v6  ;;  %v678_v14 = vmul.f32 %v15846_v25, %v15846_v25  ;;  %v682_v15 = vmul.f32 %v15849_v26, %v15849_v26  ;;  %v14982_v29 = vld [vmem:[%s15719_s14 + $0xb8] sm:$0xff] }
 0x179   : > { %v15866_v35 = vsub.f32 %v14971_v34, %v645_v30  ;;  %v15869_v37 = vsub.f32 %v14972_v36, %v645_v30  ;;  %699 = vadd.xlane.f32.xlu0 %v698_v9  ;;  %v701_v38 = vadd.f32 %v677_v13, %v676_v10  ;;  %v683_v39 = vmul.f32 %v15852_v27, %v15852_v27  ;;  %v13553_v34 = vld [vmem:[#allocation8 + $0x634] ss:$36 sps:$4 sm:$0xff]  }
 0x17a   : > { %v15874_v41 = vsub.f32 %v14973_v40, %v646_v32  ;;  %v15877_v43 = vsub.f32 %v14974_v42, %v646_v32  ;;  %v635_v44 = vpop.xlane.xlu0 %634  ;;  %v684_v45 = vmul.f32 %v15855_v8, %v15855_v8  ;;  %v15882_v47 = vsub.f32 %v14975_v46, %v645_v30  ;;  %2288 = vmatprep.subr.bf16.mxu1 %v13553_v34  ;;  %v13558_v42 = vld [vmem:[#allocation8 + $0x3f0] ss:$36 sps:$4 sm:$0xff]   ;;  %v13563_v46 = vld [vmem:[#allocation8 + $0x5e8] ss:$36 sps:$4 sm:$0xff]  }
 0x17b   : > { %v647_v48 = vmul.f32 0.0026041667, %v635_v44  ;;  %v702_v49 = vadd.f32 %v701_v38, %v678_v14  ;;  %v639_v50 = vpop.xlane.xlu1 %638  ;;  %v709_v51 = vadd.f32 %v683_v39, %v682_v15  ;;  %v685_v52 = vmul.f32 %v15866_v35, %v15866_v35  ;;  %v13555_v38 = vld [vmem:[#allocation8 + $0x3f4] ss:$36 sps:$4 sm:$0xff]   ;;  %v13559_v44 = vld [vmem:[#allocation8 + $0x5ec] ss:$36 sps:$4 sm:$0xff]  }
 0x17c   : > { %v648_v53 = vmul.f32 0.0026041667, %v639_v50  ;;  %v686_v54 = vmul.f32 %v15869_v37, %v15869_v37  ;;  %v687_v55 = vmul.f32 %v15882_v47, %v15882_v47  ;;  %v15891_v57 = vsub.f32 %v14976_v56, %v646_v32  ;;  %v13557_v39 = vld [vmem:[#allocation8 + $0x630] ss:$36 sps:$4 sm:$0xff]   ;;  %2231 = vmatprep.subr.bf16.mxu0 %v13555_v38  ;;  %v13567_v50 = vld [vmem:[#allocation8 + $0x364] ss:$36 sps:$4 sm:$0xff]  }
 0x17d   : > { %v15894_v59 = vsub.f32 %v14977_v58, %v647_v48  ;;  %v15897_v61 = vsub.f32 %v14978_v60, %v647_v48  ;;  %707 = vadd.xlane.f32.xlu0 %v706_v33  ;;  %703 = vadd.xlane.f32.xlu1 %v702_v49  ;;  %v710_v62 = vadd.f32 %v709_v51, %v684_v45  ;;  %v13561_v45 = vld [vmem:[#allocation8 + $0x3ac] ss:$36 sps:$4 sm:$0xff]   ;;  %v13565_v49 = vld [vmem:[#allocation8 + $0x5a4] ss:$36 sps:$4 sm:$0xff]   ;;  %v13576_v56 = vld [vmem:[#allocation8 + $0x318] ss:$36 sps:$4 sm:$0xff]   ;;  %v778_v34 = vlaneseq }
 0x17e   : > { %v15900_v17 = vsub.f32 %v14979_v63, %v648_v53  ;;  %v15903_v20 = vsub.f32 %v14980_v19, %v648_v53  ;;  %v713_v0 = vadd.f32 %v686_v54, %v685_v52  ;;  %v688_v1 = vmul.f32 %v15874_v41, %v15874_v41  ;;  %2289 = vmatpush1.bf16.msra.mxu1 %v13557_v39  ;;  %v13569_v51 = vld [vmem:[#allocation8 + $0x5a0] ss:$36 sps:$4 sm:$0xff]   ;;  %v13577_v58 = vld [vmem:[#allocation8 + $0x514] ss:$36 sps:$4 sm:$0xff]   ;;  %v13583_v19 = vld [vmem:[#allocation8 + $0x4cc] ss:$36 sps:$4 sm:$0xff]  }
 0x17f   : > { %v689_v2 = vmul.f32 %v15877_v43, %v15877_v43  ;;  %v690_v4 = vmul.f32 %v15891_v57, %v15891_v57  ;;  %v15912_v21 = vsub.f32 %v14981_v5, %v647_v48  ;;  %v691_v6 = vmul.f32 %v15894_v59, %v15894_v59  ;;  %2232 = vmatpush2.bf16.msra.mxu0 %v13558_v42  ;;  %v13564_v48 = vld [vmem:[#allocation8 + $0x3a8] ss:$36 sps:$4 sm:$0xff]   ;;  %v13570_v52 = vld [vmem:[#allocation8 + $0x360] ss:$36 sps:$4 sm:$0xff]   ;;  %v13579_v60 = vld [vmem:[#allocation8 + $0x2d4] ss:$36 sps:$4 sm:$0xff]  }
 0x180   : > { %v714_v24 = vadd.f32 %v713_v0, %v687_v55  ;;  %v692_v28 = vmul.f32 %v15897_v61, %v15897_v61  ;;  %v15919_v30 = vsub.f32 %v14982_v29, %v648_v53  ;;  %v694_v9 = vmul.f32 %v15900_v17, %v15900_v17  ;;  %2290 = vmatprep.subr.bf16.mxu1 %v13559_v44  ;;  %v13571_v53 = vld [vmem:[#allocation8 + $0x55c] ss:$36 sps:$4 sm:$0xff]   ;;  %v13582_v63 = vld [vmem:[#allocation8 + $0x2d0] ss:$36 sps:$4 sm:$0xff]   ;;  %v13591_v5 = vld [vmem:[#allocation8 + $0x244] ss:$36 sps:$4 sm:$0xff]  }
 0x181   : > { %711 = vadd.xlane.f32.xlu1 %v710_v62  ;;  %v717_v31 = vadd.f32 %v689_v2, %v688_v1  ;;  %v693_v10 = vmul.f32 %v15912_v21, %v15912_v21  ;;  %v695_v13 = vmul.f32 %v15903_v20, %v15903_v20  ;;  %2233 = vmatprep.subr.bf16.mxu0 %v13561_v45  ;;  %v13573_v54 = vld [vmem:[#allocation8 + $0x31c] ss:$36 sps:$4 sm:$0xff]   ;;  %v13581_v62 = vld [vmem:[#allocation8 + $0x510] ss:$36 sps:$4 sm:$0xff]   ;;  %v13587_v1 = vld [vmem:[#allocation8 + $0x4c8] ss:$36 sps:$4 sm:$0xff]  }
 0x182   : > { %715 = vadd.xlane.f32.xlu0 %v714_v24  ;;  %v721_v32 = vadd.f32 %v692_v28, %v691_v6  ;;  %v696_v33 = vmul.f32 %v15919_v30, %v15919_v30  ;;  %2291 = vmatpush1.bf16.msra.mxu1 %v13563_v46  ;;  %v13575_v55 = vld [vmem:[#allocation8 + $0x558] ss:$36 sps:$4 sm:$0xff]   ;;  %v13585_v0 = vld [vmem:[#allocation8 + $0x28c] ss:$36 sps:$4 sm:$0xff]   ;;  %v13593_v6 = vld [vmem:[#allocation8 + $0x480] ss:$36 sps:$4 sm:$0xff]  }
 0x183   : > { %v718_v14 = vadd.f32 %v717_v31, %v690_v4  ;;  %v725_v15 = vadd.f32 %v695_v13, %v694_v9  ;;  %2234 = vmatpush2.bf16.msra.mxu0 %v13564_v48  ;;  %2292 = vmatprep.subr.bf16.mxu1 %v13565_v49  ;;  %v13588_v2 = vld [vmem:[#allocation8 + $0x288] ss:$36 sps:$4 sm:$0xff]   ;;  %v13594_v24 = vld [vmem:[#allocation8 + $0x240] ss:$36 sps:$4 sm:$0xff]   ;;  %v19109_v28 = vmov 0   ;;  %v15931_v44 = vshrl.u32 %v778_v34, 7 }
 0x184   : > { %v722_v36 = vadd.f32 %v721_v32, %v693_v10  ;;  %2235 = vmatprep.subr.bf16.mxu0 %v13567_v50  ;;  %v13589_v4 = vld [vmem:[#allocation8 + $0x484] ss:$36 sps:$4 sm:$0xff]   ;;  %2318 = vmatprep.mubr.bf16.mxu1 %v19109_v28  ;;  %v606_v50 = vld [vmem:[#allocation5] sm:$0x7] }
 0x185   : > { %719 = vadd.xlane.f32.xlu1 %v718_v14  ;;  %v726_v40 = vadd.f32 %v725_v15, %v696_v33  ;;  %v13597_v29 = vld [vmem:[#allocation8 + $0x204] ss:$36 sps:$4 sm:$0xff]   ;;  %19214 = vst [vmem:[#allocation31_spill] sm:$0xff] %v15931_v44 }
 0x186   : > { %723 = vadd.xlane.f32.xlu0 %v722_v36  ;;  %2293 = vmatpush1.bf16.msra.mxu1 %v13569_v51  ;;  %v13600_v9 = vld [vmem:[#allocation8 + $0x684] ss:$36 sps:$4 sm:$0xff]  }
 0x187   : > { %2236 = vmatpush2.bf16.msra.mxu0 %v13570_v52  ;;  %2294 = vmatprep.subr.bf16.mxu1 %v13571_v53  ;;  %v15934_v53 = vsub.s32 1, %v15931_v44 }
 0x188   : > { %2237 = vmatprep.subr.bf16.mxu0 %v13573_v54 }
 0x189   : > { %727 = vadd.xlane.f32.xlu1 %v726_v40  ;;  %19215 = vst [vmem:[#allocation32_spill] sm:$0xff] %v15934_v53 }
 0x18a   : > { %2295 = vmatpush1.bf16.msra.mxu1 %v13575_v55  ;;  %v15937_v55 = vsub.s32 2, %v15931_v44 }
 0x18b   : > { %2238 = vmatpush2.bf16.msra.mxu0 %v13576_v56  ;;  %2296 = vmatprep.subr.bf16.mxu1 %v13577_v58 }
 0x18c   : > { %2239 = vmatprep.subr.bf16.mxu0 %v13579_v60  ;;  %19216 = vst [vmem:[#allocation33_spill] sm:$0xff] %v15937_v55 }
 0x18e   : > { %2297 = vmatpush1.bf16.msra.mxu1 %v13581_v62  ;;  %v15940_v62 = vsub.s32 0, %v15931_v44 }
 0x18f   : > { %2240 = vmatpush2.bf16.msra.mxu0 %v13582_v63  ;;  %2298 = vmatprep.subr.bf16.mxu1 %v13583_v19  ;;  %v607_v19 = vld [vmem:[#allocation7] sm:$0x7] }
 0x190   : > { %2241 = vmatprep.subr.bf16.mxu0 %v13585_v0  ;;  %19217 = vst [vmem:[#allocation34_spill] sm:$0xff] %v15940_v62  ;;  %v15943_v0 = vrot.slane %v606_v50, %v15934_v53 }
 0x192   : > { %2299 = vmatpush1.bf16.msra.mxu1 %v13587_v1 }
 0x193   : > { %2242 = vmatpush2.bf16.msra.mxu0 %v13588_v2  ;;  %2300 = vmatprep.subr.bf16.mxu1 %v13589_v4  ;;  %v15946_v2 = vrot.slane %v606_v50, %v15937_v55 }
 0x194   : > { %2243 = vmatprep.subr.bf16.mxu0 %v13591_v5 }
 0x196   : > { %2301 = vmatpush1.bf16.msra.mxu1 %v13593_v6 }
 0x197   : > { %2244 = vmatpush2.bf16.msra.mxu0 %v13594_v24  ;;  %2359 = vmatprep.subr.bf16.mxu1 %v13597_v29  ;;  %v15952_v29 = vrot.slane %v606_v50, %v15940_v62 }
 0x198   : > { %2432 = vmatprep.subr.bf16.mxu0 %v13600_v9 }
 0x202   : > { %v700_v31 = vpop.xlane.xlu0 %699 }
 0x203   : > { %v729_v10 = vmul.f32 0.0026041667, %v700_v31  ;;  %v15956_v31 = vrot.slane %v607_v19, %v15934_v53 }
 0x205   : > { %v737_v13 = vadd.f32 1e-05, %v729_v10 }
 0x206   : > { %v704_v32 = vpop.xlane.xlu1 %703  ;;  %v708_v33 = vpop.xlane.xlu0 %707 }
 0x207   : > { %14747 = vrsqrt.f32 %v737_v13  ;;  %v730_v14 = vmul.f32 0.0026041667, %v704_v32  ;;  %v731_v15 = vmul.f32 0.0026041667, %v708_v33  ;;  %v15960_v32 = vrot.slane %v607_v19, %v15937_v55 }
 0x209   : > { %v738_v36 = vadd.f32 1e-05, %v730_v14  ;;  %v739_v38 = vadd.f32 1e-05, %v731_v15  ;;  %v15967_v15 = vrot.slane %v607_v19, %v15940_v62  ;;  %v13603_v19 = vld [vmem:[#allocation8 + $0x1bc] ss:$36 sps:$4 sm:$0xff]  }
 0x20a   : > { %v712_v39 = vpop.xlane.xlu1 %711 }
 0x20b   : > { %14749 = vrsqrt.f32 %v738_v36  ;;  %v732_v40 = vmul.f32 0.0026041667, %v712_v39  ;;  %v716_v42 = vpop.xlane.xlu0 %715 }
 0x20c   : > { %14751 = vrsqrt.f32 %v739_v38  ;;  %v733_v45 = vmul.f32 0.0026041667, %v716_v42 }
 0x20d   : > { %v740_v46 = vadd.f32 1e-05, %v732_v40 }
 0x20e   : > { %v741_v48 = vadd.f32 1e-05, %v733_v45  ;;  %v720_v49 = vpop.xlane.xlu1 %719 }
 0x20f   : > { %14753 = vrsqrt.f32 %v740_v46  ;;  %v734_v51 = vmul.f32 0.0026041667, %v720_v49  ;;  %v724_v52 = vpop.xlane.xlu0 %723 }
 0x210   : > { %14755 = vrsqrt.f32 %v741_v48  ;;  %v735_v54 = vmul.f32 0.0026041667, %v724_v52  ;;  %v13598_v52 = vld [vmem:[#allocation8 + $0x680] ss:$36 sps:$4 sm:$0xff]  }
 0x211   : > { %v742_v56 = vadd.f32 1e-05, %v734_v51  ;;  %v13595_v51 = vld [vmem:[#allocation8 + $0x200] ss:$36 sps:$4 sm:$0xff]  }
 0x212   : > { %v743_v58 = vadd.f32 1e-05, %v735_v54  ;;  %v728_v60 = vpop.xlane.xlu1 %727 }
 0x213   : > { %14757 = vrsqrt.f32 %v742_v56  ;;  %v736_v63 = vmul.f32 0.0026041667, %v728_v60 }
 0x214   : > { %v14748_v1 = vpop.eup %14747  ;;  %14759 = vrsqrt.f32 %v743_v58 }
 0x215   : > { %v744_v4 = vadd.f32 1e-05, %v736_v63  ;;  %v754_v5 = vmul.f32 %v14748_v1, %v15813_v7  ;;  %v755_v6 = vmul.f32 %v14748_v1, %v15816_v11  ;;  %v753_v24 = vmul.f32 %v14748_v1, %v15810_v3 }
 0x217   : > { %14761 = vrsqrt.f32 %v744_v4  ;;  %v794_v9 = vmul.f32 %v15943_v0, %v754_v5  ;;  %v795_v13 = vmul.f32 %v15946_v2, %v755_v6  ;;  %v793_v14 = vmul.f32 %v15952_v29, %v753_v24 }
 0x218   : > { %v14750_v10 = vpop.eup %14749 }
 0x219   : > { %v14752_v7 = vpop.eup %14751  ;;  %v757_v11 = vmul.f32 %v14750_v10, %v15843_v23  ;;  %v758_v3 = vmul.f32 %v14750_v10, %v15846_v25  ;;  %v756_v33 = vmul.f32 %v14750_v10, %v15840_v22  ;;  %v834_v39 = vadd.f32 %v15956_v31, %v794_v9 }
 0x21a   : > { %v760_v36 = vmul.f32 %v14752_v7, %v15822_v16  ;;  %v835_v23 = vadd.f32 %v15960_v32, %v795_v13  ;;  %v761_v45 = vmul.f32 %v14752_v7, %v15825_v18  ;;  %v833_v54 = vadd.f32 %v15967_v15, %v793_v14  ;;  %v13601_v13 = vld [vmem:[#allocation8 + $0x1b8] ss:$36 sps:$4 sm:$0xff]  }
 0x21b   : > { %v797_v38 = vmul.f32 %v15943_v0, %v757_v11  ;;  %v798_v40 = vmul.f32 %v15946_v2, %v758_v3  ;;  %v796_v25 = vmul.f32 %v15952_v29, %v756_v33  ;;  %v759_v58 = vmul.f32 %v14752_v7, %v15819_v12  ;;  %v13604_v7 = vld [vmem:[#allocation8 + $0x638] ss:$36 sps:$4 sm:$0xff]  }
 0x21c   : > { %v14754_v42 = vpop.eup %14753  ;;  %v800_v22 = vmul.f32 %v15943_v0, %v760_v36  ;;  %v801_v6 = vmul.f32 %v15946_v2, %v761_v45  ;;  %v13609_v14 = vld [vmem:[#allocation8 + $0x174] ss:$36 sps:$4 sm:$0xff]  }
 0x21d   : > { %v14756_v46 = vpop.eup %14755  ;;  %v837_v48 = vadd.f32 %v15956_v31, %v797_v38  ;;  %v838_v16 = vadd.f32 %v15960_v32, %v798_v40  ;;  %v763_v49 = vmul.f32 %v14754_v42, %v15852_v27  ;;  %v764_v50 = vmul.f32 %v14754_v42, %v15855_v8  ;;  %v13606_v27 = vld [vmem:[#allocation8 + $0x63c] ss:$36 sps:$4 sm:$0xff]   ;;  %v13612_v36 = vld [vmem:[#allocation8 + $0x5f4] ss:$36 sps:$4 sm:$0xff]  }
 0x21e   : > { %v836_v56 = vadd.f32 %v15967_v15, %v796_v25  ;;  %v762_v60 = vmul.f32 %v14754_v42, %v15849_v26  ;;  %v766_v12 = vmul.f32 %v14756_v46, %v15869_v37  ;;  %v840_v26 = vadd.f32 %v15956_v31, %v800_v22 }
 0x21f   : > { %v15985_v18 = vpack.c.bf16 %v837_v48, %v834_v39  ;;  %v15987_v63 = vpack.c.bf16 %v838_v16, %v835_v23  ;;  %v803_v1 = vmul.f32 %v15943_v0, %v763_v49  ;;  %v804_v8 = vmul.f32 %v15946_v2, %v764_v50  ;;  %v13607_v48 = vld [vmem:[#allocation8 + $0x170] ss:$36 sps:$4 sm:$0xff]  }
 0x220   : > { %v14758_v4 = vpop.eup %14757  ;;  %v15991_v5 = vpack.c.bf16 %v836_v56, %v833_v54  ;;  %v802_v24 = vmul.f32 %v15952_v29, %v762_v60  ;;  %v799_v3 = vmul.f32 %v15952_v29, %v759_v58  ;;  %v806_v38 = vmul.f32 %v15943_v0, %v766_v12  ;;  %v13610_v49 = vld [vmem:[#allocation8 + $0x5f0] ss:$36 sps:$4 sm:$0xff]  }
 0x221   : > { %2245 = vmatprep.mubr.bf16.mxu0 %v15985_v18  ;;  %2319 = vmatmul.mubr.bf16.vlgmr.msra.gmra.mxu1 %v15987_v63  ;;  %v843_v9 = vadd.f32 %v15956_v31, %v803_v1  ;;  %v769_v10 = vmul.f32 %v14758_v4, %v15877_v43  ;;  %v844_v11 = vadd.f32 %v15960_v32, %v804_v8  ;;  %v16004_v37 = vpop.eup %14759  ;;  %v13618_v56 = vld [vmem:[#allocation8 + $0x5ac] ss:$36 sps:$4 sm:$0xff]  }
 0x222   : > { %2360 = vmatpush1.bf16.msra.mxu1 %v13595_v51  ;;  %2246 = vmatmul.mubr.bf16.vlgmr.msra.gmra.mxu0 %v15991_v5  ;;  %v841_v40 = vadd.f32 %v15960_v32, %v801_v6  ;;  %v842_v42 = vadd.f32 %v15967_v15, %v802_v24  ;;  %v767_v25 = vmul.f32 %v14756_v46, %v15882_v47  ;;  %v13615_v47 = vld [vmem:[#allocation8 + $0x12c] ss:$36 sps:$4 sm:$0xff]  }
 0x223   : > { %2433 = vmatpush1.bf16.msra.mxu0 %v13598_v52  ;;  %2361 = vmatprep.subr.bf16.mxu1 %v13603_v19  ;;  %v16006_v33 = vpack.c.bf16 %v843_v9, %v840_v26  ;;  %v809_v43 = vmul.f32 %v15943_v0, %v769_v10  ;;  %v770_v22 = vmul.f32 %v14758_v4, %v15891_v57  ;;  %v13613_v19 = vld [vmem:[#allocation8 + $0x128] ss:$36 sps:$4 sm:$0xff]  }
 0x224   : > { %v14762_v39 = vpop.eup %14761  ;;  %2434 = vmatprep.subr.bf16.mxu0 %v13606_v27  ;;  %2328 = vmatprep.mubr.bf16.mxu1 %v19109_v28  ;;  %v768_v45 = vmul.f32 %v14758_v4, %v15874_v41  ;;  %v16018_v16 = vpack.c.bf16 %v844_v11, %v841_v40  ;;  %v839_v50 = vadd.f32 %v15967_v15, %v799_v3  ;;  %v13616_v1 = vld [vmem:[#allocation8 + $0x5a8] ss:$36 sps:$4 sm:$0xff]  }
 0x225   : > { %2255 = vmatprep.mubr.bf16.mxu0 %v16006_v33  ;;  %v849_v23 = vadd.f32 %v15956_v31, %v809_v43  ;;  %v765_v51 = vmul.f32 %v14756_v46, %v15866_v35  ;;  %v775_v52 = vmul.f32 %v14762_v39, %v15903_v20  ;;  %v846_v54 = vadd.f32 %v15956_v31, %v806_v38  ;;  %v13621_v27 = vld [vmem:[#allocation8 + $0xe4] ss:$36 sps:$4 sm:$0xff]   ;;  %v13630_v38 = vld [vmem:[#allocation8 + $0x51c] ss:$36 sps:$4 sm:$0xff]  }
 0x226   : > { %2362 = vmatpush1.bf16.msra.mxu1 %v13601_v13  ;;  %v810_v57 = vmul.f32 %v15946_v2, %v770_v22  ;;  %v772_v41 = vmul.f32 %v16004_v37, %v15897_v61  ;;  %v16027_v58 = vpack.c.bf16 %v842_v42, %v839_v50  ;;  %v808_v60 = vmul.f32 %v15952_v29, %v768_v45  ;;  %v13624_v4 = vld [vmem:[#allocation8 + $0x564] ss:$36 sps:$4 sm:$0xff]   ;;  %v13633_v42 = vld [vmem:[#allocation8 + $0x54] ss:$36 sps:$4 sm:$0xff]   ;;  %v13639_v50 = vld [vmem:[#allocation8 + $0xc] ss:$36 sps:$4 sm:$0xff]  }
 0x227   : > { %2435 = vmatpush1.bf16.msra.mxu0 %v13604_v7  ;;  %2363 = vmatprep.subr.bf16.mxu1 %v13609_v14  ;;  %v16031_v35 = vpack.c.bf16 %v849_v23, %v846_v54  ;;  %v807_v20 = vmul.f32 %v15946_v2, %v767_v25  ;;  %v815_v46 = vmul.f32 %v15943_v0, %v775_v52  ;;  %v13619_v7 = vld [vmem:[#allocation8 + $0xe0] ss:$36 sps:$4 sm:$0xff]   ;;  %v13636_v25 = vld [vmem:[#allocation8 + $0x4d4] ss:$36 sps:$4 sm:$0xff]   ;;  %v13640_v54 = vld [vmem:[#allocation8 + $0x488] ss:$36 sps:$4 sm:$0xff]  }
 0x228   : > { %2436 = vmatprep.subr.bf16.mxu0 %v13612_v36  ;;  %v805_v61 = vmul.f32 %v15952_v29, %v765_v51  ;;  %v850_v8 = vadd.f32 %v15960_v32, %v810_v57  ;;  %v812_v6 = vmul.f32 %v15943_v0, %v772_v41  ;;  %v776_v24 = vmul.f32 %v14762_v39, %v15919_v30  ;;  %v13622_v0 = vld [vmem:[#allocation8 + $0x560] ss:$36 sps:$4 sm:$0xff]   ;;  %v13631_v45 = vld [vmem:[#allocation8 + $0x50] ss:$36 sps:$4 sm:$0xff]   ;;  %v13646_v57 = vld [vmem:[#allocation8 + $0x208] ss:$36 sps:$4 sm:$0xff]  }
 0x229   : > { %2329 = vmatmul.mubr.bf16.gmra.mxu1 %v16018_v16  ;;  %v848_v12 = vadd.f32 %v15967_v15, %v808_v60  ;;  %v847_v26 = vadd.f32 %v15960_v32, %v807_v20  ;;  %v855_v9 = vadd.f32 %v15956_v31, %v815_v46  ;;  %v773_v10 = vmul.f32 %v16004_v37, %v15912_v21  ;;  %v13627_v36 = vld [vmem:[#allocation8 + $0x9c] ss:$36 sps:$4 sm:$0xff]   ;;  %v13642_v51 = vld [vmem:[#allocation8 + $0x48c] ss:$36 sps:$4 sm:$0xff]   ;;  %v13654_v60 = vld [vmem:[#allocation8 + $0x1c4] ss:$36 sps:$4 sm:$0xff]  }
 0x22a   : > { %2364 = vmatpush1.bf16.msra.mxu1 %v13607_v48  ;;  %2256 = vmatmul.mubr.bf16.gmra.mxu0 %v16027_v58  ;;  %v774_v13 = vmul.f32 %v14762_v39, %v15900_v17  ;;  %v845_v30 = vadd.f32 %v15967_v15, %v805_v61  ;;  %v771_v11 = vmul.f32 %v16004_v37, %v15894_v59  ;;  %v13625_v37 = vld [vmem:[#allocation8 + $0x98] ss:$36 sps:$4 sm:$0xff]   ;;  %v13634_v48 = vld [vmem:[#allocation8 + $0x4d0] ss:$36 sps:$4 sm:$0xff]   ;;  %v13652_v46 = vld [vmem:[#allocation8 + $0x1c0] ss:$36 sps:$4 sm:$0xff]  }
 0x22b   : > { %2437 = vmatpush1.bf16.msra.mxu0 %v13610_v49  ;;  %2265 = vmatprep.mubr.bf16.mxu0 %v16031_v35  ;;  %v16051_v3 = vpack.c.bf16 %v850_v8, %v847_v26  ;;  %v852_v14 = vadd.f32 %v15956_v31, %v812_v6  ;;  %v816_v21 = vmul.f32 %v15946_v2, %v776_v24  ;;  %v13628_v31 = vld [vmem:[#allocation8 + $0x518] ss:$36 sps:$4 sm:$0xff]   ;;  %v13655_v61 = vld [vmem:[#allocation8 + $0x3b0] ss:$36 sps:$4 sm:$0xff]   ;;  %v13661_v6 = vld [vmem:[#allocation8 + $0x368] ss:$36 sps:$4 sm:$0xff]  }
 0x22c   : > { %2365 = vmatprep.subr.bf16.mxu1 %v13615_v47  ;;  %2438 = vmatprep.subr.bf16.mxu0 %v13618_v56  ;;  %v16055_v17 = vpack.c.bf16 %v848_v12, %v845_v30  ;;  %v814_v43 = vmul.f32 %v15952_v29, %v774_v13  ;;  %v813_v59 = vmul.f32 %v15946_v2, %v773_v10  ;;  %v13648_v47 = vld [vmem:[#allocation8 + $0x20c] ss:$36 sps:$4 sm:$0xff]   ;;  %v13643_v56 = vld [vmem:[#allocation8 + $0x440] ss:$36 sps:$4 sm:$0xff]   ;;  %v13649_v20 = vld [vmem:[#allocation8 + $0x3f8] ss:$36 sps:$4 sm:$0xff]  }
 0x22d   : > { %2338 = vmatprep.mubr.bf16.mxu1 %v19109_v28  ;;  %v16059_v39 = vpack.c.bf16 %v855_v9, %v852_v14  ;;  %v811_v40 = vmul.f32 %v15952_v29, %v771_v11  ;;  %v856_v23 = vadd.f32 %v15960_v32, %v816_v21  ;;  %v13651_v41 = vld [vmem:[#allocation8 + $0x3fc] ss:$36 sps:$4 sm:$0xff]   ;;  %v13663_v8 = vld [vmem:[#allocation8 + $0x36c] ss:$36 sps:$4 sm:$0xff]   ;;  %v13669_v12 = vld [vmem:[#allocation8 + $0x324] ss:$36 sps:$4 sm:$0xff]  }
 0x22e   : > { %2366 = vmatpush1.bf16.msra.mxu1 %v13613_v19  ;;  %v854_v22 = vadd.f32 %v15967_v15, %v814_v43  ;;  %v853_v2 = vadd.f32 %v15960_v32, %v813_v59  ;;  %v13637_v32 = vld [vmem:[#allocation8 + $0x8] ss:$36 sps:$4 sm:$0xff]   ;;  %v13657_v19 = vld [vmem:[#allocation8 + $0x3b4] ss:$36 sps:$4 sm:$0xff]   ;;  %v13667_v9 = vld [vmem:[#allocation8 + $0x320] ss:$36 sps:$4 sm:$0xff]  }
 0x22f   : > { %2439 = vmatpush1.bf16.msra.mxu0 %v13616_v1  ;;  %2367 = vmatprep.subr.bf16.mxu1 %v13621_v27  ;;  %v851_v29 = vadd.f32 %v15967_v15, %v811_v40  ;;  %v13645_v15 = vld [vmem:[#allocation8 + $0x444] ss:$36 sps:$4 sm:$0xff]   ;;  %v13660_v1 = vld [vmem:[#allocation8 + $0x17c] ss:$36 sps:$4 sm:$0xff]   ;;  %v13664_v24 = vld [vmem:[#allocation8 + $0x130] ss:$36 sps:$4 sm:$0xff]  }
 0x230   : > { %2440 = vmatprep.subr.bf16.mxu0 %v13624_v4  ;;  %v16070_v49 = vpack.c.bf16 %v856_v23, %v853_v2  ;;  %v13658_v27 = vld [vmem:[#allocation8 + $0x178] ss:$36 sps:$4 sm:$0xff]   ;;  %v13672_v26 = vld [vmem:[#allocation8 + $0xec] ss:$36 sps:$4 sm:$0xff]   ;;  %v13676_v30 = vld [vmem:[#allocation8 + $0xa0] ss:$36 sps:$4 sm:$0xff]  }
 0x231   : > { %2339 = vmatmul.mubr.bf16.gmra.mxu1 %v16051_v3  ;;  %v16072_v52 = vpack.c.bf16 %v854_v22, %v851_v29  ;;  %v13666_v4 = vld [vmem:[#allocation8 + $0x134] ss:$36 sps:$4 sm:$0xff]   ;;  %v13670_v10 = vld [vmem:[#allocation8 + $0xe8] ss:$36 sps:$4 sm:$0xff]   ;;  %v13675_v13 = vld [vmem:[#allocation8 + $0x2dc] ss:$36 sps:$4 sm:$0xff]  }
 0x232   : > { %2368 = vmatpush1.bf16.msra.mxu1 %v13619_v7  ;;  %2266 = vmatmul.mubr.bf16.gmra.mxu0 %v16055_v17  ;;  %v13678_v7 = vld [vmem:[#allocation8 + $0xa4] ss:$36 sps:$4 sm:$0xff]   ;;  %v13681_v11 = vld [vmem:[#allocation8 + $0x294] ss:$36 sps:$4 sm:$0xff]   ;;  %v13684_v14 = vld [vmem:[#allocation8 + $0x5c] ss:$36 sps:$4 sm:$0xff]  }
 0x233   : > { %2441 = vmatpush1.bf16.msra.mxu0 %v13622_v0  ;;  %2275 = vmatprep.mubr.bf16.mxu0 %v16059_v39  ;;  %v13673_v0 = vld [vmem:[#allocation8 + $0x2d8] ss:$36 sps:$4 sm:$0xff]   ;;  %v13687_v21 = vld [vmem:[#allocation8 + $0x24c] ss:$36 sps:$4 sm:$0xff]   ;;  %v13702_v22 = vld [vmem:[#allocation8 + $0x404] ss:$36 sps:$4 sm:$0xff]  }
 0x234   : > { %2369 = vmatprep.subr.bf16.mxu1 %v13627_v36  ;;  %2442 = vmatprep.subr.bf16.mxu0 %v13630_v38  ;;  %v13679_v36 = vld [vmem:[#allocation8 + $0x290] ss:$36 sps:$4 sm:$0xff]   ;;  %v13682_v38 = vld [vmem:[#allocation8 + $0x58] ss:$36 sps:$4 sm:$0xff]   ;;  %v13685_v59 = vld [vmem:[#allocation8 + $0x248] ss:$36 sps:$4 sm:$0xff]  }
 0x235   : > { %2348 = vmatprep.mubr.bf16.mxu1 %v19109_v28  ;;  %v13690_v43 = vld [vmem:[#allocation8 + $0x14] ss:$36 sps:$4 sm:$0xff]   ;;  %v13696_v40 = vld [vmem:[#allocation8 + $0x44c] ss:$36 sps:$4 sm:$0xff]   ;;  %v13697_v2 = vld [vmem:[#allocation8 + $0x640] ss:$36 sps:$4 sm:$0xff]  }
 0x236   : > { %2370 = vmatpush1.bf16.msra.mxu1 %v13625_v37  ;;  %v13688_v37 = vld [vmem:[#allocation8 + $0x10] ss:$36 sps:$4 sm:$0xff]   ;;  %v13694_v23 = vld [vmem:[#allocation8 + $0x448] ss:$36 sps:$4 sm:$0xff]   ;;  %v13708_v29 = vld [vmem:[#allocation8 + $0x3bc] ss:$36 sps:$4 sm:$0xff]  }
 0x237   : > { %2443 = vmatpush1.bf16.msra.mxu0 %v13628_v31  ;;  %2371 = vmatprep.subr.bf16.mxu1 %v13633_v42  ;;  %v13693_v31 = vld [vmem:[#allocation8 + $0x68c] ss:$36 sps:$4 sm:$0xff]  }
 0x238   : > { %2444 = vmatprep.subr.bf16.mxu0 %v13636_v25  ;;  %v13691_v42 = vld [vmem:[#allocation8 + $0x688] ss:$36 sps:$4 sm:$0xff]  }
 0x239   : > { %2349 = vmatmul.mubr.bf16.gmra.mxu1 %v16070_v49  ;;  %v13699_v25 = vld [vmem:[#allocation8 + $0x644] ss:$36 sps:$4 sm:$0xff]  }
 0x23a   : > { %2372 = vmatpush1.bf16.msra.mxu1 %v13631_v45  ;;  %2276 = vmatmul.mubr.bf16.gmra.mxu0 %v16072_v52  ;;  %v13700_v45 = vld [vmem:[#allocation8 + $0x400] ss:$36 sps:$4 sm:$0xff]  }
 0x23b   : > { %2391 = vmatprep.mubr.bf16.mxu1 %v15985_v18  ;;  %2445 = vmatpush1.bf16.msra.mxu0 %v13634_v48  ;;  %v13705_v48 = vld [vmem:[#allocation8 + $0x5fc] ss:$36 sps:$4 sm:$0xff]  }
 0x23c   : > { %2373 = vmatprep.subr.bf16.mxu1 %v13639_v50  ;;  %2446 = vmatprep.subr.bf16.mxu0 %v13642_v51  ;;  %v13703_v50 = vld [vmem:[#allocation8 + $0x5f8] ss:$36 sps:$4 sm:$0xff]  }
 0x23d   : > { %2464 = vmatprep.mubr.bf16.mxu0 %v19109_v28  ;;  %v13706_v51 = vld [vmem:[#allocation8 + $0x3b8] ss:$36 sps:$4 sm:$0xff]  }
 0x23e   : > { %2374 = vmatpush1.bf16.msra.mxu1 %v13637_v32  ;;  %v13711_v32 = vld [vmem:[#allocation8 + $0x5b4] ss:$36 sps:$4 sm:$0xff]  }
 0x23f   : > { %2447 = vmatpush1.bf16.msra.mxu0 %v13640_v54  ;;  %2375 = vmatprep.subr.bf16.mxu1 %v13645_v15  ;;  %v13714_v54 = vld [vmem:[#allocation8 + $0x374] ss:$36 sps:$4 sm:$0xff]  }
 0x240   : > { %2505 = vmatprep.subr.bf16.mxu0 %v13648_v47  ;;  %v13709_v15 = vld [vmem:[#allocation8 + $0x5b0] ss:$36 sps:$4 sm:$0xff]  }
 0x241   : > { %v13712_v47 = vld [vmem:[#allocation8 + $0x370] ss:$36 sps:$4 sm:$0xff]  }
 0x242   : > { %2376 = vmatpush2.bf16.msra.mxu1 %v13643_v56  ;;  %2465 = vmatmul.mubr.bf16.vlgmr.msra.gmra.mxu0 %v15987_v63  ;;  %v13717_v56 = vld [vmem:[#allocation8 + $0x56c] ss:$36 sps:$4 sm:$0xff]  }
 0x243   : > { %2506 = vmatpush1.bf16.msra.mxu0 %v13646_v57  ;;  %2377 = vmatprep.subr.bf16.mxu1 %v13651_v41  ;;  %v13720_v57 = vld [vmem:[#allocation8 + $0x32c] ss:$36 sps:$4 sm:$0xff]  }
 0x244   : > { %2507 = vmatprep.subr.bf16.mxu0 %v13654_v60  ;;  %2474 = vmatprep.mubr.bf16.mxu0 %v19109_v28  ;;  %v13715_v41 = vld [vmem:[#allocation8 + $0x568] ss:$36 sps:$4 sm:$0xff]  }
 0x245   : > { %v13718_v60 = vld [vmem:[#allocation8 + $0x328] ss:$36 sps:$4 sm:$0xff]  }
 0x246   : > { %2378 = vmatpush2.bf16.msra.mxu1 %v13649_v20  ;;  %v13723_v20 = vld [vmem:[#allocation8 + $0x524] ss:$36 sps:$4 sm:$0xff]  }
 0x247   : > { %2508 = vmatpush1.bf16.msra.mxu0 %v13652_v46  ;;  %2379 = vmatprep.subr.bf16.mxu1 %v13657_v19  ;;  %v13726_v46 = vld [vmem:[#allocation8 + $0x2e4] ss:$36 sps:$4 sm:$0xff]  }
 0x248   : > { %2509 = vmatprep.subr.bf16.mxu0 %v13660_v1  ;;  %v13721_v19 = vld [vmem:[#allocation8 + $0x520] ss:$36 sps:$4 sm:$0xff]  }
 0x249   : > { %v13724_v1 = vld [vmem:[#allocation8 + $0x2e0] ss:$36 sps:$4 sm:$0xff]  }
 0x24a   : > { %2380 = vmatpush2.bf16.msra.mxu1 %v13655_v61  ;;  %2475 = vmatmul.mubr.bf16.gmra.mxu0 %v16018_v16  ;;  %v13729_v61 = vld [vmem:[#allocation8 + $0x4dc] ss:$36 sps:$4 sm:$0xff]  }
 0x24b   : > { %2510 = vmatpush1.bf16.msra.mxu0 %v13658_v27  ;;  %2381 = vmatprep.subr.bf16.mxu1 %v13663_v8  ;;  %v13732_v27 = vld [vmem:[#allocation8 + $0x29c] ss:$36 sps:$4 sm:$0xff]  }
 0x24c   : > { %2511 = vmatprep.subr.bf16.mxu0 %v13666_v4  ;;  %2484 = vmatprep.mubr.bf16.mxu0 %v19109_v28  ;;  %v13727_v8 = vld [vmem:[#allocation8 + $0x4d8] ss:$36 sps:$4 sm:$0xff]  }
 0x24d   : > { %v13730_v4 = vld [vmem:[#allocation8 + $0x298] ss:$36 sps:$4 sm:$0xff]  }
 0x24e   : > { %2382 = vmatpush2.bf16.msra.mxu1 %v13661_v6  ;;  %v13735_v6 = vld [vmem:[#allocation8 + $0x494] ss:$36 sps:$4 sm:$0xff]  }
 0x24f   : > { %2512 = vmatpush1.bf16.msra.mxu0 %v13664_v24  ;;  %2383 = vmatprep.subr.bf16.mxu1 %v13669_v12  ;;  %v13738_v24 = vld [vmem:[#allocation8 + $0x254] ss:$36 sps:$4 sm:$0xff]  }
 0x250   : > { %2513 = vmatprep.subr.bf16.mxu0 %v13672_v26  ;;  %v13733_v12 = vld [vmem:[#allocation8 + $0x490] ss:$36 sps:$4 sm:$0xff]  }
 0x251   : > { %v13736_v26 = vld [vmem:[#allocation8 + $0x250] ss:$36 sps:$4 sm:$0xff]  }
 0x252   : > { %2384 = vmatpush2.bf16.msra.mxu1 %v13667_v9  ;;  %2485 = vmatmul.mubr.bf16.gmra.mxu0 %v16051_v3  ;;  %v13741_v9 = vld [vmem:[#allocation8 + $0x214] ss:$36 sps:$4 sm:$0xff]  }
 0x253   : > { %2514 = vmatpush1.bf16.msra.mxu0 %v13670_v10  ;;  %2385 = vmatprep.subr.bf16.mxu1 %v13675_v13  ;;  %v13744_v10 = vld [vmem:[#allocation8 + $0x694] ss:$36 sps:$4 sm:$0xff]  }
 0x254   : > { %2515 = vmatprep.subr.bf16.mxu0 %v13678_v7  ;;  %2494 = vmatprep.mubr.bf16.mxu0 %v19109_v28  ;;  %v13739_v13 = vld [vmem:[#allocation8 + $0x210] ss:$36 sps:$4 sm:$0xff]  }
 0x255   : > { %v13742_v7 = vld [vmem:[#allocation8 + $0x690] ss:$36 sps:$4 sm:$0xff]  }
 0x256   : > { %2386 = vmatpush2.bf16.msra.mxu1 %v13673_v0  ;;  %v13747_v0 = vld [vmem:[#allocation8 + $0x1cc] ss:$36 sps:$4 sm:$0xff]  }
 0x257   : > { %2516 = vmatpush1.bf16.msra.mxu0 %v13676_v30  ;;  %2387 = vmatprep.subr.bf16.mxu1 %v13681_v11  ;;  %v13750_v30 = vld [vmem:[#allocation8 + $0x64c] ss:$36 sps:$4 sm:$0xff]  }
 0x258   : > { %2517 = vmatprep.subr.bf16.mxu0 %v13684_v14  ;;  %v13745_v11 = vld [vmem:[#allocation8 + $0x1c8] ss:$36 sps:$4 sm:$0xff]  }
 0x259   : > { %v13748_v14 = vld [vmem:[#allocation8 + $0x648] ss:$36 sps:$4 sm:$0xff]  }
 0x25a   : > { %2388 = vmatpush2.bf16.msra.mxu1 %v13679_v36  ;;  %2495 = vmatmul.mubr.bf16.gmra.mxu0 %v16070_v49  ;;  %v13753_v36 = vld [vmem:[#allocation8 + $0x184] ss:$36 sps:$4 sm:$0xff]  }
 0x25b   : > { %2518 = vmatpush1.bf16.msra.mxu0 %v13682_v38  ;;  %2537 = vmatprep.mubr.bf16.mxu0 %v15985_v18  ;;  %v13756_v38 = vld [vmem:[#allocation8 + $0x604] ss:$36 sps:$4 sm:$0xff]  }
 0x25c   : > { %2389 = vmatprep.subr.bf16.mxu1 %v13687_v21  ;;  %2519 = vmatprep.subr.bf16.mxu0 %v13690_v43  ;;  %v13751_v21 = vld [vmem:[#allocation8 + $0x180] ss:$36 sps:$4 sm:$0xff]  }
 0x25d   : > { %v13754_v43 = vld [vmem:[#allocation8 + $0x600] ss:$36 sps:$4 sm:$0xff]  }
 0x25e   : > { %2390 = vmatpush2.bf16.msra.mxu1 %v13685_v59  ;;  %v13759_v59 = vld [vmem:[#allocation8 + $0x13c] ss:$36 sps:$4 sm:$0xff]  }
 0x25f   : > { %2520 = vmatpush1.bf16.msra.mxu0 %v13688_v37  ;;  %2578 = vmatprep.subr.bf16.mxu1 %v13693_v31  ;;  %v13762_v37 = vld [vmem:[#allocation8 + $0x5bc] ss:$36 sps:$4 sm:$0xff]  }
 0x260   : > { %2521 = vmatprep.subr.bf16.mxu0 %v13696_v40  ;;  %v13757_v31 = vld [vmem:[#allocation8 + $0x138] ss:$36 sps:$4 sm:$0xff]  }
 0x261   : > { %2392 = vmatmul.mubr.bf16.vlgmr.msra.gmra.mxu1 %v15991_v5  ;;  %v13760_v40 = vld [vmem:[#allocation8 + $0x5b8] ss:$36 sps:$4 sm:$0xff]  }
 0x262   : > { %2401 = vmatprep.mubr.bf16.mxu1 %v16006_v33  ;;  %2579 = vmatpush1.bf16.msra.mxu1 %v13691_v42  ;;  %v13765_v42 = vld [vmem:[#allocation8 + $0xf4] ss:$36 sps:$4 sm:$0xff]  }
 0x263   : > { %2522 = vmatpush2.bf16.msra.mxu0 %v13694_v23  ;;  %2580 = vmatprep.subr.bf16.mxu1 %v13699_v25  ;;  %v13768_v23 = vld [vmem:[#allocation8 + $0x574] ss:$36 sps:$4 sm:$0xff]  }
 0x264   : > { %2523 = vmatprep.subr.bf16.mxu0 %v13702_v22  ;;  %v13763_v25 = vld [vmem:[#allocation8 + $0xf0] ss:$36 sps:$4 sm:$0xff]  }
 0x265   : > { %v13766_v22 = vld [vmem:[#allocation8 + $0x570] ss:$36 sps:$4 sm:$0xff]  }
 0x266   : > { %2581 = vmatpush1.bf16.msra.mxu1 %v13697_v2  ;;  %v13771_v2 = vld [vmem:[#allocation8 + $0xac] ss:$36 sps:$4 sm:$0xff]  }
 0x267   : > { %2524 = vmatpush2.bf16.msra.mxu0 %v13700_v45  ;;  %2582 = vmatprep.subr.bf16.mxu1 %v13705_v48  ;;  %v13774_v45 = vld [vmem:[#allocation8 + $0x52c] ss:$36 sps:$4 sm:$0xff]  }
 0x268   : > { %2525 = vmatprep.subr.bf16.mxu0 %v13708_v29  ;;  %v13769_v48 = vld [vmem:[#allocation8 + $0xa8] ss:$36 sps:$4 sm:$0xff]  }
 0x269   : > { %2402 = vmatmul.mubr.bf16.gmra.mxu1 %v16027_v58  ;;  %v13772_v29 = vld [vmem:[#allocation8 + $0x528] ss:$36 sps:$4 sm:$0xff]  }
 0x26a   : > { %2411 = vmatprep.mubr.bf16.mxu1 %v16031_v35  ;;  %2583 = vmatpush1.bf16.msra.mxu1 %v13703_v50  ;;  %v13777_v50 = vld [vmem:[#allocation8 + $0x64] ss:$36 sps:$4 sm:$0xff]  }
 0x26b   : > { %2526 = vmatpush2.bf16.msra.mxu0 %v13706_v51  ;;  %2584 = vmatprep.subr.bf16.mxu1 %v13711_v32  ;;  %v13780_v51 = vld [vmem:[#allocation8 + $0x4e4] ss:$36 sps:$4 sm:$0xff]  }
 0x26c   : > { %2527 = vmatprep.subr.bf16.mxu0 %v13714_v54  ;;  %v13775_v32 = vld [vmem:[#allocation8 + $0x60] ss:$36 sps:$4 sm:$0xff]  }
 0x26d   : > { %v13778_v54 = vld [vmem:[#allocation8 + $0x4e0] ss:$36 sps:$4 sm:$0xff]  }
 0x26e   : > { %2585 = vmatpush1.bf16.msra.mxu1 %v13709_v15  ;;  %v13783_v15 = vld [vmem:[#allocation8 + $0x1c] ss:$36 sps:$4 sm:$0xff]  }
 0x26f   : > { %2528 = vmatpush2.bf16.msra.mxu0 %v13712_v47  ;;  %2586 = vmatprep.subr.bf16.mxu1 %v13717_v56  ;;  %v13786_v47 = vld [vmem:[#allocation8 + $0x49c] ss:$36 sps:$4 sm:$0xff]  }
 0x270   : > { %2529 = vmatprep.subr.bf16.mxu0 %v13720_v57  ;;  %v13781_v56 = vld [vmem:[#allocation8 + $0x18] ss:$36 sps:$4 sm:$0xff]  }
 0x271   : > { %2412 = vmatmul.mubr.bf16.gmra.mxu1 %v16055_v17  ;;  %v13784_v57 = vld [vmem:[#allocation8 + $0x498] ss:$36 sps:$4 sm:$0xff]  }
 0x272   : > { %2421 = vmatprep.mubr.bf16.mxu1 %v16059_v39  ;;  %2587 = vmatpush1.bf16.msra.mxu1 %v13715_v41  ;;  %v13789_v41 = vld [vmem:[#allocation8 + $0x454] ss:$36 sps:$4 sm:$0xff]  }
 0x273   : > { %2530 = vmatpush2.bf16.msra.mxu0 %v13718_v60  ;;  %2588 = vmatprep.subr.bf16.mxu1 %v13723_v20  ;;  %v13790_v60 = vld [vmem:[#allocation8 + $0x458] ss:$36 sps:$4 sm:$0xff]   ;;  %v13787_v20 = vld [vmem:[#allocation8 + $0x450] ss:$36 sps:$4 sm:$0xff]  }
 0x274   : > { %2531 = vmatprep.subr.bf16.mxu0 %v13726_v46  ;;  %v13791_v46 = vld [vmem:[#allocation8 + $0x218] ss:$36 sps:$4 sm:$0xff]  }
 0x276   : > { %2589 = vmatpush1.bf16.msra.mxu1 %v13721_v19  ;;  %v13794_v19 = vld [vmem:[#allocation8 + $0x40c] ss:$36 sps:$4 sm:$0xff]  }
 0x277   : > { %2532 = vmatpush2.bf16.msra.mxu0 %v13724_v1  ;;  %2590 = vmatprep.subr.bf16.mxu1 %v13729_v61  ;;  %v13795_v1 = vld [vmem:[#allocation8 + $0x410] ss:$36 sps:$4 sm:$0xff]   ;;  %v13792_v61 = vld [vmem:[#allocation8 + $0x408] ss:$36 sps:$4 sm:$0xff]  }
 0x278   : > { %2533 = vmatprep.subr.bf16.mxu0 %v13732_v27  ;;  %v13796_v27 = vld [vmem:[#allocation8 + $0x1d0] ss:$36 sps:$4 sm:$0xff]  }
 0x279   : > { %2422 = vmatmul.mubr.bf16.gmra.mxu1 %v16072_v52 }
 0x27a   : > { %2591 = vmatpush1.bf16.msra.mxu1 %v13727_v8  ;;  %2610 = vmatprep.mubr.bf16.mxu1 %v19109_v28  ;;  %v13799_v8 = vld [vmem:[#allocation8 + $0x3c4] ss:$36 sps:$4 sm:$0xff]  }
 0x27b   : > { %2534 = vmatpush2.bf16.msra.mxu0 %v13730_v4  ;;  %2592 = vmatprep.subr.bf16.mxu1 %v13735_v6  ;;  %v13800_v4 = vld [vmem:[#allocation8 + $0x3c8] ss:$36 sps:$4 sm:$0xff]   ;;  %v13797_v6 = vld [vmem:[#allocation8 + $0x3c0] ss:$36 sps:$4 sm:$0xff]  }
 0x27c   : > { %2535 = vmatprep.subr.bf16.mxu0 %v13738_v24  ;;  %v13801_v24 = vld [vmem:[#allocation8 + $0x188] ss:$36 sps:$4 sm:$0xff]  }
 0x27e   : > { %2593 = vmatpush1.bf16.msra.mxu1 %v13733_v12  ;;  %v13804_v12 = vld [vmem:[#allocation8 + $0x37c] ss:$36 sps:$4 sm:$0xff]  }
 0x27f   : > { %2536 = vmatpush2.bf16.msra.mxu0 %v13736_v26  ;;  %2651 = vmatprep.subr.bf16.mxu1 %v13741_v9  ;;  %v13805_v26 = vld [vmem:[#allocation8 + $0x380] ss:$36 sps:$4 sm:$0xff]   ;;  %v13802_v9 = vld [vmem:[#allocation8 + $0x378] ss:$36 sps:$4 sm:$0xff]  }
 0x280   : > { %2724 = vmatprep.subr.bf16.mxu0 %v13744_v10  ;;  %v13806_v10 = vld [vmem:[#allocation8 + $0x140] ss:$36 sps:$4 sm:$0xff]  }
 0x281   : > { %2611 = vmatmul.mubr.bf16.vlgmr.msra.gmra.mxu1 %v15987_v63 }
 0x282   : > { %2538 = vmatmul.mubr.bf16.vlgmr.msra.gmra.mxu0 %v15991_v5  ;;  %2652 = vmatpush1.bf16.msra.mxu1 %v13739_v13  ;;  %v13809_v13 = vld [vmem:[#allocation8 + $0x334] ss:$36 sps:$4 sm:$0xff]  }
 0x283   : > { %2547 = vmatprep.mubr.bf16.mxu0 %v16006_v33  ;;  %2725 = vmatpush1.bf16.msra.mxu0 %v13742_v7  ;;  %v13810_v7 = vld [vmem:[#allocation8 + $0x338] ss:$36 sps:$4 sm:$0xff]  }
 0x284   : > { %2653 = vmatprep.subr.bf16.mxu1 %v13747_v0  ;;  %2726 = vmatprep.subr.bf16.mxu0 %v13750_v30  ;;  %v13807_v0 = vld [vmem:[#allocation8 + $0x330] ss:$36 sps:$4 sm:$0xff]   ;;  %v13811_v30 = vld [vmem:[#allocation8 + $0xf8] ss:$36 sps:$4 sm:$0xff]  }
 0x285   : > { %2620 = vmatprep.mubr.bf16.mxu1 %v19109_v28 }
 0x286   : > { %2654 = vmatpush1.bf16.msra.mxu1 %v13745_v11  ;;  %v13814_v11 = vld [vmem:[#allocation8 + $0x2ec] ss:$36 sps:$4 sm:$0xff]  }
 0x287   : > { %2727 = vmatpush1.bf16.msra.mxu0 %v13748_v14  ;;  %2655 = vmatprep.subr.bf16.mxu1 %v13753_v36  ;;  %v13815_v14 = vld [vmem:[#allocation8 + $0x2f0] ss:$36 sps:$4 sm:$0xff]   ;;  %v13812_v36 = vld [vmem:[#allocation8 + $0x2e8] ss:$36 sps:$4 sm:$0xff]  }
 0x288   : > { %2728 = vmatprep.subr.bf16.mxu0 %v13756_v38  ;;  %v13816_v38 = vld [vmem:[#allocation8 + $0xb0] ss:$36 sps:$4 sm:$0xff]  }
 0x289   : > { %2621 = vmatmul.mubr.bf16.gmra.mxu1 %v16018_v16 }
 0x28a   : > { %2548 = vmatmul.mubr.bf16.gmra.mxu0 %v16027_v58  ;;  %2656 = vmatpush1.bf16.msra.mxu1 %v13751_v21  ;;  %v13819_v21 = vld [vmem:[#allocation8 + $0x2a4] ss:$36 sps:$4 sm:$0xff]  }
 0x28b   : > { %2557 = vmatprep.mubr.bf16.mxu0 %v16031_v35  ;;  %2729 = vmatpush1.bf16.msra.mxu0 %v13754_v43  ;;  %v13820_v43 = vld [vmem:[#allocation8 + $0x2a8] ss:$36 sps:$4 sm:$0xff]  }
 0x28c   : > { %2657 = vmatprep.subr.bf16.mxu1 %v13759_v59  ;;  %2730 = vmatprep.subr.bf16.mxu0 %v13762_v37  ;;  %v13817_v59 = vld [vmem:[#allocation8 + $0x2a0] ss:$36 sps:$4 sm:$0xff]   ;;  %v13821_v37 = vld [vmem:[#allocation8 + $0x68] ss:$36 sps:$4 sm:$0xff]  }
 0x28d   : > { %2630 = vmatprep.mubr.bf16.mxu1 %v19109_v28 }
 0x28e   : > { %2658 = vmatpush1.bf16.msra.mxu1 %v13757_v31  ;;  %v13824_v31 = vld [vmem:[#allocation8 + $0x25c] ss:$36 sps:$4 sm:$0xff]  }
 0x28f   : > { %2731 = vmatpush1.bf16.msra.mxu0 %v13760_v40  ;;  %2659 = vmatprep.subr.bf16.mxu1 %v13765_v42  ;;  %v13825_v40 = vld [vmem:[#allocation8 + $0x260] ss:$36 sps:$4 sm:$0xff]   ;;  %v13822_v42 = vld [vmem:[#allocation8 + $0x258] ss:$36 sps:$4 sm:$0xff]  }
 0x290   : > { %2732 = vmatprep.subr.bf16.mxu0 %v13768_v23  ;;  %v13826_v23 = vld [vmem:[#allocation8 + $0x20] ss:$36 sps:$4 sm:$0xff]  }
 0x291   : > { %2631 = vmatmul.mubr.bf16.gmra.mxu1 %v16051_v3 }
 0x292   : > { %2558 = vmatmul.mubr.bf16.gmra.mxu0 %v16055_v17  ;;  %2660 = vmatpush1.bf16.msra.mxu1 %v13763_v25  ;;  %v13827_v25 = vld [vmem:[#allocation8 + $0x698] ss:$36 sps:$4 sm:$0xff]  }
 0x293   : > { %2567 = vmatprep.mubr.bf16.mxu0 %v16059_v39  ;;  %2733 = vmatpush1.bf16.msra.mxu0 %v13766_v22  ;;  %v13828_v22 = vld [vmem:[#allocation8 + $0x650] ss:$36 sps:$4 sm:$0xff]  }
 0x294   : > { %2661 = vmatprep.subr.bf16.mxu1 %v13771_v2  ;;  %2734 = vmatprep.subr.bf16.mxu0 %v13774_v45  ;;  %v13829_v2 = vld [vmem:[#allocation8 + $0x608] ss:$36 sps:$4 sm:$0xff]   ;;  %v13831_v45 = vld [vmem:[#allocation8 + $0x578] ss:$36 sps:$4 sm:$0xff]  }
 0x295   : > { %2640 = vmatprep.mubr.bf16.mxu1 %v19109_v28 }
 0x296   : > { %2662 = vmatpush1.bf16.msra.mxu1 %v13769_v48 }
 0x297   : > { %2735 = vmatpush1.bf16.msra.mxu0 %v13772_v29  ;;  %2663 = vmatprep.subr.bf16.mxu1 %v13777_v50 }
 0x298   : > { %2736 = vmatprep.subr.bf16.mxu0 %v13780_v51 }
 0x299   : > { %2641 = vmatmul.mubr.bf16.gmra.mxu1 %v16070_v49 }
 0x29a   : > { %2568 = vmatmul.mubr.bf16.gmra.mxu0 %v16072_v52  ;;  %2664 = vmatpush1.bf16.msra.mxu1 %v13775_v32 }
 0x29b   : > { %2683 = vmatprep.mubr.bf16.mxu1 %v15985_v18  ;;  %2737 = vmatpush1.bf16.msra.mxu0 %v13778_v54 }
 0x29c   : > { %2665 = vmatprep.subr.bf16.mxu1 %v13783_v15  ;;  %2738 = vmatprep.subr.bf16.mxu0 %v13786_v47 }
 0x29d   : > { %2756 = vmatprep.mubr.bf16.mxu0 %v19109_v28 }
 0x29e   : > { %2666 = vmatpush1.bf16.msra.mxu1 %v13781_v56 }
 0x29f   : > { %2739 = vmatpush1.bf16.msra.mxu0 %v13784_v57  ;;  %2667 = vmatprep.subr.bf16.mxu1 %v13789_v41 }
 0x2a0   : > { %12646 = vmatprep.subr.bf16.mxu0 %v13790_v60 }
 0x2a2   : > { %2668 = vmatpush2.bf16.msra.mxu1 %v13787_v20  ;;  %2757 = vmatmul.mubr.bf16.vlgmr.msra.gmra.mxu0 %v15987_v63 }
 0x2a3   : > { %12647 = vmatpush3.bf16.msra.mxu0 %v13791_v46  ;;  %2669 = vmatprep.subr.bf16.mxu1 %v13794_v19 }
 0x2a4   : > { %12648 = vmatprep.subr.bf16.mxu0 %v13795_v1  ;;  %2766 = vmatprep.mubr.bf16.mxu0 %v19109_v28 }
 0x2a6   : > { %2670 = vmatpush2.bf16.msra.mxu1 %v13792_v61 }
 0x2a7   : > { %12649 = vmatpush3.bf16.msra.mxu0 %v13796_v27  ;;  %2671 = vmatprep.subr.bf16.mxu1 %v13799_v8 }
 0x2a8   : > { %12650 = vmatprep.subr.bf16.mxu0 %v13800_v4 }
 0x2aa   : > { %2672 = vmatpush2.bf16.msra.mxu1 %v13797_v6  ;;  %2767 = vmatmul.mubr.bf16.gmra.mxu0 %v16018_v16 }
 0x2ab   : > { %12651 = vmatpush3.bf16.msra.mxu0 %v13801_v24  ;;  %2673 = vmatprep.subr.bf16.mxu1 %v13804_v12 }
 0x2ac   : > { %12652 = vmatprep.subr.bf16.mxu0 %v13805_v26  ;;  %2776 = vmatprep.mubr.bf16.mxu0 %v19109_v28 }
 0x2ae   : > { %2674 = vmatpush2.bf16.msra.mxu1 %v13802_v9 }
 0x2af   : > { %12653 = vmatpush3.bf16.msra.mxu0 %v13806_v10  ;;  %2675 = vmatprep.subr.bf16.mxu1 %v13809_v13 }
 0x2b0   : > { %12654 = vmatprep.subr.bf16.mxu0 %v13810_v7 }
 0x2b2   : > { %2676 = vmatpush2.bf16.msra.mxu1 %v13807_v0  ;;  %2777 = vmatmul.mubr.bf16.gmra.mxu0 %v16051_v3 }
 0x2b3   : > { %12655 = vmatpush3.bf16.msra.mxu0 %v13811_v30  ;;  %2677 = vmatprep.subr.bf16.mxu1 %v13814_v11 }
 0x2b4   : > { %12656 = vmatprep.subr.bf16.mxu0 %v13815_v14  ;;  %2786 = vmatprep.mubr.bf16.mxu0 %v19109_v28 }
 0x2b6   : > { %2678 = vmatpush2.bf16.msra.mxu1 %v13812_v36 }
 0x2b7   : > { %12657 = vmatpush3.bf16.msra.mxu0 %v13816_v38  ;;  %2679 = vmatprep.subr.bf16.mxu1 %v13819_v21 }
 0x2b8   : > { %12658 = vmatprep.subr.bf16.mxu0 %v13820_v43 }
 0x2ba   : > { %2680 = vmatpush2.bf16.msra.mxu1 %v13817_v59  ;;  %2787 = vmatmul.mubr.bf16.gmra.mxu0 %v16070_v49 }
 0x2bb   : > { %12659 = vmatpush3.bf16.msra.mxu0 %v13821_v37  ;;  %2829 = vmatprep.mubr.bf16.mxu0 %v15985_v18  ;;  %v13830_v18 = vld [vmem:[#allocation8 + $0x5c0] ss:$36 sps:$4 sm:$0xff]  }
 0x2bc   : > { %2681 = vmatprep.subr.bf16.mxu1 %v13824_v31  ;;  %12660 = vmatprep.subr.bf16.mxu0 %v13825_v40 }
 0x2be   : > { %2682 = vmatpush2.bf16.msra.mxu1 %v13822_v42 }
 0x2bf   : > { %12661 = vmatpush3.bf16.msra.mxu0 %v13826_v23  ;;  %13086 = vmatprep.subr.bf16.mxu1 %v13827_v25 }
 0x2c1   : > { %2684 = vmatmul.mubr.bf16.vlgmr.msra.gmra.mxu1 %v15991_v5 }
 0x2c2   : > { %2693 = vmatprep.mubr.bf16.mxu1 %v16006_v33  ;;  %2830 = vmatmul.mubr.bf16.vlgmr.msra.gmra.mxu0 %v15991_v5  ;;  %v13832_v5 = vld [vmem:[#allocation8 + $0x530] ss:$36 sps:$4 sm:$0xff]  }
 0x2c3   : > { %13087 = vmatpush3.bf16.msra.mxu1 %v13827_v25  ;;  %2837 = vmatprep.mubr.bf16.mxu0 %v16006_v33  ;;  %v13833_v33 = vld [vmem:[#allocation8 + $0x4e8] ss:$36 sps:$4 sm:$0xff]  }
 0x2c4   : > { %13088 = vmatprep.subr.bf16.mxu1 %v13828_v22 }
 0x2c7   : > { %13089 = vmatpush3.bf16.msra.mxu1 %v13828_v22 }
 0x2c8   : > { %13090 = vmatprep.subr.bf16.mxu1 %v13829_v2 }
 0x2c9   : > { %2694 = vmatmul.mubr.bf16.gmra.mxu1 %v16027_v58 }
 0x2ca   : > { %2703 = vmatprep.mubr.bf16.mxu1 %v16031_v35  ;;  %2838 = vmatmul.mubr.bf16.gmra.mxu0 %v16027_v58  ;;  %v13834_v58 = vld [vmem:[#allocation8 + $0x4a0] ss:$36 sps:$4 sm:$0xff]  }
 0x2cb   : > { %13091 = vmatpush3.bf16.msra.mxu1 %v13829_v2  ;;  %2845 = vmatprep.mubr.bf16.mxu0 %v16031_v35 }
 0x2cc   : > { %13092 = vmatprep.subr.bf16.mxu1 %v13830_v18 }
 0x2cf   : > { %13093 = vmatpush3.bf16.msra.mxu1 %v13830_v18 }
 0x2d0   : > { %13094 = vmatprep.subr.bf16.mxu1 %v13831_v45 }
 0x2d1   : > { %2704 = vmatmul.mubr.bf16.gmra.mxu1 %v16055_v17 }
 0x2d2   : > { %2713 = vmatprep.mubr.bf16.mxu1 %v16059_v39  ;;  %2846 = vmatmul.mubr.bf16.gmra.mxu0 %v16055_v17 }
 0x2d3   : > { %13095 = vmatpush3.bf16.msra.mxu1 %v13831_v45  ;;  %2853 = vmatprep.mubr.bf16.mxu0 %v16059_v39 }
 0x2d4   : > { %13096 = vmatprep.subr.bf16.mxu1 %v13832_v5 }
 0x2d7   : > { %13097 = vmatpush3.bf16.msra.mxu1 %v13832_v5 }
 0x2d8   : > { %13098 = vmatprep.subr.bf16.mxu1 %v13833_v33 }
 0x2d9   : > { %2714 = vmatmul.mubr.bf16.gmra.mxu1 %v16072_v52 }
 0x2da   : > { %2854 = vmatmul.mubr.bf16.gmra.mxu0 %v16072_v52  ;;  %13102 = vmatprep.mubr.bf16.mxu1 %v15987_v63 }
 0x2db   : > { %13099 = vmatpush3.bf16.msra.mxu1 %v13833_v33 }
 0x2dc   : > { %13100 = vmatprep.subr.bf16.mxu1 %v13834_v58 }
 0x2df   : > { %13101 = vmatpush3.bf16.msra.mxu1 %v13834_v58 }
 0x2e1   : > { %v2320_v35 = vpop.f32.mrf.mxu1 }
 0x2e2   : > { %13103 = vmatmul.mubr.bf16.vlgmr.msra.gmra.mxu1 %v16018_v16  ;;  %v2247_v17 = vpop.f32.mrf.mxu0 }
 0x2e3   : > { %13106 = vmatprep.mubr.bf16.mxu1 %v16051_v3  ;;  %v2322_v39 = vpop.f32.mrf.mxu1  ;;  %v2321_v32 = vadd.f32 %v2320_v35, %v2247_v17 }
 0x2e4   : > { %v2249_v48 = vpop.f32.mrf.mxu0 }
 0x2e5   : > { %v16135_v29 = vadd.f32 %v2322_v39, %v2249_v48  ;;  %v2324_v50 = vpop.f32.mrf.mxu1 }
 0x2e6   : > { %v2251_v51 = vpop.f32.mrf.mxu0 }
 0x2e7   : > { %v2325_v54 = vadd.f32 %v2324_v50, %v2251_v51  ;;  %v16137_v52 = vpop.f32.mrf.mxu1 }
 0x2e8   : > { %v16139_v63 = vpop.f32.mrf.mxu0 }
 0x2e9   : > { %v16141_v15 = vpack.c.bf16 %v2325_v54, %v2321_v32  ;;  %v16143_v47 = vpop.f32.mrf.mxu1 }
 0x2ea   : > { %13107 = vmatmul.mubr.bf16.gmra.mxu1 %v16070_v49  ;;  %v16146_v16 = vpop.f32.mrf.mxu0 }
 0x2eb   : > { %v2332_v3 = vpop.f32.mrf.mxu1  ;;  %13118 = vmatprep.mubr.msk.bf16.mxu0 %vm3102_vm0, %v16141_v15 }
 0x2ec   : > { %v2259_v56 = vpop.f32.mrf.mxu0 }
 0x2ed   : > { %v16150_v57 = vadd.f32 %v2332_v3, %v2259_v56  ;;  %v16152_v41 = vpop.f32.mrf.mxu1 }
 0x2ee   : > { %v16154_v60 = vpop.f32.mrf.mxu0 }
 0x2ef   : > { %v16156_v20 = vpop.f32.mrf.mxu1 }
 0x2f0   : > { %v16158_v46 = vpop.f32.mrf.mxu0 }
 0x2f1   : > { %v2340_v19 = vpop.f32.mrf.mxu1 }
 0x2f2   : > { %v2267_v1 = vpop.f32.mrf.mxu0 }
 0x2f3   : > { %v2341_v49 = vadd.f32 %v2340_v19, %v2267_v1  ;;  %v2342_v61 = vpop.f32.mrf.mxu1 }
 0x2f4   : > { %v2269_v27 = vpop.f32.mrf.mxu0 }
 0x2f5   : > { %v16160_v8 = vadd.f32 %v2342_v61, %v2269_v27  ;;  %v2344_v4 = vpop.f32.mrf.mxu1 }
 0x2f6   : > { %v2271_v6 = vpop.f32.mrf.mxu0 }
 0x2f7   : > { %v2345_v24 = vadd.f32 %v2344_v4, %v2271_v6  ;;  %v16162_v12 = vpop.f32.mrf.mxu1 }
 0x2f8   : > { %v16164_v26 = vpop.f32.mrf.mxu0 }
 0x2f9   : > { %v16166_v9 = vpack.c.bf16 %v2345_v24, %v2341_v49  ;;  %v2350_v10 = vpop.f32.mrf.mxu1 }
 0x2fa   : > { %v2277_v13 = vpop.f32.mrf.mxu0 }
 0x2fb   : > { %v2351_v7 = vadd.f32 %v2350_v10, %v2277_v13  ;;  %v2352_v0 = vpop.f32.mrf.mxu1 }
 0x2fc   : > { %v2279_v30 = vpop.f32.mrf.mxu0 }
 0x2fd   : > { %v16168_v11 = vadd.f32 %v2352_v0, %v2279_v30  ;;  %v2354_v14 = vpop.f32.mrf.mxu1 }
 0x2fe   : > { %v2281_v36 = vpop.f32.mrf.mxu0 }
 0x2ff   : > { %v2355_v38 = vadd.f32 %v2354_v14, %v2281_v36  ;;  %v16174_v22 = vpop.f32.mrf.mxu1 }
 0x300   : > { %v16170_v21 = vpop.f32.mrf.mxu0 }
 0x301   : > { %v16172_v43 = vpack.c.bf16 %v2355_v38, %v2351_v7 }
 0x302   : > { %v2466_v59 = vpop.f32.mrf.mxu0 }
 0x304   : > { %v2468_v37 = vpop.f32.mrf.mxu0 }
 0x306   : > { %v2470_v31 = vpop.f32.mrf.mxu0 }
 0x308   : > { %v2472_v40 = vpop.f32.mrf.mxu0 }
 0x30a   : > { %v2476_v42 = vpop.f32.mrf.mxu0 }
 0x30c   : > { %v2478_v23 = vpop.f32.mrf.mxu0 }
 0x30e   : > { %v2480_v25 = vpop.f32.mrf.mxu0 }
 0x310   : > { %v2482_v2 = vpop.f32.mrf.mxu0 }
 0x312   : > { %v16176_v5 = vpop.f32.mrf.mxu0 }
 0x314   : > { %v2488_v17 = vpop.f32.mrf.mxu0 }
 0x316   : > { %v16180_v32 = vpop.f32.mrf.mxu0 }
 0x318   : > { %v2492_v19 = vpop.f32.mrf.mxu0 }
 0x31a   : > { %v2496_v27 = vpop.f32.mrf.mxu0 }
 0x31c   : > { %v2498_v24 = vpop.f32.mrf.mxu0 }
 0x31e   : > { %v2500_v38 = vpop.f32.mrf.mxu0 }
 0x321   : > { %v2393_v18 = vpop.f32.mrf.mxu1 }
 0x322   : > { %v2467_v45 = vadd.f32 %v2466_v59, %v2393_v18 }
 0x323   : > { %v2395_v33 = vpop.f32.mrf.mxu1 }
 0x325   : > { %v2397_v58 = vpop.f32.mrf.mxu1 }
 0x326   : > { %v2471_v35 = vadd.f32 %v2470_v31, %v2397_v58 }
 0x327   : > { %v2399_v39 = vpop.f32.mrf.mxu1 }
 0x328   : > { %v16178_v48 = vpack.c.bf16 %v2471_v35, %v2467_v45  ;;  %v2502_v45 = vpop.f32.mrf.mxu0  ;;  %v2473_v58 = vadd.f32 %v2472_v40, %v2399_v39 }
 0x329   : > { %v2403_v50 = vpop.f32.mrf.mxu1 }
 0x32a   : > { %v2477_v51 = vadd.f32 %v2476_v42, %v2403_v50 }
 0x32b   : > { %v2405_v54 = vpop.f32.mrf.mxu1 }
 0x32c   : > { %v2479_v31 = vadd.f32 %v2478_v23, %v2405_v54 }
 0x32d   : > { %v2407_v3 = vpop.f32.mrf.mxu1 }
 0x32e   : > { %v2481_v56 = vadd.f32 %v2480_v25, %v2407_v3 }
 0x32f   : > { %v2409_v1 = vpop.f32.mrf.mxu1 }
 0x330   : > { %v16182_v49 = vpack.c.bf16 %v2481_v56, %v2477_v51  ;;  %v2483_v30 = vadd.f32 %v2482_v2, %v2409_v1  ;;  %v2469_v2 = vadd.f32 %v2468_v37, %v2395_v33  ;;  %v2335_v37 = vadd.f32 %v16152_v41, %v16154_v60 }
 0x331   : > { %v16184_v61 = vpop.f32.mrf.mxu1 }
 0x332   : > { %v2939_v25 = vpack.c.bf16 %v2483_v30, %v2479_v31  ;;  %v2930_v23 = vpack.c.bf16 %v2473_v58, %v2469_v2 }
 0x333   : > { %v2415_v4 = vpop.f32.mrf.mxu1 }
 0x334   : > { %v2489_v13 = vadd.f32 %v2488_v17, %v2415_v4  ;;  %v2331_v4 = vadd.f32 %v16143_v47, %v16146_v16 }
 0x335   : > { %v16186_v6 = vpop.f32.mrf.mxu1 }
 0x337   : > { %v2419_v10 = vpop.f32.mrf.mxu1 }
 0x338   : > { %v2493_v7 = vadd.f32 %v2492_v19, %v2419_v10 }
 0x339   : > { %v2423_v0 = vpop.f32.mrf.mxu1 }
 0x33a   : > { %v2948_v14 = vpack.c.bf16 %v2493_v7, %v2489_v13  ;;  %v2497_v36 = vadd.f32 %v2496_v27, %v2423_v0  ;;  %v2936_v13 = vpack.c.bf16 %v2335_v37, %v2331_v4 }
 0x33b   : > { %v2425_v59 = vpop.f32.mrf.mxu1 }
 0x33c   : > { %3007 = vrot.lane.b32.xlu1 %v2948_v14, %s15433_s2  ;;  %v2499_v50 = vadd.f32 %v2498_v24, %v2425_v59  ;;  %v3122_v41 = vsel %vm3102_vm0, %v2948_v14, 0 }
 0x33d   : > { %v2427_v42 = vpop.f32.mrf.mxu1 }
 0x33e   : > { %v2501_v18 = vadd.f32 %v2500_v38, %v2427_v42 }
 0x33f   : > { %v2429_v35 = vpop.f32.mrf.mxu1 }
 0x340   : > { %v16189_v51 = vpack.c.bf16 %v2501_v18, %v2497_v36  ;;  %v2503_v17 = vadd.f32 %v2502_v45, %v2429_v35  ;;  %3005 = vrot.lane.b32.xlu1 %v2939_v25, %s15433_s2  ;;  %v3119_v35 = vsel %vm3102_vm0, %v2939_v25, 0 }
 0x341   : > { %v2612_v3 = vpop.f32.mrf.mxu1 }
 0x342   : > { %v2957_v56 = vpack.c.bf16 %v2503_v17, %v2499_v50  ;;  %v2539_v19 = vpop.f32.mrf.mxu0  ;;  %v2327_v50 = vadd.f32 %v16137_v52, %v16139_v63 }
 0x343   : > { %v16192_v54 = vpop.f32.mrf.mxu1  ;;  %v2613_v45 = vadd.f32 %v2612_v3, %v2539_v19 }
 0x344   : > { %v16194_v1 = vpop.f32.mrf.mxu0  ;;  %3009 = vrot.lane.b32.xlu0 %v2957_v56, %s15433_s2  ;;  %13326 = vmatprep.subr.msk.bf16.mxu0 %vm3102_vm0, %v2957_v56  ;;  %v3125_v40 = vsel %vm3102_vm0, %v2957_v56, 0 }
 0x345   : > { %3003 = vrot.lane.b32.xlu1 %v2930_v23, %s15433_s2  ;;  %v2616_v39 = vpop.f32.mrf.mxu1  ;;  %13111 = vmatpush3.bf16.xpose.msra.mxu0 %v3125_v40  ;;  %v2928_v40 = vpack.c.bf16 %v2327_v50, %v16135_v29 }
 0x346   : > { %v2543_v33 = vpop.f32.mrf.mxu0  ;;  %13327 = vmatprep.subr.msk.bf16.mxu0 %vm3102_vm0, %v2948_v14 }
 0x347   : > { %v16203_v27 = vpop.f32.mrf.mxu1  ;;  %v2617_v31 = vadd.f32 %v2616_v39, %v2543_v33  ;;  %v3116_v33 = vsel %vm3102_vm0, %v2930_v23, 0 }
 0x348   : > { %v16207_v24 = vpop.f32.mrf.mxu0  ;;  %2967 = vrot.lane.b32.xlu0 %v16141_v15, %s15433_s2 }
 0x349   : > { %v2622_v10 = vpop.f32.mrf.mxu1  ;;  %v16225_v17 = vpack.c.bf16 %v2617_v31, %v2613_v45 }
 0x34a   : > { %v2549_v7 = vpop.f32.mrf.mxu0 }
 0x34b   : > { %v2624_v0 = vpop.f32.mrf.mxu1  ;;  %v2623_v47 = vadd.f32 %v2622_v10, %v2549_v7 }
 0x34c   : > { %v2551_v30 = vpop.f32.mrf.mxu0  ;;  %2969 = vrot.lane.b32.xlu0 %v2936_v13, %s15433_s2 }
 0x34d   : > { %v2626_v60 = vpop.f32.mrf.mxu1  ;;  %13113 = vmatpush3.bf16.xpose.msra.mxu0 %v3122_v41 }
 0x34e   : > { %v2553_v36 = vpop.f32.mrf.mxu0  ;;  %13328 = vmatprep.subr.msk.bf16.mxu0 %vm3102_vm0, %v2939_v25  ;;  %v2337_v25 = vadd.f32 %v16156_v20, %v16158_v46 }
 0x34f   : > { %v2627_v16 = vadd.f32 %v2626_v60, %v2553_v36  ;;  %v2628_v38 = vpop.f32.mrf.mxu1  ;;  %v2625_v60 = vadd.f32 %v2624_v0, %v2551_v30 }
 0x350   : > { %v2555_v59 = vpop.f32.mrf.mxu0  ;;  %v16236_v4 = vpack.c.bf16 %v2337_v25, %v16150_v57 }
 0x351   : > { %v16214_v15 = vpack.c.bf16 %v2627_v16, %v2623_v47  ;;  %v2632_v42 = vpop.f32.mrf.mxu1  ;;  %v2629_v10 = vadd.f32 %v2628_v38, %v2555_v59  ;;  %v2357_v47 = vadd.f32 %v16174_v22, %v16170_v21 }
 0x352   : > { %v2559_v18 = vpop.f32.mrf.mxu0 }
 0x353   : > { %v16216_v58 = vpop.f32.mrf.mxu1  ;;  %3017 = vrot.lane.b32.xlu0 %v16214_v15, %s15433_s2  ;;  %v16242_v16 = vpack.c.bf16 %v2629_v10, %v2625_v60  ;;  %v2633_v57 = vadd.f32 %v2632_v42, %v2559_v18  ;;  %v16255_v21 = vpack.c.bf16 %v2357_v47, %v16168_v11  ;;  %v2487_v18 = vadd.f32 %v16176_v5, %v16184_v61 }
 0x354   : > { %v16220_v14 = vpop.f32.mrf.mxu0 }
 0x355   : > { %v2636_v2 = vpop.f32.mrf.mxu1  ;;  %13115 = vmatpush3.bf16.xpose.msra.mxu0 %v3119_v35 }
 0x356   : > { %v2563_v56 = vpop.f32.mrf.mxu0  ;;  %13329 = vmatprep.subr.msk.bf16.mxu0 %vm3102_vm0, %v2930_v23 }
 0x357   : > { %v2638_v3 = vpop.f32.mrf.mxu1  ;;  %3015 = vrot.lane.b32.xlu0 %v16225_v17, %s15433_s2  ;;  %v2637_v20 = vadd.f32 %v2636_v2, %v2563_v56 }
 0x358   : > { %v2565_v19 = vpop.f32.mrf.mxu0 }
 0x359   : > { %v2642_v39 = vpop.f32.mrf.mxu1  ;;  %v2949_v30 = vpack.c.bf16 %v2637_v20, %v2633_v57  ;;  %v2639_v50 = vadd.f32 %v2638_v3, %v2565_v19  ;;  %v2619_v3 = vadd.f32 %v16203_v27, %v16207_v24  ;;  %v3294_v19 = vsel %vm3102_vm0, %v16225_v17, 0 }
 0x35a   : > { %v2569_v37 = vpop.f32.mrf.mxu0 }
 0x35b   : > { %v2644_v52 = vpop.f32.mrf.mxu1  ;;  %2979 = vrot.lane.b32.xlu0 %v2928_v40, %s15433_s2  ;;  %v2643_v29 = vadd.f32 %v2642_v39, %v2569_v37  ;;  %v3300_v35 = vsel %vm3102_vm0, %v2949_v30, 0  ;;  %v3297_v39 = vsel %vm3102_vm0, %v16214_v15, 0 }
 0x35c   : > { %v2571_v63 = vpop.f32.mrf.mxu0 }
 0x35d   : > { %v2646_v7 = vpop.f32.mrf.mxu1  ;;  %13117 = vmatpush3.bf16.xpose.msra.mxu0 %v3116_v33 }
 0x35e   : > { %v2573_v41 = vpop.f32.mrf.mxu0 }
 0x35f   : > { %v2647_v36 = vadd.f32 %v2646_v7, %v2573_v41  ;;  %2981 = vrot.lane.b32.xlu0 %v16236_v4, %s15433_s2  ;;  %v2648_v11 = vpop.f32.mrf.mxu1 }
 0x360   : > { %v2575_v46 = vpop.f32.mrf.mxu0 }
 0x361   : > { %v2958_v23 = vpack.c.bf16 %v2647_v36, %v2643_v29 }
 0x362   : > { %v16244_v31 = vpop.f32.mrf.mxu0 }
 0x363   : > { %3029 = vrot.lane.b32.xlu0 %v16242_v16, %s15433_s2  ;;  %3021 = vrot.lane.b32.xlu1 %v2958_v23, %s15433_s2  ;;  %v3303_v0 = vsel %vm3102_vm0, %v2958_v23, 0 }
 0x364   : > { %13334 = vmatprep.subr.msk.bf16.mxu0 %vm3102_vm0, %v2958_v23  ;;  %v16251_v38 = vpop.f32.mrf.mxu0  ;;  %13119 = vmatmul.mubr.msk.bf16.vlgmr.msra.gmra.mxu0 %vm3102_vm0, %v2936_v13  ;;  %v2491_v13 = vadd.f32 %v16180_v32, %v16186_v6  ;;  %v2649_v6 = vadd.f32 %v2648_v11, %v2575_v46 }
 0x365   : > { %13122 = vmatprep.mubr.msk.bf16.mxu0 %vm3102_vm0, %v16166_v9  ;;  %13143 = vmatpush3.bf16.xpose.msra.mxu0 %v3303_v0 }
 0x366   : > { %v16259_v22 = vpop.f32.mrf.mxu0  ;;  %13335 = vmatprep.subr.msk.bf16.mxu0 %vm3102_vm0, %v2949_v30  ;;  %v16282_v32 = vpack.c.bf16 %v2491_v13, %v2487_v18 }
 0x367   : > { %3019 = vrot.lane.b32.xlu1 %v2949_v30, %s15433_s2  ;;  %2985 = vrot.lane.b32.xlu0 %v16255_v21, %s15433_s2 }
 0x368   : > { %v16265_v59 = vpop.f32.mrf.mxu0 }
 0x36a   : > { %v16269_v42 = vpop.f32.mrf.mxu0 }
 0x36b   : > { %2971 = vrot.lane.b32.xlu1 %v16166_v9, %s15433_s2  ;;  %2991 = vrot.lane.b32.xlu0 %v16178_v48, %s15433_s2  ;;  %v2645_v9 = vadd.f32 %v2644_v52, %v2571_v63 }
 0x36c   : > { %v16277_v45 = vpop.f32.mrf.mxu0  ;;  %13123 = vmatmul.mubr.msk.bf16.gmra.mxu0 %vm3102_vm0, %v16172_v43 }
 0x36d   : > { %13145 = vmatpush3.bf16.xpose.msra.mxu0 %v3300_v35  ;;  %13150 = vmatprep.mubr.msk.bf16.mxu0 %vm3102_vm0, %v2928_v40  ;;  %v2959_v2 = vpack.c.bf16 %v2649_v6, %v2645_v9  ;;  %v2635_v40 = vadd.f32 %v16216_v58, %v16220_v14 }
 0x36e   : > { %v16285_v5 = vpop.f32.mrf.mxu0  ;;  %13336 = vmatprep.subr.msk.bf16.mxu0 %vm3102_vm0, %v16214_v15 }
 0x36f   : > { %2973 = vrot.lane.b32.xlu1 %v16172_v43, %s15433_s2  ;;  %2995 = vrot.lane.b32.xlu0 %v16282_v32, %s15433_s2  ;;  %v2347_v43 = vadd.f32 %v16162_v12, %v16164_v26  ;;  %v2950_v37 = vpack.c.bf16 %v2639_v50, %v2635_v40  ;;  %v2615_v12 = vadd.f32 %v16192_v54, %v16194_v1 }
 0x370   : > { %v16293_v61 = vpop.f32.mrf.mxu0 }
 0x371   : > { %v2946_v14 = vpack.c.bf16 %v2347_v43, %v16160_v8  ;;  %v16325_v63 = vpack.c.bf16 %v2619_v3, %v2615_v12 }
 0x372   : > { %v16295_v56 = vpop.f32.mrf.mxu0 }
 0x373   : > { %3033 = vrot.lane.b32.xlu1 %v2959_v2, %s15433_s2 }
 0x374   : > { %v16300_v25 = vpop.f32.mrf.mxu0 }
 0x375   : > { %13147 = vmatpush3.bf16.xpose.msra.mxu0 %v3297_v39  ;;  %v3475_v39 = vsel %vm3102_vm0, %v16242_v16, 0 }
 0x376   : > { %v16306_v52 = vpop.f32.mrf.mxu0  ;;  %13337 = vmatprep.subr.msk.bf16.mxu0 %vm3102_vm0, %v16225_v17  ;;  %v3481_v17 = vsel %vm3102_vm0, %v2959_v2, 0 }
 0x377   : > { %3031 = vrot.lane.b32.xlu1 %v2950_v37, %s15433_s2 }
 0x378   : > { %v16311_v58 = vpop.f32.mrf.mxu0 }
 0x37a   : > { %v16316_v15 = vpop.f32.mrf.mxu0 }
 0x37b   : > { %2983 = vrot.lane.b32.xlu1 %v2946_v14, %s15433_s2 }
 0x37c   : > { %v16321_v26 = vpop.f32.mrf.mxu0 }
 0x37d   : > { %13149 = vmatpush3.bf16.xpose.msra.mxu0 %v3294_v19 }
 0x37e   : > { %v16327_v33 = vpop.f32.mrf.mxu0  ;;  %13342 = vmatprep.subr.msk.bf16.mxu0 %vm3102_vm0, %v2959_v2 }
 0x37f   : > { %3027 = vrot.lane.b32.xlu1 %v16325_v63, %s15433_s2 }
 0x380   : > { %v16332_v8 = vpop.f32.mrf.mxu0 }
 0x381   : > { %v2685_v54 = vpop.f32.mrf.mxu1 }
 0x382   : > { %v12662_v1 = vpop.f32.mrf.mxu0  ;;  %v2759_v41 = vadd.f32 %v16244_v31, %v2685_v54 }
 0x383   : > { %v2687_v27 = vpop.f32.mrf.mxu1  ;;  %2993 = vrot.lane.b32.xlu1 %v16182_v49, %s15433_s2 }
 0x384   : > { %v12663_v24 = vpop.f32.mrf.mxu0  ;;  %13151 = vmatmul.mubr.msk.bf16.vlgmr.msra.gmra.mxu0 %vm3102_vm0, %v16236_v4  ;;  %v2761_v23 = vadd.f32 %v16251_v38, %v2687_v27 }
 0x385   : > { %v16339_v10 = vadd.f32 %v12663_v24, %v12662_v1  ;;  %v2689_v7 = vpop.f32.mrf.mxu1  ;;  %13154 = vmatprep.mubr.msk.bf16.mxu0 %vm3102_vm0, %v2946_v14  ;;  %13175 = vmatpush3.bf16.xpose.msra.mxu0 %v3481_v17 }
 0x386   : > { %v2763_v60 = vadd.f32 %v16259_v22, %v2689_v7  ;;  %v16344_v29 = vpop.f32.mrf.mxu0  ;;  %13343 = vmatprep.subr.msk.bf16.mxu0 %vm3102_vm0, %v2950_v37  ;;  %v3478_v22 = vsel %vm3102_vm0, %v2950_v37, 0 }
 0x387   : > { %v2691_v36 = vpop.f32.mrf.mxu1  ;;  %2997 = vrot.lane.b32.xlu1 %v16189_v51, %s15433_s2 }
 0x388   : > { %v16349_v4 = vpack.c.bf16 %v2763_v60, %v2759_v41  ;;  %v2765_v20 = vadd.f32 %v16265_v59, %v2691_v36  ;;  %v16352_v46 = vpop.f32.mrf.mxu0 }
 0x389   : > { %v2695_v47 = vpop.f32.mrf.mxu1 }
 0x38a   : > { %v12668_v57 = vpop.f32.mrf.mxu0  ;;  %3039 = vrot.lane.b32.xlu0 %v16349_v4, %s15433_s2  ;;  %v16357_v0 = vpack.c.bf16 %v2765_v20, %v2761_v23  ;;  %v2769_v38 = vadd.f32 %v16269_v42, %v2695_v47 }
 0x38b   : > { %v2697_v31 = vpop.f32.mrf.mxu1 }
 0x38c   : > { %v12669_v30 = vpop.f32.mrf.mxu0  ;;  %13155 = vmatmul.mubr.msk.bf16.gmra.mxu0 %vm3102_vm0, %v16255_v21 }
 0x38d   : > { %v12670_v13 = vadd.f32 %v12669_v30, %v12668_v57  ;;  %v2699_v59 = vpop.f32.mrf.mxu1  ;;  %13177 = vmatpush3.bf16.xpose.msra.mxu0 %v3478_v22  ;;  %13182 = vmatprep.mubr.msk.bf16.mxu0 %vm3102_vm0, %v16178_v48  ;;  %v2771_v48 = vadd.f32 %v16277_v45, %v2697_v31  ;;  %v12667_v31 = vadd.f32 %v16352_v46, %v16344_v29 }
 0x38e   : > { %v2773_v11 = vadd.f32 %v16285_v5, %v2699_v59  ;;  %v12671_v18 = vpop.f32.mrf.mxu0  ;;  %13344 = vmatprep.subr.msk.bf16.mxu0 %vm3102_vm0, %v16242_v16  ;;  %3055 = vrot.lane.b32.xlu0 %v16357_v0, %s15433_s2 }
 0x38f   : > { %v2701_v21 = vpop.f32.mrf.mxu1 }
 0x390   : > { %v16370_v35 = vpack.c.bf16 %v2773_v11, %v2769_v38  ;;  %v2775_v6 = vadd.f32 %v16293_v61, %v2701_v21  ;;  %v12672_v9 = vpop.f32.mrf.mxu0 }
 0x391   : > { %v2705_v50 = vpop.f32.mrf.mxu1 }
 0x392   : > { %v12674_v2 = vpop.f32.mrf.mxu0  ;;  %3041 = vrot.lane.b32.xlu1 %v16370_v35, %s15433_s2  ;;  %v2943_v5 = vpack.c.bf16 %v2775_v6, %v2771_v48  ;;  %v2779_v14 = vadd.f32 %v16295_v56, %v2705_v50 }
 0x393   : > { %v2707_v42 = vpop.f32.mrf.mxu1 }
 0x394   : > { %v12675_v40 = vpop.f32.mrf.mxu0  ;;  %v2781_v12 = vadd.f32 %v16300_v25, %v2707_v42 }
 0x395   : > { %v12676_v43 = vadd.f32 %v12675_v40, %v12674_v2  ;;  %v2709_v37 = vpop.f32.mrf.mxu1  ;;  %13179 = vmatpush3.bf16.xpose.msra.mxu0 %v3475_v39 }
 0x396   : > { %v2783_v61 = vadd.f32 %v16306_v52, %v2709_v37  ;;  %v12677_v3 = vpop.f32.mrf.mxu0  ;;  %3057 = vrot.lane.b32.xlu1 %v2943_v5, %s15433_s2  ;;  %13345 = vmatprep.subr.msk.bf16.mxu0 %vm3102_vm0, %v16325_v63  ;;  %v3472_v52 = vsel %vm3102_vm0, %v16325_v63, 0 }
 0x397   : > { %v2711_v45 = vpop.f32.mrf.mxu1 }
 0x398   : > { %v16384_v19 = vpack.c.bf16 %v2783_v61, %v2779_v14  ;;  %v2785_v16 = vadd.f32 %v16311_v58, %v2711_v45  ;;  %v12678_v27 = vpop.f32.mrf.mxu0 }
 0x399   : > { %v2715_v54 = vpop.f32.mrf.mxu1  ;;  %v12679_v46 = vadd.f32 %v12678_v27, %v12677_v3 }
 0x39a   : > { %v2952_v1 = vpack.c.bf16 %v2785_v16, %v2781_v12  ;;  %3043 = vrot.lane.b32.xlu1 %v16384_v19, %s15433_s2  ;;  %v2789_v25 = vadd.f32 %v16316_v15, %v2715_v54  ;;  %v12680_v17 = vpop.f32.mrf.mxu0  ;;  %v12673_v15 = vadd.f32 %v12672_v9, %v12671_v18 }
 0x39b   : > { %v2717_v56 = vpop.f32.mrf.mxu1 }
 0x39c   : > { %3059 = vrot.lane.b32.xlu0 %v2952_v1, %s15433_s2  ;;  %v2791_v41 = vadd.f32 %v16321_v26, %v2717_v56  ;;  %v12681_v20 = vpop.f32.mrf.mxu0 }
 0x39d   : > { %v2719_v24 = vpop.f32.mrf.mxu1  ;;  %13181 = vmatpush3.bf16.xpose.msra.mxu0 %v3472_v52 }
 0x39e   : > { %v2793_v7 = vadd.f32 %v16327_v33, %v2719_v24  ;;  %v12683_v33 = vpop.f32.mrf.mxu0 }
 0x39f   : > { %v2721_v58 = vpop.f32.mrf.mxu1 }
 0x3a0   : > { %v16395_v60 = vpack.c.bf16 %v2793_v7, %v2789_v25  ;;  %v2795_v36 = vadd.f32 %v16332_v8, %v2721_v58 }
 0x3a2   : > { %v2961_v47 = vpack.c.bf16 %v2795_v36, %v2791_v41  ;;  %v13104_v23 = vpop.f32.mrf.mxu1  ;;  %3045 = vrot.lane.b32.xlu0 %v16395_v60, %s15433_s2 }
 0x3a3   : > { %v2905_v63 = vadd.f32 %v13104_v23, %v12670_v13 }
 0x3a4   : > { %v2896_v57 = vpop.f32.mrf.mxu1  ;;  %3061 = vrot.lane.b32.xlu1 %v2961_v47, %s15433_s2  ;;  %13183 = vmatmul.mubr.msk.bf16.vlgmr.msra.gmra.mxu0 %vm3102_vm0, %v16182_v49  ;;  %v12684_v49 = vpop.f32.mrf.mxu0 }
 0x3a5   : > { %v2897_v26 = vadd.f32 %v16339_v10, %v2896_v57  ;;  %13238 = vmatprep.subr.bf16.mxu0 %v2961_v47  ;;  %13186 = vmatprep.mubr.msk.bf16.mxu0 %vm3102_vm0, %v16282_v32  ;;  %v12682_v32 = vadd.f32 %v12681_v20, %v12680_v17  ;;  %v12685_v18 = vadd.f32 %v12684_v49, %v12683_v33  ;;  %v3086_v49 = vadd.s32 16, %v15931_v44 }
 0x3a6   : > { %v13105_v8 = vpop.f32.mrf.mxu1  ;;  %13239 = vmatpush3.bf16.msra.mxu0 %v2961_v47 }
 0x3a7   : > { %v2908_v30 = vadd.f32 %v13105_v8, %v12673_v15  ;;  %13240 = vmatprep.subr.bf16.mxu0 %v2952_v1 }
 0x3a8   : > { %v2899_v22 = vpop.f32.mrf.mxu1 }
 0x3a9   : > { %v16408_v13 = vpack.c.bf16 %v2908_v30, %v2905_v63  ;;  %v2900_v59 = vadd.f32 %v12667_v31, %v2899_v22 }
 0x3aa   : > { %v13108_v38 = vpop.f32.mrf.mxu1  ;;  %13241 = vmatpush3.bf16.msra.mxu0 %v2952_v1 }
 0x3ab   : > { %v16410_v10 = vpack.c.bf16 %v2900_v59, %v2897_v26  ;;  %13242 = vmatprep.subr.bf16.mxu0 %v2943_v5  ;;  %v2921_v6 = vadd.f32 %v13108_v38, %v12682_v32  ;;  %v3093_v38 = vand.u32 127, %v778_v34 }
 0x3ac   : > { %v2912_v11 = vpop.f32.mrf.mxu1  ;;  %13187 = vmatmul.mubr.msk.bf16.gmra.mxu0 %vm3102_vm0, %v16189_v51 }
 0x3ad   : > { %v2913_v21 = vadd.f32 %v12676_v43, %v2912_v11  ;;  %vm16472_vm1 = vcmp.ge.s32.totalorder %v3086_v49, %v3093_v38  ;;  %vm16480_vm2 = vcmp.ge.s32.totalorder %v15931_v44, %v3093_v38 }
 0x3ae   : > { %v13109_v29 = vpop.f32.mrf.mxu1  ;;  %13243 = vmatpush3.bf16.msra.mxu0 %v2943_v5  ;;  %v3008_v40 = vpop.permute.xlu1 %3007 }
 0x3af   : > { %v2924_v9 = vadd.f32 %v13109_v29, %v12685_v18  ;;  %13244 = vmatprep.subr.bf16.mxu0 %v16357_v0  ;;  %v3211_v43 = vsel %vm3102_vm0, %v3008_v40, 0  ;;  %v3087_v18 = vadd.s32 24, %v15931_v44 }
 0x3b0   : > { %v2915_v50 = vpop.f32.mrf.mxu1 }
 0x3b1   : > { %v16415_v48 = vpack.c.bf16 %v2924_v9, %v2921_v6  ;;  %v2916_v2 = vadd.f32 %v12679_v46, %v2915_v50  ;;  %vm16497_vm3 = vcmp.ge.s32.totalorder %v3087_v18, %v3093_v38  ;;  %v3090_v50 = vadd.s32 48, %v15931_v44 }
 0x3b2   : > { %13245 = vmatpush3.bf16.msra.mxu0 %v16357_v0  ;;  %v3006_v37 = vpop.permute.xlu1 %3005 }
 0x3b3   : > { %19218 = vst [vmem:[#allocation35_spill] sm:$0xff] %v16415_v48  ;;  %v16418_v42 = vpack.c.bf16 %v2916_v2, %v2913_v21  ;;  %13270 = vmatprep.subr.bf16.mxu0 %v16415_v48  ;;  %v3208_v0 = vsel %vm3102_vm0, %v3006_v37, 0  ;;  %vm16517_vm5 = vcmp.ge.s32.totalorder %v3090_v50, %v3093_v38 }
 0x3b5   : > { %19219 = vst [vmem:[#allocation36_spill] sm:$0xff] %v16418_v42 }
 0x3b6   : > { %v3010_v51 = vpop.permute.xlu0 %3009 }
 0x3b7   : > { %13330 = vmatprep.subr.msk.bf16.mxu1 %vm3102_vm0, %v3010_v51  ;;  %v3214_v5 = vsel %vm3102_vm0, %v3010_v51, 0  ;;  %v3004_v14 = vpop.permute.xlu1 %3003 }
 0x3b8   : > { %13127 = vmatpush3.bf16.xpose.msra.mxu1 %v3214_v5  ;;  %v3205_v61 = vsel %vm3102_vm0, %v3004_v14, 0 }
 0x3b9   : > { %13331 = vmatprep.subr.msk.bf16.mxu1 %vm3102_vm0, %v3008_v40  ;;  %v3091_v40 = vadd.s32 56, %v15931_v44 }
 0x3ba   : > { %v2968_v39 = vpop.permute.xlu0 %2967 }
 0x3bb   : > { %13134 = vmatprep.mubr.msk.bf16.mxu1 %vm3102_vm0, %v2968_v39  ;;  %vm16527_vm6 = vcmp.ge.s32.totalorder %v3091_v40, %v3093_v38 }
 0x3be   : > { %v2970_v3 = vpop.permute.xlu0 %2969 }
 0x3c0   : > { %13129 = vmatpush3.bf16.xpose.msra.mxu1 %v3211_v43 }
 0x3c1   : > { %13332 = vmatprep.subr.msk.bf16.mxu1 %vm3102_vm0, %v3006_v37 }
 0x3c5   : > { %v3018_v12 = vpop.permute.xlu0 %3017 }
 0x3c6   : > { %v3386_v25 = vsel %vm3102_vm0, %v3018_v12, 0 }
 0x3c8   : > { %13131 = vmatpush3.bf16.xpose.msra.mxu1 %v3208_v0 }
 0x3c9   : > { %13333 = vmatprep.subr.msk.bf16.mxu1 %vm3102_vm0, %v3004_v14  ;;  %v3016_v1 = vpop.permute.xlu0 %3015 }
 0x3ca   : > { %v3383_v58 = vsel %vm3102_vm0, %v3016_v1, 0 }
 0x3cd   : > { %v2980_v24 = vpop.permute.xlu0 %2979 }
 0x3d0   : > { %13133 = vmatpush3.bf16.xpose.msra.mxu1 %v3205_v61  ;;  %v3088_v61 = vadd.s32 32, %v15931_v44 }
 0x3d1   : > { %v2982_v7 = vpop.permute.xlu0 %2981 }
 0x3d2   : > { %vm16535_vm7 = vcmp.ge.s32.totalorder %v3088_v61, %v3093_v38 }
 0x3d5   : > { %v3022_v45 = vpop.permute.xlu1 %3021  ;;  %v3030_v36 = vpop.permute.xlu0 %3029 }
 0x3d6   : > { %13338 = vmatprep.subr.msk.bf16.mxu1 %vm3102_vm0, %v3022_v45  ;;  %v3392_v16 = vsel %vm3102_vm0, %v3022_v45, 0  ;;  %v3564_v15 = vsel %vm3102_vm0, %v3030_v36, 0 }
 0x3d7   : > { %13135 = vmatmul.mubr.msk.bf16.vlgmr.msra.gmra.mxu1 %vm3102_vm0, %v2970_v3  ;;  %v3089_v3 = vadd.s32 40, %v15931_v44 }
 0x3d8   : > { %13159 = vmatpush3.bf16.xpose.msra.mxu1 %v3392_v16 }
 0x3d9   : > { %v3020_v54 = vpop.permute.xlu1 %3019  ;;  %v2986_v23 = vpop.permute.xlu0 %2985  ;;  %vm16539_vm8 = vcmp.ge.s32.totalorder %v3089_v3, %v3093_v38 }
 0x3da   : > { %13339 = vmatprep.subr.msk.bf16.mxu1 %vm3102_vm0, %v3020_v54  ;;  %v3389_v56 = vsel %vm3102_vm0, %v3020_v54, 0 }
 0x3dd   : > { %v2972_v27 = vpop.permute.xlu1 %2971  ;;  %v2992_v63 = vpop.permute.xlu0 %2991 }
 0x3de   : > { %13138 = vmatprep.mubr.msk.bf16.mxu1 %vm3102_vm0, %v2972_v27 }
 0x3e0   : > { %13161 = vmatpush3.bf16.xpose.msra.mxu1 %v3389_v56 }
 0x3e1   : > { %13340 = vmatprep.subr.msk.bf16.mxu1 %vm3102_vm0, %v3018_v12  ;;  %v2974_v52 = vpop.permute.xlu1 %2973  ;;  %v2996_v8 = vpop.permute.xlu0 %2995 }
 0x3e2   : > { %13139 = vmatmul.mubr.msk.bf16.gmra.mxu1 %vm3102_vm0, %v2974_v52 }
 0x3e3   : > { %13166 = vmatprep.mubr.msk.bf16.mxu1 %vm3102_vm0, %v2980_v24 }
 0x3e5   : > { %v3034_v17 = vpop.permute.xlu1 %3033 }
 0x3e6   : > { %v3570_v47 = vsel %vm3102_vm0, %v3034_v17, 0 }
 0x3e8   : > { %13163 = vmatpush3.bf16.xpose.msra.mxu1 %v3386_v25 }
 0x3e9   : > { %13341 = vmatprep.subr.msk.bf16.mxu1 %vm3102_vm0, %v3016_v1  ;;  %v3032_v41 = vpop.permute.xlu1 %3031 }
 0x3ea   : > { %v3567_v57 = vsel %vm3102_vm0, %v3032_v41, 0 }
 0x3ed   : > { %v2984_v20 = vpop.permute.xlu1 %2983 }
 0x3f0   : > { %13165 = vmatpush3.bf16.xpose.msra.mxu1 %v3383_v58 }
 0x3f1   : > { %13346 = vmatprep.subr.msk.bf16.mxu1 %vm3102_vm0, %v3034_v17  ;;  %v3028_v26 = vpop.permute.xlu1 %3027 }
 0x3f2   : > { %v3561_v33 = vsel %vm3102_vm0, %v3028_v26, 0 }
 0x3f5   : > { %v2994_v31 = vpop.permute.xlu1 %2993 }
 0x3f7   : > { %13167 = vmatmul.mubr.msk.bf16.vlgmr.msra.gmra.mxu1 %vm3102_vm0, %v2982_v7 }
 0x3f8   : > { %13170 = vmatprep.mubr.msk.bf16.mxu1 %vm3102_vm0, %v2984_v20  ;;  %13191 = vmatpush3.bf16.xpose.msra.mxu1 %v3570_v47 }
 0x3f9   : > { %13347 = vmatprep.subr.msk.bf16.mxu1 %vm3102_vm0, %v3032_v41  ;;  %v2998_v59 = vpop.permute.xlu1 %2997 }
 0x3fc   : > { %v16455_v30 = vpop.permute.xlu0 %3039 }
 0x3ff   : > { %13171 = vmatmul.mubr.msk.bf16.gmra.mxu1 %vm3102_vm0, %v2986_v23 }
 0x400   : > { %13193 = vmatpush3.bf16.xpose.msra.mxu1 %v3567_v57  ;;  %13198 = vmatprep.mubr.msk.bf16.mxu1 %vm3102_vm0, %v2992_v63  ;;  %v16461_v22 = vpop.permute.xlu0 %3055 }
 0x401   : > { %13348 = vmatprep.subr.msk.bf16.mxu1 %vm3102_vm0, %v3030_v36  ;;  %19220 = vst [vmem:[#allocation37_spill] sm:$0xff] %v16461_v22 }
 0x408   : > { %13195 = vmatpush3.bf16.xpose.msra.mxu1 %v3564_v15 }
 0x409   : > { %13349 = vmatprep.subr.msk.bf16.mxu1 %vm3102_vm0, %v3028_v26 }
 0x40e   : > { %v16468_v11 = vpop.permute.xlu0 %3059 }
 0x40f   : > { %19221 = vst [vmem:[#allocation38_spill] sm:$0xff] %v16468_v11 }
 0x410   : > { %13197 = vmatpush3.bf16.xpose.msra.mxu1 %v3561_v33 }
 0x411   : > { %13206 = vmatprep.subr.bf16.mxu1 %v16395_v60 }
 0x417   : > { %13199 = vmatmul.mubr.msk.bf16.vlgmr.msra.gmra.mxu1 %vm3102_vm0, %v2994_v31 }
 0x418   : > { %13202 = vmatprep.mubr.msk.bf16.mxu1 %vm3102_vm0, %v2996_v8  ;;  %13207 = vmatpush3.bf16.msra.mxu1 %v16395_v60 }
 0x419   : > { %13208 = vmatprep.subr.bf16.mxu1 %v16384_v19 }
 0x41c   : > { %13209 = vmatpush3.bf16.msra.mxu1 %v16384_v19  ;;  %v16476_v19 = vpop.permute.xlu0 %3045 }
 0x41d   : > { %13210 = vmatprep.subr.bf16.mxu1 %v16370_v35 }
 0x41f   : > { %13203 = vmatmul.mubr.msk.bf16.gmra.mxu1 %vm3102_vm0, %v2998_v59 }
 0x420   : > { %13211 = vmatpush3.bf16.msra.mxu1 %v16370_v35  ;;  %v3085_v35 = vadd.s32 8, %v15931_v44 }
 0x421   : > { %13212 = vmatprep.subr.bf16.mxu1 %v16349_v4 }
 0x422   : > { %vm16502_vm4 = vcmp.ge.s32.totalorder %v3085_v35, %v3093_v38 }
 0x424   : > { %v13120_v32 = vpop.f32.mrf.mxu0  ;;  %13213 = vmatpush3.bf16.msra.mxu1 %v16349_v4 }
 0x425   : > { %v16488_v21 = vsel %vm16472_vm1, %v13120_v32, -1e+30  ;;  %13222 = vmatprep.subr.bf16.mxu1 %v16476_v19 }
 0x426   : > { %v3161_v29 = vpop.f32.mrf.mxu0  ;;  %v3707_v46 = vsel %vm3102_vm0, %v16488_v21, -inf }
 0x427   : > { %v16495_v4 = vsel %vm16480_vm2, %v3161_v29, -1e+30  ;;  %3708 = vmax.xlane.f32.xlu0 %v3707_v46 }
 0x428   : > { %v13121_v9 = vpop.f32.mrf.mxu0  ;;  %v3701_v5 = vsel %vm3102_vm0, %v16495_v4, -inf }
 0x429   : > { %v16511_v39 = vsel %vm16497_vm3, %v13121_v9, -1e+30 }
 0x42a   : > { %v3164_v51 = vpop.f32.mrf.mxu0  ;;  %v3710_v12 = vsel %vm3102_vm0, %v16511_v39, -inf }
 0x42b   : > { %3702 = vmax.xlane.f32.xlu0 %v3701_v5  ;;  %v16515_v43 = vsel %vm16502_vm4, %v3164_v51, -1e+30 }
 0x42c   : > { %v13124_v0 = vpop.f32.mrf.mxu0  ;;  %v3704_v14 = vsel %vm3102_vm0, %v16515_v43, -inf }
 0x42d   : > { %3705 = vmax.xlane.f32.xlu1 %v3704_v14  ;;  %v16533_v54 = vsel %vm16517_vm5, %v13124_v0, -1e+30 }
 0x42e   : > { %v3177_v45 = vpop.f32.mrf.mxu0  ;;  %v3719_v17 = vsel %vm3102_vm0, %v16533_v54, -inf }
 0x42f   : > { %3711 = vmax.xlane.f32.xlu0 %v3710_v12  ;;  %v16553_v7 = vsel %vm16535_vm7, %v3177_v45, -1e+30 }
 0x430   : > { %v13125_v27 = vpop.f32.mrf.mxu0  ;;  %v3713_v36 = vsel %vm3102_vm0, %v16553_v7, -inf }
 0x431   : > { %v16545_v52 = vsel %vm16527_vm6, %v13125_v27, -1e+30 }
 0x432   : > { %v3180_v24 = vpop.f32.mrf.mxu0  ;;  %v3722_v25 = vsel %vm3102_vm0, %v16545_v52, -inf }
 0x433   : > { %3723 = vmax.xlane.f32.xlu1 %v3722_v25  ;;  %3720 = vmax.xlane.f32.xlu0 %v3719_v17  ;;  %v16557_v58 = vsel %vm16539_vm8, %v3180_v24, -1e+30 }
 0x434   : > { %v3716_v41 = vsel %vm3102_vm0, %v16557_v58, -inf }
 0x437   : > { %3717 = vmax.xlane.f32.xlu1 %v3716_v41  ;;  %3714 = vmax.xlane.f32.xlu0 %v3713_v36 }
 0x444   : > { %v13152_v20 = vpop.f32.mrf.mxu0 }
 0x445   : > { %v16565_v47 = vsel %vm16472_vm1, %v13152_v20, -1e+30 }
 0x446   : > { %v3339_v23 = vpop.f32.mrf.mxu0  ;;  %v3755_v63 = vsel %vm3102_vm0, %v16565_v47, -inf }
 0x447   : > { %v16571_v57 = vsel %vm16480_vm2, %v3339_v23, -1e+30  ;;  %3756 = vmax.xlane.f32.xlu0 %v3755_v63 }
 0x448   : > { %v13153_v15 = vpop.f32.mrf.mxu0  ;;  %v3749_v31 = vsel %vm3102_vm0, %v16571_v57, -inf }
 0x449   : > { %v16575_v26 = vsel %vm16497_vm3, %v13153_v15, -1e+30 }
 0x44a   : > { %v3342_v33 = vpop.f32.mrf.mxu0  ;;  %v3758_v8 = vsel %vm3102_vm0, %v16575_v26, -inf }
 0x44b   : > { %3759 = vmax.xlane.f32.xlu1 %v3758_v8  ;;  %3750 = vmax.xlane.f32.xlu0 %v3749_v31  ;;  %v16583_v59 = vsel %vm16502_vm4, %v3342_v33, -1e+30 }
 0x44c   : > { %v13156_v49 = vpop.f32.mrf.mxu0  ;;  %v3752_v18 = vsel %vm3102_vm0, %v16583_v59, -inf }
 0x44d   : > { %v16587_v38 = vsel %vm16517_vm5, %v13156_v49, -1e+30 }
 0x44e   : > { %19238 = vst [vmem:[#allocation39_spill] sm:$0xff] %v16587_v38  ;;  %v3355_v32 = vpop.f32.mrf.mxu0  ;;  %v3767_v35 = vsel %vm3102_vm0, %v16587_v38, -inf }
 0x44f   : > { %v16595_v29 = vsel %vm16535_vm7, %v3355_v32, -1e+30  ;;  %3753 = vmax.xlane.f32.xlu1 %v3752_v18  ;;  %3768 = vmax.xlane.f32.xlu0 %v3767_v35 }
 0x450   : > { %19239 = vst [vmem:[#allocation40_spill] sm:$0xff] %v16595_v29  ;;  %v13157_v46 = vpop.f32.mrf.mxu0  ;;  %v3761_v51 = vsel %vm3102_vm0, %v16595_v29, -inf }
 0x451   : > { %v16599_v9 = vsel %vm16527_vm6, %v13157_v46, -1e+30 }
 0x452   : > { %19240 = vst [vmem:[#allocation41_spill] sm:$0xff] %v16599_v9  ;;  %v3358_v50 = vpop.f32.mrf.mxu0  ;;  %v3770_v5 = vsel %vm3102_vm0, %v16599_v9, -inf }
 0x453   : > { %3762 = vmax.xlane.f32.xlu0 %v3761_v51  ;;  %3771 = vmax.xlane.f32.xlu1 %v3770_v5  ;;  %v16607_v40 = vsel %vm16539_vm8, %v3358_v50, -1e+30 }
 0x454   : > { %v3764_v0 = vsel %vm3102_vm0, %v16607_v40, -inf }
 0x457   : > { %3765 = vmax.xlane.f32.xlu1 %v3764_v0 }
 0x464   : > { %v13184_v14 = vpop.f32.mrf.mxu0 }
 0x465   : > { %v16613_v61 = vsel %vm16472_vm1, %v13184_v14, -1e+30 }
 0x466   : > { %19241 = vst [vmem:[#allocation42_spill] sm:$0xff] %v16613_v61  ;;  %v3517_v3 = vpop.f32.mrf.mxu0  ;;  %v3803_v45 = vsel %vm3102_vm0, %v16613_v61, -inf }
 0x467   : > { %v16619_v12 = vsel %vm16480_vm2, %v3517_v3, -1e+30  ;;  %3804 = vmax.xlane.f32.xlu0 %v3803_v45 }
 0x468   : > { %19242 = vst [vmem:[#allocation43_spill] sm:$0xff] %v16619_v12  ;;  %v13185_v27 = vpop.f32.mrf.mxu0  ;;  %v3797_v17 = vsel %vm3102_vm0, %v16619_v12, -inf }
 0x469   : > { %v16623_v24 = vsel %vm16497_vm3, %v13185_v27, -1e+30 }
 0x46a   : > { %19243 = vst [vmem:[#allocation44_spill] sm:$0xff] %v16623_v24  ;;  %v3520_v25 = vpop.f32.mrf.mxu0  ;;  %v3806_v41 = vsel %vm3102_vm0, %v16623_v24, -inf }
 0x46b   : > { %3798 = vmax.xlane.f32.xlu0 %v3797_v17  ;;  %3807 = vmax.xlane.f32.xlu1 %v3806_v41  ;;  %v16631_v36 = vsel %vm16502_vm4, %v3520_v25, -1e+30 }
 0x46c   : > { %19244 = vst [vmem:[#allocation45_spill] sm:$0xff] %v16631_v36  ;;  %v13188_v20 = vpop.f32.mrf.mxu0  ;;  %v3800_v15 = vsel %vm3102_vm0, %v16631_v36, -inf }
 0x46d   : > { %v16635_v23 = vsel %vm16517_vm5, %v13188_v20, -1e+30 }
 0x46e   : > { %19245 = vst [vmem:[#allocation46_spill] sm:$0xff] %v16635_v23  ;;  %v3533_v63 = vpop.f32.mrf.mxu0  ;;  %v3815_v33 = vsel %vm3102_vm0, %v16635_v23, -inf }
 0x46f   : > { %v16643_v8 = vsel %vm16535_vm7, %v3533_v63, -1e+30  ;;  %3801 = vmax.xlane.f32.xlu1 %v3800_v15  ;;  %3816 = vmax.xlane.f32.xlu0 %v3815_v33  ;;  %v16683_v15 = vpop.permute.xlu1 %3041 }
 0x470   : > { %19246 = vst [vmem:[#allocation47_spill] sm:$0xff] %v16643_v8  ;;  %v13189_v31 = vpop.f32.mrf.mxu0  ;;  %v3809_v49 = vsel %vm3102_vm0, %v16643_v8, -inf }
 0x471   : > { %v16649_v32 = vsel %vm16527_vm6, %v13189_v31, -1e+30 }
 0x472   : > { %19247 = vst [vmem:[#allocation48_spill] sm:$0xff] %v16649_v32  ;;  %v3536_v18 = vpop.f32.mrf.mxu0  ;;  %v3818_v35 = vsel %vm3102_vm0, %v16649_v32, -inf }
 0x473   : > { %3810 = vmax.xlane.f32.xlu1 %v3809_v49  ;;  %v16655_v46 = vsel %vm16539_vm8, %v3536_v18, -1e+30 }
 0x474   : > { %19248 = vst [vmem:[#allocation49_spill] sm:$0xff] %v16655_v46  ;;  %v3812_v50 = vsel %vm3102_vm0, %v16655_v46, -inf }
 0x477   : > { %3819 = vmax.xlane.f32.xlu1 %v3818_v35 }
 0x47b   : > { %3813 = vmax.xlane.f32.xlu1 %v3812_v50 }
 0x497   : > { %v13136_v51 = vpop.f32.mrf.mxu1 }
 0x498   : > { %v16661_v5 = vsel %vm16472_vm1, %v13136_v51, -1e+30 }
 0x499   : > { %v3250_v0 = vpop.f32.mrf.mxu1  ;;  %v3731_v14 = vsel %vm3102_vm0, %v16661_v5, -inf }
 0x49a   : > { %v16667_v3 = vsel %vm16480_vm2, %v3250_v0, -1e+30  ;;  %3732 = vmax.xlane.f32.xlu0 %v3731_v14  ;;  %v16699_v0 = vpop.permute.xlu1 %3057 }
 0x49b   : > { %v13137_v45 = vpop.f32.mrf.mxu1  ;;  %v3725_v17 = vsel %vm3102_vm0, %v16667_v3, -inf  ;;  %19249 = vst [vmem:[#allocation50_spill] sm:$0xff] %v16699_v0 }
 0x49c   : > { %v16671_v27 = vsel %vm16497_vm3, %v13137_v45, -1e+30 }
 0x49d   : > { %v3253_v25 = vpop.f32.mrf.mxu1  ;;  %v3734_v41 = vsel %vm3102_vm0, %v16671_v27, -inf }
 0x49e   : > { %3726 = vmax.xlane.f32.xlu0 %v3725_v17  ;;  %3735 = vmax.xlane.f32.xlu1 %v3734_v41  ;;  %v16679_v20 = vsel %vm16502_vm4, %v3253_v25, -1e+30 }
 0x49f   : > { %v3728_v63 = vsel %vm3102_vm0, %v16679_v20, -inf }
 0x4a2   : > { %v13140_v33 = vpop.f32.mrf.mxu1  ;;  %3729 = vmax.xlane.f32.xlu1 %v3728_v63  ;;  %v16711_v63 = vpop.permute.xlu1 %3043 }
 0x4a3   : > { %v16687_v31 = vsel %vm16517_vm5, %v13140_v33, -1e+30 }
 0x4a4   : > { %v3266_v49 = vpop.f32.mrf.mxu1  ;;  %v3743_v18 = vsel %vm3102_vm0, %v16687_v31, -inf }
 0x4a5   : > { %v16693_v35 = vsel %vm16535_vm7, %v3266_v49, -1e+30  ;;  %3744 = vmax.xlane.f32.xlu0 %v3743_v18 }
 0x4a6   : > { %v13141_v50 = vpop.f32.mrf.mxu1  ;;  %v3737_v45 = vsel %vm3102_vm0, %v16693_v35, -inf  ;;  %v16714_v18 = vpop.permute.xlu1 %3061 }
 0x4a7   : > { %v16697_v51 = vsel %vm16527_vm6, %v13141_v50, -1e+30 }
 0x4a8   : > { %v3269_v14 = vpop.f32.mrf.mxu1  ;;  %v3746_v25 = vsel %vm3102_vm0, %v16697_v51, -inf }
 0x4a9   : > { %3738 = vmax.xlane.f32.xlu0 %v3737_v45  ;;  %3747 = vmax.xlane.f32.xlu1 %v3746_v25  ;;  %v16707_v17 = vsel %vm16539_vm8, %v3269_v14, -1e+30 }
 0x4aa   : > { %v3740_v41 = vsel %vm3102_vm0, %v16707_v17, -inf }
 0x4ad   : > { %3741 = vmax.xlane.f32.xlu1 %v3740_v41 }
 0x4b0   : > { %v3709_v33 = vpop.xlane.xlu0 %3708 }
 0x4b1   : > { %v3847_v49 = vsub.f32 %v16488_v21, %v3709_v33 }
 0x4b3   : > { %v3897_v28 = vmul.f32 1.442695, %v3847_v49 }
 0x4b4   : > { %v3703_v50 = vpop.xlane.xlu0 %3702 }
 0x4b5   : > { %v3845_v45 = vsub.f32 %v16495_v4, %v3703_v50  ;;  %14763 = vpow2.f32 %v3897_v28 }
 0x4b6   : > { %v3706_v25 = vpop.xlane.xlu1 %3705 }
 0x4b7   : > { %v13168_v44 = vpop.f32.mrf.mxu1  ;;  %v3893_v55 = vmul.f32 1.442695, %v3845_v45  ;;  %v3846_v14 = vsub.f32 %v16515_v43, %v3706_v25 }
 0x4b8   : > { %v16720_v62 = vsel %vm16472_vm1, %v13168_v44, -1e+30  ;;  %v3712_v41 = vpop.xlane.xlu0 %3711 }
 0x4b9   : > { %v3848_v53 = vsub.f32 %v16511_v39, %v3712_v41  ;;  %v3428_v21 = vpop.f32.mrf.mxu1  ;;  %v3779_v33 = vsel %vm3102_vm0, %v16720_v62, -inf  ;;  %14765 = vpow2.f32 %v3893_v55  ;;  %v3895_v43 = vmul.f32 1.442695, %v3846_v14 }
 0x4ba   : > { %v16727_v4 = vsel %vm16480_vm2, %v3428_v21, -1e+30  ;;  %3780 = vmax.xlane.f32.xlu0 %v3779_v33 }
 0x4bb   : > { %v3899_v49 = vmul.f32 1.442695, %v3848_v53  ;;  %v13169_v50 = vpop.f32.mrf.mxu1  ;;  %v3773_v39 = vsel %vm3102_vm0, %v16727_v4, -inf }
 0x4bc   : > { %v16731_v44 = vsel %vm16497_vm3, %v13169_v50, -1e+30  ;;  %v3724_v28 = vpop.xlane.xlu1 %3723  ;;  %v3721_v45 = vpop.xlane.xlu0 %3720 }
 0x4bd   : > { %14767 = vpow2.f32 %v3899_v49  ;;  %v3852_v25 = vsub.f32 %v16545_v52, %v3724_v28  ;;  %v3851_v41 = vsub.f32 %v16533_v54, %v3721_v45  ;;  %v3431_v21 = vpop.f32.mrf.mxu1  ;;  %v3782_v53 = vsel %vm3102_vm0, %v16731_v44, -inf }
 0x4be   : > { %3774 = vmax.xlane.f32.xlu0 %v3773_v39  ;;  %3783 = vmax.xlane.f32.xlu1 %v3782_v53  ;;  %v16741_v55 = vsel %vm16502_vm4, %v3431_v21, -1e+30  ;;  %14769 = vpow2.f32 %v3895_v43 }
 0x4bf   : > { %v3905_v14 = vmul.f32 1.442695, %v3851_v41  ;;  %v13172_v33 = vpop.f32.mrf.mxu1  ;;  %v3907_v50 = vmul.f32 1.442695, %v3852_v25  ;;  %v3776_v41 = vsel %vm3102_vm0, %v16741_v55, -inf }
 0x4c0   : > { %v16745_v49 = vsel %vm16517_vm5, %v13172_v33, -1e+30  ;;  %v3718_v52 = vpop.xlane.xlu1 %3717  ;;  %v3715_v54 = vpop.xlane.xlu0 %3714 }
 0x4c1   : > { %v3850_v28 = vsub.f32 %v16557_v58, %v3718_v52  ;;  %v3849_v45 = vsub.f32 %v16553_v7, %v3715_v54  ;;  %v3444_v39 = vpop.f32.mrf.mxu1  ;;  %v3791_v53 = vsel %vm3102_vm0, %v16745_v49, -inf  ;;  %14771 = vpow2.f32 %v3905_v14 }
 0x4c2   : > { %v16755_v43 = vsel %vm16535_vm7, %v3444_v39, -1e+30  ;;  %3792 = vmax.xlane.f32.xlu0 %v3791_v53  ;;  %3777 = vmax.xlane.f32.xlu1 %v3776_v41  ;;  %14773 = vpow2.f32 %v3907_v50  ;;  %v16765_v54 = vpop.eup %14763 }
 0x4c3   : > { %v3901_v25 = vmul.f32 1.442695, %v3849_v45  ;;  %v13173_v21 = vpop.f32.mrf.mxu1  ;;  %v3903_v7 = vmul.f32 1.442695, %v3850_v28  ;;  %v3785_v52 = vsel %vm3102_vm0, %v16755_v43, -inf  ;;  %v3995_v50 = vsel %vm3102_vm0, %v16765_v54, 0.0 }
 0x4c4   : > { %v16759_v58 = vsel %vm16527_vm6, %v13173_v21, -1e+30 }
 0x4c5   : > { %v3447_v33 = vpop.f32.mrf.mxu1  ;;  %v3794_v14 = vsel %vm3102_vm0, %v16759_v58, -inf  ;;  %14775 = vpow2.f32 %v3901_v25 }
 0x4c6   : > { %3786 = vmax.xlane.f32.xlu0 %v3785_v52  ;;  %3795 = vmax.xlane.f32.xlu1 %v3794_v14  ;;  %v16769_v45 = vsel %vm16539_vm8, %v3447_v33, -1e+30  ;;  %v16771_v39 = vpop.eup %14765  ;;  %14777 = vpow2.f32 %v3903_v7 }
 0x4c7   : > { %v3788_v28 = vsel %vm3102_vm0, %v16769_v45, -inf  ;;  %v3989_v25 = vsel %vm3102_vm0, %v16771_v39, 0.0 }
 0x4ca   : > { %v16777_v53 = vpop.eup %14767  ;;  %3996 = vadd.xlane.f32.xlu0 %v3995_v50  ;;  %3789 = vmax.xlane.f32.xlu1 %v3788_v28 }
 0x4cb   : > { %v16779_v41 = vpop.eup %14769  ;;  %v3998_v21 = vsel %vm3102_vm0, %v16777_v53, 0.0 }
 0x4cc   : > { %v3992_v52 = vsel %vm3102_vm0, %v16779_v41, 0.0 }
 0x4ce   : > { %3990 = vadd.xlane.f32.xlu0 %v3989_v25  ;;  %3999 = vadd.xlane.f32.xlu1 %v3998_v21  ;;  %v16785_v7 = vpop.eup %14771 }
 0x4cf   : > { %v4007_v33 = vsel %vm3102_vm0, %v16785_v7, 0.0  ;;  %v16791_v14 = vpop.eup %14773 }
 0x4d0   : > { %v4010_v25 = vsel %vm3102_vm0, %v16791_v14, 0.0 }
 0x4d2   : > { %4008 = vadd.xlane.f32.xlu0 %v4007_v33  ;;  %3993 = vadd.xlane.f32.xlu1 %v3992_v52  ;;  %v16793_v50 = vpop.eup %14775 }
 0x4d3   : > { %v4001_v28 = vsel %vm3102_vm0, %v16793_v50, 0.0  ;;  %v16799_v21 = vpop.eup %14777 }
 0x4d4   : > { %v4004_v52 = vsel %vm3102_vm0, %v16799_v21, 0.0  ;;  %v16851_v16 = vpop.xlane.xlu1 %3759 }
 0x4d6   : > { %4002 = vadd.xlane.f32.xlu0 %v4001_v28  ;;  %4011 = vadd.xlane.f32.xlu1 %v4010_v25 }
 0x4d7   : > { %v13200_v22 = vpop.f32.mrf.mxu1 }
 0x4d8   : > { %v16803_v0 = vsel %vm16472_vm1, %v13200_v22, -1e+30 }
 0x4d9   : > { %v3606_v11 = vpop.f32.mrf.mxu1  ;;  %v3827_v33 = vsel %vm3102_vm0, %v16803_v0, -inf }
 0x4da   : > { %v16811_v23 = vsel %vm16480_vm2, %v3606_v11, -1e+30  ;;  %3828 = vmax.xlane.f32.xlu0 %v3827_v33  ;;  %4005 = vadd.xlane.f32.xlu1 %v4004_v52 }
 0x4db   : > { %v13201_v28 = vpop.f32.mrf.mxu1  ;;  %v3821_v8 = vsel %vm3102_vm0, %v16811_v23, -inf }
 0x4dc   : > { %v16815_v25 = vsel %vm16497_vm3, %v13201_v28, -1e+30 }
 0x4dd   : > { %v3830_v22 = vsel %vm3102_vm0, %v16815_v25, -inf  ;;  %v3609_v60 = vpop.f32.mrf.mxu1 }
 0x4de   : > { %v16823_v32 = vsel %vm16502_vm4, %v3609_v60, -1e+30  ;;  %3822 = vmax.xlane.f32.xlu0 %v3821_v8  ;;  %3831 = vmax.xlane.f32.xlu1 %v3830_v22 }
 0x4df   : > { %v13204_v11 = vpop.f32.mrf.mxu1  ;;  %v3824_v52 = vsel %vm3102_vm0, %v16823_v32, -inf }
 0x4e0   : > { %v16827_v34 = vsel %vm16517_vm5, %v13204_v11, -1e+30 }
 0x4e1   : > { %v3839_v6 = vsel %vm3102_vm0, %v16827_v34, -inf  ;;  %v3622_v33 = vpop.f32.mrf.mxu1 }
 0x4e2   : > { %v16835_v28 = vsel %vm16535_vm7, %v3622_v33, -1e+30  ;;  %3840 = vmax.xlane.f32.xlu0 %v3839_v6  ;;  %3825 = vmax.xlane.f32.xlu1 %v3824_v52  ;;  %v16853_v6 = vpop.xlane.xlu1 %3753  ;;  %v16859_v33 = vpop.xlane.xlu0 %3756 }
 0x4e3   : > { %v13205_v2 = vpop.f32.mrf.mxu1  ;;  %v3833_v37 = vsel %vm3102_vm0, %v16835_v28, -inf }
 0x4e4   : > { %v16839_v8 = vsel %vm16527_vm6, %v13205_v2, -1e+30 }
 0x4e5   : > { %v3842_v22 = vsel %vm3102_vm0, %v16839_v8, -inf  ;;  %v3625_v60 = vpop.f32.mrf.mxu1 }
 0x4e6   : > { %v16847_v11 = vsel %vm16539_vm8, %v3625_v60, -1e+30  ;;  %3834 = vmax.xlane.f32.xlu0 %v3833_v37  ;;  %3843 = vmax.xlane.f32.xlu1 %v3842_v22  ;;  %v16861_v56 = vpop.xlane.xlu1 %3771  ;;  %v16863_v52 = vpop.xlane.xlu0 %3750 }
 0x4e7   : > { %v3836_v1 = vsel %vm3102_vm0, %v16847_v11, -inf }
 0x4ea   : > { %3837 = vmax.xlane.f32.xlu1 %v3836_v1  ;;  %v16865_v2 = vpop.xlane.xlu1 %3765  ;;  %v16867_v37 = vpop.xlane.xlu0 %3768 }
 0x4eb   : > { %19250 = vst [vmem:[#allocation51_spill] sm:$0xff] %v16867_v37 }
 0x4ee   : > { %v16871_v60 = vpop.xlane.xlu0 %3762 }
 0x4ef   : > { %19252 = vst [vmem:[#allocation53_spill] sm:$0xff] %v16871_v60 }
 0x4f4   : > { %v16869_v22 = vpop.xlane.xlu1 %3807 }
 0x4f5   : > { %19251 = vst [vmem:[#allocation52_spill] sm:$0xff] %v16869_v22 }
 0x4f8   : > { %v16873_v1 = vpop.xlane.xlu1 %3801 }
 0x4f9   : > { %19253 = vst [vmem:[#allocation54_spill] sm:$0xff] %v16873_v1 }
 0x4fb   : > { %3075 = vrot.lane.b32.xlu1 %v16418_v42, %s15433_s2  ;;  %v16875_v42 = vpop.xlane.xlu0 %3804 }
 0x4fc   : > { %3077 = vrot.lane.b32.xlu0 %v16415_v48, %s15433_s2  ;;  %19254 = vst [vmem:[#allocation55_spill] sm:$0xff] %v16875_v42  ;;  %v16877_v61 = vpop.xlane.xlu1 %3810 }
 0x4fd   : > { %19255 = vst [vmem:[#allocation56_spill] sm:$0xff] %v16877_v61 }
 0x4ff   : > { %v16879_v48 = vpop.xlane.xlu0 %3798 }
 0x500   : > { %19256 = vst [vmem:[#allocation57_spill] sm:$0xff] %v16879_v48  ;;  %v16881_v46 = vpop.xlane.xlu1 %3819 }
 0x501   : > { %19257 = vst [vmem:[#allocation58_spill] sm:$0xff] %v16881_v46 }
 0x503   : > { %v16883_v12 = vpop.xlane.xlu0 %3816 }
 0x504   : > { %19258 = vst [vmem:[#allocation59_spill] sm:$0xff] %v16883_v12  ;;  %v16885_v24 = vpop.xlane.xlu1 %3813 }
 0x505   : > { %19259 = vst [vmem:[#allocation60_spill] sm:$0xff] %v16885_v24 }
 0x523   : > { %v3733_v38 = vpop.xlane.xlu0 %3732 }
 0x524   : > { %v3855_v37 = vsub.f32 %v16661_v5, %v3733_v38 }
 0x526   : > { %v3913_v22 = vmul.f32 1.442695, %v3855_v37 }
 0x527   : > { %v3727_v36 = vpop.xlane.xlu0 %3726  ;;  %v3736_v29 = vpop.xlane.xlu1 %3735 }
 0x528   : > { %14779 = vpow2.f32 %v3913_v22  ;;  %v3853_v1 = vsub.f32 %v16667_v3, %v3727_v36  ;;  %v3856_v42 = vsub.f32 %v16671_v27, %v3736_v29 }
 0x52a   : > { %v3909_v61 = vmul.f32 1.442695, %v3853_v1  ;;  %v3915_v60 = vmul.f32 1.442695, %v3856_v42 }
 0x52b   : > { %v3730_v48 = vpop.xlane.xlu1 %3729 }
 0x52c   : > { %14781 = vpow2.f32 %v3909_v61  ;;  %v3854_v46 = vsub.f32 %v16679_v20, %v3730_v48 }
 0x52d   : > { %14783 = vpow2.f32 %v3915_v60 }
 0x52e   : > { %v3911_v12 = vmul.f32 1.442695, %v3854_v46  ;;  %v3745_v24 = vpop.xlane.xlu0 %3744 }
 0x52f   : > { %v3859_v9 = vsub.f32 %v16687_v31, %v3745_v24 }
 0x530   : > { %14785 = vpow2.f32 %v3911_v12 }
 0x531   : > { %v3921_v38 = vmul.f32 1.442695, %v3859_v9 }
 0x532   : > { %v3739_v5 = vpop.xlane.xlu0 %3738  ;;  %v3748_v37 = vpop.xlane.xlu1 %3747 }
 0x533   : > { %14787 = vpow2.f32 %v3921_v38  ;;  %v3857_v36 = vsub.f32 %v16693_v35, %v3739_v5  ;;  %v3860_v29 = vsub.f32 %v16697_v51, %v3748_v37 }
 0x535   : > { %v16894_v3 = vpop.eup %14779  ;;  %v3917_v42 = vmul.f32 1.442695, %v3857_v36  ;;  %v3923_v61 = vmul.f32 1.442695, %v3860_v29 }
 0x536   : > { %v3742_v27 = vpop.xlane.xlu1 %3741  ;;  %v4019_v48 = vsel %vm3102_vm0, %v16894_v3, 0.0 }
 0x537   : > { %14789 = vpow2.f32 %v3917_v42  ;;  %v3858_v24 = vsub.f32 %v16707_v17, %v3742_v27  ;;  %4020 = vadd.xlane.f32.xlu0 %v4019_v48 }
 0x538   : > { %14791 = vpow2.f32 %v3923_v61 }
 0x539   : > { %v16899_v9 = vpop.eup %14781  ;;  %v3919_v12 = vmul.f32 1.442695, %v3858_v24 }
 0x53a   : > { %v16901_v46 = vpop.eup %14783  ;;  %v4013_v20 = vsel %vm3102_vm0, %v16899_v9, 0.0 }
 0x53b   : > { %14793 = vpow2.f32 %v3919_v12  ;;  %4014 = vadd.xlane.f32.xlu0 %v4013_v20  ;;  %v4022_v31 = vsel %vm3102_vm0, %v16901_v46, 0.0 }
 0x53c   : > { %4023 = vadd.xlane.f32.xlu1 %v4022_v31 }
 0x53d   : > { %v16907_v35 = vpop.eup %14785 }
 0x53e   : > { %v4016_v51 = vsel %vm3102_vm0, %v16907_v35, 0.0 }
 0x540   : > { %v16911_v17 = vpop.eup %14787  ;;  %4017 = vadd.xlane.f32.xlu1 %v4016_v51 }
 0x541   : > { %v4031_v22 = vsel %vm3102_vm0, %v16911_v17, 0.0 }
 0x542   : > { %4032 = vadd.xlane.f32.xlu0 %v4031_v22 }
 0x543   : > { %v3781_v60 = vpop.xlane.xlu0 %3780 }
 0x544   : > { %v16915_v1 = vpop.eup %14789  ;;  %v3871_v38 = vsub.f32 %v16720_v62, %v3781_v60 }
 0x545   : > { %v16918_v5 = vpop.eup %14791  ;;  %v4025_v37 = vsel %vm3102_vm0, %v16915_v1, 0.0 }
 0x546   : > { %v3945_v36 = vmul.f32 1.442695, %v3871_v38  ;;  %4026 = vadd.xlane.f32.xlu0 %v4025_v37  ;;  %v4034_v29 = vsel %vm3102_vm0, %v16918_v5, 0.0 }
 0x547   : > { %4035 = vadd.xlane.f32.xlu1 %v4034_v29  ;;  %v3775_v42 = vpop.xlane.xlu0 %3774  ;;  %v3784_v61 = vpop.xlane.xlu1 %3783 }
 0x548   : > { %v16924_v27 = vpop.eup %14793  ;;  %14795 = vpow2.f32 %v3945_v36  ;;  %v3869_v48 = vsub.f32 %v16727_v4, %v3775_v42  ;;  %v3872_v62 = vsub.f32 %v16731_v44, %v3784_v61 }
 0x549   : > { %v4028_v24 = vsel %vm3102_vm0, %v16924_v27, 0.0 }
 0x54a   : > { %v3941_v12 = vmul.f32 1.442695, %v3869_v48  ;;  %v3947_v20 = vmul.f32 1.442695, %v3872_v62 }
 0x54b   : > { %4029 = vadd.xlane.f32.xlu1 %v4028_v24  ;;  %v3793_v31 = vpop.xlane.xlu0 %3792  ;;  %v3778_v51 = vpop.xlane.xlu1 %3777 }
 0x54c   : > { %14797 = vpow2.f32 %v3941_v12  ;;  %v3875_v22 = vsub.f32 %v16745_v49, %v3793_v31  ;;  %v3870_v60 = vsub.f32 %v16741_v55, %v3778_v51 }
 0x54d   : > { %14799 = vpow2.f32 %v3947_v20 }
 0x54e   : > { %v3953_v38 = vmul.f32 1.442695, %v3875_v22  ;;  %v3943_v37 = vmul.f32 1.442695, %v3870_v60 }
 0x54f   : > { %v3787_v36 = vpop.xlane.xlu0 %3786  ;;  %v3796_v4 = vpop.xlane.xlu1 %3795 }
 0x550   : > { %14801 = vpow2.f32 %v3953_v38  ;;  %v3873_v44 = vsub.f32 %v16755_v43, %v3787_v36  ;;  %v3876_v29 = vsub.f32 %v16759_v58, %v3796_v4 }
 0x551   : > { %14803 = vpow2.f32 %v3943_v37 }
 0x552   : > { %v3949_v42 = vmul.f32 1.442695, %v3873_v44  ;;  %v3955_v61 = vmul.f32 1.442695, %v3876_v29 }
 0x553   : > { %v3997_v48 = vpop.xlane.xlu0 %3996  ;;  %v3790_v62 = vpop.xlane.xlu1 %3789 }
 0x554   : > { %v3874_v24 = vsub.f32 %v16769_v45, %v3790_v62  ;;  %14805 = vpow2.f32 %v3955_v61 }
 0x555   : > { %v16935_v49 = vpop.eup %14795  ;;  %14807 = vpow2.f32 %v3949_v42 }
 0x556   : > { %v3951_v55 = vmul.f32 1.442695, %v3874_v24  ;;  %v4067_v12 = vsel %vm3102_vm0, %v16935_v49, 0.0 }
 0x557   : > { %v3991_v20 = vpop.xlane.xlu0 %3990  ;;  %4068 = vadd.xlane.f32.xlu1 %v4067_v12  ;;  %v4000_v43 = vpop.xlane.xlu1 %3999 }
 0x558   : > { %14809 = vpow2.f32 %v3951_v55 }
 0x559   : > { %v16939_v58 = vpop.eup %14797  ;;  %14811 = vrcp.f32 %v4000_v43 }
 0x55a   : > { %v4061_v31 = vsel %vm3102_vm0, %v16939_v58, 0.0  ;;  %v16943_v51 = vpop.eup %14799  ;;  %14813 = vrcp.f32 %v3991_v20 }
 0x55b   : > { %v4009_v45 = vpop.xlane.xlu0 %4008  ;;  %4062 = vadd.xlane.f32.xlu1 %v4061_v31  ;;  %v3994_v22 = vpop.xlane.xlu1 %3993  ;;  %14815 = vrcp.f32 %v3997_v48  ;;  %v4070_v37 = vsel %vm3102_vm0, %v16943_v51, 0.0 }
 0x55c   : > { %14817 = vrcp.f32 %v3994_v22 }
 0x55d   : > { %v16945_v60 = vpop.eup %14801 }
 0x55e   : > { %19260 = vst [vmem:[#allocation61_spill] sm:$0xff] %v16945_v60  ;;  %v4079_v38 = vsel %vm3102_vm0, %v16945_v60, 0.0  ;;  %v16951_v36 = vpop.eup %14803 }
 0x55f   : > { %4080 = vadd.xlane.f32.xlu0 %v4079_v38  ;;  %v4003_v4 = vpop.xlane.xlu0 %4002  ;;  %4071 = vadd.xlane.f32.xlu1 %v4070_v37  ;;  %v4012_v44 = vpop.xlane.xlu1 %4011  ;;  %v4064_v42 = vsel %vm3102_vm0, %v16951_v36, 0.0 }
 0x560   : > { %14819 = vrcp.f32 %v4003_v4 }
 0x561   : > { %14821 = vrcp.f32 %v4012_v44  ;;  %v16953_v29 = vpop.eup %14805 }
 0x562   : > { %19261 = vst [vmem:[#allocation62_spill] sm:$0xff] %v16953_v29  ;;  %v16957_v61 = vpop.eup %14807  ;;  %14823 = vrcp.f32 %v4009_v45  ;;  %v4082_v62 = vsel %vm3102_vm0, %v16953_v29, 0.0 }
 0x563   : > { %v3829_v48 = vpop.xlane.xlu0 %3828  ;;  %4065 = vadd.xlane.f32.xlu1 %v4064_v42  ;;  %v4006_v24 = vpop.xlane.xlu1 %4005  ;;  %4083 = vadd.xlane.f32.xlu0 %v4082_v62  ;;  %v4073_v43 = vsel %vm3102_vm0, %v16957_v61, 0.0 }
 0x564   : > { %v3887_v55 = vsub.f32 %v16803_v0, %v3829_v48  ;;  %14825 = vrcp.f32 %v4006_v24 }
 0x565   : > { %v16962_v12 = vpop.eup %14809 }
 0x566   : > { %19262 = vst [vmem:[#allocation63_spill] sm:$0xff] %v16962_v12  ;;  %v3977_v20 = vmul.f32 1.442695, %v3887_v55  ;;  %v4076_v31 = vsel %vm3102_vm0, %v16962_v12, 0.0  ;;  %v14812_v45 = vpop.eup %14811 }
 0x567   : > { %v3823_v22 = vpop.xlane.xlu0 %3822  ;;  %4074 = vadd.xlane.f32.xlu1 %v4073_v43  ;;  %v3832_v38 = vpop.xlane.xlu1 %3831  ;;  %4077 = vadd.xlane.f32.xlu0 %v4076_v31  ;;  %v4184_v48 = vmul.f32 %v14812_v45, %v16777_v53 }
 0x568   : > { %v14814_v37 = vpop.eup %14813  ;;  %14827 = vpow2.f32 %v3977_v20  ;;  %v3885_v4 = vsub.f32 %v16811_v23, %v3823_v22  ;;  %v3888_v0 = vsub.f32 %v16815_v25, %v3832_v38 }
 0x569   : > { %v14816_v44 = vpop.eup %14815  ;;  %v4181_v29 = vmul.f32 %v14814_v37, %v16771_v39 }
 0x56a   : > { %v14818_v42 = vpop.eup %14817  ;;  %v3973_v62 = vmul.f32 1.442695, %v3885_v4  ;;  %v3979_v24 = vmul.f32 1.442695, %v3888_v0  ;;  %v4183_v12 = vmul.f32 %v14816_v44, %v16765_v54 }
 0x56b   : > { %v3841_v55 = vpop.xlane.xlu0 %3840  ;;  %v3826_v60 = vpop.xlane.xlu1 %3825  ;;  %v4182_v43 = vmul.f32 %v14818_v42, %v16779_v41 }
 0x56c   : > { %14829 = vpow2.f32 %v3973_v62  ;;  %v3891_v23 = vsub.f32 %v16827_v34, %v3841_v55  ;;  %v3886_v20 = vsub.f32 %v16823_v32, %v3826_v60  ;;  %v4230_v38 = vpack.c.bf16 %v4184_v48, %v4183_v12 }
 0x56d   : > { %v14820_v25 = vpop.eup %14819  ;;  %v4229_v31 = vpack.c.bf16 %v4182_v43, %v4181_v29  ;;  %14831 = vpow2.f32 %v3979_v24 }
 0x56e   : > { %v14822_v22 = vpop.eup %14821  ;;  %v3985_v53 = vmul.f32 1.442695, %v3891_v23  ;;  %v3975_v45 = vmul.f32 1.442695, %v3886_v20  ;;  %v4185_v32 = vmul.f32 %v14820_v25, %v16793_v50 }
 0x56f   : > { %13214 = vmatprep.mubr.msk.bf16.mxu1 %vm3102_vm0, %v4229_v31  ;;  %v3835_v4 = vpop.xlane.xlu0 %3834  ;;  %v3844_v39 = vpop.xlane.xlu1 %3843  ;;  %v4188_v60 = vmul.f32 %v14822_v22, %v16791_v14  ;;  %v3861_v22 = vsub.f32 %v16571_v57, %v16863_v52  ;;  %v19263_v57 = vld [vmem:[#allocation41_spill] sm:$0xff] }
 0x570   : > { %v14824_v37 = vpop.eup %14823  ;;  %v3889_v41 = vsub.f32 %v16835_v28, %v3835_v4  ;;  %13215 = vmatmul.mubr.msk.bf16.vlgmr.msra.gmra.mxu1 %vm3102_vm0, %v4230_v38  ;;  %v3892_v54 = vsub.f32 %v16839_v8, %v3844_v39  ;;  %14833 = vpow2.f32 %v3975_v45  ;;  %v3864_v38 = vsub.f32 %v16575_v26, %v16851_v16  ;;  %v19264_v26 = vld [vmem:[#allocation53_spill] sm:$0xff]  ;;  %v19265_v16 = vld [vmem:[#allocation40_spill] sm:$0xff] }
 0x571   : > { %v14826_v34 = vpop.eup %14825  ;;  %13223 = vmatpush3.bf16.msra.mxu1 %v16476_v19  ;;  %14835 = vpow2.f32 %v3985_v53  ;;  %v4187_v42 = vmul.f32 %v14824_v37, %v16785_v7  ;;  %v3925_v53 = vmul.f32 1.442695, %v3861_v22  ;;  %v3862_v45 = vsub.f32 %v16583_v59, %v16853_v6  ;;  %v19266_v6 = vld [vmem:[#allocation54_spill] sm:$0xff] }
 0x572   : > { %v3981_v29 = vmul.f32 1.442695, %v3889_v41  ;;  %v3987_v12 = vmul.f32 1.442695, %v3892_v54  ;;  %13224 = vmatprep.subr.bf16.mxu1 %v16711_v63  ;;  %v4186_v0 = vmul.f32 %v14826_v34, %v16799_v21  ;;  %v3931_v4 = vmul.f32 1.442695, %v3864_v38 }
 0x573   : > { %v3838_v28 = vpop.xlane.xlu1 %3837  ;;  %v4232_v50 = vpack.c.bf16 %v4188_v60, %v4187_v42  ;;  %v3866_v39 = vsub.f32 %v16607_v40, %v16865_v2  ;;  %v3863_v37 = vsub.f32 %v16565_v47, %v16859_v33  ;;  %v3927_v41 = vmul.f32 1.442695, %v3862_v45  ;;  %v19267_v60 = vld [vmem:[#allocation45_spill] sm:$0xff]  ;;  %v19268_v40 = vld [vmem:[#allocation51_spill] sm:$0xff]  ;;  %v19278_v45 = vld [vmem:[#allocation58_spill] sm:$0xff] }
 0x574   : > { %14837 = vpow2.f32 %v3981_v29  ;;  %v3890_v44 = vsub.f32 %v16847_v11, %v3838_v28  ;;  %v4231_v8 = vpack.c.bf16 %v4186_v0, %v4185_v32  ;;  %v3868_v52 = vsub.f32 %v19263_v57, %v16861_v56  ;;  %v19269_v2 = vld [vmem:[#allocation39_spill] sm:$0xff]  ;;  %v19271_v0 = vld [vmem:[#allocation44_spill] sm:$0xff]  ;;  %v19272_v42 = vld [vmem:[#allocation57_spill] sm:$0xff] }
 0x575   : > { %v16987_v48 = vpop.eup %14827  ;;  %13225 = vmatpush3.bf16.msra.mxu1 %v16711_v63  ;;  %14839 = vpow2.f32 %v3987_v12  ;;  %v3935_v54 = vmul.f32 1.442695, %v3866_v39  ;;  %v3929_v34 = vmul.f32 1.442695, %v3863_v37  ;;  %v3865_v32 = vsub.f32 %v19265_v16, %v19264_v26  ;;  %v19270_v12 = vld [vmem:[#allocation52_spill] sm:$0xff] }
 0x576   : > { %v3983_v19 = vmul.f32 1.442695, %v3890_v44  ;;  %13226 = vmatprep.subr.bf16.mxu1 %v16683_v15  ;;  %13218 = vmatprep.mubr.msk.bf16.mxu1 %vm3102_vm0, %v4231_v8  ;;  %v4115_v14 = vsel %vm3102_vm0, %v16987_v48, 0.0  ;;  %v3939_v59 = vmul.f32 1.442695, %v3868_v52  ;;  %v3878_v29 = vsub.f32 %v19267_v60, %v19266_v6 }
 0x577   : > { %4116 = vadd.xlane.f32.xlu0 %v4115_v14  ;;  %v3867_v47 = vsub.f32 %v19269_v2, %v19268_v40  ;;  %v3933_v33 = vmul.f32 1.442695, %v3865_v32  ;;  %v3880_v56 = vsub.f32 %v19271_v0, %v19270_v12  ;;  %v17083_v2 = vpop.permute.xlu1 %3075  ;;  %v19283_v12 = vld [vmem:[#allocation46_spill] sm:$0xff] }
 0x578   : > { %13219 = vmatmul.mubr.msk.bf16.gmra.mxu1 %vm3102_vm0, %v4232_v50  ;;  %14841 = vpow2.f32 %v3983_v19  ;;  %v3959_v28 = vmul.f32 1.442695, %v3878_v29  ;;  %v19273_v19 = vld [vmem:[#allocation43_spill] sm:$0xff] }
 0x579   : > { %v16995_v21 = vpop.eup %14829  ;;  %13227 = vmatpush3.bf16.msra.mxu1 %v16683_v15  ;;  %14843 = vpow2.f32 %v3925_v53  ;;  %v3937_v8 = vmul.f32 1.442695, %v3867_v47  ;;  %v3877_v14 = vsub.f32 %v19273_v19, %v19272_v42  ;;  %v3963_v50 = vmul.f32 1.442695, %v3880_v56 }
 0x57a   : > { %13228 = vmatprep.subr.bf16.mxu1 %v16455_v30  ;;  %v4109_v63 = vsel %vm3102_vm0, %v16995_v21, 0.0  ;;  %v17001_v7 = vpop.eup %14831  ;;  %14845 = vpow2.f32 %v3931_v4  ;;  %v19279_v4 = vld [vmem:[#allocation48_spill] sm:$0xff] }
 0x57b   : > { %4110 = vadd.xlane.f32.xlu0 %v4109_v63  ;;  %v4118_v62 = vsel %vm3102_vm0, %v17001_v7, 0.0  ;;  %14847 = vpow2.f32 %v3927_v41  ;;  %v19274_v63 = vld [vmem:[#allocation60_spill] sm:$0xff]  ;;  %v3957_v38 = vmul.f32 1.442695, %v3877_v14  ;;  %v3884_v39 = vsub.f32 %v19279_v4, %v19278_v45  ;;  %v17067_v41 = vpop.permute.xlu0 %3077 }
 0x57c   : > { %14849 = vpow2.f32 %v3935_v54  ;;  %v19280_v54 = vld [vmem:[#allocation56_spill] sm:$0xff] }
 0x57d   : > { %13229 = vmatpush3.bf16.msra.mxu1 %v16455_v30  ;;  %v17004_v11 = vpop.eup %14833  ;;  %14851 = vpow2.f32 %v3929_v34  ;;  %v19281_v34 = vld [vmem:[#allocation47_spill] sm:$0xff]  ;;  %v3971_v6 = vmul.f32 1.442695, %v3884_v39 }
 0x57e   : > { %13254 = vmatprep.subr.bf16.mxu1 %v16714_v18  ;;  %v17009_v24 = vpop.eup %14835  ;;  %v4112_v15 = vsel %vm3102_vm0, %v17004_v11, 0.0  ;;  %14853 = vpow2.f32 %v3939_v59  ;;  %v3881_v26 = vsub.f32 %v19281_v34, %v19280_v54 }
 0x57f   : > { %4119 = vadd.xlane.f32.xlu0 %v4118_v62  ;;  %4113 = vadd.xlane.f32.xlu1 %v4112_v15  ;;  %v4127_v43 = vsel %vm3102_vm0, %v17009_v24, 0.0  ;;  %14855 = vpow2.f32 %v3933_v33  ;;  %v19275_v62 = vld [vmem:[#allocation49_spill] sm:$0xff]  ;;  %v19282_v33 = vld [vmem:[#allocation59_spill] sm:$0xff] }
 0x580   : > { %14857 = vpow2.f32 %v3959_v28  ;;  %v3882_v15 = vsub.f32 %v19275_v62, %v19274_v63  ;;  %v3965_v47 = vmul.f32 1.442695, %v3881_v26  ;;  %v3883_v0 = vsub.f32 %v19283_v12, %v19282_v33 }
 0x581   : > { %v17013_v55 = vpop.eup %14837  ;;  %14859 = vpow2.f32 %v3937_v8 }
 0x582   : > { %v4121_v30 = vsel %vm3102_vm0, %v17013_v55, 0.0  ;;  %v17019_v23 = vpop.eup %14839  ;;  %14861 = vpow2.f32 %v3963_v50  ;;  %v3967_v37 = vmul.f32 1.442695, %v3882_v15  ;;  %v3969_v50 = vmul.f32 1.442695, %v3883_v0 }
 0x583   : > { %4128 = vadd.xlane.f32.xlu0 %v4127_v43  ;;  %4122 = vadd.xlane.f32.xlu1 %v4121_v30  ;;  %v4130_v20 = vsel %vm3102_vm0, %v17019_v23, 0.0  ;;  %14863 = vpow2.f32 %v3957_v38 }
 0x584   : > { %14865 = vpow2.f32 %v3967_v37 }
 0x585   : > { %v17023_v25 = vpop.eup %14841 }
 0x586   : > { %v4124_v31 = vsel %vm3102_vm0, %v17023_v25, 0.0  ;;  %v17051_v44 = vpop.eup %14843 }
 0x587   : > { %4131 = vadd.xlane.f32.xlu0 %v4130_v20  ;;  %v4037_v43 = vsel %vm3102_vm0, %v17051_v44, 0.0  ;;  %v17059_v30 = vpop.eup %14845  ;;  %v19276_v20 = vld [vmem:[#allocation55_spill] sm:$0xff] }
 0x588   : > { %v17063_v53 = vpop.eup %14847  ;;  %v4046_v57 = vsel %vm3102_vm0, %v17059_v30, 0.0 }
 0x589   : > { %v17071_v52 = vpop.eup %14849  ;;  %v4040_v32 = vsel %vm3102_vm0, %v17063_v53, 0.0 }
 0x58a   : > { %v17077_v59 = vpop.eup %14851  ;;  %v4052_v29 = vsel %vm3102_vm0, %v17071_v52, 0.0 }
 0x58b   : > { %4125 = vadd.xlane.f32.xlu0 %v4124_v31  ;;  %v19277_v31 = vld [vmem:[#allocation42_spill] sm:$0xff]  ;;  %v17081_v40 = vpop.eup %14853  ;;  %v4043_v56 = vsel %vm3102_vm0, %v17077_v59, 0.0 }
 0x58c   : > { %v3879_v22 = vsub.f32 %v19277_v31, %v19276_v20  ;;  %v17089_v28 = vpop.eup %14855  ;;  %v4058_v8 = vsel %vm3102_vm0, %v17081_v40, 0.0 }
 0x58d   : > { %v17093_v42 = vpop.eup %14857  ;;  %v4049_v63 = vsel %vm3102_vm0, %v17089_v28, 0.0 }
 0x58e   : > { %v3961_v16 = vmul.f32 1.442695, %v3879_v22  ;;  %v17097_v62 = vpop.eup %14859  ;;  %v4088_v15 = vsel %vm3102_vm0, %v17093_v42, 0.0 }
 0x58f   : > { %v4055_v22 = vsel %vm3102_vm0, %v17097_v62, 0.0 }
 0x590   : > { %14867 = vpow2.f32 %v3961_v16 }
 0x591   : > { %14869 = vpow2.f32 %v3971_v6 }
 0x592   : > { %14871 = vpow2.f32 %v3965_v47 }
 0x594   : > { %3071 = vrot.lane.b32.xlu1 %v16410_v10, %s15433_s2 }
 0x5a1   : > { %3073 = vrot.lane.b32.xlu0 %v16408_v13, %s15433_s2 }
 0x5b8   : > { %4038 = vadd.xlane.f32.xlu1 %v4037_v43  ;;  %v17101_v43 = vpop.eup %14861 }
 0x5b9   : > { %v17105_v38 = vpop.eup %14863  ;;  %v4094_v45 = vsel %vm3102_vm0, %v17101_v43, 0.0 }
 0x5ba   : > { %v17109_v4 = vpop.eup %14865  ;;  %v4085_v39 = vsel %vm3102_vm0, %v17105_v38, 0.0 }
 0x5bb   : > { %v17113_v37 = vpop.eup %14867  ;;  %v4100_v34 = vsel %vm3102_vm0, %v17109_v4, 0.0 }
 0x5bc   : > { %4047 = vadd.xlane.f32.xlu1 %v4046_v57  ;;  %v17117_v26 = vpop.eup %14869 }
 0x5bd   : > { %v17119_v16 = vpop.eup %14871 }
 0x5c0   : > { %v4021_v60 = vpop.xlane.xlu0 %4020  ;;  %4041 = vadd.xlane.f32.xlu0 %v4040_v32  ;;  %4053 = vadd.xlane.f32.xlu1 %v4052_v29  ;;  %v4091_v32 = vsel %vm3102_vm0, %v17113_v37, 0.0  ;;  %v4106_v29 = vsel %vm3102_vm0, %v17117_v26, 0.0 }
 0x5c4   : > { %4044 = vadd.xlane.f32.xlu0 %v4043_v56  ;;  %v4015_v19 = vpop.xlane.xlu0 %4014  ;;  %4059 = vadd.xlane.f32.xlu1 %v4058_v8  ;;  %v4097_v56 = vsel %vm3102_vm0, %v17119_v16, 0.0 }
 0x5c5   : > { %v4024_v14 = vpop.xlane.xlu1 %4023 }
 0x5c6   : > { %14873 = vrcp.f32 %v4024_v14 }
 0x5c7   : > { %14875 = vrcp.f32 %v4015_v19 }
 0x5c8   : > { %4050 = vadd.xlane.f32.xlu0 %v4049_v63  ;;  %14877 = vrcp.f32 %v4021_v60  ;;  %4089 = vadd.xlane.f32.xlu1 %v4088_v15 }
 0x5c9   : > { %v4018_v20 = vpop.xlane.xlu1 %4017 }
 0x5ca   : > { %14879 = vrcp.f32 %v4018_v20 }
 0x5cb   : > { %14881 = vpow2.f32 %v3969_v50  ;;  %v4033_v31 = vpop.xlane.xlu0 %4032 }
 0x5cc   : > { %4056 = vadd.xlane.f32.xlu0 %v4055_v22  ;;  %4095 = vadd.xlane.f32.xlu1 %v4094_v45 }
 0x5cf   : > { %v4027_v57 = vpop.xlane.xlu0 %4026 }
 0x5d0   : > { %v4036_v54 = vpop.xlane.xlu1 %4035  ;;  %4086 = vadd.xlane.f32.xlu0 %v4085_v39  ;;  %4101 = vadd.xlane.f32.xlu1 %v4100_v34  ;;  %v19285_v39 = vld [vmem:[#allocation50_spill] sm:$0xff] }
 0x5d1   : > { %14883 = vrcp.f32 %v4036_v54 }
 0x5d2   : > { %14885 = vrcp.f32 %v4027_v57 }
 0x5d3   : > { %v14874_v6 = vpop.eup %14873  ;;  %14887 = vrcp.f32 %v4033_v31  ;;  %v19284_v31 = vld [vmem:[#allocation38_spill] sm:$0xff] }
 0x5d4   : > { %v4030_v60 = vpop.xlane.xlu1 %4029  ;;  %4092 = vadd.xlane.f32.xlu0 %v4091_v32  ;;  %v14876_v47 = vpop.eup %14875  ;;  %4107 = vadd.xlane.f32.xlu1 %v4106_v29  ;;  %v4192_v0 = vmul.f32 %v14874_v6, %v16901_v46 }
 0x5d5   : > { %14889 = vrcp.f32 %v4030_v60  ;;  %v14878_v33 = vpop.eup %14877  ;;  %v4189_v19 = vmul.f32 %v14876_v47, %v16899_v9  ;;  %v19286_v60 = vld [vmem:[#allocation37_spill] sm:$0xff] }
 0x5d6   : > { %v4191_v50 = vmul.f32 %v14878_v33, %v16894_v3 }
 0x5d7   : > { %v14880_v12 = vpop.eup %14879 }
 0x5d8   : > { %v17128_v8 = vpop.eup %14881  ;;  %4098 = vadd.xlane.f32.xlu0 %v4097_v56  ;;  %v4190_v14 = vmul.f32 %v14880_v12, %v16907_v35  ;;  %v4234_v15 = vpack.c.bf16 %v4192_v0, %v4191_v50 }
 0x5d9   : > { %v4103_v20 = vsel %vm3102_vm0, %v17128_v8, 0.0 }
 0x5da   : > { %v4233_v63 = vpack.c.bf16 %v4190_v14, %v4189_v19 }
 0x5dc   : > { %13230 = vmatprep.mubr.msk.bf16.mxu1 %vm3102_vm0, %v4233_v63  ;;  %4104 = vadd.xlane.f32.xlu0 %v4103_v20 }
 0x5dd   : > { %13231 = vmatmul.mubr.msk.bf16.vlgmr.msra.gmra.mxu1 %vm3102_vm0, %v4234_v15 }
 0x5de   : > { %13255 = vmatpush3.bf16.msra.mxu1 %v16714_v18  ;;  %v14884_v46 = vpop.eup %14883 }
 0x5df   : > { %13256 = vmatprep.subr.bf16.mxu1 %v19284_v31  ;;  %v14886_v9 = vpop.eup %14885  ;;  %v4196_v3 = vmul.f32 %v14884_v46, %v16918_v5 }
 0x5e0   : > { %v4069_v22 = vpop.xlane.xlu1 %4068  ;;  %v14888_v35 = vpop.eup %14887  ;;  %v4193_v57 = vmul.f32 %v14886_v9, %v16915_v1 }
 0x5e1   : > { %v4195_v18 = vmul.f32 %v14888_v35, %v16911_v17 }
 0x5e2   : > { %v14890_v45 = vpop.eup %14889  ;;  %13257 = vmatpush3.bf16.msra.mxu1 %v19284_v31 }
 0x5e3   : > { %13258 = vmatprep.subr.bf16.mxu1 %v19285_v39  ;;  %v4194_v54 = vmul.f32 %v14890_v45, %v16924_v27  ;;  %v4236_v6 = vpack.c.bf16 %v4196_v3, %v4195_v18  ;;  %v19287_v45 = vld [vmem:[#allocation63_spill] sm:$0xff] }
 0x5e4   : > { %v4063_v34 = vpop.xlane.xlu1 %4062 }
 0x5e5   : > { %v4235_v32 = vpack.c.bf16 %v4194_v54, %v4193_v57  ;;  %v19289_v57 = vld [vmem:[#allocation61_spill] sm:$0xff] }
 0x5e6   : > { %13259 = vmatpush3.bf16.msra.mxu1 %v19285_v39 }
 0x5e7   : > { %13260 = vmatprep.subr.bf16.mxu1 %v19286_v60  ;;  %13234 = vmatprep.mubr.msk.bf16.mxu1 %vm3102_vm0, %v4235_v32 }
 0x5e8   : > { %13235 = vmatmul.mubr.msk.bf16.gmra.mxu1 %vm3102_vm0, %v4236_v6  ;;  %v4081_v5 = vpop.xlane.xlu0 %4080  ;;  %v4072_v29 = vpop.xlane.xlu1 %4071 }
 0x5e9   : > { %14891 = vrcp.f32 %v4072_v29 }
 0x5ea   : > { %13261 = vmatpush3.bf16.msra.mxu1 %v19286_v60  ;;  %14893 = vrcp.f32 %v4063_v34 }
 0x5eb   : > { %13286 = vmatprep.subr.bf16.mxu1 %v17067_v41  ;;  %14895 = vrcp.f32 %v4069_v22 }
 0x5ec   : > { %v4066_v17 = vpop.xlane.xlu1 %4065  ;;  %v4084_v1 = vpop.xlane.xlu0 %4083 }
 0x5ed   : > { %14897 = vrcp.f32 %v4066_v17 }
 0x5ee   : > { %14899 = vrcp.f32 %v4084_v1 }
 0x5f0   : > { %v4075_v27 = vpop.xlane.xlu1 %4074  ;;  %v4078_v47 = vpop.xlane.xlu0 %4077 }
 0x5f1   : > { %14901 = vrcp.f32 %v4075_v27 }
 0x5f2   : > { %14903 = vrcp.f32 %v4078_v47 }
 0x5f3   : > { %14905 = vrcp.f32 %v4081_v5 }
 0x5f6   : > { %v14892_v33 = vpop.eup %14891 }
 0x5f7   : > { %v14894_v12 = vpop.eup %14893  ;;  %v4208_v19 = vmul.f32 %v14892_v33, %v16943_v51 }
 0x5f8   : > { %v14896_v0 = vpop.eup %14895  ;;  %v4205_v14 = vmul.f32 %v14894_v12, %v16939_v58  ;;  %v19288_v58 = vld [vmem:[#allocation62_spill] sm:$0xff] }
 0x5f9   : > { %v4207_v63 = vmul.f32 %v14896_v0, %v16935_v49 }
 0x5fa   : > { %v14898_v56 = vpop.eup %14897 }
 0x5fb   : > { %v4206_v50 = vmul.f32 %v14898_v56, %v16951_v36  ;;  %v14900_v15 = vpop.eup %14899  ;;  %v4242_v31 = vpack.c.bf16 %v4208_v19, %v4207_v63 }
 0x5fc   : > { %v4212_v36 = vmul.f32 %v14900_v15, %v19288_v58 }
 0x5fd   : > { %v4241_v20 = vpack.c.bf16 %v4206_v50, %v4205_v14 }
 0x5fe   : > { %v14902_v46 = vpop.eup %14901 }
 0x5ff   : > { %v14904_v9 = vpop.eup %14903  ;;  %13262 = vmatprep.mubr.msk.bf16.mxu1 %vm3102_vm0, %v4241_v20  ;;  %v4209_v22 = vmul.f32 %v14902_v46, %v16957_v61 }
 0x600   : > { %v4117_v35 = vpop.xlane.xlu0 %4116  ;;  %13263 = vmatmul.mubr.msk.bf16.vlgmr.msra.gmra.mxu1 %vm3102_vm0, %v4242_v31  ;;  %v4210_v51 = vmul.f32 %v14904_v9, %v19287_v45  ;;  %v14906_v3 = vpop.eup %14905  ;;  %v19290_v31 = vmov 0  }
 0x601   : > { %13287 = vmatpush3.bf16.msra.mxu1 %v17067_v41  ;;  %v4211_v54 = vmul.f32 %v14906_v3, %v19289_v57 }
 0x602   : > { %13288 = vmatprep.subr.bf16.mxu1 %v17083_v2  ;;  %v4243_v49 = vpack.c.bf16 %v4210_v51, %v4209_v22 }
 0x603   : > { %v4244_v61 = vpack.c.bf16 %v4212_v36, %v4211_v54 }
 0x604   : > { %13266 = vmatprep.mubr.msk.bf16.mxu1 %vm3102_vm0, %v4243_v49  ;;  %v4111_v39 = vpop.xlane.xlu0 %4110 }
 0x605   : > { %13289 = vmatpush3.bf16.msra.mxu1 %v17083_v2  ;;  %14907 = vrcp.f32 %v4111_v39 }
 0x608   : > { %v4120_v34 = vpop.xlane.xlu0 %4119  ;;  %13267 = vmatmul.mubr.msk.bf16.gmra.mxu1 %vm3102_vm0, %v4244_v61  ;;  %v4114_v18 = vpop.xlane.xlu1 %4113 }
 0x609   : > { %14909 = vrcp.f32 %v4114_v18 }
 0x60a   : > { %14911 = vrcp.f32 %v4120_v34 }
 0x60b   : > { %14913 = vrcp.f32 %v4117_v35 }
 0x60c   : > { %v4129_v41 = vpop.xlane.xlu0 %4128  ;;  %v4123_v32 = vpop.xlane.xlu1 %4122 }
 0x60d   : > { %14915 = vrcp.f32 %v4123_v32 }
 0x610   : > { %v4132_v6 = vpop.xlane.xlu0 %4131  ;;  %v3072_v33 = vpop.permute.xlu1 %3071 }
 0x611   : > { %14917 = vrcp.f32 %v4132_v6 }
 0x612   : > { %14919 = vrcp.f32 %v4129_v41  ;;  %v14908_v5 = vpop.eup %14907 }
 0x613   : > { %v4221_v1 = vmul.f32 %v14908_v5, %v16995_v21 }
 0x614   : > { %v4126_v60 = vpop.xlane.xlu0 %4125 }
 0x615   : > { %14921 = vrcp.f32 %v4126_v60 }
 0x616   : > { %v14910_v29 = vpop.eup %14909 }
 0x617   : > { %v14912_v2 = vpop.eup %14911  ;;  %v4222_v27 = vmul.f32 %v14910_v29, %v17004_v11 }
 0x618   : > { %v3074_v17 = vpop.permute.xlu0 %3073  ;;  %v14914_v47 = vpop.eup %14913  ;;  %v4224_v0 = vmul.f32 %v14912_v2, %v17001_v7 }
 0x619   : > { %13290 = vmatprep.subr.bf16.mxu1 %v3074_v17  ;;  %v4249_v12 = vpack.c.bf16 %v4222_v27, %v4221_v1  ;;  %v4223_v56 = vmul.f32 %v14914_v47, %v16987_v48 }
 0x61a   : > { %13291 = vmatpush3.bf16.msra.mxu1 %v3074_v17  ;;  %v14916_v19 = vpop.eup %14915 }
 0x61b   : > { %13292 = vmatprep.subr.bf16.mxu1 %v3072_v33  ;;  %13294 = vmatprep.mubr.msk.bf16.mxu1 %vm3102_vm0, %v4249_v12  ;;  %v4250_v14 = vpack.c.bf16 %v4224_v0, %v4223_v56  ;;  %v4225_v11 = vmul.f32 %v14916_v19, %v17013_v55 }
 0x61e   : > { %13293 = vmatpush3.bf16.msra.mxu1 %v3072_v33  ;;  %v14918_v50 = vpop.eup %14917 }
 0x61f   : > { %v14920_v63 = vpop.eup %14919  ;;  %v4228_v20 = vmul.f32 %v14918_v50, %v17019_v23  ;;  %v19292_v50 = vld [vmem:[#allocation36_spill] sm:$0xff] }
 0x620   : > { %v4227_v46 = vmul.f32 %v14920_v63, %v17009_v24 }
 0x621   : > { %13295 = vmatmul.mubr.msk.bf16.vlgmr.msra.gmra.mxu1 %vm3102_vm0, %v4250_v14 }
 0x622   : > { %v14922_v21 = vpop.eup %14921  ;;  %v4252_v48 = vpack.c.bf16 %v4228_v20, %v4227_v46 }
 0x623   : > { %v4226_v15 = vmul.f32 %v14922_v21, %v17023_v25 }
 0x625   : > { %v4251_v7 = vpack.c.bf16 %v4226_v15, %v4225_v11 }
 0x627   : > { %13298 = vmatprep.mubr.msk.bf16.mxu1 %vm3102_vm0, %v4251_v7 }
 0x629   : > { %13299 = vmatmul.mubr.msk.bf16.gmra.mxu1 %vm3102_vm0, %v4252_v48 }
 0x62a   : > { %5425 = vmatprep.mubr.bf16.mxu1 %v19290_v31 }
 0x630   : > { %v17179_v9 = vpop.f32.mrf.mxu1 }
 0x632   : > { %v17181_v22 = vpop.f32.mrf.mxu1 }
 0x634   : > { %v17183_v35 = vpop.f32.mrf.mxu1 }
 0x635   : > { %v4716_v55 = vpack.c.bf16 %v17183_v35, %v17179_v9  ;;  %v13918_v35 = vld [vmem:[#allocation10 + $0x68] ss:$12 sps:$4 sm:$0xff]  }
 0x636   : > { %v17187_v23 = vpop.f32.mrf.mxu1 }
 0x638   : > { %v17189_v25 = vpop.f32.mrf.mxu1 }
 0x63a   : > { %v17191_v24 = vpop.f32.mrf.mxu1 }
 0x63c   : > { %v17193_v45 = vpop.f32.mrf.mxu1 }
 0x63d   : > { %v4718_v51 = vpack.c.bf16 %v17193_v45, %v17189_v25 }
 0x641   : > { %v4039_v3 = vpop.xlane.xlu1 %4038 }
 0x642   : > { %14923 = vrcp.f32 %v4039_v3 }
 0x645   : > { %v4048_v49 = vpop.xlane.xlu1 %4047 }
 0x649   : > { %v4042_v58 = vpop.xlane.xlu0 %4041  ;;  %v4054_v36 = vpop.xlane.xlu1 %4053 }
 0x64a   : > { %14925 = vrcp.f32 %v4042_v58 }
 0x64b   : > { %14927 = vrcp.f32 %v4048_v49 }
 0x64d   : > { %v4045_v39 = vpop.xlane.xlu0 %4044  ;;  %v4060_v57 = vpop.xlane.xlu1 %4059 }
 0x64e   : > { %14929 = vrcp.f32 %v4045_v39 }
 0x64f   : > { %14931 = vrcp.f32 %v4054_v36  ;;  %v14924_v34 = vpop.eup %14923 }
 0x650   : > { %v4197_v6 = vmul.f32 %v14924_v34, %v17051_v44 }
 0x651   : > { %v4051_v54 = vpop.xlane.xlu0 %4050  ;;  %v4090_v61 = vpop.xlane.xlu1 %4089 }
 0x652   : > { %14933 = vrcp.f32 %v4051_v54 }
 0x653   : > { %14935 = vrcp.f32 %v4060_v57 }
 0x655   : > { %v4057_v18 = vpop.xlane.xlu0 %4056  ;;  %v4096_v41 = vpop.xlane.xlu1 %4095 }
 0x656   : > { %14937 = vrcp.f32 %v4057_v18  ;;  %v13837_v18 = vld [vmem:[#allocation10 + $0xac] ss:$12 sps:$4 sm:$0xff]  }
 0x657   : > { %v14926_v32 = vpop.eup %14925  ;;  %14939 = vrcp.f32 %v4090_v61 }
 0x658   : > { %v4198_v60 = vmul.f32 %v14926_v32, %v17063_v53  ;;  %v14928_v5 = vpop.eup %14927  ;;  %v13841_v32 = vld [vmem:[#allocation10 + $0x78] ss:$12 sps:$4 sm:$0xff]  }
 0x659   : > { %v4087_v29 = vpop.xlane.xlu0 %4086  ;;  %v4102_v1 = vpop.xlane.xlu1 %4101  ;;  %v4200_v27 = vmul.f32 %v14928_v5, %v17059_v30  ;;  %v19291_v30 = vld [vmem:[#allocation35_spill] sm:$0xff] }
 0x65a   : > { %14941 = vrcp.f32 %v4087_v29  ;;  %v4237_v2 = vpack.c.bf16 %v4198_v60, %v4197_v6  ;;  %v13846_v6 = vld [vmem:[#allocation10 + $0x64] ss:$12 sps:$4 sm:$0xff]   ;;  %v13844_v60 = vld [vmem:[#allocation10 + $0x60] ss:$12 sps:$4 sm:$0xff]  }
 0x65b   : > { %v14930_v17 = vpop.eup %14929  ;;  %14943 = vrcp.f32 %v4096_v41  ;;  %v13840_v41 = vld [vmem:[#allocation10 + $0x94] ss:$12 sps:$4 sm:$0xff]   ;;  %v13850_v29 = vld [vmem:[#allocation10 + $0x30] ss:$12 sps:$4 sm:$0xff]  }
 0x65c   : > { %v4199_v47 = vmul.f32 %v14930_v17, %v17077_v59  ;;  %13246 = vmatprep.mubr.msk.bf16.mxu0 %vm3102_vm0, %v4237_v2  ;;  %v14932_v33 = vpop.eup %14931  ;;  %v13852_v5 = vld [vmem:[#allocation10 + $0x34] ss:$12 sps:$4 sm:$0xff]   ;;  %v13855_v2 = vld [vmem:[#allocation10 + $0x1c] ss:$12 sps:$4 sm:$0xff]   ;;  %v13853_v17 = vld [vmem:[#allocation10 + $0x18] ss:$12 sps:$4 sm:$0xff]  }
 0x65d   : > { %v4093_v12 = vpop.xlane.xlu0 %4092  ;;  %v4202_v56 = vmul.f32 %v14932_v33, %v17071_v52  ;;  %v4108_v14 = vpop.xlane.xlu1 %4107  ;;  %v13861_v33 = vld [vmem:[#allocation10 + $0x16c] ss:$12 sps:$4 sm:$0xff]  }
 0x65e   : > { %v4238_v0 = vpack.c.bf16 %v4200_v27, %v4199_v47  ;;  %14945 = vrcp.f32 %v4093_v12  ;;  %v13856_v27 = vld [vmem:[#allocation10] ss:$12 sps:$4 sm:$0xff]   ;;  %v13859_v47 = vld [vmem:[#allocation10 + $0x168] ss:$12 sps:$4 sm:$0xff]   ;;  %v17228_v12 = vpop.f32.mrf.mxu1 }
 0x65f   : > { %v14934_v44 = vpop.eup %14933  ;;  %14947 = vrcp.f32 %v4102_v1  ;;  %v13858_v1 = vld [vmem:[#allocation10 + $0x4] ss:$12 sps:$4 sm:$0xff]   ;;  %v4717_v9 = vpack.c.bf16 %v17228_v12, %v17191_v24 }
 0x660   : > { %13247 = vmatmul.mubr.msk.bf16.vlgmr.msra.gmra.mxu0 %vm3102_vm0, %v4238_v0  ;;  %v4201_v53 = vmul.f32 %v14934_v44, %v17089_v28  ;;  %v14936_v19 = vpop.eup %14935  ;;  %v13862_v44 = vld [vmem:[#allocation10 + $0x150] ss:$12 sps:$4 sm:$0xff]   ;;  %v13923_v24 = vld [vmem:[#allocation10 + $0xf8] ss:$12 sps:$4 sm:$0xff]  }
 0x661   : > { %13271 = vmatpush3.bf16.msra.mxu0 %v19291_v30  ;;  %v4099_v59 = vpop.xlane.xlu0 %4098  ;;  %v4204_v15 = vmul.f32 %v14936_v19, %v17081_v40  ;;  %v13865_v19 = vld [vmem:[#allocation10 + $0x138] ss:$12 sps:$4 sm:$0xff]  }
 0x662   : > { %14949 = vrcp.f32 %v4099_v59  ;;  %13272 = vmatprep.subr.bf16.mxu0 %v19292_v50  ;;  %v4239_v63 = vpack.c.bf16 %v4202_v56, %v4201_v53  ;;  %v13864_v53 = vld [vmem:[#allocation10 + $0x154] ss:$12 sps:$4 sm:$0xff]  }
 0x663   : > { %v14938_v21 = vpop.eup %14937  ;;  %14951 = vrcp.f32 %v4108_v14  ;;  %v13867_v14 = vld [vmem:[#allocation10 + $0x13c] ss:$12 sps:$4 sm:$0xff]   ;;  %v13868_v59 = vld [vmem:[#allocation10 + $0x120] ss:$12 sps:$4 sm:$0xff]  }
 0x664   : > { %13250 = vmatprep.mubr.msk.bf16.mxu0 %vm3102_vm0, %v4239_v63  ;;  %v4203_v11 = vmul.f32 %v14938_v21, %v17097_v62  ;;  %v14940_v28 = vpop.eup %14939  ;;  %v13871_v21 = vld [vmem:[#allocation10 + $0x108] ss:$12 sps:$4 sm:$0xff]  }
 0x665   : > { %13273 = vmatpush3.bf16.msra.mxu0 %v19292_v50  ;;  %v4105_v52 = vpop.xlane.xlu0 %4104  ;;  %v4214_v48 = vmul.f32 %v14940_v28, %v17093_v42  ;;  %v13870_v50 = vld [vmem:[#allocation10 + $0x124] ss:$12 sps:$4 sm:$0xff]  }
 0x666   : > { %14953 = vrcp.f32 %v4105_v52  ;;  %13274 = vmatprep.subr.bf16.mxu0 %v16408_v13  ;;  %v4240_v20 = vpack.c.bf16 %v4204_v15, %v4203_v11  ;;  %v13873_v11 = vld [vmem:[#allocation10 + $0x10c] ss:$12 sps:$4 sm:$0xff]   ;;  %v13874_v28 = vld [vmem:[#allocation10 + $0xf0] ss:$12 sps:$4 sm:$0xff]   ;;  %v13876_v52 = vld [vmem:[#allocation10 + $0xf4] ss:$12 sps:$4 sm:$0xff]  }
 0x667   : > { %v14942_v7 = vpop.eup %14941 }
 0x668   : > { %13251 = vmatmul.mubr.msk.bf16.gmra.mxu0 %vm3102_vm0, %v4240_v20  ;;  %v4213_v46 = vmul.f32 %v14942_v7, %v17105_v38  ;;  %v14944_v3 = vpop.eup %14943  ;;  %v13877_v7 = vld [vmem:[#allocation10 + $0xd8] ss:$12 sps:$4 sm:$0xff]  }
 0x669   : > { %13275 = vmatpush3.bf16.msra.mxu0 %v16408_v13  ;;  %v4216_v49 = vmul.f32 %v14944_v3, %v17101_v43  ;;  %v13880_v3 = vld [vmem:[#allocation10 + $0xc0] ss:$12 sps:$4 sm:$0xff]  }
 0x66a   : > { %13276 = vmatprep.subr.bf16.mxu0 %v16410_v10  ;;  %v4245_v40 = vpack.c.bf16 %v4214_v48, %v4213_v46  ;;  %v13879_v46 = vld [vmem:[#allocation10 + $0xdc] ss:$12 sps:$4 sm:$0xff]  }
 0x66b   : > { %v14946_v62 = vpop.eup %14945 }
 0x66c   : > { %v4215_v58 = vmul.f32 %v14946_v62, %v17113_v37  ;;  %13278 = vmatprep.mubr.msk.bf16.mxu0 %vm3102_vm0, %v4245_v40  ;;  %v14948_v36 = vpop.eup %14947  ;;  %v13882_v40 = vld [vmem:[#allocation10 + $0xc4] ss:$12 sps:$4 sm:$0xff]  }
 0x66d   : > { %13277 = vmatpush3.bf16.msra.mxu0 %v16410_v10  ;;  %v4218_v13 = vmul.f32 %v14948_v36, %v17109_v4  ;;  %v13835_v10 = vld [vmem:[#allocation10 + $0xa8] ss:$12 sps:$4 sm:$0xff]  }
 0x66e   : > { %v4246_v39 = vpack.c.bf16 %v4216_v49, %v4215_v58  ;;  %5320 = vmatprep.subr.bf16.mxu0 %v13837_v18  ;;  %v13843_v4 = vld [vmem:[#allocation10 + $0x7c] ss:$12 sps:$4 sm:$0xff]   ;;  %v13885_v58 = vld [vmem:[#allocation10 + $0x22c] ss:$12 sps:$4 sm:$0xff]  }
 0x66f   : > { %v14950_v38 = vpop.eup %14949  ;;  %v13883_v49 = vld [vmem:[#allocation10 + $0x228] ss:$12 sps:$4 sm:$0xff]   ;;  %5393 = vmatprep.subr.bf16.mxu1 %v13885_v58  ;;  %v13897_v18 = vld [vmem:[#allocation10 + $0x1cc] ss:$12 sps:$4 sm:$0xff]  }
 0x670   : > { %13279 = vmatmul.mubr.msk.bf16.vlgmr.msra.gmra.mxu0 %vm3102_vm0, %v4246_v39  ;;  %v4217_v42 = vmul.f32 %v14950_v38, %v17119_v16  ;;  %v14952_v57 = vpop.eup %14951  ;;  %v13838_v16 = vld [vmem:[#allocation10 + $0x90] ss:$12 sps:$4 sm:$0xff]   ;;  %v13888_v39 = vld [vmem:[#allocation10 + $0x214] ss:$12 sps:$4 sm:$0xff]   ;;  %5394 = vmatpush1.bf16.msra.mxu1 %v13883_v49 }
 0x671   : > { %v4220_v37 = vmul.f32 %v14952_v57, %v17117_v26  ;;  %5321 = vmatpush1.bf16.msra.mxu0 %v13835_v10  ;;  %v13847_v26 = vld [vmem:[#allocation10 + $0x48] ss:$12 sps:$4 sm:$0xff]   ;;  %5395 = vmatprep.subr.bf16.mxu1 %v13888_v39 }
 0x672   : > { %v4247_v54 = vpack.c.bf16 %v4218_v13, %v4217_v42  ;;  %5322 = vmatprep.subr.bf16.mxu0 %v13840_v41  ;;  %v13886_v42 = vld [vmem:[#allocation10 + $0x210] ss:$12 sps:$4 sm:$0xff]   ;;  %v13895_v41 = vld [vmem:[#allocation10 + $0x1c8] ss:$12 sps:$4 sm:$0xff]  }
 0x673   : > { %v14954_v61 = vpop.eup %14953  ;;  %v13891_v13 = vld [vmem:[#allocation10 + $0x1fc] ss:$12 sps:$4 sm:$0xff]  }
 0x674   : > { %13282 = vmatprep.mubr.msk.bf16.mxu0 %vm3102_vm0, %v4247_v54  ;;  %v4219_v43 = vmul.f32 %v14954_v61, %v17128_v8  ;;  %v13849_v8 = vld [vmem:[#allocation10 + $0x4c] ss:$12 sps:$4 sm:$0xff]   ;;  %5396 = vmatpush1.bf16.msra.mxu1 %v13886_v42 }
 0x675   : > { %5323 = vmatpush1.bf16.msra.mxu0 %v13838_v16  ;;  %v13889_v61 = vld [vmem:[#allocation10 + $0x1f8] ss:$12 sps:$4 sm:$0xff]   ;;  %5397 = vmatprep.subr.bf16.mxu1 %v13891_v13  ;;  %v13900_v16 = vld [vmem:[#allocation10 + $0x1b4] ss:$12 sps:$4 sm:$0xff]  }
 0x676   : > { %v4248_v34 = vpack.c.bf16 %v4220_v37, %v4219_v43  ;;  %5324 = vmatprep.subr.bf16.mxu0 %v13843_v4  ;;  %v13894_v37 = vld [vmem:[#allocation10 + $0x1e4] ss:$12 sps:$4 sm:$0xff]   ;;  %v13913_v13 = vld [vmem:[#allocation10 + $0x200] ss:$12 sps:$4 sm:$0xff]  }
 0x677   : > { %v13898_v4 = vld [vmem:[#allocation10 + $0x1b0] ss:$12 sps:$4 sm:$0xff]  }
 0x678   : > { %13283 = vmatmul.mubr.msk.bf16.gmra.mxu0 %vm3102_vm0, %v4248_v34  ;;  %5398 = vmatpush1.bf16.msra.mxu1 %v13889_v61  ;;  %v13892_v34 = vld [vmem:[#allocation10 + $0x1e0] ss:$12 sps:$4 sm:$0xff]  }
 0x679   : > { %5325 = vmatpush1.bf16.msra.mxu0 %v13841_v32  ;;  %5399 = vmatprep.subr.bf16.mxu1 %v13894_v37 }
 0x67a   : > { %5326 = vmatprep.subr.bf16.mxu0 %v13846_v6  ;;  %v13903_v6 = vld [vmem:[#allocation10 + $0x19c] ss:$12 sps:$4 sm:$0xff]  }
 0x67c   : > { %5400 = vmatpush1.bf16.msra.mxu1 %v13892_v34  ;;  %v13925_v34 = vld [vmem:[#allocation10 + $0x1a0] ss:$12 sps:$4 sm:$0xff]  }
 0x67d   : > { %5327 = vmatpush1.bf16.msra.mxu0 %v13844_v60  ;;  %5401 = vmatprep.subr.bf16.mxu1 %v13897_v18  ;;  %v13901_v60 = vld [vmem:[#allocation10 + $0x198] ss:$12 sps:$4 sm:$0xff]   ;;  %v13928_v18 = vld [vmem:[#allocation10 + $0x188] ss:$12 sps:$4 sm:$0xff]  }
 0x67e   : > { %5328 = vmatprep.subr.bf16.mxu0 %v13849_v8 }
 0x680   : > { %5402 = vmatpush1.bf16.msra.mxu1 %v13895_v41 }
 0x681   : > { %5329 = vmatpush1.bf16.msra.mxu0 %v13847_v26  ;;  %5403 = vmatprep.subr.bf16.mxu1 %v13900_v16  ;;  %v13906_v26 = vld [vmem:[#allocation10 + $0x184] ss:$12 sps:$4 sm:$0xff]  }
 0x682   : > { %5330 = vmatprep.subr.bf16.mxu0 %v13852_v5  ;;  %v13904_v5 = vld [vmem:[#allocation10 + $0x180] ss:$12 sps:$4 sm:$0xff]  }
 0x684   : > { %5404 = vmatpush1.bf16.msra.mxu1 %v13898_v4 }
 0x685   : > { %5331 = vmatpush1.bf16.msra.mxu0 %v13850_v29  ;;  %5405 = vmatprep.subr.bf16.mxu1 %v13903_v6 }
 0x686   : > { %5332 = vmatprep.subr.bf16.mxu0 %v13855_v2  ;;  %v13907_v2 = vld [vmem:[#allocation10 + $0x230] ss:$12 sps:$4 sm:$0xff]  }
 0x688   : > { %5406 = vmatpush1.bf16.msra.mxu1 %v13901_v60 }
 0x689   : > { %5333 = vmatpush1.bf16.msra.mxu0 %v13853_v17  ;;  %5407 = vmatprep.subr.bf16.mxu1 %v13906_v26  ;;  %v13908_v17 = vld [vmem:[#allocation10 + $0x170] ss:$12 sps:$4 sm:$0xff]  }
 0x68a   : > { %5334 = vmatprep.subr.bf16.mxu0 %v13858_v1 }
 0x68c   : > { %5408 = vmatpush1.bf16.msra.mxu1 %v13904_v5 }
 0x68d   : > { %5335 = vmatpush1.bf16.msra.mxu0 %v13856_v27  ;;  %12794 = vmatprep.subr.bf16.mxu1 %v13908_v17 }
 0x68e   : > { %5336 = vmatprep.subr.bf16.mxu0 %v13861_v33 }
 0x691   : > { %5337 = vmatpush2.bf16.msra.mxu0 %v13859_v47 }
 0x692   : > { %5338 = vmatprep.subr.bf16.mxu0 %v13864_v53 }
 0x695   : > { %5339 = vmatpush2.bf16.msra.mxu0 %v13862_v44 }
 0x696   : > { %5340 = vmatprep.subr.bf16.mxu0 %v13867_v14 }
 0x699   : > { %5341 = vmatpush2.bf16.msra.mxu0 %v13865_v19 }
 0x69a   : > { %5342 = vmatprep.subr.bf16.mxu0 %v13870_v50 }
 0x69d   : > { %v17230_v0 = vpop.f32.mrf.mxu1  ;;  %5343 = vmatpush2.bf16.msra.mxu0 %v13868_v59 }
 0x69e   : > { %5344 = vmatprep.subr.bf16.mxu0 %v13873_v11 }
 0x69f   : > { %v4376_v56 = vpop.f32.mrf.mxu1 }
 0x6a1   : > { %v17232_v30 = vpop.f32.mrf.mxu1  ;;  %5345 = vmatpush2.bf16.msra.mxu0 %v13871_v21 }
 0x6a2   : > { %5346 = vmatprep.subr.bf16.mxu0 %v13876_v52  ;;  %v4720_v14 = vpack.c.bf16 %v17232_v30, %v17230_v0 }
 0x6a3   : > { %v4379_v63 = vpop.f32.mrf.mxu1 }
 0x6a4   : > { %v4719_v10 = vpack.c.bf16 %v4379_v63, %v4376_v56 }
 0x6a5   : > { %5347 = vmatpush2.bf16.msra.mxu0 %v13874_v28 }
 0x6a6   : > { %5348 = vmatprep.subr.bf16.mxu0 %v13879_v46 }
 0x6a8   : > { %v17234_v15 = vpop.f32.mrf.mxu1 }
 0x6a9   : > { %5349 = vmatpush2.bf16.msra.mxu0 %v13877_v7 }
 0x6aa   : > { %v17236_v20 = vpop.f32.mrf.mxu1  ;;  %5350 = vmatprep.subr.bf16.mxu0 %v13882_v40 }
 0x6ac   : > { %v17238_v48 = vpop.f32.mrf.mxu1 }
 0x6ad   : > { %5351 = vmatpush2.bf16.msra.mxu0 %v13880_v3  ;;  %v4722_v30 = vpack.c.bf16 %v17238_v48, %v17234_v15  ;;  %v4715_v15 = vpack.c.bf16 %v17187_v23, %v17181_v22  ;;  %v13919_v22 = vld [vmem:[#allocation10 + $0x1d0] ss:$12 sps:$4 sm:$0xff]  }
 0x6ae   : > { %v17240_v62 = vpop.f32.mrf.mxu1  ;;  %13302 = vmatprep.subr.bf16.mxu0 %v13907_v2 }
 0x6af   : > { %v4721_v0 = vpack.c.bf16 %v17240_v62, %v17236_v20  ;;  %v13910_v62 = vld [vmem:[#allocation10 + $0x218] ss:$12 sps:$4 sm:$0xff]  }
 0x6c0   : > { %v13264_v36 = vpop.f32.mrf.mxu1 }
 0x6c2   : > { %v4530_v38 = vpop.f32.mrf.mxu1 }
 0x6c4   : > { %v13265_v57 = vpop.f32.mrf.mxu1 }
 0x6c5   : > { %v4728_v50 = vpack.c.bf16 %v13265_v57, %v13264_v36 }
 0x6c6   : > { %v4533_v54 = vpop.f32.mrf.mxu1 }
 0x6c7   : > { %v4727_v43 = vpack.c.bf16 %v4533_v54, %v4530_v38  ;;  %v13916_v54 = vld [vmem:[#allocation10 + $0x1e8] ss:$12 sps:$4 sm:$0xff]  }
 0x6c8   : > { %v13268_v32 = vpop.f32.mrf.mxu1 }
 0x6c9   : > { %4755 = vrot.lane.b32.xlu1 %v4727_v43, %s15433_s2  ;;  %v13922_v43 = vld [vmem:[#allocation10 + $0x1b8] ss:$12 sps:$4 sm:$0xff]  }
 0x6ca   : > { %v4546_v8 = vpop.f32.mrf.mxu1 }
 0x6cc   : > { %v13269_v29 = vpop.f32.mrf.mxu1 }
 0x6cd   : > { %4743 = vrot.lane.b32.xlu1 %v4719_v10, %s15433_s2  ;;  %v4730_v7 = vpack.c.bf16 %v13269_v29, %v13268_v32  ;;  %v13909_v32 = vld [vmem:[#allocation10 + $0xb0] ss:$12 sps:$4 sm:$0xff]  }
 0x6ce   : > { %v4549_v1 = vpop.f32.mrf.mxu1 }
 0x6cf   : > { %v4729_v21 = vpack.c.bf16 %v4549_v1, %v4546_v8  ;;  %v13911_v8 = vld [vmem:[#allocation10 + $0x158] ss:$12 sps:$4 sm:$0xff]  }
 0x6e1   : > { %v13296_v27 = vpop.f32.mrf.mxu1 }
 0x6e3   : > { %v4684_v47 = vpop.f32.mrf.mxu1 }
 0x6e5   : > { %v13297_v33 = vpop.f32.mrf.mxu1 }
 0x6e6   : > { %v4736_v44 = vpack.c.bf16 %v13297_v33, %v13296_v27  ;;  %v13914_v27 = vld [vmem:[#allocation10 + $0x140] ss:$12 sps:$4 sm:$0xff]  }
 0x6e7   : > { %v4687_v53 = vpop.f32.mrf.mxu1 }
 0x6e8   : > { %v4735_v56 = vpack.c.bf16 %v4687_v53, %v4684_v47  ;;  %4769 = vrot.lane.b32.xlu1 %v4736_v44, %s15433_s2 }
 0x6e9   : > { %v13300_v19 = vpop.f32.mrf.mxu1 }
 0x6ea   : > { %4767 = vrot.lane.b32.xlu0 %v4735_v56, %s15433_s2 }
 0x6eb   : > { %v4700_v59 = vpop.f32.mrf.mxu1 }
 0x6ec   : > { %4745 = vrot.lane.b32.xlu1 %v4720_v14, %s15433_s2  ;;  %v13915_v14 = vld [vmem:[#allocation10 + $0x80] ss:$12 sps:$4 sm:$0xff]  }
 0x6ed   : > { %v13301_v63 = vpop.f32.mrf.mxu1 }
 0x6ee   : > { %4757 = vrot.lane.b32.xlu0 %v4728_v50, %s15433_s2  ;;  %v4738_v52 = vpack.c.bf16 %v13301_v63, %v13300_v19  ;;  %v13917_v63 = vld [vmem:[#allocation10 + $0x128] ss:$12 sps:$4 sm:$0xff]  }
 0x6ef   : > { %v4703_v11 = vpop.f32.mrf.mxu1 }
 0x6f0   : > { %v4737_v28 = vpack.c.bf16 %v4703_v11, %v4700_v59  ;;  %4759 = vrot.lane.b32.xlu1 %v4729_v21, %s15433_s2 }
 0x6f2   : > { %4771 = vrot.lane.b32.xlu0 %v4737_v28, %s15433_s2  ;;  %v13920_v28 = vld [vmem:[#allocation10 + $0x110] ss:$12 sps:$4 sm:$0xff]  }
 0x6f4   : > { %4773 = vrot.lane.b32.xlu1 %v4738_v52, %s15433_s2 }
 0x6f6   : > { %4747 = vrot.lane.b32.xlu0 %v4721_v0, %s15433_s2 }
 0x6f8   : > { %4749 = vrot.lane.b32.xlu1 %v4722_v30, %s15433_s2 }
 0x6fa   : > { %4761 = vrot.lane.b32.xlu0 %v4730_v7, %s15433_s2 }
 0x720   : > { %v13248_v46 = vpop.f32.mrf.mxu0 }
 0x722   : > { %v4453_v3 = vpop.f32.mrf.mxu0 }
 0x724   : > { %v13249_v40 = vpop.f32.mrf.mxu0 }
 0x725   : > { %v4724_v29 = vpack.c.bf16 %v13249_v40, %v13248_v46  ;;  %v13921_v46 = vld [vmem:[#allocation10 + $0x50] ss:$12 sps:$4 sm:$0xff]  }
 0x726   : > { %v4456_v49 = vpop.f32.mrf.mxu0 }
 0x727   : > { %v4723_v58 = vpack.c.bf16 %v4456_v49, %v4453_v3 }
 0x728   : > { %v17260_v39 = vpop.f32.mrf.mxu0 }
 0x72a   : > { %v4469_v38 = vpop.f32.mrf.mxu0 }
 0x72c   : > { %v17272_v57 = vpop.f32.mrf.mxu0 }
 0x72d   : > { %v4726_v30 = vpack.c.bf16 %v17272_v57, %v17260_v39 }
 0x72e   : > { %v4472_v61 = vpop.f32.mrf.mxu0 }
 0x72f   : > { %v4725_v47 = vpack.c.bf16 %v4472_v61, %v4469_v38 }
 0x730   : > { %v13280_v23 = vpop.f32.mrf.mxu0 }
 0x732   : > { %v4607_v37 = vpop.f32.mrf.mxu0 }
 0x734   : > { %v13281_v10 = vpop.f32.mrf.mxu0 }
 0x735   : > { %v4732_v56 = vpack.c.bf16 %v13281_v10, %v13280_v23 }
 0x736   : > { %v4610_v41 = vpop.f32.mrf.mxu0 }
 0x737   : > { %v4731_v4 = vpack.c.bf16 %v4610_v41, %v4607_v37 }
 0x738   : > { %v17274_v6 = vpop.f32.mrf.mxu0 }
 0x73a   : > { %v4623_v17 = vpop.f32.mrf.mxu0 }
 0x73b   : > { %v4756_v36 = vpop.permute.xlu1 %4755 }
 0x73c   : > { %v17263_v20 = vsel %vm3102_vm0, %v4723_v58, %v4756_v36  ;;  %v13285_v59 = vpop.f32.mrf.mxu0  ;;  %v13924_v58 = vld [vmem:[#allocation10 + $0x38] ss:$12 sps:$4 sm:$0xff]   ;;  %v13926_v36 = vld [vmem:[#allocation10 + $0xe0] ss:$12 sps:$4 sm:$0xff]  }
 0x73d   : > { %5352 = vmatprep.mubr.bf16.mxu0 %v17263_v20 }
 0x73f   : > { %v4744_v48 = vpop.permute.xlu1 %4743 }
 0x740   : > { %v17269_v42 = vsel %vm3102_vm0, %v4715_v15, %v4744_v48  ;;  %v4734_v15 = vpack.c.bf16 %v13285_v59, %v17274_v6  ;;  %v13927_v48 = vld [vmem:[#allocation10 + $0x20] ss:$12 sps:$4 sm:$0xff]  }
 0x741   : > { %5353 = vmatmul.mubr.bf16.vlgmr.msra.gmra.mxu0 %v17269_v42 }
 0x742   : > { %13303 = vmatpush3.bf16.msra.mxu0 %v13907_v2  ;;  %v13912_v2 = vld [vmem:[#allocation10 + $0x98] ss:$12 sps:$4 sm:$0xff]  }
 0x743   : > { %13304 = vmatprep.subr.bf16.mxu0 %v13910_v62 }
 0x746   : > { %13305 = vmatpush3.bf16.msra.mxu0 %v13910_v62  ;;  %v13929_v62 = vld [vmem:[#allocation10 + $0xc8] ss:$12 sps:$4 sm:$0xff]  }
 0x747   : > { %13306 = vmatprep.subr.bf16.mxu0 %v13913_v13 }
 0x74a   : > { %13307 = vmatpush3.bf16.msra.mxu0 %v13913_v13  ;;  %v13930_v13 = vld [vmem:[#allocation10 + $0x8] ss:$12 sps:$4 sm:$0xff]  }
 0x74b   : > { %13308 = vmatprep.subr.bf16.mxu0 %v13916_v54 }
 0x74e   : > { %13309 = vmatpush3.bf16.msra.mxu0 %v13916_v54 }
 0x74f   : > { %13310 = vmatprep.subr.bf16.mxu0 %v13919_v22 }
 0x752   : > { %13311 = vmatpush3.bf16.msra.mxu0 %v13919_v22 }
 0x753   : > { %13312 = vmatprep.subr.bf16.mxu0 %v13922_v43 }
 0x756   : > { %13313 = vmatpush3.bf16.msra.mxu0 %v13922_v43 }
 0x757   : > { %13314 = vmatprep.subr.bf16.mxu0 %v13925_v34 }
 0x75a   : > { %v4770_v16 = vpop.permute.xlu1 %4769  ;;  %13315 = vmatpush3.bf16.msra.mxu0 %v13925_v34 }
 0x75b   : > { %13316 = vmatprep.subr.bf16.mxu0 %v13928_v18  ;;  %v4813_v21 = vsel %vm3102_vm0, %v4732_v56, %v4770_v16  ;;  %v19294_v56 = vld [vmem:[#allocation34_spill] sm:$0xff] }
 0x75c   : > { %v4768_v60 = vpop.permute.xlu0 %4767 }
 0x75d   : > { %v4809_v26 = vsel %vm3102_vm0, %v4731_v4, %v4768_v60 }
 0x75e   : > { %5426 = vmatmul.mubr.bf16.vlgmr.msra.gmra.mxu1 %v4809_v26  ;;  %v4746_v5 = vpop.permute.xlu1 %4745  ;;  %13317 = vmatpush3.bf16.msra.mxu0 %v13928_v18 }
 0x75f   : > { %12795 = vmatpush3.bf16.msra.mxu1 %v13909_v32  ;;  %5435 = vmatprep.mubr.bf16.mxu1 %v19290_v31  ;;  %v17283_v44 = vsel %vm3102_vm0, %v4716_v55, %v4746_v5  ;;  %v4626_v55 = vpop.f32.mrf.mxu0 }
 0x760   : > { %v4758_v1 = vpop.permute.xlu0 %4757  ;;  %12796 = vmatprep.subr.bf16.mxu1 %v13911_v8  ;;  %v4733_v7 = vpack.c.bf16 %v4626_v55, %v4623_v17  ;;  %v19295_v55 = vld [vmem:[#allocation33_spill] sm:$0xff] }
 0x761   : > { %v4797_v33 = vsel %vm3102_vm0, %v4724_v29, %v4758_v1  ;;  %v4919_v1 = vld [vmem:[#allocation11] sm:$0x7] }
 0x762   : > { %5362 = vmatprep.mubr.bf16.mxu0 %v4797_v33  ;;  %v4760_v53 = vpop.permute.xlu1 %4759 }
 0x763   : > { %5363 = vmatmul.mubr.bf16.gmra.mxu0 %v17283_v44  ;;  %12797 = vmatpush3.bf16.msra.mxu1 %v13912_v2  ;;  %v4801_v19 = vsel %vm3102_vm0, %v4725_v47, %v4760_v53  ;;  %v19293_v47 = vld [vmem:[#allocation32_spill] sm:$0xff] }
 0x764   : > { %v4772_v50 = vpop.permute.xlu0 %4771  ;;  %5372 = vmatprep.mubr.bf16.mxu0 %v4801_v19  ;;  %12798 = vmatprep.subr.bf16.mxu1 %v13914_v27 }
 0x765   : > { %v4817_v12 = vsel %vm3102_vm0, %v4733_v7, %v4772_v50 }
 0x766   : > { %5436 = vmatmul.mubr.bf16.gmra.mxu1 %v4813_v21  ;;  %v4774_v52 = vpop.permute.xlu1 %4773 }
 0x767   : > { %12799 = vmatpush3.bf16.msra.mxu1 %v13915_v14  ;;  %5445 = vmatprep.mubr.bf16.mxu1 %v19290_v31  ;;  %v4821_v38 = vsel %vm3102_vm0, %v4734_v15, %v4774_v52 }
 0x768   : > { %v4748_v11 = vpop.permute.xlu0 %4747  ;;  %12800 = vmatprep.subr.bf16.mxu1 %v13917_v63 }
 0x769   : > { %v4785_v0 = vsel %vm3102_vm0, %v4717_v9, %v4748_v11  ;;  %v17352_v11 = vrot.slane %v4919_v1, %v19295_v55 }
 0x76a   : > { %v4750_v49 = vpop.permute.xlu1 %4749 }
 0x76b   : > { %5373 = vmatmul.mubr.bf16.gmra.mxu0 %v4785_v0  ;;  %12801 = vmatpush3.bf16.msra.mxu1 %v13918_v35  ;;  %v4789_v39 = vsel %vm3102_vm0, %v4718_v51, %v4750_v49 }
 0x76c   : > { %v4762_v3 = vpop.permute.xlu0 %4761  ;;  %12802 = vmatprep.subr.bf16.mxu1 %v13920_v28 }
 0x76d   : > { %v4805_v40 = vsel %vm3102_vm0, %v4726_v30, %v4762_v3  ;;  %v14983_v3 = vld [vmem:[%s15719_s14 + $0x8] sm:$0xff] }
 0x76e   : > { %5382 = vmatprep.mubr.bf16.mxu0 %v4805_v40  ;;  %5446 = vmatmul.mubr.bf16.gmra.mxu1 %v4817_v12 }
 0x76f   : > { %12803 = vmatpush3.bf16.msra.mxu1 %v13921_v46  ;;  %5455 = vmatprep.mubr.bf16.mxu1 %v19290_v31 }
 0x770   : > { %12804 = vmatprep.subr.bf16.mxu1 %v13923_v24 }
 0x773   : > { %5383 = vmatmul.mubr.bf16.gmra.mxu0 %v4789_v39  ;;  %12805 = vmatpush3.bf16.msra.mxu1 %v13924_v58 }
 0x774   : > { %13318 = vmatprep.mubr.bf16.mxu0 %v4809_v26  ;;  %12806 = vmatprep.subr.bf16.mxu1 %v13926_v36  ;;  %v14984_v36 = vld [vmem:[%s15719_s14] sm:$0xff] }
 0x776   : > { %5456 = vmatmul.mubr.bf16.gmra.mxu1 %v4821_v38 }
 0x777   : > { %12807 = vmatpush3.bf16.msra.mxu1 %v13927_v48  ;;  %5498 = vmatprep.mubr.bf16.mxu1 %v17263_v20 }
 0x778   : > { %12808 = vmatprep.subr.bf16.mxu1 %v13929_v62 }
 0x77b   : > { %12809 = vmatpush3.bf16.msra.mxu1 %v13930_v13  ;;  %13319 = vmatmul.mubr.bf16.vlgmr.msra.gmra.mxu0 %v4813_v21 }
 0x77c   : > { %13322 = vmatprep.mubr.bf16.mxu0 %v4817_v12 }
 0x77e   : > { %5499 = vmatmul.mubr.bf16.vlgmr.msra.gmra.mxu1 %v17269_v42 }
 0x77f   : > { %5506 = vmatprep.mubr.bf16.mxu1 %v4797_v33  ;;  %v17336_v33 = vrot.slane %v4919_v1, %v19293_v47 }
 0x783   : > { %13323 = vmatmul.mubr.bf16.gmra.mxu0 %v4821_v38 }
 0x784   : > { %7779 = vmatprep.mubr.bf16.mxu0 %v19290_v31 }
 0x786   : > { %5507 = vmatmul.mubr.bf16.gmra.mxu1 %v17283_v44 }
 0x787   : > { %5514 = vmatprep.mubr.bf16.mxu1 %v4801_v19  ;;  %v17343_v19 = vrot.slane %v4919_v1, %v19294_v56 }
 0x78e   : > { %5515 = vmatmul.mubr.bf16.gmra.mxu1 %v4785_v0 }
 0x78f   : > { %5522 = vmatprep.mubr.bf16.mxu1 %v4805_v40 }
 0x796   : > { %5523 = vmatmul.mubr.bf16.gmra.mxu1 %v4789_v39 }
 0x801   : > { %v5354_v25 = vpop.f32.mrf.mxu0 }
 0x802   : > { %v5355_v21 = vadd.f32 %v5354_v25, %v17343_v19 }
 0x803   : > { %v5356_v45 = vpop.f32.mrf.mxu0 }
 0x804   : > { %v5357_v59 = vadd.f32 %v5356_v45, %v17336_v33  ;;  %v14985_v45 = vld [vmem:[%s15719_s14 + $0x20] sm:$0xff] }
 0x805   : > { %v5358_v51 = vpop.f32.mrf.mxu0 }
 0x806   : > { %v5359_v46 = vadd.f32 %v5358_v51, %v17343_v19 }
 0x807   : > { %v5360_v54 = vpop.f32.mrf.mxu0 }
 0x808   : > { %v5361_v28 = vadd.f32 %v5360_v54, %v17336_v33 }
 0x81e   : > { %v5427_v20 = vpop.f32.mrf.mxu1 }
 0x81f   : > { %v5428_v52 = vadd.f32 %v5427_v20, %v5355_v21 }
 0x820   : > { %v5429_v57 = vpop.f32.mrf.mxu1 }
 0x821   : > { %v5430_v9 = vadd.f32 %v5429_v57, %v5357_v59  ;;  %v17362_v39 = vadd.f32 %v14984_v36, %v5428_v52 }
 0x822   : > { %v5431_v61 = vpop.f32.mrf.mxu1 }
 0x823   : > { %v5364_v22 = vpop.f32.mrf.mxu0  ;;  %v17357_v24 = vadd.f32 %v14983_v3, %v5430_v9  ;;  %19297 = vst [vmem:[#allocation53_spill] sm:$0xff] %v17362_v39  ;;  %v5432_v15 = vadd.f32 %v5431_v61, %v5359_v46  ;;  %v14988_v46 = vld [vmem:[%s15719_s14 + $0x38] sm:$0xff] }
 0x824   : > { %v5433_v23 = vpop.f32.mrf.mxu1  ;;  %v5365_v48 = vadd.f32 %v5364_v22, %v17343_v19  ;;  %v14987_v22 = vld [vmem:[%s15719_s14 + $0x18] sm:$0xff] }
 0x825   : > { %v5366_v42 = vpop.f32.mrf.mxu0  ;;  %19296 = vst [vmem:[#allocation41_spill] sm:$0xff] %v17357_v24  ;;  %v5434_v12 = vadd.f32 %v5433_v23, %v5361_v28  ;;  %v5622_v57 = vadd.f32 %v17357_v24, %v17362_v39  ;;  %v17376_v59 = vadd.f32 %v14987_v22, %v5432_v15  ;;  %v14993_v22 = vld [vmem:[%s15719_s14 + $0x48] sm:$0xff] }
 0x826   : > { %v5437_v43 = vpop.f32.mrf.mxu1  ;;  %v5367_v49 = vadd.f32 %v5366_v42, %v17336_v33  ;;  %v14986_v42 = vld [vmem:[%s15719_s14 + $0x10] sm:$0xff] }
 0x827   : > { %v17307_v37 = vpop.f32.mrf.mxu0  ;;  %v17366_v51 = vadd.f32 %v14985_v45, %v5434_v12  ;;  %19300 = vst [vmem:[#allocation45_spill] sm:$0xff] %v17376_v59  ;;  %v5438_v21 = vadd.f32 %v5437_v43, %v5365_v48  ;;  %v14989_v12 = vld [vmem:[%s15719_s14 + $0x28] sm:$0xff] }
 0x828   : > { %v5439_v34 = vpop.f32.mrf.mxu1  ;;  %v5369_v28 = vadd.f32 %v17307_v37, %v17343_v19 }
 0x829   : > { %v5370_v10 = vpop.f32.mrf.mxu0  ;;  %19298 = vst [vmem:[#allocation40_spill] sm:$0xff] %v17366_v51  ;;  %v5440_v54 = vadd.f32 %v5439_v34, %v5367_v49  ;;  %v14990_v49 = vld [vmem:[%s15719_s14 + $0x30] sm:$0xff] }
 0x82a   : > { %v17309_v18 = vpop.f32.mrf.mxu1  ;;  %v5371_v23 = vadd.f32 %v5370_v10, %v17336_v33 }
 0x82b   : > { %v17311_v41 = vpop.f32.mrf.mxu0  ;;  %v17385_v3 = vadd.f32 %v14988_v46, %v5440_v54  ;;  %v5442_v48 = vadd.f32 %v17309_v18, %v5369_v28  ;;  %v14996_v46 = vld [vmem:[%s15719_s14 + $0x60] sm:$0xff] }
 0x82c   : > { %v17313_v16 = vpop.f32.mrf.mxu1 }
 0x82d   : > { %v5376_v4 = vpop.f32.mrf.mxu0  ;;  %19301 = vst [vmem:[#allocation51_spill] sm:$0xff] %v17385_v3  ;;  %v5444_v43 = vadd.f32 %v17313_v16, %v5371_v23 }
 0x82e   : > { %v17315_v32 = vpop.f32.mrf.mxu1 }
 0x82f   : > { %v17317_v6 = vpop.f32.mrf.mxu0 }
 0x830   : > { %v17319_v60 = vpop.f32.mrf.mxu1 }
 0x831   : > { %v17321_v8 = vpop.f32.mrf.mxu0 }
 0x832   : > { %v17323_v26 = vpop.f32.mrf.mxu1  ;;  %v5381_v45 = vadd.f32 %v17321_v8, %v17336_v33  ;;  %v5379_v8 = vadd.f32 %v17317_v6, %v17343_v19  ;;  %v14995_v6 = vld [vmem:[%s15719_s14 + $0x58] sm:$0xff] }
 0x833   : > { %v17325_v5 = vpop.f32.mrf.mxu0 }
 0x834   : > { %v17327_v29 = vpop.f32.mrf.mxu1 }
 0x835   : > { %v17329_v2 = vpop.f32.mrf.mxu0 }
 0x836   : > { %v17331_v17 = vpop.f32.mrf.mxu1 }
 0x837   : > { %v17333_v27 = vpop.f32.mrf.mxu0 }
 0x838   : > { %v17338_v44 = vpop.f32.mrf.mxu1 }
 0x839   : > { %v17340_v53 = vpop.f32.mrf.mxu0 }
 0x83a   : > { %v17345_v14 = vpop.f32.mrf.mxu1 }
 0x83b   : > { %v13320_v50 = vpop.f32.mrf.mxu0 }
 0x83c   : > { %v17348_v63 = vpop.f32.mrf.mxu1 }
 0x83d   : > { %v5565_v0 = vpop.f32.mrf.mxu0 }
 0x83e   : > { %v12810_v35 = vpop.f32.mrf.mxu1 }
 0x83f   : > { %v13321_v62 = vpop.f32.mrf.mxu0 }
 0x840   : > { %v12811_v30 = vpop.f32.mrf.mxu1 }
 0x841   : > { %v12812_v7 = vadd.f32 %v12811_v30, %v12810_v35  ;;  %v5568_v9 = vpop.f32.mrf.mxu0 }
 0x842   : > { %v12813_v40 = vpop.f32.mrf.mxu1 }
 0x843   : > { %v5501_v58 = vadd.f32 %v12812_v7, %v17352_v11  ;;  %v5626_v7 = vadd.f32 %v17366_v51, %v17376_v59  ;;  %v17397_v36 = vpop.f32.mrf.mxu0 }
 0x844   : > { %v12814_v38 = vpop.f32.mrf.mxu1 }
 0x845   : > { %v5566_v13 = vadd.f32 %v5565_v0, %v5501_v58  ;;  %v12815_v25 = vadd.f32 %v12814_v38, %v12813_v40  ;;  %v5377_v0 = vadd.f32 %v5376_v4, %v17336_v33  ;;  %v17393_v58 = vadd.f32 %v14990_v49, %v5438_v21 }
 0x846   : > { %v12816_v20 = vpop.f32.mrf.mxu1  ;;  %v5375_v4 = vadd.f32 %v17311_v41, %v17343_v19  ;;  %v14992_v41 = vld [vmem:[%s15719_s14 + $0x40] sm:$0xff]  ;;  %v17417_v21 = vadd.f32 %v14993_v22, %v5442_v48  ;;  %v15000_v22 = vld [vmem:[%s15719_s14 + $0x98] sm:$0xff] }
 0x847   : > { %v17372_v1 = vadd.f32 %v14986_v42, %v5566_v13  ;;  %v5504_v61 = vadd.f32 %v12815_v25, %v17352_v11  ;;  %19303 = vst [vmem:[#allocation52_spill] sm:$0xff] %v17393_v58  ;;  %v5450_v25 = vadd.f32 %v17319_v60, %v5377_v0  ;;  %v5581_v42 = vpop.f32.mrf.mxu0  ;;  %v14997_v48 = vld [vmem:[%s15719_s14 + $0x80] sm:$0xff] }
 0x848   : > { %v12817_v35 = vpop.f32.mrf.mxu1  ;;  %v5448_v60 = vadd.f32 %v17315_v32, %v5375_v4  ;;  %19306 = vst [vmem:[#allocation43_spill] sm:$0xff] %v17417_v21  ;;  %v5387_v32 = vadd.f32 %v17329_v2, %v17336_v33 }
 0x849   : > { %19299 = vst [vmem:[#allocation54_spill] sm:$0xff] %v17372_v1  ;;  %v5569_v34 = vadd.f32 %v5568_v9, %v5504_v61  ;;  %v12818_v52 = vadd.f32 %v12817_v35, %v12816_v20  ;;  %v5623_v10 = vadd.f32 %v5622_v57, %v17372_v1  ;;  %v14991_v57 = vld [vmem:[%s15719_s14 + $0x50] sm:$0xff]  ;;  %v13325_v2 = vpop.f32.mrf.mxu0 }
 0x84a   : > { %v12819_v30 = vpop.f32.mrf.mxu1  ;;  %v17405_v54 = vadd.f32 %v14991_v57, %v5444_v43  ;;  %v17433_v43 = vadd.f32 %v14996_v46, %v5448_v60  ;;  %v14999_v57 = vld [vmem:[%s15719_s14 + $0x78] sm:$0xff]  ;;  %v15004_v46 = vld [vmem:[%s15719_s14 + $0xa0] sm:$0xff] }
 0x84b   : > { %v17389_v40 = vadd.f32 %v14989_v12, %v5569_v34  ;;  %v5509_v37 = vadd.f32 %v12818_v52, %v17352_v11  ;;  %5624 = vadd.xlane.f32.xlu0 %v5623_v10  ;;  %v14994_v34 = vld [vmem:[%s15719_s14 + $0x68] sm:$0xff]  ;;  %v5454_v10 = vadd.f32 %v17327_v29, %v5381_v45  ;;  %v5452_v29 = vadd.f32 %v17323_v26, %v5379_v8 }
 0x84c   : > { %v12820_v15 = vpop.f32.mrf.mxu1  ;;  %19304 = vst [vmem:[#allocation44_spill] sm:$0xff] %v17405_v54  ;;  %v17421_v52 = vadd.f32 %v14994_v34, %v5450_v25  ;;  %19309 = vst [vmem:[#allocation55_spill] sm:$0xff] %v17433_v43  ;;  %v5385_v12 = vadd.f32 %v17325_v5, %v17343_v19  ;;  %v5460_v25 = vadd.f32 %v17338_v44, %v5387_v32  ;;  %v14998_v5 = vld [vmem:[%s15719_s14 + $0x70] sm:$0xff] }
 0x84d   : > { %19302 = vst [vmem:[#allocation39_spill] sm:$0xff] %v17389_v40  ;;  %v5574_v16 = vadd.f32 %v13320_v50, %v5509_v37  ;;  %v12821_v38 = vadd.f32 %v12820_v15, %v12819_v30  ;;  %v5627_v13 = vadd.f32 %v5626_v7, %v17389_v40  ;;  %v5630_v50 = vadd.f32 %v17385_v3, %v17393_v58 }
 0x84e   : > { %v12822_v20 = vpop.f32.mrf.mxu1  ;;  %19307 = vst [vmem:[#allocation60_spill] sm:$0xff] %v17421_v52  ;;  %v5391_v26 = vadd.f32 %v17340_v53, %v17336_v33  ;;  %v5389_v44 = vadd.f32 %v17333_v27, %v17343_v19  ;;  %v15002_v19 = vld [vmem:[%s15719_s14 + $0x90] sm:$0xff] }
 0x84f   : > { %v17408_v23 = vadd.f32 %v14992_v41, %v5574_v16  ;;  %v5512_v18 = vadd.f32 %v12821_v38, %v17352_v11  ;;  %5628 = vadd.xlane.f32.xlu1 %v5627_v13  ;;  %v17440_v16 = vadd.f32 %v14997_v48, %v5454_v10  ;;  %v5638_v13 = vadd.f32 %v17421_v52, %v17433_v43 }
 0x850   : > { %v12823_v61 = vpop.f32.mrf.mxu1  ;;  %v17452_v41 = vadd.f32 %v14999_v57, %v5452_v29  ;;  %v13957_v57 = vld [vmem:[#allocation16 + $0x8a4] ss:$48 sps:$4 sm:$0xff]  }
 0x851   : > { %19305 = vst [vmem:[#allocation57_spill] sm:$0xff] %v17408_v23  ;;  %v5577_v9 = vadd.f32 %v13321_v62, %v5512_v18  ;;  %v12824_v35 = vadd.f32 %v12823_v61, %v12822_v20  ;;  %v5631_v28 = vadd.f32 %v5630_v50, %v17408_v23  ;;  %v5634_v62 = vadd.f32 %v17405_v54, %v17417_v21  ;;  %v5584_v50 = vpop.f32.mrf.mxu0 }
 0x852   : > { %v12825_v0 = vpop.f32.mrf.mxu1  ;;  %19310 = vst [vmem:[#allocation42_spill] sm:$0xff] %v17440_v16  ;;  %19312 = vst [vmem:[#allocation48_spill] sm:$0xff] %v17452_v41  ;;  %v5458_v18 = vadd.f32 %v17331_v17, %v5385_v12  ;;  %v5642_v61 = vadd.f32 %v17440_v16, %v17452_v41  ;;  %v5464_v17 = vadd.f32 %v17348_v63, %v5391_v26  ;;  %v15003_v63 = vld [vmem:[%s15719_s14 + $0xb0] sm:$0xff]  ;;  %v13936_v26 = vld [vmem:[#allocation16 + $0x244] ss:$48 sps:$4 sm:$0xff]   ;;  %7747 = vmatprep.subr.bf16.mxu0 %v13957_v57 }
 0x853   : > { %v17427_v30 = vadd.f32 %v14995_v6, %v5577_v9  ;;  %v5517_v7 = vadd.f32 %v12824_v35, %v17352_v11  ;;  %5632 = vadd.xlane.f32.xlu0 %v5631_v28  ;;  %v17461_v9 = vadd.f32 %v15000_v22, %v5460_v25  ;;  %v15001_v35 = vld [vmem:[%s15719_s14 + $0x88] sm:$0xff] }
 0x854   : > { %v12826_v37 = vpop.f32.mrf.mxu1  ;;  %v17469_v34 = vadd.f32 %v15002_v19, %v5458_v18  ;;  %v13933_v25 = vld [vmem:[#allocation16 + $0x2a4] ss:$48 sps:$4 sm:$0xff]   ;;  %v13937_v18 = vld [vmem:[#allocation16 + $0x1e0] ss:$48 sps:$4 sm:$0xff]  }
 0x855   : > { %19308 = vst [vmem:[#allocation49_spill] sm:$0xff] %v17427_v30  ;;  %v5582_v49 = vadd.f32 %v5581_v42, %v5517_v7  ;;  %v12827_v4 = vadd.f32 %v12826_v37, %v12825_v0  ;;  %v5635_v15 = vadd.f32 %v5634_v62, %v17427_v30  ;;  %19313 = vst [vmem:[#allocation56_spill] sm:$0xff] %v17461_v9  ;;  %7674 = vmatprep.subr.bf16.mxu1 %v13933_v25  ;;  %v13954_v22 = vld [vmem:[#allocation16 + $0x4] ss:$48 sps:$4 sm:$0xff]  }
 0x856   : > { %v12828_v38 = vpop.f32.mrf.mxu1  ;;  %19315 = vst [vmem:[#allocation59_spill] sm:$0xff] %v17469_v34  ;;  %v5462_v0 = vadd.f32 %v17345_v14, %v5389_v44  ;;  %v17475_v62 = vadd.f32 %v15003_v63, %v5464_v17  ;;  %v5646_v37 = vadd.f32 %v17461_v9, %v17469_v34  ;;  %v13945_v44 = vld [vmem:[#allocation16 + $0x124] ss:$48 sps:$4 sm:$0xff]   ;;  %v13952_v17 = vld [vmem:[#allocation16] ss:$48 sps:$4 sm:$0xff]  }
 0x857   : > { %v17448_v45 = vadd.f32 %v14998_v5, %v5582_v49  ;;  %v5520_v20 = vadd.f32 %v12827_v4, %v17352_v11  ;;  %5636 = vadd.xlane.f32.xlu0 %v5635_v15  ;;  %v15005_v49 = vld [vmem:[%s15719_s14 + $0xa8] sm:$0xff]  ;;  %v15006_v15 = vld [vmem:[%s15719_s14 + $0xb8] sm:$0xff]  ;;  %v13934_v5 = vld [vmem:[#allocation16 + $0x240] ss:$48 sps:$4 sm:$0xff]  }
 0x858   : > { %v12829_v60 = vpop.f32.mrf.mxu1  ;;  %19316 = vst [vmem:[#allocation46_spill] sm:$0xff] %v17475_v62  ;;  %v17484_v4 = vadd.f32 %v15005_v49, %v5462_v0 }
 0x859   : > { %19311 = vst [vmem:[#allocation58_spill] sm:$0xff] %v17448_v45  ;;  %v5585_v33 = vadd.f32 %v5584_v50, %v5520_v20  ;;  %v12830_v53 = vadd.f32 %v12829_v60, %v12828_v38  ;;  %v5639_v8 = vadd.f32 %v5638_v13, %v17448_v45  ;;  %v13955_v20 = vld [vmem:[#allocation16 + $0x8a0] ss:$48 sps:$4 sm:$0xff]   ;;  %v13942_v50 = vld [vmem:[#allocation16 + $0x184] ss:$48 sps:$4 sm:$0xff]  }
 0x85a   : > { %v12831_v42 = vpop.f32.mrf.mxu1  ;;  %19318 = vst [vmem:[#allocation50_spill] sm:$0xff] %v17484_v4  ;;  %v5650_v38 = vadd.f32 %v17475_v62, %v17484_v4  ;;  %7748 = vmatpush1.bf16.msra.mxu0 %v13955_v20  ;;  %v13940_v60 = vld [vmem:[#allocation16 + $0x180] ss:$48 sps:$4 sm:$0xff]  }
 0x85b   : > { %v17465_v28 = vadd.f32 %v15001_v35, %v5585_v33  ;;  %v5525_v27 = vadd.f32 %v12830_v53, %v17352_v11  ;;  %5640 = vadd.xlane.f32.xlu0 %v5639_v8  ;;  %v13943_v33 = vld [vmem:[#allocation16 + $0x120] ss:$48 sps:$4 sm:$0xff]   ;;  %v13948_v53 = vld [vmem:[#allocation16 + $0xc4] ss:$48 sps:$4 sm:$0xff]  }
 0x85c   : > { %v12832_v10 = vpop.f32.mrf.mxu1  ;;  %v13946_v8 = vld [vmem:[#allocation16 + $0xc0] ss:$48 sps:$4 sm:$0xff]   ;;  %v13960_v35 = vld [vmem:[#allocation16 + $0x5a4] ss:$48 sps:$4 sm:$0xff]  }
 0x85d   : > { %19314 = vst [vmem:[#allocation47_spill] sm:$0xff] %v17465_v28  ;;  %v5590_v32 = vadd.f32 %v17397_v36, %v5525_v27  ;;  %v12833_v6 = vadd.f32 %v12832_v10, %v12831_v42  ;;  %v5643_v7 = vadd.f32 %v5642_v61, %v17465_v28  ;;  %v13951_v42 = vld [vmem:[#allocation16 + $0x64] ss:$48 sps:$4 sm:$0xff]   ;;  %v13949_v61 = vld [vmem:[#allocation16 + $0x60] ss:$48 sps:$4 sm:$0xff]  }
 0x85e   : > { %v13958_v27 = vld [vmem:[#allocation16 + $0x5a0] ss:$48 sps:$4 sm:$0xff]  }
 0x85f   : > { %v17478_v29 = vadd.f32 %v15004_v46, %v5590_v32  ;;  %v5528_v12 = vadd.f32 %v12833_v6, %v17352_v11  ;;  %5644 = vadd.xlane.f32.xlu1 %v5643_v7  ;;  %v13931_v11 = vld [vmem:[#allocation16 + $0x2a0] ss:$48 sps:$4 sm:$0xff]  }
 0x860   : > { %7675 = vmatpush1.bf16.msra.mxu1 %v13931_v11 }
 0x861   : > { %19317 = vst [vmem:[#allocation38_spill] sm:$0xff] %v17478_v29  ;;  %v5593_v14 = vadd.f32 %v13325_v2, %v5528_v12  ;;  %v5647_v36 = vadd.f32 %v5646_v37, %v17478_v29  ;;  %7676 = vmatprep.subr.bf16.mxu1 %v13936_v26  ;;  %v13939_v2 = vld [vmem:[#allocation16 + $0x1e4] ss:$48 sps:$4 sm:$0xff]  }
 0x863   : > { %v17488_v48 = vadd.f32 %v15006_v15, %v5593_v14  ;;  %5648 = vadd.xlane.f32.xlu0 %v5647_v36 }
 0x864   : > { %7677 = vmatpush1.bf16.msra.mxu1 %v13934_v5 }
 0x865   : > { %19319 = vst [vmem:[#allocation37_spill] sm:$0xff] %v17488_v48  ;;  %v5651_v13 = vadd.f32 %v5650_v38, %v17488_v48  ;;  %7678 = vmatprep.subr.bf16.mxu1 %v13939_v2 }
 0x867   : > { %5652 = vadd.xlane.f32.xlu1 %v5651_v13 }
 0x868   : > { %7679 = vmatpush1.bf16.msra.mxu1 %v13937_v18 }
 0x869   : > { %7680 = vmatprep.subr.bf16.mxu1 %v13942_v50 }
 0x86c   : > { %7681 = vmatpush1.bf16.msra.mxu1 %v13940_v60 }
 0x86d   : > { %7682 = vmatprep.subr.bf16.mxu1 %v13945_v44 }
 0x870   : > { %7683 = vmatpush1.bf16.msra.mxu1 %v13943_v33 }
 0x871   : > { %7684 = vmatprep.subr.bf16.mxu1 %v13948_v53 }
 0x874   : > { %7685 = vmatpush1.bf16.msra.mxu1 %v13946_v8 }
 0x875   : > { %7686 = vmatprep.subr.bf16.mxu1 %v13951_v42 }
 0x878   : > { %7687 = vmatpush1.bf16.msra.mxu1 %v13949_v61 }
 0x879   : > { %7688 = vmatprep.subr.bf16.mxu1 %v13954_v22 }
 0x87c   : > { %7689 = vmatpush1.bf16.msra.mxu1 %v13952_v17 }
 0x87d   : > { %7690 = vmatprep.subr.bf16.mxu1 %v13960_v35 }
 0x880   : > { %7691 = vmatpush2.bf16.msra.mxu1 %v13958_v27 }
 0x8d4   : > { %v5625_v19 = vpop.xlane.xlu0 %5624 }
 0x8d5   : > { %v5654_v10 = vmul.f32 0.0026041667, %v5625_v19 }
 0x8d7   : > { %v17494_v0 = vsub.f32 %v17362_v39, %v5654_v10  ;;  %v17497_v32 = vsub.f32 %v17357_v24, %v5654_v10  ;;  %v17500_v6 = vsub.f32 %v17372_v1, %v5654_v10  ;;  %v14399_v39 = vld [vmem:[#allocation19 + $0x1f8] ss:$12 sps:$4 sm:$0xff]  }
 0x8d8   : > { %v5629_v7 = vpop.xlane.xlu1 %5628 }
 0x8d9   : > { %v5686_v63 = vmul.f32 %v17494_v0, %v17494_v0  ;;  %v5687_v46 = vmul.f32 %v17497_v32, %v17497_v32  ;;  %v5655_v12 = vmul.f32 0.0026041667, %v5629_v7  ;;  %v5688_v37 = vmul.f32 %v17500_v6, %v17500_v6 }
 0x8db   : > { %v17509_v49 = vsub.f32 %v17376_v59, %v5655_v12  ;;  %v17512_v14 = vsub.f32 %v17366_v51, %v5655_v12  ;;  %v17515_v36 = vsub.f32 %v17389_v40, %v5655_v12  ;;  %v5710_v15 = vadd.f32 %v5687_v46, %v5686_v63  ;;  %v14404_v51 = vld [vmem:[#allocation19 + $0x13c] ss:$12 sps:$4 sm:$0xff]  }
 0x8dc   : > { %v5633_v38 = vpop.xlane.xlu0 %5632 }
 0x8dd   : > { %v5689_v13 = vmul.f32 %v17509_v49, %v17509_v49  ;;  %v5690_v11 = vmul.f32 %v17512_v14, %v17512_v14  ;;  %v5656_v25 = vmul.f32 0.0026041667, %v5633_v38  ;;  %v5711_v26 = vadd.f32 %v5710_v15, %v5688_v37 }
 0x8de   : > { %v5691_v5 = vmul.f32 %v17515_v36, %v17515_v36 }
 0x8df   : > { %v17524_v2 = vsub.f32 %v17393_v58, %v5656_v25  ;;  %v17527_v20 = vsub.f32 %v17385_v3, %v5656_v25  ;;  %v17530_v57 = vsub.f32 %v17408_v23, %v5656_v25  ;;  %5712 = vadd.xlane.f32.xlu0 %v5711_v26  ;;  %v5714_v18 = vadd.f32 %v5690_v11, %v5689_v13  ;;  %v13978_v23 = vld [vmem:[#allocation16 + $0x484] ss:$48 sps:$4 sm:$0xff]  }
 0x8e0   : > { %v5637_v50 = vpop.xlane.xlu0 %5636 }
 0x8e1   : > { %v5692_v60 = vmul.f32 %v17524_v2, %v17524_v2  ;;  %v5693_v44 = vmul.f32 %v17527_v20, %v17527_v20  ;;  %v5657_v33 = vmul.f32 0.0026041667, %v5637_v50  ;;  %v5715_v53 = vadd.f32 %v5714_v18, %v5691_v5 }
 0x8e2   : > { %v5694_v8 = vmul.f32 %v17530_v57, %v17530_v57 }
 0x8e3   : > { %v17539_v42 = vsub.f32 %v17417_v21, %v5657_v33  ;;  %v17542_v61 = vsub.f32 %v17405_v54, %v5657_v33  ;;  %v17545_v22 = vsub.f32 %v17427_v30, %v5657_v33  ;;  %5716 = vadd.xlane.f32.xlu1 %v5715_v53  ;;  %v5718_v17 = vadd.f32 %v5693_v44, %v5692_v60  ;;  %v13976_v30 = vld [vmem:[#allocation16 + $0x480] ss:$48 sps:$4 sm:$0xff]  }
 0x8e4   : > { %v5641_v35 = vpop.xlane.xlu0 %5640 }
 0x8e5   : > { %v5695_v27 = vmul.f32 %v17539_v42, %v17539_v42  ;;  %v5696_v19 = vmul.f32 %v17542_v61, %v17542_v61  ;;  %v5658_v10 = vmul.f32 0.0026041667, %v5641_v35  ;;  %v5719_v7 = vadd.f32 %v5718_v17, %v5694_v8 }
 0x8e6   : > { %v5697_v63 = vmul.f32 %v17545_v22, %v17545_v22 }
 0x8e7   : > { %v17554_v46 = vsub.f32 %v17433_v43, %v5658_v10  ;;  %v17557_v12 = vsub.f32 %v17421_v52, %v5658_v10  ;;  %v17560_v37 = vsub.f32 %v17448_v45, %v5658_v10  ;;  %5720 = vadd.xlane.f32.xlu0 %v5719_v7  ;;  %v5722_v15 = vadd.f32 %v5696_v19, %v5695_v27  ;;  %v13961_v27 = vld [vmem:[#allocation16 + $0x840] ss:$48 sps:$4 sm:$0xff]   ;;  %v13963_v19 = vld [vmem:[#allocation16 + $0x844] ss:$48 sps:$4 sm:$0xff]  }
 0x8e8   : > { %v5645_v38 = vpop.xlane.xlu1 %5644  ;;  %v13964_v7 = vld [vmem:[#allocation16 + $0x540] ss:$48 sps:$4 sm:$0xff]   ;;  %7749 = vmatprep.subr.bf16.mxu0 %v13963_v19  ;;  %v13969_v45 = vld [vmem:[#allocation16 + $0x7e4] ss:$48 sps:$4 sm:$0xff]  }
 0x8e9   : > { %v5698_v13 = vmul.f32 %v17554_v46, %v17554_v46  ;;  %v5699_v11 = vmul.f32 %v17557_v12, %v17557_v12  ;;  %v5659_v25 = vmul.f32 0.0026041667, %v5645_v38  ;;  %v5723_v26 = vadd.f32 %v5722_v15, %v5697_v63  ;;  %v13966_v63 = vld [vmem:[#allocation16 + $0x544] ss:$48 sps:$4 sm:$0xff]   ;;  %7750 = vmatpush1.bf16.msra.mxu0 %v13961_v27 }
 0x8ea   : > { %v5700_v5 = vmul.f32 %v17560_v37, %v17560_v37  ;;  %7692 = vmatprep.subr.bf16.mxu1 %v13966_v63  ;;  %7751 = vmatprep.subr.bf16.mxu0 %v13969_v45 }
 0x8eb   : > { %v17569_v18 = vsub.f32 %v17452_v41, %v5659_v25  ;;  %v17572_v50 = vsub.f32 %v17440_v16, %v5659_v25  ;;  %v17575_v60 = vsub.f32 %v17465_v28, %v5659_v25  ;;  %5724 = vadd.xlane.f32.xlu1 %v5723_v26  ;;  %v5726_v44 = vadd.f32 %v5699_v11, %v5698_v13  ;;  %v13967_v28 = vld [vmem:[#allocation16 + $0x7e0] ss:$48 sps:$4 sm:$0xff]  }
 0x8ec   : > { %v5649_v33 = vpop.xlane.xlu0 %5648  ;;  %7693 = vmatpush2.bf16.msra.mxu1 %v13964_v7 }
 0x8ed   : > { %v5701_v53 = vmul.f32 %v17569_v18, %v17569_v18  ;;  %v5702_v8 = vmul.f32 %v17572_v50, %v17572_v50  ;;  %v5660_v17 = vmul.f32 0.0026041667, %v5649_v33  ;;  %v5727_v35 = vadd.f32 %v5726_v44, %v5700_v5  ;;  %7752 = vmatpush1.bf16.msra.mxu0 %v13967_v28  ;;  %v13985_v28 = vld [vmem:[#allocation16 + $0x6c0] ss:$48 sps:$4 sm:$0xff]  }
 0x8ee   : > { %v5703_v10 = vmul.f32 %v17575_v60, %v17575_v60 }
 0x8ef   : > { %v17584_v15 = vsub.f32 %v17469_v34, %v5660_v17  ;;  %v17587_v38 = vsub.f32 %v17461_v9, %v5660_v17  ;;  %v17590_v13 = vsub.f32 %v17478_v29, %v5660_v17  ;;  %5728 = vadd.xlane.f32.xlu0 %v5727_v35  ;;  %v5730_v11 = vadd.f32 %v5702_v8, %v5701_v53  ;;  %v13970_v35 = vld [vmem:[#allocation16 + $0x4e0] ss:$48 sps:$4 sm:$0xff]   ;;  %v13972_v53 = vld [vmem:[#allocation16 + $0x4e4] ss:$48 sps:$4 sm:$0xff]  }
 0x8f0   : > { %v5653_v25 = vpop.xlane.xlu1 %5652  ;;  %7694 = vmatprep.subr.bf16.mxu1 %v13972_v53  ;;  %v13975_v29 = vld [vmem:[#allocation16 + $0x784] ss:$48 sps:$4 sm:$0xff]   ;;  %v13982_v53 = vld [vmem:[#allocation16 + $0x420] ss:$48 sps:$4 sm:$0xff]  }
 0x8f1   : > { %v5704_v26 = vmul.f32 %v17584_v15, %v17584_v15  ;;  %v5705_v5 = vmul.f32 %v17587_v38, %v17587_v38  ;;  %v5661_v44 = vmul.f32 0.0026041667, %v5653_v25  ;;  %v5731_v33 = vadd.f32 %v5730_v11, %v5703_v10  ;;  %v13973_v25 = vld [vmem:[#allocation16 + $0x780] ss:$48 sps:$4 sm:$0xff]   ;;  %7695 = vmatpush2.bf16.msra.mxu1 %v13970_v35  ;;  %7753 = vmatprep.subr.bf16.mxu0 %v13975_v29  ;;  %v13987_v35 = vld [vmem:[#allocation16 + $0x6c4] ss:$48 sps:$4 sm:$0xff]  }
 0x8f2   : > { %v5706_v17 = vmul.f32 %v17590_v13, %v17590_v13  ;;  %7696 = vmatprep.subr.bf16.mxu1 %v13978_v23  ;;  %7754 = vmatpush1.bf16.msra.mxu0 %v13973_v25  ;;  %v13991_v23 = vld [vmem:[#allocation16 + $0x660] ss:$48 sps:$4 sm:$0xff]   ;;  %v13993_v29 = vld [vmem:[#allocation16 + $0x664] ss:$48 sps:$4 sm:$0xff]  }
 0x8f3   : > { %v17599_v8 = vsub.f32 %v17484_v4, %v5661_v44  ;;  %v17602_v19 = vsub.f32 %v17475_v62, %v5661_v44  ;;  %v17605_v63 = vsub.f32 %v17488_v48, %v5661_v44  ;;  %5732 = vadd.xlane.f32.xlu1 %v5731_v33  ;;  %v5734_v10 = vadd.f32 %v5705_v5, %v5704_v26  ;;  %v13979_v5 = vld [vmem:[#allocation16 + $0x720] ss:$48 sps:$4 sm:$0xff]   ;;  %v13981_v33 = vld [vmem:[#allocation16 + $0x724] ss:$48 sps:$4 sm:$0xff]   ;;  %v14014_v4 = vld [vmem:[#allocation16 + $0x84c] ss:$48 sps:$4 sm:$0xff]  }
 0x8f4   : > { %7755 = vmatprep.subr.bf16.mxu0 %v13981_v33  ;;  %v13999_v25 = vld [vmem:[#allocation16 + $0x604] ss:$48 sps:$4 sm:$0xff]  }
 0x8f5   : > { %v5707_v27 = vmul.f32 %v17599_v8, %v17599_v8  ;;  %v5708_v7 = vmul.f32 %v17602_v19, %v17602_v19  ;;  %v5735_v11 = vadd.f32 %v5734_v10, %v5706_v17  ;;  %v5709_v44 = vmul.f32 %v17605_v63, %v17605_v63  ;;  %7697 = vmatpush2.bf16.msra.mxu1 %v13976_v30  ;;  %v13984_v17 = vld [vmem:[#allocation16 + $0x424] ss:$48 sps:$4 sm:$0xff]   ;;  %v13988_v10 = vld [vmem:[#allocation16 + $0x3c0] ss:$48 sps:$4 sm:$0xff]  }
 0x8f6   : > { %7698 = vmatprep.subr.bf16.mxu1 %v13984_v17  ;;  %7756 = vmatpush1.bf16.msra.mxu0 %v13979_v5  ;;  %v13997_v30 = vld [vmem:[#allocation16 + $0x600] ss:$48 sps:$4 sm:$0xff]   ;;  %v14008_v5 = vld [vmem:[#allocation16 + $0x8ac] ss:$48 sps:$4 sm:$0xff]  }
 0x8f7   : > { %5736 = vadd.xlane.f32.xlu0 %v5735_v11  ;;  %v5738_v26 = vadd.f32 %v5708_v7, %v5707_v27  ;;  %v13990_v11 = vld [vmem:[#allocation16 + $0x3c4] ss:$48 sps:$4 sm:$0xff]   ;;  %7757 = vmatprep.subr.bf16.mxu0 %v13987_v35  ;;  %v13994_v27 = vld [vmem:[#allocation16 + $0x360] ss:$48 sps:$4 sm:$0xff]  }
 0x8f8   : > { %v13996_v7 = vld [vmem:[#allocation16 + $0x364] ss:$48 sps:$4 sm:$0xff]  }
 0x8f9   : > { %v5739_v45 = vadd.f32 %v5738_v26, %v5709_v44  ;;  %7699 = vmatpush2.bf16.msra.mxu1 %v13982_v53  ;;  %v14000_v44 = vld [vmem:[#allocation16 + $0x300] ss:$48 sps:$4 sm:$0xff]   ;;  %v14002_v26 = vld [vmem:[#allocation16 + $0x304] ss:$48 sps:$4 sm:$0xff]  }
 0x8fa   : > { %7700 = vmatprep.subr.bf16.mxu1 %v13990_v11  ;;  %7758 = vmatpush1.bf16.msra.mxu0 %v13985_v28 }
 0x8fb   : > { %5740 = vadd.xlane.f32.xlu1 %v5739_v45  ;;  %7759 = vmatprep.subr.bf16.mxu0 %v13993_v29  ;;  %v14005_v45 = vld [vmem:[#allocation16 + $0x2ac] ss:$48 sps:$4 sm:$0xff]  }
 0x8fd   : > { %7701 = vmatpush2.bf16.msra.mxu1 %v13988_v10 }
 0x8fe   : > { %7702 = vmatprep.subr.bf16.mxu1 %v13996_v7  ;;  %7760 = vmatpush1.bf16.msra.mxu0 %v13991_v23 }
 0x8ff   : > { %7761 = vmatprep.subr.bf16.mxu0 %v13999_v25  ;;  %v5620_v25 = vld [vmem:[#allocation13] sm:$0x7] }
 0x901   : > { %7703 = vmatpush2.bf16.msra.mxu1 %v13994_v27 }
 0x902   : > { %7704 = vmatprep.subr.bf16.mxu1 %v14002_v26  ;;  %7762 = vmatpush1.bf16.msra.mxu0 %v13997_v30 }
 0x903   : > { %7820 = vmatprep.subr.bf16.mxu0 %v14005_v45 }
 0x905   : > { %7705 = vmatpush2.bf16.msra.mxu1 %v14000_v44 }
 0x906   : > { %7893 = vmatprep.subr.bf16.mxu1 %v14008_v5  ;;  %v17614_v5 = vrot.slane %v5620_v25, %v19293_v47 }
 0x968   : > { %v5713_v33 = vpop.xlane.xlu0 %5712 }
 0x969   : > { %v5742_v53 = vmul.f32 0.0026041667, %v5713_v33  ;;  %v17617_v33 = vrot.slane %v5620_v25, %v19295_v55 }
 0x96b   : > { %v5750_v17 = vadd.f32 1e-05, %v5742_v53 }
 0x96c   : > { %v5717_v28 = vpop.xlane.xlu1 %5716 }
 0x96d   : > { %14955 = vrsqrt.f32 %v5750_v17  ;;  %v5743_v35 = vmul.f32 0.0026041667, %v5717_v28  ;;  %v5621_v17 = vld [vmem:[#allocation14] sm:$0x7] }
 0x96f   : > { %v5751_v10 = vadd.f32 1e-05, %v5743_v35 }
 0x970   : > { %v5721_v11 = vpop.xlane.xlu0 %5720 }
 0x971   : > { %14957 = vrsqrt.f32 %v5751_v10  ;;  %v5744_v23 = vmul.f32 0.0026041667, %v5721_v11 }
 0x973   : > { %v5752_v29 = vadd.f32 1e-05, %v5744_v23  ;;  %v17623_v23 = vrot.slane %v5620_v25, %v19294_v56 }
 0x974   : > { %v5725_v27 = vpop.xlane.xlu1 %5724 }
 0x975   : > { %14959 = vrsqrt.f32 %v5752_v29  ;;  %v5745_v7 = vmul.f32 0.0026041667, %v5725_v27 }
 0x977   : > { %v5753_v30 = vadd.f32 1e-05, %v5745_v7 }
 0x978   : > { %v5729_v44 = vpop.xlane.xlu0 %5728 }
 0x979   : > { %14961 = vrsqrt.f32 %v5753_v30  ;;  %v5746_v26 = vmul.f32 0.0026041667, %v5729_v44  ;;  %v17627_v30 = vrot.slane %v5621_v17, %v19293_v47 }
 0x97a   : > { %v14956_v45 = vpop.eup %14955 }
 0x97b   : > { %v5754_v53 = vadd.f32 1e-05, %v5746_v26  ;;  %v5767_v28 = vmul.f32 %v14956_v45, %v17497_v32  ;;  %v5768_v35 = vmul.f32 %v14956_v45, %v17500_v6  ;;  %v5766_v11 = vmul.f32 %v14956_v45, %v17494_v0 }
 0x97c   : > { %v5733_v10 = vpop.xlane.xlu1 %5732  ;;  %v17631_v32 = vrot.slane %v5621_v17, %v19295_v55 }
 0x97d   : > { %14963 = vrsqrt.f32 %v5754_v53  ;;  %v5747_v29 = vmul.f32 0.0026041667, %v5733_v10  ;;  %v5807_v7 = vmul.f32 %v17614_v5, %v5767_v28  ;;  %v5808_v44 = vmul.f32 %v17617_v33, %v5768_v35 }
 0x97e   : > { %v14958_v27 = vpop.eup %14957  ;;  %v5806_v53 = vmul.f32 %v17623_v23, %v5766_v11  ;;  %v17638_v28 = vrot.slane %v5621_v17, %v19294_v56 }
 0x97f   : > { %v5755_v6 = vadd.f32 1e-05, %v5747_v29  ;;  %v5770_v26 = vmul.f32 %v14958_v27, %v17512_v14  ;;  %v5771_v0 = vmul.f32 %v14958_v27, %v17515_v36  ;;  %v5769_v45 = vmul.f32 %v14958_v27, %v17509_v49 }
 0x980   : > { %v5737_v25 = vpop.xlane.xlu0 %5736  ;;  %v5847_v29 = vadd.f32 %v17627_v30, %v5807_v7  ;;  %v5848_v14 = vadd.f32 %v17631_v32, %v5808_v44 }
 0x981   : > { %14965 = vrsqrt.f32 %v5755_v6  ;;  %v5748_v10 = vmul.f32 0.0026041667, %v5737_v25  ;;  %v5810_v35 = vmul.f32 %v17614_v5, %v5770_v26  ;;  %v5811_v48 = vmul.f32 %v17617_v33, %v5771_v0  ;;  %v14003_v6 = vld [vmem:[#allocation16 + $0x2a8] ss:$48 sps:$4 sm:$0xff]  }
 0x982   : > { %v14960_v40 = vpop.eup %14959  ;;  %v5809_v36 = vmul.f32 %v17623_v23, %v5769_v45  ;;  %v5846_v26 = vadd.f32 %v17638_v28, %v5806_v53 }
 0x983   : > { %v5756_v1 = vadd.f32 1e-05, %v5748_v10  ;;  %v5850_v49 = vadd.f32 %v17627_v30, %v5810_v35  ;;  %v5851_v11 = vadd.f32 %v17631_v32, %v5811_v48  ;;  %v5773_v17 = vmul.f32 %v14960_v40, %v17527_v20  ;;  %v14006_v35 = vld [vmem:[#allocation16 + $0x8a8] ss:$48 sps:$4 sm:$0xff]   ;;  %v14011_v48 = vld [vmem:[#allocation16 + $0x24c] ss:$48 sps:$4 sm:$0xff]  }
 0x984   : > { %v5741_v27 = vpop.xlane.xlu1 %5740  ;;  %v5849_v0 = vadd.f32 %v17638_v28, %v5809_v36  ;;  %v5774_v25 = vmul.f32 %v14960_v40, %v17530_v57  ;;  %v5772_v7 = vmul.f32 %v14960_v40, %v17524_v2 }
 0x985   : > { %14967 = vrsqrt.f32 %v5756_v1  ;;  %v5749_v44 = vmul.f32 0.0026041667, %v5741_v27  ;;  %v17652_v45 = vpack.c.bf16 %v5850_v49, %v5847_v29  ;;  %v17654_v10 = vpack.c.bf16 %v5851_v11, %v5848_v14  ;;  %v14009_v29 = vld [vmem:[#allocation16 + $0x248] ss:$48 sps:$4 sm:$0xff]   ;;  %v14017_v49 = vld [vmem:[#allocation16 + $0x1ec] ss:$48 sps:$4 sm:$0xff]  }
 0x986   : > { %v14962_v62 = vpop.eup %14961  ;;  %v17656_v20 = vpack.c.bf16 %v5849_v0, %v5846_v26  ;;  %v5813_v53 = vmul.f32 %v17614_v5, %v5773_v17  ;;  %v5814_v36 = vmul.f32 %v17617_v33, %v5774_v25  ;;  %v5812_v57 = vmul.f32 %v17623_v23, %v5772_v7  ;;  %v14012_v14 = vld [vmem:[#allocation16 + $0x848] ss:$48 sps:$4 sm:$0xff]  }
 0x987   : > { %v5757_v9 = vadd.f32 1e-05, %v5749_v44  ;;  %7706 = vmatprep.mubr.bf16.mxu1 %v17652_v45  ;;  %7780 = vmatmul.mubr.bf16.vlgmr.msra.gmra.mxu0 %v17654_v10  ;;  %v5776_v1 = vmul.f32 %v14962_v62, %v17542_v61  ;;  %v5777_v40 = vmul.f32 %v14962_v62, %v17545_v22  ;;  %v5775_v2 = vmul.f32 %v14962_v62, %v17539_v42  ;;  %v14020_v22 = vld [vmem:[#allocation16 + $0x7ec] ss:$48 sps:$4 sm:$0xff]   ;;  %v14015_v7 = vld [vmem:[#allocation16 + $0x1e8] ss:$48 sps:$4 sm:$0xff]  }
 0x988   : > { %7821 = vmatpush1.bf16.msra.mxu0 %v14003_v6  ;;  %7707 = vmatmul.mubr.bf16.vlgmr.msra.gmra.mxu1 %v17656_v20  ;;  %v5853_v62 = vadd.f32 %v17627_v30, %v5813_v53  ;;  %v5854_v42 = vadd.f32 %v17631_v32, %v5814_v36  ;;  %v14018_v53 = vld [vmem:[#allocation16 + $0x7e8] ss:$48 sps:$4 sm:$0xff]  }
 0x989   : > { %14969 = vrsqrt.f32 %v5757_v9  ;;  %7894 = vmatpush1.bf16.msra.mxu1 %v14006_v35  ;;  %7822 = vmatprep.subr.bf16.mxu0 %v14011_v48  ;;  %v5816_v11 = vmul.f32 %v17614_v5, %v5776_v1  ;;  %v5817_v17 = vmul.f32 %v17617_v33, %v5777_v40  ;;  %v5815_v27 = vmul.f32 %v17623_v23, %v5775_v2  ;;  %v14026_v40 = vld [vmem:[#allocation16 + $0x78c] ss:$48 sps:$4 sm:$0xff]  }
 0x98a   : > { %v14964_v61 = vpop.eup %14963  ;;  %7895 = vmatprep.subr.bf16.mxu1 %v14014_v4  ;;  %7789 = vmatprep.mubr.bf16.mxu0 %v19290_v31  ;;  %v5852_v9 = vadd.f32 %v17638_v28, %v5812_v57  ;;  %v14023_v57 = vld [vmem:[#allocation16 + $0x18c] ss:$48 sps:$4 sm:$0xff]  }
 0x98b   : > { %v5856_v6 = vadd.f32 %v17627_v30, %v5816_v11  ;;  %v5857_v26 = vadd.f32 %v17631_v32, %v5817_v17  ;;  %v5855_v0 = vadd.f32 %v17638_v28, %v5815_v27  ;;  %v5779_v25 = vmul.f32 %v14964_v61, %v17557_v12  ;;  %v14024_v11 = vld [vmem:[#allocation16 + $0x788] ss:$48 sps:$4 sm:$0xff]   ;;  %v14029_v17 = vld [vmem:[#allocation16 + $0x12c] ss:$48 sps:$4 sm:$0xff]  }
 0x98c   : > { %7823 = vmatpush1.bf16.msra.mxu0 %v14009_v29  ;;  %v5780_v4 = vmul.f32 %v14964_v61, %v17560_v37  ;;  %v5778_v44 = vmul.f32 %v14964_v61, %v17554_v46 }
 0x98d   : > { %7896 = vmatpush1.bf16.msra.mxu1 %v14012_v14  ;;  %7824 = vmatprep.subr.bf16.mxu0 %v14017_v49  ;;  %v17680_v35 = vpack.c.bf16 %v5856_v6, %v5853_v62  ;;  %v17682_v48 = vpack.c.bf16 %v5857_v26, %v5854_v42  ;;  %v17684_v36 = vpack.c.bf16 %v5855_v0, %v5852_v9  ;;  %v14021_v49 = vld [vmem:[#allocation16 + $0x188] ss:$48 sps:$4 sm:$0xff]  }
 0x98e   : > { %v14966_v1 = vpop.eup %14965  ;;  %7897 = vmatprep.subr.bf16.mxu1 %v14020_v22  ;;  %v5819_v12 = vmul.f32 %v17614_v5, %v5779_v25  ;;  %v5820_v2 = vmul.f32 %v17617_v33, %v5780_v4  ;;  %v5818_v37 = vmul.f32 %v17623_v23, %v5778_v44  ;;  %v14027_v25 = vld [vmem:[#allocation16 + $0x128] ss:$48 sps:$4 sm:$0xff]  }
 0x98f   : > { %7716 = vmatprep.mubr.bf16.mxu1 %v17680_v35  ;;  %7790 = vmatmul.mubr.bf16.gmra.mxu0 %v17682_v48  ;;  %v5782_v46 = vmul.f32 %v14966_v1, %v17572_v50  ;;  %v5783_v29 = vmul.f32 %v14966_v1, %v17575_v60  ;;  %v5781_v14 = vmul.f32 %v14966_v1, %v17569_v18  ;;  %v14032_v60 = vld [vmem:[#allocation16 + $0x72c] ss:$48 sps:$4 sm:$0xff]  }
 0x990   : > { %7825 = vmatpush1.bf16.msra.mxu0 %v14015_v7  ;;  %7717 = vmatmul.mubr.bf16.gmra.mxu1 %v17684_v36  ;;  %v5859_v18 = vadd.f32 %v17627_v30, %v5819_v12  ;;  %v5860_v50 = vadd.f32 %v17631_v32, %v5820_v2  ;;  %v5858_v22 = vadd.f32 %v17638_v28, %v5818_v37  ;;  %v14038_v2 = vld [vmem:[#allocation16 + $0x6cc] ss:$48 sps:$4 sm:$0xff]  }
 0x991   : > { %7898 = vmatpush1.bf16.msra.mxu1 %v14018_v53  ;;  %7826 = vmatprep.subr.bf16.mxu0 %v14023_v57  ;;  %v5822_v27 = vmul.f32 %v17614_v5, %v5782_v46  ;;  %v5823_v61 = vmul.f32 %v17617_v33, %v5783_v29  ;;  %v5821_v62 = vmul.f32 %v17623_v23, %v5781_v14  ;;  %v14030_v57 = vld [vmem:[#allocation16 + $0x728] ss:$48 sps:$4 sm:$0xff]  }
 0x992   : > { %v14968_v42 = vpop.eup %14967  ;;  %7899 = vmatprep.subr.bf16.mxu1 %v14026_v40  ;;  %7799 = vmatprep.mubr.bf16.mxu0 %v19290_v31  ;;  %v14035_v40 = vld [vmem:[#allocation16 + $0xcc] ss:$48 sps:$4 sm:$0xff]   ;;  %v14033_v14 = vld [vmem:[#allocation16 + $0xc8] ss:$48 sps:$4 sm:$0xff]  }
 0x993   : > { %v5862_v9 = vadd.f32 %v17627_v30, %v5822_v27  ;;  %v5863_v6 = vadd.f32 %v17631_v32, %v5823_v61  ;;  %v5861_v26 = vadd.f32 %v17638_v28, %v5821_v62  ;;  %v5785_v0 = vmul.f32 %v14968_v42, %v17587_v38 }
 0x994   : > { %7827 = vmatpush1.bf16.msra.mxu0 %v14021_v49  ;;  %v5786_v7 = vmul.f32 %v14968_v42, %v17590_v13  ;;  %v5784_v4 = vmul.f32 %v14968_v42, %v17584_v15  ;;  %v14036_v49 = vld [vmem:[#allocation16 + $0x6c8] ss:$48 sps:$4 sm:$0xff]  }
 0x995   : > { %7900 = vmatpush1.bf16.msra.mxu1 %v14024_v11  ;;  %7828 = vmatprep.subr.bf16.mxu0 %v14029_v17  ;;  %v17708_v44 = vpack.c.bf16 %v5862_v9, %v5859_v18  ;;  %v17710_v53 = vpack.c.bf16 %v5863_v6, %v5860_v50  ;;  %v17712_v1 = vpack.c.bf16 %v5861_v26, %v5858_v22  ;;  %v14041_v11 = vld [vmem:[#allocation16 + $0x6c] ss:$48 sps:$4 sm:$0xff]   ;;  %v14056_v26 = vld [vmem:[#allocation16 + $0x2b4] ss:$48 sps:$4 sm:$0xff]  }
 0x996   : > { %v14970_v12 = vpop.eup %14969  ;;  %7901 = vmatprep.subr.bf16.mxu1 %v14032_v60  ;;  %v5825_v38 = vmul.f32 %v17614_v5, %v5785_v0  ;;  %v5826_v37 = vmul.f32 %v17617_v33, %v5786_v7  ;;  %v5824_v13 = vmul.f32 %v17623_v23, %v5784_v4  ;;  %v14042_v60 = vld [vmem:[#allocation16 + $0x668] ss:$48 sps:$4 sm:$0xff]   ;;  %v14047_v9 = vld [vmem:[#allocation16 + $0xc] ss:$48 sps:$4 sm:$0xff]   ;;  %v14062_v4 = vld [vmem:[#allocation16 + $0x254] ss:$48 sps:$4 sm:$0xff]  }
 0x997   : > { %7726 = vmatprep.mubr.bf16.mxu1 %v17708_v44  ;;  %7800 = vmatmul.mubr.bf16.gmra.mxu0 %v17710_v53  ;;  %v5788_v15 = vmul.f32 %v14970_v12, %v17602_v19  ;;  %v5789_v46 = vmul.f32 %v14970_v12, %v17605_v63  ;;  %v5787_v29 = vmul.f32 %v14970_v12, %v17599_v8  ;;  %v14044_v63 = vld [vmem:[#allocation16 + $0x66c] ss:$48 sps:$4 sm:$0xff]   ;;  %v14051_v0 = vld [vmem:[#allocation16 + $0x5a8] ss:$48 sps:$4 sm:$0xff]  }
 0x998   : > { %7829 = vmatpush1.bf16.msra.mxu0 %v14027_v25  ;;  %7727 = vmatmul.mubr.bf16.gmra.mxu1 %v17712_v1  ;;  %v5865_v19 = vadd.f32 %v17627_v30, %v5825_v38  ;;  %v5866_v8 = vadd.f32 %v17631_v32, %v5826_v37  ;;  %v5864_v18 = vadd.f32 %v17638_v28, %v5824_v13  ;;  %v14053_v6 = vld [vmem:[#allocation16 + $0x5ac] ss:$48 sps:$4 sm:$0xff]   ;;  %v14054_v25 = vld [vmem:[#allocation16 + $0x2b0] ss:$48 sps:$4 sm:$0xff]   ;;  %v14063_v38 = vld [vmem:[#allocation16 + $0x4e8] ss:$48 sps:$4 sm:$0xff]  }
 0x999   : > { %7902 = vmatpush1.bf16.msra.mxu1 %v14030_v57  ;;  %7830 = vmatprep.subr.bf16.mxu0 %v14035_v40  ;;  %v5828_v17 = vmul.f32 %v17614_v5, %v5788_v15  ;;  %v5829_v27 = vmul.f32 %v17617_v33, %v5789_v46  ;;  %v5827_v61 = vmul.f32 %v17623_v23, %v5787_v29  ;;  %v14039_v33 = vld [vmem:[#allocation16 + $0x68] ss:$48 sps:$4 sm:$0xff]   ;;  %v14059_v7 = vld [vmem:[#allocation16 + $0x54c] ss:$48 sps:$4 sm:$0xff]   ;;  %v14060_v40 = vld [vmem:[#allocation16 + $0x250] ss:$48 sps:$4 sm:$0xff]  }
 0x99a   : > { %7903 = vmatprep.subr.bf16.mxu1 %v14038_v2  ;;  %7809 = vmatprep.mubr.bf16.mxu0 %v19290_v31  ;;  %v14057_v57 = vld [vmem:[#allocation16 + $0x548] ss:$48 sps:$4 sm:$0xff]   ;;  %v14065_v12 = vld [vmem:[#allocation16 + $0x4ec] ss:$48 sps:$4 sm:$0xff]   ;;  %v14068_v2 = vld [vmem:[#allocation16 + $0x1f4] ss:$48 sps:$4 sm:$0xff]  }
 0x99b   : > { %v5868_v62 = vadd.f32 %v17627_v30, %v5828_v17  ;;  %v5869_v42 = vadd.f32 %v17631_v32, %v5829_v27  ;;  %v5867_v5 = vadd.f32 %v17638_v28, %v5827_v61  ;;  %v14050_v30 = vld [vmem:[#allocation16 + $0x60c] ss:$48 sps:$4 sm:$0xff]   ;;  %v14045_v32 = vld [vmem:[#allocation16 + $0x8] ss:$48 sps:$4 sm:$0xff]   ;;  %v14066_v37 = vld [vmem:[#allocation16 + $0x1f0] ss:$48 sps:$4 sm:$0xff]  }
 0x99c   : > { %7831 = vmatpush1.bf16.msra.mxu0 %v14033_v14  ;;  %v14048_v28 = vld [vmem:[#allocation16 + $0x608] ss:$48 sps:$4 sm:$0xff]   ;;  %v14071_v13 = vld [vmem:[#allocation16 + $0x48c] ss:$48 sps:$4 sm:$0xff]   ;;  %v14074_v15 = vld [vmem:[#allocation16 + $0x194] ss:$48 sps:$4 sm:$0xff]  }
 0x99d   : > { %7904 = vmatpush1.bf16.msra.mxu1 %v14036_v49  ;;  %7832 = vmatprep.subr.bf16.mxu0 %v14041_v11  ;;  %v17733_v23 = vpack.c.bf16 %v5868_v62, %v5865_v19  ;;  %v17735_v50 = vpack.c.bf16 %v5869_v42, %v5866_v8  ;;  %v17737_v22 = vpack.c.bf16 %v5867_v5, %v5864_v18  ;;  %v14069_v46 = vld [vmem:[#allocation16 + $0x488] ss:$48 sps:$4 sm:$0xff]   ;;  %v14072_v29 = vld [vmem:[#allocation16 + $0x190] ss:$48 sps:$4 sm:$0xff]   ;;  %v14077_v14 = vld [vmem:[#allocation16 + $0x42c] ss:$48 sps:$4 sm:$0xff]  }
 0x99e   : > { %7905 = vmatprep.subr.bf16.mxu1 %v14044_v63  ;;  %v14080_v49 = vld [vmem:[#allocation16 + $0x134] ss:$48 sps:$4 sm:$0xff]   ;;  %v14075_v11 = vld [vmem:[#allocation16 + $0x428] ss:$48 sps:$4 sm:$0xff]   ;;  %v14078_v17 = vld [vmem:[#allocation16 + $0x130] ss:$48 sps:$4 sm:$0xff]  }
 0x99f   : > { %7736 = vmatprep.mubr.bf16.mxu1 %v17733_v23  ;;  %7810 = vmatmul.mubr.bf16.gmra.mxu0 %v17735_v50  ;;  %v14083_v27 = vld [vmem:[#allocation16 + $0x3cc] ss:$48 sps:$4 sm:$0xff]   ;;  %v14086_v61 = vld [vmem:[#allocation16 + $0xd4] ss:$48 sps:$4 sm:$0xff]   ;;  %v14081_v19 = vld [vmem:[#allocation16 + $0x3c8] ss:$48 sps:$4 sm:$0xff]  }
 0x9a0   : > { %7833 = vmatpush1.bf16.msra.mxu0 %v14039_v33  ;;  %7737 = vmatmul.mubr.bf16.gmra.mxu1 %v17737_v22  ;;  %v14084_v8 = vld [vmem:[#allocation16 + $0xd0] ss:$48 sps:$4 sm:$0xff]   ;;  %v14089_v63 = vld [vmem:[#allocation16 + $0x36c] ss:$48 sps:$4 sm:$0xff]   ;;  %v14092_v62 = vld [vmem:[#allocation16 + $0x74] ss:$48 sps:$4 sm:$0xff]  }
 0x9a1   : > { %7852 = vmatprep.mubr.bf16.mxu0 %v17652_v45  ;;  %7906 = vmatpush1.bf16.msra.mxu1 %v14042_v60  ;;  %v14087_v42 = vld [vmem:[#allocation16 + $0x368] ss:$48 sps:$4 sm:$0xff]   ;;  %v14090_v18 = vld [vmem:[#allocation16 + $0x70] ss:$48 sps:$4 sm:$0xff]   ;;  %v14095_v5 = vld [vmem:[#allocation16 + $0x30c] ss:$48 sps:$4 sm:$0xff]  }
 0x9a2   : > { %7834 = vmatprep.subr.bf16.mxu0 %v14047_v9  ;;  %7907 = vmatprep.subr.bf16.mxu1 %v14050_v30  ;;  %v14098_v33 = vld [vmem:[#allocation16 + $0x14] ss:$48 sps:$4 sm:$0xff]   ;;  %v14093_v60 = vld [vmem:[#allocation16 + $0x308] ss:$48 sps:$4 sm:$0xff]   ;;  %v14096_v9 = vld [vmem:[#allocation16 + $0x10] ss:$48 sps:$4 sm:$0xff]  }
 0x9a3   : > { %7925 = vmatprep.mubr.bf16.mxu1 %v19290_v31  ;;  %v14101_v30 = vld [vmem:[#allocation16 + $0x8b4] ss:$48 sps:$4 sm:$0xff]  }
 0x9a4   : > { %7835 = vmatpush1.bf16.msra.mxu0 %v14045_v32  ;;  %v14104_v32 = vld [vmem:[#allocation16 + $0x5b4] ss:$48 sps:$4 sm:$0xff]  }
 0x9a5   : > { %7908 = vmatpush1.bf16.msra.mxu1 %v14048_v28  ;;  %7836 = vmatprep.subr.bf16.mxu0 %v14053_v6  ;;  %v14099_v28 = vld [vmem:[#allocation16 + $0x8b0] ss:$48 sps:$4 sm:$0xff]  }
 0x9a6   : > { %7966 = vmatprep.subr.bf16.mxu1 %v14056_v26  ;;  %v14102_v6 = vld [vmem:[#allocation16 + $0x5b0] ss:$48 sps:$4 sm:$0xff]   ;;  %v14107_v26 = vld [vmem:[#allocation16 + $0x854] ss:$48 sps:$4 sm:$0xff]  }
 0x9a8   : > { %7837 = vmatpush2.bf16.msra.mxu0 %v14051_v0  ;;  %7926 = vmatmul.mubr.bf16.vlgmr.msra.gmra.mxu1 %v17654_v10  ;;  %v14110_v0 = vld [vmem:[#allocation16 + $0x554] ss:$48 sps:$4 sm:$0xff]  }
 0x9a9   : > { %7967 = vmatpush1.bf16.msra.mxu1 %v14054_v25  ;;  %7838 = vmatprep.subr.bf16.mxu0 %v14059_v7  ;;  %v14105_v25 = vld [vmem:[#allocation16 + $0x850] ss:$48 sps:$4 sm:$0xff]  }
 0x9aa   : > { %7968 = vmatprep.subr.bf16.mxu1 %v14062_v4  ;;  %7935 = vmatprep.mubr.bf16.mxu1 %v19290_v31  ;;  %v14108_v7 = vld [vmem:[#allocation16 + $0x550] ss:$48 sps:$4 sm:$0xff]   ;;  %v14113_v4 = vld [vmem:[#allocation16 + $0x7f4] ss:$48 sps:$4 sm:$0xff]  }
 0x9ac   : > { %7839 = vmatpush2.bf16.msra.mxu0 %v14057_v57  ;;  %v14116_v57 = vld [vmem:[#allocation16 + $0x4f4] ss:$48 sps:$4 sm:$0xff]  }
 0x9ad   : > { %7969 = vmatpush1.bf16.msra.mxu1 %v14060_v40  ;;  %7840 = vmatprep.subr.bf16.mxu0 %v14065_v12  ;;  %v14111_v40 = vld [vmem:[#allocation16 + $0x7f0] ss:$48 sps:$4 sm:$0xff]  }
 0x9ae   : > { %7970 = vmatprep.subr.bf16.mxu1 %v14068_v2  ;;  %v14114_v12 = vld [vmem:[#allocation16 + $0x4f0] ss:$48 sps:$4 sm:$0xff]   ;;  %v14119_v2 = vld [vmem:[#allocation16 + $0x794] ss:$48 sps:$4 sm:$0xff]  }
 0x9b0   : > { %7841 = vmatpush2.bf16.msra.mxu0 %v14063_v38  ;;  %7936 = vmatmul.mubr.bf16.gmra.mxu1 %v17682_v48  ;;  %v14122_v38 = vld [vmem:[#allocation16 + $0x494] ss:$48 sps:$4 sm:$0xff]  }
 0x9b1   : > { %7971 = vmatpush1.bf16.msra.mxu1 %v14066_v37  ;;  %7842 = vmatprep.subr.bf16.mxu0 %v14071_v13  ;;  %v14117_v37 = vld [vmem:[#allocation16 + $0x790] ss:$48 sps:$4 sm:$0xff]  }
 0x9b2   : > { %7972 = vmatprep.subr.bf16.mxu1 %v14074_v15  ;;  %7945 = vmatprep.mubr.bf16.mxu1 %v19290_v31  ;;  %v14120_v13 = vld [vmem:[#allocation16 + $0x490] ss:$48 sps:$4 sm:$0xff]   ;;  %v14125_v15 = vld [vmem:[#allocation16 + $0x734] ss:$48 sps:$4 sm:$0xff]  }
 0x9b4   : > { %7843 = vmatpush2.bf16.msra.mxu0 %v14069_v46  ;;  %v14128_v46 = vld [vmem:[#allocation16 + $0x434] ss:$48 sps:$4 sm:$0xff]  }
 0x9b5   : > { %7973 = vmatpush1.bf16.msra.mxu1 %v14072_v29  ;;  %7844 = vmatprep.subr.bf16.mxu0 %v14077_v14  ;;  %v14123_v29 = vld [vmem:[#allocation16 + $0x730] ss:$48 sps:$4 sm:$0xff]  }
 0x9b6   : > { %7974 = vmatprep.subr.bf16.mxu1 %v14080_v49  ;;  %v14126_v14 = vld [vmem:[#allocation16 + $0x430] ss:$48 sps:$4 sm:$0xff]   ;;  %v14131_v49 = vld [vmem:[#allocation16 + $0x6d4] ss:$48 sps:$4 sm:$0xff]  }
 0x9b8   : > { %7845 = vmatpush2.bf16.msra.mxu0 %v14075_v11  ;;  %7946 = vmatmul.mubr.bf16.gmra.mxu1 %v17710_v53  ;;  %v14134_v11 = vld [vmem:[#allocation16 + $0x3d4] ss:$48 sps:$4 sm:$0xff]  }
 0x9b9   : > { %7975 = vmatpush1.bf16.msra.mxu1 %v14078_v17  ;;  %7846 = vmatprep.subr.bf16.mxu0 %v14083_v27  ;;  %v14129_v17 = vld [vmem:[#allocation16 + $0x6d0] ss:$48 sps:$4 sm:$0xff]  }
 0x9ba   : > { %7976 = vmatprep.subr.bf16.mxu1 %v14086_v61  ;;  %7955 = vmatprep.mubr.bf16.mxu1 %v19290_v31  ;;  %v14132_v27 = vld [vmem:[#allocation16 + $0x3d0] ss:$48 sps:$4 sm:$0xff]   ;;  %v14137_v61 = vld [vmem:[#allocation16 + $0x674] ss:$48 sps:$4 sm:$0xff]  }
 0x9bc   : > { %7847 = vmatpush2.bf16.msra.mxu0 %v14081_v19  ;;  %v14140_v19 = vld [vmem:[#allocation16 + $0x374] ss:$48 sps:$4 sm:$0xff]  }
 0x9bd   : > { %7977 = vmatpush1.bf16.msra.mxu1 %v14084_v8  ;;  %7848 = vmatprep.subr.bf16.mxu0 %v14089_v63  ;;  %v14135_v8 = vld [vmem:[#allocation16 + $0x670] ss:$48 sps:$4 sm:$0xff]  }
 0x9be   : > { %7978 = vmatprep.subr.bf16.mxu1 %v14092_v62  ;;  %v14138_v63 = vld [vmem:[#allocation16 + $0x370] ss:$48 sps:$4 sm:$0xff]   ;;  %v14143_v62 = vld [vmem:[#allocation16 + $0x614] ss:$48 sps:$4 sm:$0xff]  }
 0x9c0   : > { %7849 = vmatpush2.bf16.msra.mxu0 %v14087_v42  ;;  %7956 = vmatmul.mubr.bf16.gmra.mxu1 %v17735_v50  ;;  %v14146_v42 = vld [vmem:[#allocation16 + $0x314] ss:$48 sps:$4 sm:$0xff]  }
 0x9c1   : > { %7979 = vmatpush1.bf16.msra.mxu1 %v14090_v18  ;;  %7998 = vmatprep.mubr.bf16.mxu1 %v17652_v45  ;;  %v14141_v18 = vld [vmem:[#allocation16 + $0x610] ss:$48 sps:$4 sm:$0xff]  }
 0x9c2   : > { %7850 = vmatprep.subr.bf16.mxu0 %v14095_v5  ;;  %7980 = vmatprep.subr.bf16.mxu1 %v14098_v33  ;;  %v14144_v5 = vld [vmem:[#allocation16 + $0x310] ss:$48 sps:$4 sm:$0xff]   ;;  %v14149_v33 = vld [vmem:[#allocation16 + $0x2bc] ss:$48 sps:$4 sm:$0xff]  }
 0x9c4   : > { %7851 = vmatpush2.bf16.msra.mxu0 %v14093_v60  ;;  %v14152_v60 = vld [vmem:[#allocation16 + $0x8bc] ss:$48 sps:$4 sm:$0xff]  }
 0x9c5   : > { %7981 = vmatpush1.bf16.msra.mxu1 %v14096_v9  ;;  %8039 = vmatprep.subr.bf16.mxu0 %v14101_v30  ;;  %v14147_v9 = vld [vmem:[#allocation16 + $0x2b8] ss:$48 sps:$4 sm:$0xff]  }
 0x9c6   : > { %7982 = vmatprep.subr.bf16.mxu1 %v14104_v32  ;;  %v14150_v30 = vld [vmem:[#allocation16 + $0x8b8] ss:$48 sps:$4 sm:$0xff]   ;;  %v14155_v32 = vld [vmem:[#allocation16 + $0x25c] ss:$48 sps:$4 sm:$0xff]  }
 0x9c7   : > { %7853 = vmatmul.mubr.bf16.vlgmr.msra.gmra.mxu0 %v17656_v20 }
 0x9c8   : > { %7862 = vmatprep.mubr.bf16.mxu0 %v17680_v35  ;;  %8040 = vmatpush1.bf16.msra.mxu0 %v14099_v28  ;;  %v14158_v28 = vld [vmem:[#allocation16 + $0x85c] ss:$48 sps:$4 sm:$0xff]  }
 0x9c9   : > { %7983 = vmatpush2.bf16.msra.mxu1 %v14102_v6  ;;  %8041 = vmatprep.subr.bf16.mxu0 %v14107_v26  ;;  %v14153_v6 = vld [vmem:[#allocation16 + $0x258] ss:$48 sps:$4 sm:$0xff]  }
 0x9ca   : > { %7984 = vmatprep.subr.bf16.mxu1 %v14110_v0  ;;  %v14156_v26 = vld [vmem:[#allocation16 + $0x858] ss:$48 sps:$4 sm:$0xff]   ;;  %v14161_v0 = vld [vmem:[#allocation16 + $0x1fc] ss:$48 sps:$4 sm:$0xff]  }
 0x9cc   : > { %8042 = vmatpush1.bf16.msra.mxu0 %v14105_v25  ;;  %v14164_v25 = vld [vmem:[#allocation16 + $0x7fc] ss:$48 sps:$4 sm:$0xff]  }
 0x9cd   : > { %7985 = vmatpush2.bf16.msra.mxu1 %v14108_v7  ;;  %8043 = vmatprep.subr.bf16.mxu0 %v14113_v4  ;;  %v14159_v7 = vld [vmem:[#allocation16 + $0x1f8] ss:$48 sps:$4 sm:$0xff]  }
 0x9ce   : > { %7986 = vmatprep.subr.bf16.mxu1 %v14116_v57  ;;  %v14162_v4 = vld [vmem:[#allocation16 + $0x7f8] ss:$48 sps:$4 sm:$0xff]   ;;  %v14167_v57 = vld [vmem:[#allocation16 + $0x19c] ss:$48 sps:$4 sm:$0xff]  }
 0x9cf   : > { %7863 = vmatmul.mubr.bf16.gmra.mxu0 %v17684_v36 }
 0x9d0   : > { %7872 = vmatprep.mubr.bf16.mxu0 %v17708_v44  ;;  %8044 = vmatpush1.bf16.msra.mxu0 %v14111_v40  ;;  %v14170_v40 = vld [vmem:[#allocation16 + $0x79c] ss:$48 sps:$4 sm:$0xff]  }
 0x9d1   : > { %7987 = vmatpush2.bf16.msra.mxu1 %v14114_v12  ;;  %8045 = vmatprep.subr.bf16.mxu0 %v14119_v2  ;;  %v14165_v12 = vld [vmem:[#allocation16 + $0x198] ss:$48 sps:$4 sm:$0xff]  }
 0x9d2   : > { %7988 = vmatprep.subr.bf16.mxu1 %v14122_v38  ;;  %v14168_v2 = vld [vmem:[#allocation16 + $0x798] ss:$48 sps:$4 sm:$0xff]   ;;  %v14173_v38 = vld [vmem:[#allocation16 + $0x13c] ss:$48 sps:$4 sm:$0xff]  }
 0x9d4   : > { %8046 = vmatpush1.bf16.msra.mxu0 %v14117_v37  ;;  %v14176_v37 = vld [vmem:[#allocation16 + $0x73c] ss:$48 sps:$4 sm:$0xff]  }
 0x9d5   : > { %7989 = vmatpush2.bf16.msra.mxu1 %v14120_v13  ;;  %8047 = vmatprep.subr.bf16.mxu0 %v14125_v15  ;;  %v14171_v13 = vld [vmem:[#allocation16 + $0x138] ss:$48 sps:$4 sm:$0xff]  }
 0x9d6   : > { %7990 = vmatprep.subr.bf16.mxu1 %v14128_v46  ;;  %v14174_v15 = vld [vmem:[#allocation16 + $0x738] ss:$48 sps:$4 sm:$0xff]   ;;  %v14179_v46 = vld [vmem:[#allocation16 + $0xdc] ss:$48 sps:$4 sm:$0xff]  }
 0x9d7   : > { %7873 = vmatmul.mubr.bf16.gmra.mxu0 %v17712_v1 }
 0x9d8   : > { %7882 = vmatprep.mubr.bf16.mxu0 %v17733_v23  ;;  %8048 = vmatpush1.bf16.msra.mxu0 %v14123_v29  ;;  %v14182_v29 = vld [vmem:[#allocation16 + $0x6dc] ss:$48 sps:$4 sm:$0xff]  }
 0x9d9   : > { %7991 = vmatpush2.bf16.msra.mxu1 %v14126_v14  ;;  %8049 = vmatprep.subr.bf16.mxu0 %v14131_v49  ;;  %v14177_v14 = vld [vmem:[#allocation16 + $0xd8] ss:$48 sps:$4 sm:$0xff]  }
 0x9da   : > { %7992 = vmatprep.subr.bf16.mxu1 %v14134_v11  ;;  %v14180_v49 = vld [vmem:[#allocation16 + $0x6d8] ss:$48 sps:$4 sm:$0xff]   ;;  %v14185_v11 = vld [vmem:[#allocation16 + $0x7c] ss:$48 sps:$4 sm:$0xff]  }
 0x9dc   : > { %8050 = vmatpush1.bf16.msra.mxu0 %v14129_v17  ;;  %v14188_v17 = vld [vmem:[#allocation16 + $0x67c] ss:$48 sps:$4 sm:$0xff]  }
 0x9dd   : > { %7993 = vmatpush2.bf16.msra.mxu1 %v14132_v27  ;;  %8051 = vmatprep.subr.bf16.mxu0 %v14137_v61  ;;  %v14183_v27 = vld [vmem:[#allocation16 + $0x78] ss:$48 sps:$4 sm:$0xff]  }
 0x9de   : > { %7994 = vmatprep.subr.bf16.mxu1 %v14140_v19  ;;  %v14186_v61 = vld [vmem:[#allocation16 + $0x678] ss:$48 sps:$4 sm:$0xff]   ;;  %v14191_v19 = vld [vmem:[#allocation16 + $0x1c] ss:$48 sps:$4 sm:$0xff]  }
 0x9df   : > { %7883 = vmatmul.mubr.bf16.gmra.mxu0 %v17737_v22 }
 0x9e0   : > { %8052 = vmatpush1.bf16.msra.mxu0 %v14135_v8  ;;  %8071 = vmatprep.mubr.bf16.mxu0 %v19290_v31  ;;  %v14194_v8 = vld [vmem:[#allocation16 + $0x61c] ss:$48 sps:$4 sm:$0xff]  }
 0x9e1   : > { %7995 = vmatpush2.bf16.msra.mxu1 %v14138_v63  ;;  %8053 = vmatprep.subr.bf16.mxu0 %v14143_v62  ;;  %v14189_v63 = vld [vmem:[#allocation16 + $0x18] ss:$48 sps:$4 sm:$0xff]  }
 0x9e2   : > { %7996 = vmatprep.subr.bf16.mxu1 %v14146_v42  ;;  %v14192_v62 = vld [vmem:[#allocation16 + $0x618] ss:$48 sps:$4 sm:$0xff]   ;;  %v14197_v42 = vld [vmem:[#allocation16 + $0x5bc] ss:$48 sps:$4 sm:$0xff]  }
 0x9e4   : > { %8054 = vmatpush1.bf16.msra.mxu0 %v14141_v18  ;;  %v14200_v18 = vld [vmem:[#allocation16 + $0x2c4] ss:$48 sps:$4 sm:$0xff]  }
 0x9e5   : > { %7997 = vmatpush2.bf16.msra.mxu1 %v14144_v5  ;;  %8112 = vmatprep.subr.bf16.mxu0 %v14149_v33  ;;  %v14195_v5 = vld [vmem:[#allocation16 + $0x5b8] ss:$48 sps:$4 sm:$0xff]   ;;  %v14198_v33 = vld [vmem:[#allocation16 + $0x2c0] ss:$48 sps:$4 sm:$0xff]  }
 0x9e6   : > { %8185 = vmatprep.subr.bf16.mxu1 %v14152_v60  ;;  %v14203_v60 = vld [vmem:[#allocation16 + $0x55c] ss:$48 sps:$4 sm:$0xff]  }
 0x9e7   : > { %8072 = vmatmul.mubr.bf16.vlgmr.msra.gmra.mxu0 %v17654_v10 }
 0x9e8   : > { %7999 = vmatmul.mubr.bf16.vlgmr.msra.gmra.mxu1 %v17656_v20  ;;  %8113 = vmatpush1.bf16.msra.mxu0 %v14147_v9  ;;  %v14206_v9 = vld [vmem:[#allocation16 + $0x264] ss:$48 sps:$4 sm:$0xff]  }
 0x9e9   : > { %8008 = vmatprep.mubr.bf16.mxu1 %v17680_v35  ;;  %8186 = vmatpush1.bf16.msra.mxu1 %v14150_v30  ;;  %v14201_v30 = vld [vmem:[#allocation16 + $0x558] ss:$48 sps:$4 sm:$0xff]  }
 0x9ea   : > { %8114 = vmatprep.subr.bf16.mxu0 %v14155_v32  ;;  %8187 = vmatprep.subr.bf16.mxu1 %v14158_v28  ;;  %v14204_v32 = vld [vmem:[#allocation16 + $0x260] ss:$48 sps:$4 sm:$0xff]   ;;  %v14209_v28 = vld [vmem:[#allocation16 + $0x4fc] ss:$48 sps:$4 sm:$0xff]  }
 0x9eb   : > { %8081 = vmatprep.mubr.bf16.mxu0 %v19290_v31 }
 0x9ec   : > { %8115 = vmatpush1.bf16.msra.mxu0 %v14153_v6  ;;  %v14212_v6 = vld [vmem:[#allocation16 + $0x204] ss:$48 sps:$4 sm:$0xff]  }
 0x9ed   : > { %8188 = vmatpush1.bf16.msra.mxu1 %v14156_v26  ;;  %8116 = vmatprep.subr.bf16.mxu0 %v14161_v0  ;;  %v14207_v26 = vld [vmem:[#allocation16 + $0x4f8] ss:$48 sps:$4 sm:$0xff]   ;;  %v14210_v0 = vld [vmem:[#allocation16 + $0x200] ss:$48 sps:$4 sm:$0xff]  }
 0x9ee   : > { %8189 = vmatprep.subr.bf16.mxu1 %v14164_v25  ;;  %v14215_v25 = vld [vmem:[#allocation16 + $0x49c] ss:$48 sps:$4 sm:$0xff]  }
 0x9ef   : > { %8082 = vmatmul.mubr.bf16.gmra.mxu0 %v17682_v48 }
 0x9f0   : > { %8009 = vmatmul.mubr.bf16.gmra.mxu1 %v17684_v36  ;;  %8117 = vmatpush1.bf16.msra.mxu0 %v14159_v7  ;;  %v14218_v7 = vld [vmem:[#allocation16 + $0x1a4] ss:$48 sps:$4 sm:$0xff]  }
 0x9f1   : > { %8018 = vmatprep.mubr.bf16.mxu1 %v17708_v44  ;;  %8190 = vmatpush1.bf16.msra.mxu1 %v14162_v4  ;;  %v14213_v4 = vld [vmem:[#allocation16 + $0x498] ss:$48 sps:$4 sm:$0xff]  }
 0x9f2   : > { %8118 = vmatprep.subr.bf16.mxu0 %v14167_v57  ;;  %8191 = vmatprep.subr.bf16.mxu1 %v14170_v40  ;;  %v14216_v57 = vld [vmem:[#allocation16 + $0x1a0] ss:$48 sps:$4 sm:$0xff]   ;;  %v14221_v40 = vld [vmem:[#allocation16 + $0x43c] ss:$48 sps:$4 sm:$0xff]  }
 0x9f3   : > { %8091 = vmatprep.mubr.bf16.mxu0 %v19290_v31 }
 0x9f4   : > { %8119 = vmatpush1.bf16.msra.mxu0 %v14165_v12  ;;  %v14224_v12 = vld [vmem:[#allocation16 + $0x144] ss:$48 sps:$4 sm:$0xff]  }
 0x9f5   : > { %8192 = vmatpush1.bf16.msra.mxu1 %v14168_v2  ;;  %8120 = vmatprep.subr.bf16.mxu0 %v14173_v38  ;;  %v14219_v2 = vld [vmem:[#allocation16 + $0x438] ss:$48 sps:$4 sm:$0xff]   ;;  %v14222_v38 = vld [vmem:[#allocation16 + $0x140] ss:$48 sps:$4 sm:$0xff]  }
 0x9f6   : > { %8193 = vmatprep.subr.bf16.mxu1 %v14176_v37  ;;  %v14227_v37 = vld [vmem:[#allocation16 + $0x3dc] ss:$48 sps:$4 sm:$0xff]  }
 0x9f7   : > { %8092 = vmatmul.mubr.bf16.gmra.mxu0 %v17710_v53 }
 0x9f8   : > { %8019 = vmatmul.mubr.bf16.gmra.mxu1 %v17712_v1  ;;  %8121 = vmatpush1.bf16.msra.mxu0 %v14171_v13  ;;  %v14230_v13 = vld [vmem:[#allocation16 + $0xe4] ss:$48 sps:$4 sm:$0xff]  }
 0x9f9   : > { %8028 = vmatprep.mubr.bf16.mxu1 %v17733_v23  ;;  %8194 = vmatpush1.bf16.msra.mxu1 %v14174_v15  ;;  %v14225_v15 = vld [vmem:[#allocation16 + $0x3d8] ss:$48 sps:$4 sm:$0xff]  }
 0x9fa   : > { %8122 = vmatprep.subr.bf16.mxu0 %v14179_v46  ;;  %8195 = vmatprep.subr.bf16.mxu1 %v14182_v29  ;;  %v14228_v46 = vld [vmem:[#allocation16 + $0xe0] ss:$48 sps:$4 sm:$0xff]   ;;  %v14233_v29 = vld [vmem:[#allocation16 + $0x37c] ss:$48 sps:$4 sm:$0xff]  }
 0x9fb   : > { %8101 = vmatprep.mubr.bf16.mxu0 %v19290_v31 }
 0x9fc   : > { %8123 = vmatpush1.bf16.msra.mxu0 %v14177_v14  ;;  %v14236_v14 = vld [vmem:[#allocation16 + $0x84] ss:$48 sps:$4 sm:$0xff]  }
 0x9fd   : > { %8196 = vmatpush1.bf16.msra.mxu1 %v14180_v49  ;;  %8124 = vmatprep.subr.bf16.mxu0 %v14185_v11  ;;  %v14231_v49 = vld [vmem:[#allocation16 + $0x378] ss:$48 sps:$4 sm:$0xff]   ;;  %v14234_v11 = vld [vmem:[#allocation16 + $0x80] ss:$48 sps:$4 sm:$0xff]  }
 0x9fe   : > { %8197 = vmatprep.subr.bf16.mxu1 %v14188_v17  ;;  %v14239_v17 = vld [vmem:[#allocation16 + $0x31c] ss:$48 sps:$4 sm:$0xff]  }
 0x9ff   : > { %8102 = vmatmul.mubr.bf16.gmra.mxu0 %v17735_v50 }
 0xa00   : > { %8029 = vmatmul.mubr.bf16.gmra.mxu1 %v17737_v22  ;;  %8125 = vmatpush1.bf16.msra.mxu0 %v14183_v27  ;;  %v14242_v27 = vld [vmem:[#allocation16 + $0x24] ss:$48 sps:$4 sm:$0xff]  }
 0xa01   : > { %8144 = vmatprep.mubr.bf16.mxu0 %v17652_v45  ;;  %8198 = vmatpush1.bf16.msra.mxu1 %v14186_v61  ;;  %v14237_v61 = vld [vmem:[#allocation16 + $0x318] ss:$48 sps:$4 sm:$0xff]  }
 0xa02   : > { %8126 = vmatprep.subr.bf16.mxu0 %v14191_v19  ;;  %8199 = vmatprep.subr.bf16.mxu1 %v14194_v8  ;;  %v14240_v19 = vld [vmem:[#allocation16 + $0x20] ss:$48 sps:$4 sm:$0xff]   ;;  %v14245_v8 = vld [vmem:[#allocation16 + $0x8c4] ss:$48 sps:$4 sm:$0xff]  }
 0xa03   : > { %8217 = vmatprep.mubr.bf16.mxu1 %v19290_v31 }
 0xa04   : > { %8127 = vmatpush1.bf16.msra.mxu0 %v14189_v63  ;;  %v14248_v63 = vld [vmem:[#allocation16 + $0x5c4] ss:$48 sps:$4 sm:$0xff]  }
 0xa05   : > { %8200 = vmatpush1.bf16.msra.mxu1 %v14192_v62  ;;  %8128 = vmatprep.subr.bf16.mxu0 %v14197_v42  ;;  %v14243_v62 = vld [vmem:[#allocation16 + $0x8c0] ss:$48 sps:$4 sm:$0xff]  }
 0xa06   : > { %8258 = vmatprep.subr.bf16.mxu1 %v14200_v18  ;;  %v14246_v42 = vld [vmem:[#allocation16 + $0x5c0] ss:$48 sps:$4 sm:$0xff]   ;;  %v14251_v18 = vld [vmem:[#allocation16 + $0x864] ss:$48 sps:$4 sm:$0xff]  }
 0xa08   : > { %8129 = vmatpush2.bf16.msra.mxu0 %v14195_v5  ;;  %8218 = vmatmul.mubr.bf16.vlgmr.msra.gmra.mxu1 %v17654_v10  ;;  %v14254_v5 = vld [vmem:[#allocation16 + $0x564] ss:$48 sps:$4 sm:$0xff]  }
 0xa09   : > { %8259 = vmatpush1.bf16.msra.mxu1 %v14198_v33  ;;  %8130 = vmatprep.subr.bf16.mxu0 %v14203_v60  ;;  %v14249_v33 = vld [vmem:[#allocation16 + $0x860] ss:$48 sps:$4 sm:$0xff]  }
 0xa0a   : > { %8260 = vmatprep.subr.bf16.mxu1 %v14206_v9  ;;  %8227 = vmatprep.mubr.bf16.mxu1 %v19290_v31  ;;  %v14252_v60 = vld [vmem:[#allocation16 + $0x560] ss:$48 sps:$4 sm:$0xff]   ;;  %v14257_v9 = vld [vmem:[#allocation16 + $0x804] ss:$48 sps:$4 sm:$0xff]  }
 0xa0c   : > { %8131 = vmatpush2.bf16.msra.mxu0 %v14201_v30  ;;  %v14260_v30 = vld [vmem:[#allocation16 + $0x504] ss:$48 sps:$4 sm:$0xff]  }
 0xa0d   : > { %8261 = vmatpush1.bf16.msra.mxu1 %v14204_v32  ;;  %8132 = vmatprep.subr.bf16.mxu0 %v14209_v28  ;;  %v14255_v32 = vld [vmem:[#allocation16 + $0x800] ss:$48 sps:$4 sm:$0xff]  }
 0xa0e   : > { %8262 = vmatprep.subr.bf16.mxu1 %v14212_v6  ;;  %v14258_v28 = vld [vmem:[#allocation16 + $0x500] ss:$48 sps:$4 sm:$0xff]   ;;  %v14263_v6 = vld [vmem:[#allocation16 + $0x7a4] ss:$48 sps:$4 sm:$0xff]  }
 0xa10   : > { %8133 = vmatpush2.bf16.msra.mxu0 %v14207_v26  ;;  %8228 = vmatmul.mubr.bf16.gmra.mxu1 %v17682_v48  ;;  %v14266_v26 = vld [vmem:[#allocation16 + $0x4a4] ss:$48 sps:$4 sm:$0xff]  }
 0xa11   : > { %8263 = vmatpush1.bf16.msra.mxu1 %v14210_v0  ;;  %8134 = vmatprep.subr.bf16.mxu0 %v14215_v25  ;;  %v14261_v0 = vld [vmem:[#allocation16 + $0x7a0] ss:$48 sps:$4 sm:$0xff]  }
 0xa12   : > { %8264 = vmatprep.subr.bf16.mxu1 %v14218_v7  ;;  %8237 = vmatprep.mubr.bf16.mxu1 %v19290_v31  ;;  %v14264_v25 = vld [vmem:[#allocation16 + $0x4a0] ss:$48 sps:$4 sm:$0xff]   ;;  %v14269_v7 = vld [vmem:[#allocation16 + $0x744] ss:$48 sps:$4 sm:$0xff]  }
 0xa14   : > { %8135 = vmatpush2.bf16.msra.mxu0 %v14213_v4  ;;  %v14272_v4 = vld [vmem:[#allocation16 + $0x444] ss:$48 sps:$4 sm:$0xff]  }
 0xa15   : > { %8265 = vmatpush1.bf16.msra.mxu1 %v14216_v57  ;;  %8136 = vmatprep.subr.bf16.mxu0 %v14221_v40  ;;  %v14267_v57 = vld [vmem:[#allocation16 + $0x740] ss:$48 sps:$4 sm:$0xff]  }
 0xa16   : > { %8266 = vmatprep.subr.bf16.mxu1 %v14224_v12  ;;  %v14270_v40 = vld [vmem:[#allocation16 + $0x440] ss:$48 sps:$4 sm:$0xff]   ;;  %v14275_v12 = vld [vmem:[#allocation16 + $0x6e4] ss:$48 sps:$4 sm:$0xff]  }
 0xa18   : > { %8137 = vmatpush2.bf16.msra.mxu0 %v14219_v2  ;;  %8238 = vmatmul.mubr.bf16.gmra.mxu1 %v17710_v53  ;;  %v14278_v2 = vld [vmem:[#allocation16 + $0x3e4] ss:$48 sps:$4 sm:$0xff]  }
 0xa19   : > { %8267 = vmatpush1.bf16.msra.mxu1 %v14222_v38  ;;  %8138 = vmatprep.subr.bf16.mxu0 %v14227_v37  ;;  %v14273_v38 = vld [vmem:[#allocation16 + $0x6e0] ss:$48 sps:$4 sm:$0xff]  }
 0xa1a   : > { %8268 = vmatprep.subr.bf16.mxu1 %v14230_v13  ;;  %8247 = vmatprep.mubr.bf16.mxu1 %v19290_v31  ;;  %v14276_v37 = vld [vmem:[#allocation16 + $0x3e0] ss:$48 sps:$4 sm:$0xff]   ;;  %v14281_v13 = vld [vmem:[#allocation16 + $0x684] ss:$48 sps:$4 sm:$0xff]  }
 0xa1c   : > { %8139 = vmatpush2.bf16.msra.mxu0 %v14225_v15  ;;  %v14284_v15 = vld [vmem:[#allocation16 + $0x384] ss:$48 sps:$4 sm:$0xff]  }
 0xa1d   : > { %8269 = vmatpush1.bf16.msra.mxu1 %v14228_v46  ;;  %8140 = vmatprep.subr.bf16.mxu0 %v14233_v29  ;;  %v14279_v46 = vld [vmem:[#allocation16 + $0x680] ss:$48 sps:$4 sm:$0xff]  }
 0xa1e   : > { %8270 = vmatprep.subr.bf16.mxu1 %v14236_v14  ;;  %v14282_v29 = vld [vmem:[#allocation16 + $0x380] ss:$48 sps:$4 sm:$0xff]   ;;  %v14287_v14 = vld [vmem:[#allocation16 + $0x624] ss:$48 sps:$4 sm:$0xff]  }
 0xa20   : > { %8141 = vmatpush2.bf16.msra.mxu0 %v14231_v49  ;;  %8248 = vmatmul.mubr.bf16.gmra.mxu1 %v17735_v50  ;;  %v14290_v49 = vld [vmem:[#allocation16 + $0x324] ss:$48 sps:$4 sm:$0xff]  }
 0xa21   : > { %8271 = vmatpush1.bf16.msra.mxu1 %v14234_v11  ;;  %8290 = vmatprep.mubr.bf16.mxu1 %v17652_v45  ;;  %v14285_v11 = vld [vmem:[#allocation16 + $0x620] ss:$48 sps:$4 sm:$0xff]  }
 0xa22   : > { %8142 = vmatprep.subr.bf16.mxu0 %v14239_v17  ;;  %8272 = vmatprep.subr.bf16.mxu1 %v14242_v27  ;;  %v14288_v17 = vld [vmem:[#allocation16 + $0x320] ss:$48 sps:$4 sm:$0xff]   ;;  %v14293_v27 = vld [vmem:[#allocation16 + $0x2cc] ss:$48 sps:$4 sm:$0xff]  }
 0xa24   : > { %8143 = vmatpush2.bf16.msra.mxu0 %v14237_v61  ;;  %v14296_v61 = vld [vmem:[#allocation16 + $0x8cc] ss:$48 sps:$4 sm:$0xff]  }
 0xa25   : > { %8273 = vmatpush1.bf16.msra.mxu1 %v14240_v19  ;;  %8331 = vmatprep.subr.bf16.mxu0 %v14245_v8  ;;  %v14291_v19 = vld [vmem:[#allocation16 + $0x2c8] ss:$48 sps:$4 sm:$0xff]  }
 0xa26   : > { %8274 = vmatprep.subr.bf16.mxu1 %v14248_v63  ;;  %v14294_v8 = vld [vmem:[#allocation16 + $0x8c8] ss:$48 sps:$4 sm:$0xff]   ;;  %v14299_v63 = vld [vmem:[#allocation16 + $0x26c] ss:$48 sps:$4 sm:$0xff]  }
 0xa27   : > { %8145 = vmatmul.mubr.bf16.vlgmr.msra.gmra.mxu0 %v17656_v20 }
 0xa28   : > { %8154 = vmatprep.mubr.bf16.mxu0 %v17680_v35  ;;  %8332 = vmatpush1.bf16.msra.mxu0 %v14243_v62  ;;  %v14302_v62 = vld [vmem:[#allocation16 + $0x86c] ss:$48 sps:$4 sm:$0xff]  }
 0xa29   : > { %8275 = vmatpush2.bf16.msra.mxu1 %v14246_v42  ;;  %8333 = vmatprep.subr.bf16.mxu0 %v14251_v18  ;;  %v14297_v18 = vld [vmem:[#allocation16 + $0x268] ss:$48 sps:$4 sm:$0xff]  }
 0xa2a   : > { %8276 = vmatprep.subr.bf16.mxu1 %v14254_v5 }
 0xa2c   : > { %8334 = vmatpush1.bf16.msra.mxu0 %v14249_v33  ;;  %v14300_v33 = vld [vmem:[#allocation16 + $0x868] ss:$48 sps:$4 sm:$0xff]  }
 0xa2d   : > { %8277 = vmatpush2.bf16.msra.mxu1 %v14252_v60  ;;  %8335 = vmatprep.subr.bf16.mxu0 %v14257_v9  ;;  %v14305_v60 = vld [vmem:[#allocation16 + $0x20c] ss:$48 sps:$4 sm:$0xff]  }
 0xa2e   : > { %8278 = vmatprep.subr.bf16.mxu1 %v14260_v30  ;;  %v14308_v30 = vld [vmem:[#allocation16 + $0x80c] ss:$48 sps:$4 sm:$0xff]  }
 0xa2f   : > { %8155 = vmatmul.mubr.bf16.gmra.mxu0 %v17684_v36 }
 0xa30   : > { %8164 = vmatprep.mubr.bf16.mxu0 %v17708_v44  ;;  %8336 = vmatpush1.bf16.msra.mxu0 %v14255_v32 }
 0xa31   : > { %8279 = vmatpush2.bf16.msra.mxu1 %v14258_v28  ;;  %8337 = vmatprep.subr.bf16.mxu0 %v14263_v6  ;;  %v14303_v28 = vld [vmem:[#allocation16 + $0x208] ss:$48 sps:$4 sm:$0xff]  }
 0xa32   : > { %8280 = vmatprep.subr.bf16.mxu1 %v14266_v26  ;;  %v14306_v26 = vld [vmem:[#allocation16 + $0x808] ss:$48 sps:$4 sm:$0xff]  }
 0xa34   : > { %8338 = vmatpush1.bf16.msra.mxu0 %v14261_v0 }
 0xa35   : > { %8281 = vmatpush2.bf16.msra.mxu1 %v14264_v25  ;;  %8339 = vmatprep.subr.bf16.mxu0 %v14269_v7  ;;  %v14311_v25 = vld [vmem:[#allocation16 + $0x1ac] ss:$48 sps:$4 sm:$0xff]  }
 0xa36   : > { %8282 = vmatprep.subr.bf16.mxu1 %v14272_v4  ;;  %v14314_v7 = vld [vmem:[#allocation16 + $0x7ac] ss:$48 sps:$4 sm:$0xff]  }
 0xa37   : > { %8165 = vmatmul.mubr.bf16.gmra.mxu0 %v17712_v1 }
 0xa38   : > { %8174 = vmatprep.mubr.bf16.mxu0 %v17733_v23  ;;  %8340 = vmatpush1.bf16.msra.mxu0 %v14267_v57  ;;  %v14309_v57 = vld [vmem:[#allocation16 + $0x1a8] ss:$48 sps:$4 sm:$0xff]  }
 0xa39   : > { %8283 = vmatpush2.bf16.msra.mxu1 %v14270_v40  ;;  %8341 = vmatprep.subr.bf16.mxu0 %v14275_v12  ;;  %v14312_v12 = vld [vmem:[#allocation16 + $0x7a8] ss:$48 sps:$4 sm:$0xff]  }
 0xa3a   : > { %8284 = vmatprep.subr.bf16.mxu1 %v14278_v2  ;;  %v14317_v2 = vld [vmem:[#allocation16 + $0x14c] ss:$48 sps:$4 sm:$0xff]  }
 0xa3c   : > { %8342 = vmatpush1.bf16.msra.mxu0 %v14273_v38 }
 0xa3d   : > { %8285 = vmatpush2.bf16.msra.mxu1 %v14276_v37  ;;  %8343 = vmatprep.subr.bf16.mxu0 %v14281_v13  ;;  %v14320_v37 = vld [vmem:[#allocation16 + $0x74c] ss:$48 sps:$4 sm:$0xff]  }
 0xa3e   : > { %8286 = vmatprep.subr.bf16.mxu1 %v14284_v15  ;;  %v14315_v15 = vld [vmem:[#allocation16 + $0x148] ss:$48 sps:$4 sm:$0xff]  }
 0xa3f   : > { %8175 = vmatmul.mubr.bf16.gmra.mxu0 %v17737_v22 }
 0xa40   : > { %8344 = vmatpush1.bf16.msra.mxu0 %v14279_v46  ;;  %8363 = vmatprep.mubr.bf16.mxu0 %v19290_v31 }
 0xa41   : > { %8287 = vmatpush2.bf16.msra.mxu1 %v14282_v29  ;;  %8345 = vmatprep.subr.bf16.mxu0 %v14287_v14  ;;  %v14318_v29 = vld [vmem:[#allocation16 + $0x748] ss:$48 sps:$4 sm:$0xff]  }
 0xa42   : > { %8288 = vmatprep.subr.bf16.mxu1 %v14290_v49  ;;  %v14323_v49 = vld [vmem:[#allocation16 + $0xec] ss:$48 sps:$4 sm:$0xff]  }
 0xa44   : > { %8346 = vmatpush1.bf16.msra.mxu0 %v14285_v11  ;;  %v14326_v11 = vld [vmem:[#allocation16 + $0x6ec] ss:$48 sps:$4 sm:$0xff]  }
 0xa45   : > { %8289 = vmatpush2.bf16.msra.mxu1 %v14288_v17  ;;  %8404 = vmatprep.subr.bf16.mxu0 %v14293_v27  ;;  %v14321_v27 = vld [vmem:[#allocation16 + $0xe8] ss:$48 sps:$4 sm:$0xff]  }
 0xa46   : > { %8477 = vmatprep.subr.bf16.mxu1 %v14296_v61 }
 0xa47   : > { %8364 = vmatmul.mubr.bf16.vlgmr.msra.gmra.mxu0 %v17654_v10  ;;  %v17796_v5 = vpop.f32.mrf.mxu0 }
 0xa48   : > { %8291 = vmatmul.mubr.bf16.vlgmr.msra.gmra.mxu1 %v17656_v20  ;;  %8405 = vmatpush1.bf16.msra.mxu0 %v14291_v19  ;;  %v17794_v42 = vpop.f32.mrf.mxu1  ;;  %v14324_v19 = vld [vmem:[#allocation16 + $0x6e8] ss:$48 sps:$4 sm:$0xff]  }
 0xa49   : > { %8300 = vmatprep.mubr.bf16.mxu1 %v17680_v35  ;;  %8478 = vmatpush1.bf16.msra.mxu1 %v14294_v8  ;;  %v17804_v6 = vpop.f32.mrf.mxu0  ;;  %v14329_v8 = vld [vmem:[#allocation16 + $0x8c] ss:$48 sps:$4 sm:$0xff]  }
 0xa4a   : > { %v17799_v9 = vpop.f32.mrf.mxu1  ;;  %8406 = vmatprep.subr.bf16.mxu0 %v14299_v63  ;;  %8479 = vmatprep.subr.bf16.mxu1 %v14302_v62  ;;  %v14332_v62 = vld [vmem:[#allocation16 + $0x68c] ss:$48 sps:$4 sm:$0xff]  }
 0xa4b   : > { %8373 = vmatprep.mubr.bf16.mxu0 %v19290_v31  ;;  %v17812_v40 = vpop.f32.mrf.mxu0 }
 0xa4c   : > { %8407 = vmatpush1.bf16.msra.mxu0 %v14297_v18  ;;  %v17802_v32 = vpop.f32.mrf.mxu1 }
 0xa4d   : > { %8480 = vmatpush1.bf16.msra.mxu1 %v14300_v33  ;;  %8408 = vmatprep.subr.bf16.mxu0 %v14305_v60  ;;  %v17820_v46 = vpop.f32.mrf.mxu0  ;;  %v14327_v33 = vld [vmem:[#allocation16 + $0x88] ss:$48 sps:$4 sm:$0xff]  }
 0xa4e   : > { %v17806_v0 = vpop.f32.mrf.mxu1  ;;  %8481 = vmatprep.subr.bf16.mxu1 %v14308_v30  ;;  %v14330_v30 = vld [vmem:[#allocation16 + $0x688] ss:$48 sps:$4 sm:$0xff]  }
 0xa4f   : > { %8374 = vmatmul.mubr.bf16.gmra.mxu0 %v17682_v48  ;;  %v17828_v61 = vpop.f32.mrf.mxu0 }
 0xa50   : > { %8301 = vmatmul.mubr.bf16.gmra.mxu1 %v17684_v36  ;;  %8409 = vmatpush1.bf16.msra.mxu0 %v14303_v28  ;;  %v17810_v4 = vpop.f32.mrf.mxu1 }
 0xa51   : > { %8310 = vmatprep.mubr.bf16.mxu1 %v17708_v44  ;;  %8482 = vmatpush1.bf16.msra.mxu1 %v14306_v26  ;;  %v17836_v60 = vpop.f32.mrf.mxu0  ;;  %v14335_v26 = vld [vmem:[#allocation16 + $0x2c] ss:$48 sps:$4 sm:$0xff]  }
 0xa52   : > { %v17815_v38 = vpop.f32.mrf.mxu1  ;;  %8410 = vmatprep.subr.bf16.mxu0 %v14311_v25  ;;  %8483 = vmatprep.subr.bf16.mxu1 %v14314_v7  ;;  %v14338_v25 = vld [vmem:[#allocation16 + $0x62c] ss:$48 sps:$4 sm:$0xff]  }
 0xa53   : > { %8383 = vmatprep.mubr.bf16.mxu0 %v19290_v31 }
 0xa54   : > { %8411 = vmatpush1.bf16.msra.mxu0 %v14309_v57  ;;  %v17818_v13 = vpop.f32.mrf.mxu1  ;;  %v14333_v57 = vld [vmem:[#allocation16 + $0x28] ss:$48 sps:$4 sm:$0xff]  }
 0xa55   : > { %8484 = vmatpush1.bf16.msra.mxu1 %v14312_v12  ;;  %8412 = vmatprep.subr.bf16.mxu0 %v14317_v2  ;;  %v17844_v12 = vpop.f32.mrf.mxu0  ;;  %v14336_v2 = vld [vmem:[#allocation16 + $0x628] ss:$48 sps:$4 sm:$0xff]  }
 0xa56   : > { %v17822_v14 = vpop.f32.mrf.mxu1  ;;  %8485 = vmatprep.subr.bf16.mxu1 %v14320_v37  ;;  %v14341_v37 = vld [vmem:[#allocation16 + $0x5cc] ss:$48 sps:$4 sm:$0xff]  }
 0xa57   : > { %8384 = vmatmul.mubr.bf16.gmra.mxu0 %v17710_v53 }
 0xa58   : > { %8311 = vmatmul.mubr.bf16.gmra.mxu1 %v17712_v1  ;;  %8413 = vmatpush1.bf16.msra.mxu0 %v14315_v15  ;;  %v17826_v17 = vpop.f32.mrf.mxu1 }
 0xa59   : > { %8320 = vmatprep.mubr.bf16.mxu1 %v17733_v23  ;;  %8486 = vmatpush1.bf16.msra.mxu1 %v14318_v29  ;;  %v14344_v29 = vld [vmem:[#allocation19 + $0xac] ss:$12 sps:$4 sm:$0xff]  }
 0xa5a   : > { %v17831_v63 = vpop.f32.mrf.mxu1  ;;  %8414 = vmatprep.subr.bf16.mxu0 %v14323_v49  ;;  %8487 = vmatprep.subr.bf16.mxu1 %v14326_v11  ;;  %v14339_v11 = vld [vmem:[#allocation16 + $0x5c8] ss:$48 sps:$4 sm:$0xff]  }
 0xa5b   : > { %8393 = vmatprep.mubr.bf16.mxu0 %v19290_v31 }
 0xa5c   : > { %8415 = vmatpush1.bf16.msra.mxu0 %v14321_v27  ;;  %v17834_v18 = vpop.f32.mrf.mxu1  ;;  %v17852_v27 = vpop.f32.mrf.mxu0 }
 0xa5d   : > { %8488 = vmatpush1.bf16.msra.mxu1 %v14324_v19  ;;  %8416 = vmatprep.subr.bf16.mxu0 %v14329_v8  ;;  %v14342_v19 = vld [vmem:[#allocation19 + $0xa8] ss:$12 sps:$4 sm:$0xff]  }
 0xa5e   : > { %v17838_v28 = vpop.f32.mrf.mxu1  ;;  %8489 = vmatprep.subr.bf16.mxu1 %v14332_v62  ;;  %v14350_v62 = vld [vmem:[#allocation19 + $0x94] ss:$12 sps:$4 sm:$0xff]  }
 0xa5f   : > { %8394 = vmatmul.mubr.bf16.gmra.mxu0 %v17735_v50 }
 0xa60   : > { %8321 = vmatmul.mubr.bf16.gmra.mxu1 %v17737_v22  ;;  %8417 = vmatpush1.bf16.msra.mxu0 %v14327_v33  ;;  %v17842_v7 = vpop.f32.mrf.mxu1  ;;  %v14345_v33 = vld [vmem:[#allocation16 + $0x568] ss:$48 sps:$4 sm:$0xff]  }
 0xa61   : > { %8436 = vmatprep.mubr.bf16.mxu0 %v17652_v45  ;;  %8490 = vmatpush1.bf16.msra.mxu1 %v14330_v30  ;;  %v14347_v45 = vld [vmem:[#allocation16 + $0x56c] ss:$48 sps:$4 sm:$0xff]   ;;  %v17857_v30 = vpop.f32.mrf.mxu0 }
 0xa62   : > { %v17847_v15 = vpop.f32.mrf.mxu1  ;;  %8418 = vmatprep.subr.bf16.mxu0 %v14335_v26  ;;  %8491 = vmatprep.subr.bf16.mxu1 %v14338_v25  ;;  %v14348_v26 = vld [vmem:[#allocation19 + $0x90] ss:$12 sps:$4 sm:$0xff]  }
 0xa63   : > { %8509 = vmatprep.mubr.bf16.mxu1 %v19290_v31  ;;  %v14353_v25 = vld [vmem:[#allocation16 + $0x50c] ss:$48 sps:$4 sm:$0xff]  }
 0xa64   : > { %8419 = vmatpush1.bf16.msra.mxu0 %v14333_v57  ;;  %v17850_v49 = vpop.f32.mrf.mxu1 }
 0xa65   : > { %8492 = vmatpush1.bf16.msra.mxu1 %v14336_v2  ;;  %8420 = vmatprep.subr.bf16.mxu0 %v14341_v37  ;;  %v14356_v2 = vld [vmem:[#allocation19 + $0x7c] ss:$12 sps:$4 sm:$0xff]  }
 0xa66   : > { %v17854_v8 = vpop.f32.mrf.mxu1  ;;  %10631 = vmatprep.subr.bf16.mxu1 %v14344_v29  ;;  %v14351_v37 = vld [vmem:[#allocation16 + $0x508] ss:$48 sps:$4 sm:$0xff]   ;;  %v17862_v29 = vpop.f32.mrf.mxu0 }
 0xa68   : > { %8421 = vmatpush2.bf16.msra.mxu0 %v14339_v11  ;;  %8510 = vmatmul.mubr.bf16.vlgmr.msra.gmra.mxu1 %v17654_v10  ;;  %v17859_v57 = vpop.f32.mrf.mxu1  ;;  %v14354_v10 = vld [vmem:[#allocation19 + $0x78] ss:$12 sps:$4 sm:$0xff]   ;;  %v14359_v11 = vld [vmem:[#allocation16 + $0x4ac] ss:$48 sps:$4 sm:$0xff]   ;;  %v17873_v16 = vpop.f32.mrf.mxu0 }
 0xa69   : > { %10632 = vmatpush1.bf16.msra.mxu1 %v14342_v19  ;;  %8422 = vmatprep.subr.bf16.mxu0 %v14347_v45  ;;  %v14362_v19 = vld [vmem:[#allocation19 + $0x64] ss:$12 sps:$4 sm:$0xff]   ;;  %v17866_v45 = vld [vmem:[#allocation17] sm:$0xff] }
 0xa6a   : > { %10633 = vmatprep.subr.bf16.mxu1 %v14350_v62  ;;  %8519 = vmatprep.mubr.bf16.mxu1 %v19290_v31  ;;  %v17864_v34 = vpop.f32.mrf.mxu1  ;;  %v14357_v62 = vld [vmem:[#allocation16 + $0x4a8] ss:$48 sps:$4 sm:$0xff]   ;;  %v17882_v43 = vpop.f32.mrf.mxu0 }
 0xa6c   : > { %8423 = vmatpush2.bf16.msra.mxu0 %v14345_v33  ;;  %v17871_v33 = vrot.slane %v17866_v45, %v19293_v47  ;;  %v17875_v41 = vpop.f32.mrf.mxu1  ;;  %v17889_v3 = vpop.f32.mrf.mxu0 }
 0xa6d   : > { %10634 = vmatpush1.bf16.msra.mxu1 %v14348_v26  ;;  %8424 = vmatprep.subr.bf16.mxu0 %v14353_v25  ;;  %v14360_v26 = vld [vmem:[#allocation19 + $0x60] ss:$12 sps:$4 sm:$0xff]  }
 0xa6e   : > { %10635 = vmatprep.subr.bf16.mxu1 %v14356_v2  ;;  %v14365_v25 = vld [vmem:[#allocation16 + $0x44c] ss:$48 sps:$4 sm:$0xff]   ;;  %v14368_v2 = vld [vmem:[#allocation19 + $0x4c] ss:$12 sps:$4 sm:$0xff]   ;;  %v7711_v52 = vadd.f32 %v17799_v9, %v17871_v33  ;;  %v17884_v54 = vpop.f32.mrf.mxu1 }
 0xa6f   : > { %v14372_v9 = vld [vmem:[#allocation19 + $0x30] ss:$12 sps:$4 sm:$0xff]  }
 0xa70   : > { %8425 = vmatpush2.bf16.msra.mxu0 %v14351_v37  ;;  %8520 = vmatmul.mubr.bf16.gmra.mxu1 %v17682_v48  ;;  %v7715_v48 = vadd.f32 %v17806_v0, %v17871_v33  ;;  %v14363_v37 = vld [vmem:[#allocation16 + $0x448] ss:$48 sps:$4 sm:$0xff]  }
 0xa71   : > { %10636 = vmatpush1.bf16.msra.mxu1 %v14354_v10  ;;  %8426 = vmatprep.subr.bf16.mxu0 %v14359_v11  ;;  %v14366_v10 = vld [vmem:[#allocation19 + $0x48] ss:$12 sps:$4 sm:$0xff]   ;;  %v14371_v11 = vld [vmem:[#allocation16 + $0x3ec] ss:$48 sps:$4 sm:$0xff]   ;;  %v14369_v0 = vld [vmem:[#allocation16 + $0x3e8] ss:$48 sps:$4 sm:$0xff]  }
 0xa72   : > { %10637 = vmatprep.subr.bf16.mxu1 %v14362_v19  ;;  %8529 = vmatprep.mubr.bf16.mxu1 %v19290_v31  ;;  %v14374_v19 = vld [vmem:[#allocation19 + $0x34] ss:$12 sps:$4 sm:$0xff]   ;;  %v7788_v21 = vadd.f32 %v17820_v46, %v7715_v48  ;;  %v14375_v46 = vld [vmem:[#allocation16 + $0x388] ss:$48 sps:$4 sm:$0xff]  }
 0xa74   : > { %8427 = vmatpush2.bf16.msra.mxu0 %v14357_v62  ;;  %v7784_v62 = vadd.f32 %v17804_v6, %v7711_v52  ;;  %v8563_v58 = vmax.f32 %v7788_v21, 0.0  ;;  %v14378_v52 = vld [vmem:[#allocation19 + $0x18] ss:$12 sps:$4 sm:$0xff]  }
 0xa75   : > { %10638 = vmatpush1.bf16.msra.mxu1 %v14360_v26  ;;  %8428 = vmatprep.subr.bf16.mxu0 %v14365_v25  ;;  %v14377_v26 = vld [vmem:[#allocation16 + $0x38c] ss:$48 sps:$4 sm:$0xff]   ;;  %v17891_v25 = vpop.f32.mrf.mxu1 }
 0xa76   : > { %10639 = vmatprep.subr.bf16.mxu1 %v14368_v2  ;;  %19320 = vst [vmem:[#allocation63_spill] sm:$0xff] %v17891_v25  ;;  %v14380_v2 = vld [vmem:[#allocation19 + $0x1c] ss:$12 sps:$4 sm:$0xff]   ;;  %v8551_v48 = vmax.f32 %v7784_v62, 0.0 }
 0xa77   : > { %v17896_v6 = vpop.f32.mrf.mxu1 }
 0xa78   : > { %8429 = vmatpush2.bf16.msra.mxu0 %v14363_v37  ;;  %8530 = vmatmul.mubr.bf16.gmra.mxu1 %v17710_v53  ;;  %v17894_v53 = vpop.f32.mrf.mxu0  ;;  %v14383_v37 = vld [vmem:[#allocation16 + $0x32c] ss:$48 sps:$4 sm:$0xff]  }
 0xa79   : > { %10640 = vmatpush1.bf16.msra.mxu1 %v14366_v10  ;;  %8430 = vmatprep.subr.bf16.mxu0 %v14371_v11  ;;  %v14386_v10 = vld [vmem:[#allocation19 + $0x4] ss:$12 sps:$4 sm:$0xff]   ;;  %v17898_v11 = vpack.c.bf16 %v8563_v58, %v8551_v48  ;;  %v17904_v62 = vpop.f32.mrf.mxu1  ;;  %v14398_v48 = vld [vmem:[#allocation19 + $0x154] ss:$12 sps:$4 sm:$0xff]  }
 0xa7a   : > { %10641 = vmatprep.subr.bf16.mxu1 %v14374_v19  ;;  %8539 = vmatprep.mubr.bf16.mxu1 %v19290_v31  ;;  %v14381_v31 = vld [vmem:[#allocation16 + $0x328] ss:$48 sps:$4 sm:$0xff]   ;;  %v17901_v21 = vpop.f32.mrf.mxu0 }
 0xa7b   : > { %19321 = vst [vmem:[#allocation62_spill] sm:$0xff] %v17898_v11  ;;  %v14384_v19 = vld [vmem:[#allocation19] ss:$12 sps:$4 sm:$0xff]  }
 0xa7c   : > { %8431 = vmatpush2.bf16.msra.mxu0 %v14369_v0  ;;  %v14389_v0 = vld [vmem:[#allocation19 + $0x22c] ss:$12 sps:$4 sm:$0xff]   ;;  %v17906_v58 = vpop.f32.mrf.mxu0 }
 0xa7d   : > { %10642 = vmatpush1.bf16.msra.mxu1 %v14372_v9  ;;  %8432 = vmatprep.subr.bf16.mxu0 %v14377_v26  ;;  %v14392_v9 = vld [vmem:[#allocation19 + $0x16c] ss:$12 sps:$4 sm:$0xff]   ;;  %v14387_v26 = vld [vmem:[#allocation19 + $0x228] ss:$12 sps:$4 sm:$0xff]  }
 0xa7e   : > { %10643 = vmatprep.subr.bf16.mxu1 %v14380_v2  ;;  %v14395_v2 = vld [vmem:[#allocation19 + $0x214] ss:$12 sps:$4 sm:$0xff]  }
 0xa80   : > { %8433 = vmatpush2.bf16.msra.mxu0 %v14375_v46  ;;  %8540 = vmatmul.mubr.bf16.gmra.mxu1 %v17735_v50  ;;  %v14390_v50 = vld [vmem:[#allocation19 + $0x168] ss:$12 sps:$4 sm:$0xff]   ;;  %v17908_v46 = vpop.f32.mrf.mxu1 }
 0xa81   : > { %10644 = vmatpush1.bf16.msra.mxu1 %v14378_v52  ;;  %10663 = vmatprep.mubr.bf16.mxu1 %v17898_v11 }
 0xa82   : > { %8434 = vmatprep.subr.bf16.mxu0 %v14383_v37  ;;  %10645 = vmatprep.subr.bf16.mxu1 %v14386_v10  ;;  %v14393_v37 = vld [vmem:[#allocation19 + $0x210] ss:$12 sps:$4 sm:$0xff]  }
 0xa84   : > { %8435 = vmatpush2.bf16.msra.mxu0 %v14381_v31  ;;  %v14396_v31 = vld [vmem:[#allocation19 + $0x150] ss:$12 sps:$4 sm:$0xff]  }
 0xa85   : > { %10646 = vmatpush1.bf16.msra.mxu1 %v14384_v19  ;;  %10704 = vmatprep.subr.bf16.mxu0 %v14389_v0  ;;  %v14401_v19 = vld [vmem:[#allocation19 + $0x1fc] ss:$12 sps:$4 sm:$0xff]   ;;  %v17914_v0 = vpop.f32.mrf.mxu1 }
 0xa86   : > { %10647 = vmatprep.subr.bf16.mxu1 %v14392_v9  ;;  %19322 = vst [vmem:[#allocation61_spill] sm:$0xff] %v17914_v0  ;;  %v19323_v9 = vld [vmem:[#allocation31_spill] sm:$0xff] }
 0xa87   : > { %v17910_v52 = vpop.f32.mrf.mxu0  ;;  %8437 = vmatmul.mubr.bf16.vlgmr.msra.gmra.mxu0 %v17656_v20  ;;  %v19165_v24 = vsub.s32 3, %v19323_v9  ;;  %v17919_v11 = vpop.f32.mrf.mxu1 }
 0xa88   : > { %8446 = vmatprep.mubr.bf16.mxu0 %v17680_v35  ;;  %10705 = vmatpush1.bf16.msra.mxu0 %v14387_v26  ;;  %v14402_v35 = vld [vmem:[#allocation19 + $0x138] ss:$12 sps:$4 sm:$0xff]   ;;  %19324 = vst [vmem:[#allocation35_spill] sm:$0xff] %v17919_v11 }
 0xa89   : > { %v7856_v10 = vpop.f32.mrf.mxu0  ;;  %10648 = vmatpush2.bf16.msra.mxu1 %v14390_v50  ;;  %10706 = vmatprep.subr.bf16.mxu0 %v14395_v2  ;;  %v14407_v26 = vld [vmem:[#allocation19 + $0x1e4] ss:$12 sps:$4 sm:$0xff]   ;;  %v17932_v47 = vpop.f32.mrf.mxu1 }
 0xa8a   : > { %10649 = vmatprep.subr.bf16.mxu1 %v14398_v48  ;;  %v14410_v50 = vld [vmem:[#allocation19 + $0x124] ss:$12 sps:$4 sm:$0xff]   ;;  %v17927_v48 = vrot.slane %v17866_v45, %v19165_v24  ;;  %19325 = vst [vmem:[#allocation36_spill] sm:$0xff] %v17932_v47 }
 0xa8b   : > { %v17916_v59 = vpop.f32.mrf.mxu0  ;;  %v17940_v25 = vpop.f32.mrf.mxu1 }
 0xa8c   : > { %10707 = vmatpush1.bf16.msra.mxu0 %v14393_v37  ;;  %v14405_v37 = vld [vmem:[#allocation19 + $0x1e0] ss:$12 sps:$4 sm:$0xff]   ;;  %v7857_v24 = vadd.f32 %v7856_v10, %v17927_v48  ;;  %v17948_v10 = vrot.slane %v17866_v45, %v19294_v56  ;;  %v14428_v56 = vld [vmem:[#allocation19 + $0xdc] ss:$12 sps:$4 sm:$0xff]  }
 0xa8d   : > { %v7860_v20 = vpop.f32.mrf.mxu0  ;;  %10650 = vmatpush2.bf16.msra.mxu1 %v14396_v31  ;;  %10708 = vmatprep.subr.bf16.mxu0 %v14401_v19  ;;  %v14408_v19 = vld [vmem:[#allocation19 + $0x120] ss:$12 sps:$4 sm:$0xff]  }
 0xa8e   : > { %10651 = vmatprep.subr.bf16.mxu1 %v14404_v51  ;;  %v14413_v51 = vld [vmem:[#allocation19 + $0x1cc] ss:$12 sps:$4 sm:$0xff]   ;;  %v7861_v0 = vadd.f32 %v7860_v20, %v17927_v48  ;;  %v14422_v20 = vld [vmem:[#allocation19 + $0xf4] ss:$12 sps:$4 sm:$0xff]  }
 0xa8f   : > { %v17921_v2 = vpop.f32.mrf.mxu0  ;;  %8447 = vmatmul.mubr.bf16.gmra.mxu0 %v17684_v36  ;;  %v14416_v36 = vld [vmem:[#allocation19 + $0x10c] ss:$12 sps:$4 sm:$0xff]  }
 0xa90   : > { %8456 = vmatprep.mubr.bf16.mxu0 %v17708_v44  ;;  %10709 = vmatpush1.bf16.msra.mxu0 %v14399_v39  ;;  %v14411_v44 = vld [vmem:[#allocation19 + $0x1c8] ss:$12 sps:$4 sm:$0xff]   ;;  %v7934_v47 = vadd.f32 %v17884_v54, %v7861_v0  ;;  %v14420_v54 = vld [vmem:[#allocation19 + $0xf0] ss:$12 sps:$4 sm:$0xff]  }
 0xa91   : > { %v17930_v31 = vpop.f32.mrf.mxu0  ;;  %10652 = vmatpush2.bf16.msra.mxu1 %v14402_v35  ;;  %10710 = vmatprep.subr.bf16.mxu0 %v14407_v26  ;;  %v14414_v35 = vld [vmem:[#allocation19 + $0x108] ss:$12 sps:$4 sm:$0xff]  }
 0xa92   : > { %10653 = vmatprep.subr.bf16.mxu1 %v14410_v50  ;;  %v14419_v26 = vld [vmem:[#allocation19 + $0x1b4] ss:$12 sps:$4 sm:$0xff]   ;;  %v14425_v0 = vld [vmem:[#allocation19 + $0x19c] ss:$12 sps:$4 sm:$0xff]  }
 0xa93   : > { %v17935_v11 = vpop.f32.mrf.mxu0 }
 0xa94   : > { %10711 = vmatpush1.bf16.msra.mxu0 %v14405_v37  ;;  %v7930_v37 = vadd.f32 %v17864_v34, %v7857_v24  ;;  %v7725_v24 = vadd.f32 %v17822_v14, %v17871_v33 }
 0xa95   : > { %v17938_v39 = vpop.f32.mrf.mxu0  ;;  %10654 = vmatpush2.bf16.msra.mxu1 %v14408_v19  ;;  %10712 = vmatprep.subr.bf16.mxu0 %v14413_v51  ;;  %v14417_v19 = vld [vmem:[#allocation19 + $0x1b0] ss:$12 sps:$4 sm:$0xff]  }
 0xa96   : > { %10655 = vmatprep.subr.bf16.mxu1 %v14416_v36  ;;  %v7713_v36 = vadd.f32 %v17802_v32, %v17948_v10 }
 0xa97   : > { %v17943_v50 = vpop.f32.mrf.mxu0  ;;  %8457 = vmatmul.mubr.bf16.gmra.mxu0 %v17712_v1  ;;  %v17956_v1 = vpop.f32.mrf.mxu1 }
 0xa98   : > { %19326 = vst [vmem:[#allocation31_spill] sm:$0xff] %v17943_v50  ;;  %8466 = vmatprep.mubr.bf16.mxu0 %v17733_v23  ;;  %10713 = vmatpush1.bf16.msra.mxu0 %v14411_v44  ;;  %19327 = vst [vmem:[#allocation64_spill] sm:$0xff] %v17956_v1  ;;  %v8565_v50 = vmax.f32 %v7934_v47, 0.0  ;;  %v7709_v23 = vadd.f32 %v17794_v42, %v17948_v10  ;;  %v8553_v44 = vmax.f32 %v7930_v37, 0.0  ;;  %v14426_v47 = vld [vmem:[#allocation19 + $0xd8] ss:$12 sps:$4 sm:$0xff]  }
 0xa99   : > { %v17952_v51 = vpop.f32.mrf.mxu0  ;;  %10656 = vmatpush2.bf16.msra.mxu1 %v14414_v35  ;;  %10714 = vmatprep.subr.bf16.mxu0 %v14419_v26  ;;  %v14423_v35 = vld [vmem:[#allocation19 + $0x198] ss:$12 sps:$4 sm:$0xff]   ;;  %v7721_v26 = vadd.f32 %v17815_v38, %v17871_v33  ;;  %v7786_v1 = vadd.f32 %v17812_v40, %v7713_v36  ;;  %v17969_v14 = vpop.f32.mrf.mxu1  ;;  %v7798_v37 = vadd.f32 %v17852_v27, %v7725_v24 }
 0xa9a   : > { %10657 = vmatprep.subr.bf16.mxu1 %v14422_v20  ;;  %v14431_v20 = vld [vmem:[#allocation19 + $0x184] ss:$12 sps:$4 sm:$0xff]   ;;  %v7782_v38 = vadd.f32 %v17796_v5, %v7709_v23  ;;  %v7723_v27 = vadd.f32 %v17818_v13, %v17948_v10  ;;  %v7735_v23 = vadd.f32 %v17838_v28, %v17871_v33  ;;  %v7731_v13 = vadd.f32 %v17831_v63, %v17871_v33 }
 0xa9b   : > { %v17960_v34 = vpop.f32.mrf.mxu0  ;;  %v14434_v42 = vld [vmem:[#allocation19 + $0xc4] ss:$12 sps:$4 sm:$0xff]   ;;  %v7794_v40 = vadd.f32 %v17836_v60, %v7721_v26  ;;  %v8562_v36 = vmax.f32 %v7786_v1, 0.0  ;;  %v17984_v24 = vpop.f32.mrf.mxu1  ;;  %v8587_v5 = vmax.f32 %v7798_v37, 0.0  ;;  %v14435_v26 = vld [vmem:[#allocation19 + $0x2e8] ss:$12 sps:$4 sm:$0xff]  }
 0xa9c   : > { %19328 = vst [vmem:[#allocation65_spill] sm:$0xff] %v17960_v34  ;;  %10715 = vmatpush1.bf16.msra.mxu0 %v14417_v19  ;;  %v17971_v34 = vpack.c.bf16 %v8565_v50, %v8553_v44  ;;  %v14437_v50 = vld [vmem:[#allocation19 + $0x2ec] ss:$12 sps:$4 sm:$0xff]   ;;  %v8550_v60 = vmax.f32 %v7782_v38, 0.0  ;;  %v7796_v28 = vadd.f32 %v17844_v12, %v7723_v27  ;;  %v14443_v38 = vld [vmem:[#allocation19 + $0x2d4] ss:$12 sps:$4 sm:$0xff]  }
 0xa9d   : > { %v17966_v32 = vpop.f32.mrf.mxu0  ;;  %10658 = vmatpush2.bf16.msra.mxu1 %v14420_v54  ;;  %10716 = vmatprep.subr.bf16.mxu0 %v14425_v0  ;;  %v14429_v54 = vld [vmem:[#allocation19 + $0x180] ss:$12 sps:$4 sm:$0xff]   ;;  %v8575_v1 = vmax.f32 %v7794_v40, 0.0  ;;  %v17999_v37 = vpop.f32.mrf.mxu1  ;;  %v14449_v27 = vld [vmem:[#allocation19 + $0x2bc] ss:$12 sps:$4 sm:$0xff]  }
 0xa9e   : > { %10659 = vmatprep.subr.bf16.mxu1 %v14428_v56  ;;  %19329 = vst [vmem:[#allocation66_spill] sm:$0xff] %v17971_v34  ;;  %v14432_v56 = vld [vmem:[#allocation19 + $0xc0] ss:$12 sps:$4 sm:$0xff]  }
 0xa9f   : > { %v17974_v19 = vpop.f32.mrf.mxu0  ;;  %8467 = vmatmul.mubr.bf16.gmra.mxu0 %v17737_v22  ;;  %v14440_v22 = vld [vmem:[#allocation19 + $0x3ac] ss:$12 sps:$4 sm:$0xff]   ;;  %v18002_v40 = vpack.c.bf16 %v8587_v5, %v8575_v1  ;;  %v14452_v5 = vld [vmem:[#allocation19 + $0x37c] ss:$12 sps:$4 sm:$0xff]  }
 0xaa0   : > { %10717 = vmatpush1.bf16.msra.mxu0 %v14423_v35  ;;  %10736 = vmatprep.mubr.bf16.mxu0 %v17971_v34  ;;  %v7719_v35 = vadd.f32 %v17810_v4, %v17948_v10  ;;  %v14446_v4 = vld [vmem:[#allocation19 + $0x394] ss:$12 sps:$4 sm:$0xff]   ;;  %v14447_v1 = vld [vmem:[#allocation19 + $0x2b8] ss:$12 sps:$4 sm:$0xff]  }
 0xaa1   : > { %v17980_v0 = vpop.f32.mrf.mxu0  ;;  %10660 = vmatpush2.bf16.msra.mxu1 %v14426_v47  ;;  %10718 = vmatprep.subr.bf16.mxu0 %v14431_v20  ;;  %v14438_v20 = vld [vmem:[#allocation19 + $0x3a8] ss:$12 sps:$4 sm:$0xff]  }
 0xaa2   : > { %10661 = vmatprep.subr.bf16.mxu1 %v14434_v42  ;;  %v17996_v42 = vpack.c.bf16 %v8562_v36, %v8550_v60  ;;  %v7792_v63 = vadd.f32 %v17828_v61, %v7719_v35  ;;  %v14444_v36 = vld [vmem:[#allocation19 + $0x390] ss:$12 sps:$4 sm:$0xff]   ;;  %v7745_v60 = vadd.f32 %v17854_v8, %v17871_v33  ;;  %v7729_v35 = vadd.f32 %v17826_v17, %v17948_v10 }
 0xaa3   : > { %v17988_v44 = vpop.f32.mrf.mxu0  ;;  %v14455_v17 = vld [vmem:[#allocation19 + $0x2a4] ss:$12 sps:$4 sm:$0xff]  }
 0xaa4   : > { %10719 = vmatpush1.bf16.msra.mxu0 %v14429_v54  ;;  %v7808_v54 = vadd.f32 %v17882_v43, %v7735_v23  ;;  %v8586_v43 = vmax.f32 %v7796_v28, 0.0  ;;  %v6196_v28 = vsub.s32 5, %v19323_v9 }
 0xaa5   : > { %v17994_v47 = vpop.f32.mrf.mxu0  ;;  %10662 = vmatpush2.bf16.msra.mxu1 %v14432_v56  ;;  %10720 = vmatprep.subr.bf16.mxu0 %v14437_v50  ;;  %v14441_v56 = vld [vmem:[#allocation19 + $0x2d0] ss:$12 sps:$4 sm:$0xff]   ;;  %v7804_v50 = vadd.f32 %v17862_v29, %v7731_v13  ;;  %v8574_v29 = vmax.f32 %v7792_v63, 0.0 }
 0xaa6   : > { %10777 = vmatprep.subr.bf16.mxu1 %v14440_v22  ;;  %v7733_v22 = vadd.f32 %v17834_v18, %v17948_v10  ;;  %v8611_v23 = vmax.f32 %v7808_v54, 0.0  ;;  %v7741_v18 = vadd.f32 %v17847_v15, %v17871_v33  ;;  %v14458_v63 = vld [vmem:[#allocation19 + $0x364] ss:$12 sps:$4 sm:$0xff]   ;;  %v7802_v15 = vadd.f32 %v17857_v30, %v7729_v35 }
 0xaa7   : > { %v18009_v12 = vpop.f32.mrf.mxu0  ;;  %v8599_v13 = vmax.f32 %v7804_v50, 0.0  ;;  %v7743_v30 = vadd.f32 %v17850_v49, %v17948_v10 }
 0xaa8   : > { %v18005_v34 = vpop.f32.mrf.mxu1  ;;  %10664 = vmatmul.mubr.bf16.vlgmr.msra.gmra.mxu1 %v17996_v42  ;;  %10721 = vmatpush2.bf16.msra.mxu0 %v14435_v26  ;;  %v7806_v8 = vadd.f32 %v17873_v16, %v7733_v22  ;;  %v18035_v16 = vrot.slane %v17866_v45, %v6196_v28  ;;  %v14461_v22 = vld [vmem:[#allocation19 + $0x28c] ss:$12 sps:$4 sm:$0xff]   ;;  %v8598_v35 = vmax.f32 %v7802_v15, 0.0 }
 0xaa9   : > { %10673 = vmatprep.mubr.bf16.mxu1 %v18002_v40  ;;  %10778 = vmatpush1.bf16.msra.mxu1 %v14438_v20  ;;  %v8075_v20 = vpop.f32.mrf.mxu0  ;;  %v18027_v50 = vpack.c.bf16 %v8611_v23, %v8599_v13 }
 0xaaa   : > { %v8002_v61 = vpop.f32.mrf.mxu1  ;;  %10722 = vmatprep.subr.bf16.mxu0 %v14443_v38  ;;  %10779 = vmatprep.subr.bf16.mxu1 %v14446_v4  ;;  %v14450_v38 = vld [vmem:[#allocation19 + $0x378] ss:$12 sps:$4 sm:$0xff]   ;;  %v18023_v4 = vpack.c.bf16 %v8586_v43, %v8574_v29 }
 0xaab   : > { %v18037_v43 = vpop.f32.mrf.mxu0 }
 0xaac   : > { %v18018_v26 = vpop.f32.mrf.mxu1  ;;  %10723 = vmatpush2.bf16.msra.mxu0 %v14441_v56  ;;  %v7818_v56 = vadd.f32 %v17906_v58, %v7745_v60  ;;  %v14456_v58 = vld [vmem:[#allocation19 + $0x360] ss:$12 sps:$4 sm:$0xff]  }
 0xaad   : > { %10780 = vmatpush1.bf16.msra.mxu1 %v14444_v36  ;;  %10724 = vmatprep.subr.bf16.mxu0 %v14449_v27  ;;  %v14453_v36 = vld [vmem:[#allocation19 + $0x2a0] ss:$12 sps:$4 sm:$0xff]   ;;  %v7814_v27 = vadd.f32 %v17894_v53, %v7741_v18  ;;  %v14459_v18 = vld [vmem:[#allocation19 + $0x288] ss:$12 sps:$4 sm:$0xff]   ;;  %v8079_v49 = vpop.f32.mrf.mxu0 }
 0xaae   : > { %v8006_v54 = vpop.f32.mrf.mxu1  ;;  %10781 = vmatprep.subr.bf16.mxu1 %v14452_v5  ;;  %v8610_v5 = vmax.f32 %v7806_v8, 0.0  ;;  %v14464_v60 = vld [vmem:[#allocation19 + $0x34c] ss:$12 sps:$4 sm:$0xff]   ;;  %v8635_v53 = vmax.f32 %v7818_v56, 0.0  ;;  %v14462_v8 = vld [vmem:[#allocation19 + $0x348] ss:$12 sps:$4 sm:$0xff]  }
 0xaaf   : > { %v8007_v29 = vadd.f32 %v8006_v54, %v18035_v16  ;;  %v8623_v28 = vmax.f32 %v7814_v27, 0.0  ;;  %v14467_v56 = vld [vmem:[#allocation19 + $0x274] ss:$12 sps:$4 sm:$0xff]  }
 0xab0   : > { %v18030_v33 = vpop.f32.mrf.mxu1  ;;  %10674 = vmatmul.mubr.bf16.gmra.mxu1 %v18023_v4  ;;  %10725 = vmatpush2.bf16.msra.mxu0 %v14447_v1  ;;  %v7739_v1 = vadd.f32 %v17842_v7, %v17948_v10  ;;  %v14470_v7 = vld [vmem:[#allocation19 + $0x334] ss:$12 sps:$4 sm:$0xff]   ;;  %v18057_v10 = vrot.slane %v17866_v45, %v19295_v55 }
 0xab1   : > { %10683 = vmatprep.mubr.bf16.mxu1 %v18027_v50  ;;  %10782 = vmatpush1.bf16.msra.mxu1 %v14450_v38  ;;  %v8003_v38 = vadd.f32 %v8002_v61, %v18035_v16  ;;  %v8080_v15 = vadd.f32 %v8079_v49, %v8007_v29 }
 0xab2   : > { %v18042_v23 = vpop.f32.mrf.mxu1  ;;  %10726 = vmatprep.subr.bf16.mxu0 %v14455_v17  ;;  %10783 = vmatprep.subr.bf16.mxu1 %v14458_v63  ;;  %v18050_v17 = vpack.c.bf16 %v8610_v5, %v8598_v35  ;;  %v7816_v63 = vadd.f32 %v17901_v21, %v7743_v30  ;;  %v7812_v61 = vadd.f32 %v17889_v3, %v7739_v1  ;;  %v14465_v21 = vld [vmem:[#allocation19 + $0x270] ss:$12 sps:$4 sm:$0xff]   ;;  %v18067_v5 = vpop.f32.mrf.mxu0 }
 0xab3   : > { %v14468_v30 = vld [vmem:[#allocation19 + $0x330] ss:$12 sps:$4 sm:$0xff]   ;;  %v7871_v3 = vadd.f32 %v17938_v39, %v17927_v48 }
 0xab4   : > { %v18047_v13 = vpop.f32.mrf.mxu1  ;;  %10727 = vmatpush2.bf16.msra.mxu0 %v14453_v36  ;;  %v18059_v36 = vpack.c.bf16 %v8635_v53, %v8623_v28  ;;  %v8634_v53 = vmax.f32 %v7816_v63, 0.0  ;;  %v14476_v35 = vld [vmem:[#allocation19 + $0x31c] ss:$12 sps:$4 sm:$0xff]   ;;  %v8622_v1 = vmax.f32 %v7812_v61, 0.0  ;;  %v14474_v63 = vld [vmem:[#allocation19 + $0x318] ss:$12 sps:$4 sm:$0xff]  }
 0xab5   : > { %10784 = vmatpush1.bf16.msra.mxu1 %v14456_v58  ;;  %10728 = vmatprep.subr.bf16.mxu0 %v14461_v22  ;;  %v7859_v58 = vadd.f32 %v17916_v59, %v18057_v10  ;;  %v8076_v22 = vadd.f32 %v8075_v20, %v8003_v38  ;;  %v7855_v59 = vadd.f32 %v17910_v52, %v18057_v10  ;;  %v8567_v20 = vmax.f32 %v8080_v15, 0.0  ;;  %v14471_v38 = vld [vmem:[#allocation19 + $0x258] ss:$12 sps:$4 sm:$0xff]  }
 0xab6   : > { %v18053_v54 = vpop.f32.mrf.mxu1  ;;  %10785 = vmatprep.subr.bf16.mxu1 %v14464_v60  ;;  %v14473_v60 = vld [vmem:[#allocation19 + $0x25c] ss:$12 sps:$4 sm:$0xff]   ;;  %v7944_v52 = vadd.f32 %v17908_v46, %v7871_v3  ;;  %v14482_v15 = vld [vmem:[#allocation19 + $0x304] ss:$12 sps:$4 sm:$0xff]   ;;  %v7869_v46 = vadd.f32 %v17935_v11, %v18057_v10  ;;  %v7865_v11 = vadd.f32 %v17921_v2, %v18057_v10 }
 0xab7   : > { %v7932_v49 = vadd.f32 %v17875_v41, %v7859_v58  ;;  %v8555_v39 = vmax.f32 %v8076_v22, 0.0  ;;  %v7928_v61 = vadd.f32 %v17859_v57, %v7855_v59  ;;  %v14477_v22 = vld [vmem:[#allocation19 + $0x240] ss:$12 sps:$4 sm:$0xff]  }
 0xab8   : > { %v18062_v27 = vpop.f32.mrf.mxu1  ;;  %10684 = vmatmul.mubr.bf16.gmra.mxu1 %v18050_v17  ;;  %10729 = vmatpush2.bf16.msra.mxu0 %v14459_v18  ;;  %v7867_v18 = vadd.f32 %v17930_v31, %v17927_v48  ;;  %v14479_v31 = vld [vmem:[#allocation19 + $0x244] ss:$12 sps:$4 sm:$0xff]   ;;  %v14480_v57 = vld [vmem:[#allocation19 + $0x300] ss:$12 sps:$4 sm:$0xff]   ;;  %v8589_v3 = vmax.f32 %v7944_v52, 0.0 }
 0xab9   : > { %10693 = vmatprep.mubr.bf16.mxu1 %v18059_v36  ;;  %10786 = vmatpush1.bf16.msra.mxu1 %v14462_v8  ;;  %v18081_v8 = vpop.f32.mrf.mxu0  ;;  %v14488_v59 = vld [vmem:[#allocation19 + $0x46c] ss:$12 sps:$4 sm:$0xff]   ;;  %v14486_v52 = vld [vmem:[#allocation19 + $0x468] ss:$12 sps:$4 sm:$0xff]  }
 0xaba   : > { %v18072_v29 = vpop.f32.mrf.mxu1  ;;  %10730 = vmatprep.subr.bf16.mxu0 %v14467_v56  ;;  %10787 = vmatprep.subr.bf16.mxu1 %v14470_v7  ;;  %v18083_v56 = vpack.c.bf16 %v8634_v53, %v8622_v1  ;;  %v7940_v41 = vadd.f32 %v17896_v6, %v7867_v18  ;;  %v14485_v53 = vld [vmem:[#allocation19 + $0x52c] ss:$12 sps:$4 sm:$0xff]   ;;  %v7881_v6 = vadd.f32 %v17966_v32, %v17927_v48 }
 0xabb   : > { %v7877_v18 = vadd.f32 %v17952_v51, %v17927_v48  ;;  %v7942_v32 = vadd.f32 %v17904_v62, %v7869_v46  ;;  %v14494_v51 = vld [vmem:[#allocation19 + $0x454] ss:$12 sps:$4 sm:$0xff]   ;;  %v14489_v46 = vld [vmem:[#allocation19 + $0x510] ss:$12 sps:$4 sm:$0xff]  }
 0xabc   : > { %v18078_v28 = vpop.f32.mrf.mxu1  ;;  %10731 = vmatpush2.bf16.msra.mxu0 %v14465_v21  ;;  %v18089_v21 = vpack.c.bf16 %v8567_v20, %v8555_v39  ;;  %v8552_v20 = vmax.f32 %v7928_v61, 0.0  ;;  %v8577_v1 = vmax.f32 %v7940_v41, 0.0  ;;  %v7954_v2 = vadd.f32 %v17940_v25, %v7881_v6  ;;  %v19333_v41 = vld [vmem:[#allocation63_spill] sm:$0xff] }
 0xabd   : > { %10788 = vmatpush1.bf16.msra.mxu1 %v14468_v30  ;;  %10732 = vmatprep.subr.bf16.mxu0 %v14473_v60  ;;  %v8564_v30 = vmax.f32 %v7932_v49, 0.0  ;;  %v18097_v60 = vpop.f32.mrf.mxu0  ;;  %v14483_v49 = vld [vmem:[#allocation19 + $0x528] ss:$12 sps:$4 sm:$0xff]  }
 0xabe   : > { %v18086_v7 = vpop.f32.mrf.mxu1  ;;  %10789 = vmatprep.subr.bf16.mxu1 %v14476_v35  ;;  %19330 = vst [vmem:[#allocation67_spill] sm:$0xff] %v18089_v21  ;;  %v18118_v61 = vpack.c.bf16 %v8589_v3, %v8577_v1  ;;  %v14492_v3 = vld [vmem:[#allocation19 + $0x450] ss:$12 sps:$4 sm:$0xff]  }
 0xabf   : > { %v18110_v39 = vpack.c.bf16 %v8564_v30, %v8552_v20  ;;  %v19334_v30 = vld [vmem:[#allocation35_spill] sm:$0xff]  ;;  %v8613_v20 = vmax.f32 %v7954_v2, 0.0  ;;  %v19337_v2 = vld [vmem:[#allocation36_spill] sm:$0xff] }
 0xac0   : > { %v18092_v58 = vpop.f32.mrf.mxu1  ;;  %10694 = vmatmul.mubr.bf16.gmra.mxu1 %v18083_v56  ;;  %10733 = vmatpush2.bf16.msra.mxu0 %v14471_v38  ;;  %19332 = vst [vmem:[#allocation69_spill] sm:$0xff] %v18118_v61  ;;  %v7950_v62 = vadd.f32 %v19334_v30, %v7877_v18  ;;  %v14500_v18 = vld [vmem:[#allocation19 + $0x43c] ss:$12 sps:$4 sm:$0xff]  }
 0xac1   : > { %10790 = vmatpush1.bf16.msra.mxu1 %v14474_v63  ;;  %10809 = vmatprep.mubr.bf16.mxu1 %v18089_v21  ;;  %19331 = vst [vmem:[#allocation68_spill] sm:$0xff] %v18110_v39  ;;  %v18113_v63 = vpop.f32.mrf.mxu0 }
 0xac2   : > { %v18102_v35 = vpop.f32.mrf.mxu1  ;;  %10734 = vmatprep.subr.bf16.mxu0 %v14479_v31  ;;  %10791 = vmatprep.subr.bf16.mxu1 %v14482_v15  ;;  %v14491_v31 = vld [vmem:[#allocation19 + $0x514] ss:$12 sps:$4 sm:$0xff]   ;;  %v8601_v30 = vmax.f32 %v7950_v62, 0.0 }
 0xac3   : > { %v18126_v6 = vpop.f32.mrf.mxu0 }
 0xac4   : > { %v18108_v38 = vpop.f32.mrf.mxu1  ;;  %10735 = vmatpush2.bf16.msra.mxu0 %v14477_v22  ;;  %v7938_v22 = vadd.f32 %v19333_v41, %v7865_v11  ;;  %v7891_v11 = vadd.f32 %v17994_v47, %v17927_v48  ;;  %v14498_v47 = vld [vmem:[#allocation19 + $0x438] ss:$12 sps:$4 sm:$0xff]   ;;  %v18144_v62 = vpack.c.bf16 %v8613_v20, %v8601_v30  ;;  %v14504_v20 = vld [vmem:[#allocation19 + $0x420] ss:$12 sps:$4 sm:$0xff]  }
 0xac5   : > { %10792 = vmatpush1.bf16.msra.mxu1 %v14480_v57  ;;  %10850 = vmatprep.subr.bf16.mxu0 %v14485_v53  ;;  %v8588_v57 = vmax.f32 %v7942_v32, 0.0  ;;  %v19335_v53 = vld [vmem:[#allocation65_spill] sm:$0xff]  ;;  %v19336_v32 = vld [vmem:[#allocation31_spill] sm:$0xff] }
 0xac6   : > { %v18116_v15 = vpop.f32.mrf.mxu1  ;;  %10793 = vmatprep.subr.bf16.mxu1 %v14488_v59  ;;  %v7879_v25 = vadd.f32 %v19335_v53, %v18057_v10  ;;  %v14497_v59 = vld [vmem:[#allocation19 + $0x4fc] ss:$12 sps:$4 sm:$0xff]   ;;  %v7875_v41 = vadd.f32 %v19336_v32, %v18057_v10  ;;  %v7887_v53 = vadd.f32 %v17980_v0, %v17927_v48  ;;  %v14506_v48 = vld [vmem:[#allocation19 + $0x424] ss:$12 sps:$4 sm:$0xff]   ;;  %v19338_v0 = vld [vmem:[#allocation61_spill] sm:$0xff] }
 0xac7   : > { %10737 = vmatmul.mubr.bf16.vlgmr.msra.gmra.mxu0 %v18110_v39  ;;  %v18139_v39 = vpop.f32.mrf.mxu0  ;;  %v14512_v32 = vld [vmem:[#allocation19 + $0x40c] ss:$12 sps:$4 sm:$0xff]  }
 0xac8   : > { %10746 = vmatprep.mubr.bf16.mxu0 %v18118_v61  ;;  %10851 = vmatpush1.bf16.msra.mxu0 %v14483_v49  ;;  %v18130_v1 = vpop.f32.mrf.mxu1  ;;  %v8576_v49 = vmax.f32 %v7938_v22, 0.0  ;;  %v7952_v61 = vadd.f32 %v19337_v2, %v7879_v25  ;;  %v7964_v22 = vadd.f32 %v17999_v37, %v7891_v11  ;;  %v14501_v25 = vld [vmem:[#allocation19 + $0x4e0] ss:$12 sps:$4 sm:$0xff]   ;;  %v7889_v37 = vadd.f32 %v17988_v44, %v18057_v10  ;;  %v14507_v44 = vld [vmem:[#allocation19 + $0x4c8] ss:$12 sps:$4 sm:$0xff]  }
 0xac9   : > { %10794 = vmatpush2.bf16.msra.mxu1 %v14486_v52  ;;  %10852 = vmatprep.subr.bf16.mxu0 %v14491_v31  ;;  %v14495_v52 = vld [vmem:[#allocation19 + $0x4f8] ss:$12 sps:$4 sm:$0xff]  }
 0xaca   : > { %10795 = vmatprep.subr.bf16.mxu1 %v14494_v51  ;;  %v18136_v31 = vpack.c.bf16 %v8588_v57, %v8576_v49  ;;  %v14503_v51 = vld [vmem:[#allocation19 + $0x4e4] ss:$12 sps:$4 sm:$0xff]   ;;  %v18142_v21 = vpop.f32.mrf.mxu1  ;;  %v7960_v57 = vadd.f32 %v17969_v14, %v7887_v53  ;;  %v14509_v11 = vld [vmem:[#allocation19 + $0x4cc] ss:$12 sps:$4 sm:$0xff]  }
 0xacc   : > { %10853 = vmatpush1.bf16.msra.mxu0 %v14489_v46  ;;  %v7948_v46 = vadd.f32 %v19338_v0, %v7875_v41  ;;  %v18154_v49 = vpop.f32.mrf.mxu1  ;;  %v7885_v41 = vadd.f32 %v17974_v19, %v18057_v10  ;;  %v8625_v30 = vmax.f32 %v7960_v57, 0.0  ;;  %v14518_v19 = vld [vmem:[#allocation19 + $0x3f4] ss:$12 sps:$4 sm:$0xff]   ;;  %v19339_v10 = vld [vmem:[#allocation64_spill] sm:$0xff] }
 0xacd   : > { %10796 = vmatpush2.bf16.msra.mxu1 %v14492_v3  ;;  %10854 = vmatprep.subr.bf16.mxu0 %v14497_v59  ;;  %v8612_v3 = vmax.f32 %v7952_v61, 0.0  ;;  %v18152_v59 = vpop.f32.mrf.mxu0  ;;  %v6192_v61 = vsub.s32 4, %v19323_v9 }
 0xace   : > { %10797 = vmatprep.subr.bf16.mxu1 %v14500_v18  ;;  %v8637_v18 = vmax.f32 %v7964_v22, 0.0  ;;  %v8600_v14 = vmax.f32 %v7948_v46, 0.0  ;;  %v18164_v22 = vpop.f32.mrf.mxu1  ;;  %v7958_v0 = vadd.f32 %v19339_v10, %v7885_v41 }
 0xacf   : > { %10747 = vmatmul.mubr.bf16.gmra.mxu0 %v18136_v31  ;;  %v18162_v2 = vpop.f32.mrf.mxu0  ;;  %v18171_v46 = vrot.slane %v17866_v45, %v6192_v61 }
 0xad0   : > { %10756 = vmatprep.mubr.bf16.mxu0 %v18144_v62  ;;  %10855 = vmatpush1.bf16.msra.mxu0 %v14495_v52  ;;  %v18159_v53 = vpack.c.bf16 %v8612_v3, %v8600_v14  ;;  %v7962_v52 = vadd.f32 %v17984_v24, %v7889_v37  ;;  %v14513_v24 = vld [vmem:[#allocation19 + $0x4b0] ss:$12 sps:$4 sm:$0xff]   ;;  %v8017_v14 = vadd.f32 %v18053_v54, %v18035_v16 }
 0xad1   : > { %10798 = vmatpush2.bf16.msra.mxu1 %v14498_v47  ;;  %10856 = vmatprep.subr.bf16.mxu0 %v14503_v51  ;;  %v14510_v47 = vld [vmem:[#allocation19 + $0x408] ss:$12 sps:$4 sm:$0xff]   ;;  %v14516_v3 = vld [vmem:[#allocation19 + $0x3f0] ss:$12 sps:$4 sm:$0xff]   ;;  %v8001_v41 = vadd.f32 %v18005_v34, %v18171_v46 }
 0xad2   : > { %10799 = vmatprep.subr.bf16.mxu1 %v14506_v48  ;;  %v14515_v51 = vld [vmem:[#allocation19 + $0x4b4] ss:$12 sps:$4 sm:$0xff]   ;;  %v18166_v48 = vpack.c.bf16 %v8637_v18, %v8625_v30  ;;  %v8636_v57 = vmax.f32 %v7962_v52, 0.0  ;;  %v14521_v37 = vld [vmem:[#allocation19 + $0x49c] ss:$12 sps:$4 sm:$0xff]   ;;  %v8090_v34 = vadd.f32 %v18113_v63, %v8017_v14  ;;  %v8011_v14 = vadd.f32 %v18030_v33, %v18171_v46 }
 0xad3   : > { %v14524_v18 = vld [vmem:[#allocation19 + $0x3dc] ss:$12 sps:$4 sm:$0xff]   ;;  %v14519_v30 = vld [vmem:[#allocation19 + $0x498] ss:$12 sps:$4 sm:$0xff]   ;;  %v8074_v10 = vadd.f32 %v18009_v12, %v8001_v41  ;;  %v6204_v12 = vsub.s32 7, %v19323_v9 }
 0xad4   : > { %10857 = vmatpush1.bf16.msra.mxu0 %v14501_v25  ;;  %v18174_v25 = vpop.f32.mrf.mxu0  ;;  %v14530_v54 = vld [vmem:[#allocation19 + $0x3c4] ss:$12 sps:$4 sm:$0xff]   ;;  %v14536_v63 = vld [vmem:[#allocation19 + $0x6ac] ss:$12 sps:$4 sm:$0xff]   ;;  %v14531_v41 = vld [vmem:[#allocation19 + $0x5e8] ss:$12 sps:$4 sm:$0xff]  }
 0xad5   : > { %10800 = vmatpush2.bf16.msra.mxu1 %v14504_v20  ;;  %10858 = vmatprep.subr.bf16.mxu0 %v14509_v11  ;;  %v8005_v20 = vadd.f32 %v18018_v26, %v18171_v46  ;;  %v18178_v11 = vpop.f32.mrf.mxu1  ;;  %v14522_v26 = vld [vmem:[#allocation19 + $0x3d8] ss:$12 sps:$4 sm:$0xff]   ;;  %v14539_v33 = vld [vmem:[#allocation19 + $0x5d4] ss:$12 sps:$4 sm:$0xff]  }
 0xad6   : > { %10801 = vmatprep.subr.bf16.mxu1 %v14512_v32  ;;  %v8624_v32 = vmax.f32 %v7958_v0, 0.0  ;;  %v18188_v52 = vpop.f32.mrf.mxu0 }
 0xad7   : > { %10757 = vmatmul.mubr.bf16.gmra.mxu0 %v18159_v53 }
 0xad8   : > { %10766 = vmatprep.mubr.bf16.mxu0 %v18166_v48  ;;  %10859 = vmatpush1.bf16.msra.mxu0 %v14507_v44  ;;  %v18184_v61 = vpack.c.bf16 %v8636_v57, %v8624_v32  ;;  %v8013_v44 = vadd.f32 %v18042_v23, %v18035_v16  ;;  %v14525_v23 = vld [vmem:[#allocation19 + $0x480] ss:$12 sps:$4 sm:$0xff]   ;;  %v8554_v32 = vmax.f32 %v8074_v10, 0.0 }
 0xad9   : > { %10802 = vmatpush2.bf16.msra.mxu1 %v14510_v47  ;;  %10860 = vmatprep.subr.bf16.mxu0 %v14515_v51  ;;  %v14527_v47 = vld [vmem:[#allocation19 + $0x484] ss:$12 sps:$4 sm:$0xff]   ;;  %v8078_v51 = vadd.f32 %v18037_v43, %v8005_v20  ;;  %v14528_v57 = vld [vmem:[#allocation19 + $0x3c0] ss:$12 sps:$4 sm:$0xff]  }
 0xada   : > { %10803 = vmatprep.subr.bf16.mxu1 %v14518_v19  ;;  %v18191_v19 = vpop.f32.mrf.mxu1  ;;  %v8086_v0 = vadd.f32 %v18081_v8, %v8013_v44  ;;  %v14533_v43 = vld [vmem:[#allocation19 + $0x5ec] ss:$12 sps:$4 sm:$0xff]   ;;  %v8027_v8 = vadd.f32 %v18086_v7, %v18035_v16  ;;  %v18216_v7 = vrot.slane %v17866_v45, %v6204_v12  ;;  %v14540_v45 = vld [vmem:[#allocation19 + $0x690] ss:$12 sps:$4 sm:$0xff]  }
 0xadb   : > { %v14548_v12 = vld [vmem:[#allocation19 + $0x67c] ss:$12 sps:$4 sm:$0xff]  }
 0xadc   : > { %10861 = vmatpush1.bf16.msra.mxu0 %v14513_v24  ;;  %v18197_v24 = vpop.f32.mrf.mxu0  ;;  %v18201_v20 = vpop.f32.mrf.mxu1  ;;  %v8100_v10 = vadd.f32 %v18162_v2, %v8027_v8  ;;  %v8025_v2 = vadd.f32 %v18078_v28, %v18171_v46 }
 0xadd   : > { %10804 = vmatpush2.bf16.msra.mxu1 %v14516_v3  ;;  %10862 = vmatprep.subr.bf16.mxu0 %v14521_v37  ;;  %v8566_v3 = vmax.f32 %v8078_v51, 0.0  ;;  %v8015_v37 = vadd.f32 %v18047_v13, %v18171_v46  ;;  %v8023_v13 = vadd.f32 %v18072_v29, %v18035_v16 }
 0xade   : > { %10805 = vmatprep.subr.bf16.mxu1 %v14524_v18  ;;  %v8591_v18 = vmax.f32 %v8090_v34, 0.0  ;;  %v8109_v44 = vpop.f32.mrf.mxu0  ;;  %v14542_v34 = vld [vmem:[#allocation19 + $0x694] ss:$12 sps:$4 sm:$0xff]  }
 0xadf   : > { %10767 = vmatmul.mubr.bf16.gmra.mxu0 %v18184_v61  ;;  %v8088_v51 = vadd.f32 %v18097_v60, %v8015_v37  ;;  %v14537_v60 = vld [vmem:[#allocation19 + $0x5d0] ss:$12 sps:$4 sm:$0xff]  }
 0xae0   : > { %10863 = vmatpush1.bf16.msra.mxu0 %v14519_v30  ;;  %v8579_v30 = vmax.f32 %v8086_v0, 0.0  ;;  %v8084_v0 = vadd.f32 %v18067_v5, %v8011_v14  ;;  %v8021_v14 = vadd.f32 %v18062_v27, %v18171_v46 }
 0xae1   : > { %10806 = vmatpush2.bf16.msra.mxu1 %v14522_v26  ;;  %10864 = vmatprep.subr.bf16.mxu0 %v14527_v47  ;;  %v14534_v26 = vld [vmem:[#allocation19 + $0x6a8] ss:$12 sps:$4 sm:$0xff]   ;;  %v18210_v47 = vpack.c.bf16 %v8566_v3, %v8554_v32  ;;  %v8590_v37 = vmax.f32 %v8088_v51, 0.0 }
 0xae2   : > { %10807 = vmatprep.subr.bf16.mxu1 %v14530_v54  ;;  %v18213_v54 = vpop.f32.mrf.mxu1  ;;  %v18221_v29 = vpack.c.bf16 %v8591_v18, %v8579_v30  ;;  %v14545_v3 = vld [vmem:[#allocation19 + $0x5bc] ss:$12 sps:$4 sm:$0xff]   ;;  %v8615_v18 = vmax.f32 %v8100_v10, 0.0  ;;  %v8578_v32 = vmax.f32 %v8084_v0, 0.0  ;;  %v8033_v30 = vadd.f32 %v18102_v35, %v18035_v16  ;;  %v14551_v10 = vld [vmem:[#allocation19 + $0x5a4] ss:$12 sps:$4 sm:$0xff]  }
 0xae3   : > { %v14554_v0 = vld [vmem:[#allocation19 + $0x664] ss:$12 sps:$4 sm:$0xff]   ;;  %v8094_v35 = vadd.f32 %v18126_v6, %v8021_v14  ;;  %v8031_v14 = vadd.f32 %v18092_v58, %v18171_v46  ;;  %v14566_v58 = vld [vmem:[#allocation19 + $0x634] ss:$12 sps:$4 sm:$0xff]  }
 0xae4   : > { %10865 = vmatpush1.bf16.msra.mxu0 %v14525_v23  ;;  %v18240_v51 = vpack.c.bf16 %v8590_v37, %v8578_v32 }
 0xae5   : > { %10808 = vmatpush2.bf16.msra.mxu1 %v14528_v57  ;;  %10866 = vmatprep.subr.bf16.mxu0 %v14533_v43  ;;  %v8096_v57 = vadd.f32 %v18139_v39, %v8023_v13  ;;  %v8037_v39 = vadd.f32 %v18116_v15, %v18035_v16  ;;  %v8098_v15 = vadd.f32 %v18152_v59, %v8025_v2  ;;  %v14549_v59 = vld [vmem:[#allocation19 + $0x5a0] ss:$12 sps:$4 sm:$0xff]   ;;  %v8602_v32 = vmax.f32 %v8094_v35, 0.0 }
 0xae6   : > { %10923 = vmatprep.subr.bf16.mxu1 %v14536_v63  ;;  %v18229_v63 = vpop.f32.mrf.mxu1  ;;  %v8035_v2 = vadd.f32 %v18108_v38, %v18171_v46  ;;  %v15007_v46 = vld [vmem:[#allocation17] sm:$0xff]  ;;  %v8104_v35 = vadd.f32 %v18174_v25, %v8031_v14  ;;  %v14572_v25 = vld [vmem:[#allocation19 + $0x61c] ss:$12 sps:$4 sm:$0xff]  }
 0xae7   : > { %v18219_v23 = vpop.f32.mrf.mxu0  ;;  %v8603_v28 = vmax.f32 %v8096_v57, 0.0  ;;  %v8614_v37 = vmax.f32 %v8098_v15, 0.0  ;;  %v14570_v14 = vld [vmem:[#allocation19 + $0x618] ss:$12 sps:$4 sm:$0xff]  }
 0xae8   : > { %10810 = vmatmul.mubr.bf16.vlgmr.msra.gmra.mxu1 %v18210_v47  ;;  %10867 = vmatpush2.bf16.msra.mxu0 %v14531_v41  ;;  %v14543_v41 = vld [vmem:[#allocation19 + $0x5b8] ss:$12 sps:$4 sm:$0xff]   ;;  %v8108_v15 = vadd.f32 %v18197_v24, %v8035_v2  ;;  %v14561_v24 = vld [vmem:[#allocation19 + $0x570] ss:$12 sps:$4 sm:$0xff]  }
 0xae9   : > { %v8148_v43 = vpop.f32.mrf.mxu0  ;;  %10819 = vmatprep.mubr.bf16.mxu1 %v18221_v29  ;;  %10924 = vmatpush1.bf16.msra.mxu1 %v14534_v26  ;;  %v14546_v26 = vld [vmem:[#allocation19 + $0x678] ss:$12 sps:$4 sm:$0xff]   ;;  %v18249_v16 = vpack.c.bf16 %v8615_v18, %v8603_v28  ;;  %v14555_v28 = vld [vmem:[#allocation19 + $0x588] ss:$12 sps:$4 sm:$0xff]  }
 0xaea   : > { %v8149_v5 = vadd.f32 %v8148_v43, %v18216_v7  ;;  %10868 = vmatprep.subr.bf16.mxu0 %v14539_v33  ;;  %10925 = vmatprep.subr.bf16.mxu1 %v14542_v34  ;;  %v18243_v33 = vpop.f32.mrf.mxu1 }
 0xaeb   : > { %v18234_v8 = vpop.f32.mrf.mxu0 }
 0xaec   : > { %10869 = vmatpush2.bf16.msra.mxu0 %v14537_v60  ;;  %v8222_v34 = vadd.f32 %v18142_v21, %v8149_v5  ;;  %v8110_v60 = vadd.f32 %v8109_v44, %v8037_v39  ;;  %v8106_v21 = vadd.f32 %v18188_v52, %v8033_v30  ;;  %v14557_v44 = vld [vmem:[#allocation19 + $0x58c] ss:$12 sps:$4 sm:$0xff]   ;;  %v18258_v5 = vpop.f32.mrf.mxu1  ;;  %v6200_v52 = vsub.s32 6, %v19323_v9 }
 0xaed   : > { %v8152_v13 = vpop.f32.mrf.mxu0  ;;  %10926 = vmatpush1.bf16.msra.mxu1 %v14540_v45  ;;  %10870 = vmatprep.subr.bf16.mxu0 %v14545_v3  ;;  %v14552_v3 = vld [vmem:[#allocation19 + $0x660] ss:$12 sps:$4 sm:$0xff]  }
 0xaee   : > { %v8153_v27 = vadd.f32 %v8152_v13, %v18216_v7  ;;  %10927 = vmatprep.subr.bf16.mxu1 %v14548_v12  ;;  %v8557_v6 = vmax.f32 %v8222_v34, 0.0  ;;  %v14560_v12 = vld [vmem:[#allocation19 + $0x64c] ss:$12 sps:$4 sm:$0xff]   ;;  %v8639_v18 = vmax.f32 %v8110_v60, 0.0  ;;  %v8627_v38 = vmax.f32 %v8106_v21, 0.0  ;;  %v18268_v34 = vpop.f32.mrf.mxu1 }
 0xaef   : > { %v18247_v57 = vpop.f32.mrf.mxu0  ;;  %v14558_v13 = vld [vmem:[#allocation19 + $0x648] ss:$12 sps:$4 sm:$0xff]   ;;  %v14564_v21 = vld [vmem:[#allocation19 + $0x630] ss:$12 sps:$4 sm:$0xff]  }
 0xaf0   : > { %v8226_v43 = vadd.f32 %v18164_v22, %v8153_v27  ;;  %10820 = vmatmul.mubr.bf16.gmra.mxu1 %v18240_v51  ;;  %10871 = vmatpush2.bf16.msra.mxu0 %v14543_v41  ;;  %v14563_v27 = vld [vmem:[#allocation19 + $0x574] ss:$12 sps:$4 sm:$0xff]   ;;  %v18275_v60 = vpack.c.bf16 %v8639_v18, %v8627_v38  ;;  %v14567_v18 = vld [vmem:[#allocation19 + $0x558] ss:$12 sps:$4 sm:$0xff]  }
 0xaf1   : > { %v8158_v45 = vpop.f32.mrf.mxu0  ;;  %10829 = vmatprep.mubr.bf16.mxu1 %v18249_v16  ;;  %10928 = vmatpush1.bf16.msra.mxu1 %v14546_v26  ;;  %v18265_v26 = vpack.c.bf16 %v8614_v37, %v8602_v32  ;;  %v18282_v37 = vpop.f32.mrf.mxu1 }
 0xaf2   : > { %v8569_v22 = vmax.f32 %v8226_v43, 0.0  ;;  %10872 = vmatprep.subr.bf16.mxu0 %v14551_v10  ;;  %10929 = vmatprep.subr.bf16.mxu1 %v14554_v0  ;;  %v18271_v10 = vrot.slane %v15007_v46, %v6200_v52 }
 0xaf3   : > { %v8160_v39 = vpop.f32.mrf.mxu0 }
 0xaf4   : > { %10873 = vmatpush2.bf16.msra.mxu0 %v14549_v59  ;;  %v18263_v41 = vpack.c.bf16 %v8569_v22, %v8557_v6  ;;  %v8151_v43 = vadd.f32 %v18234_v8, %v18271_v10  ;;  %v8147_v6 = vadd.f32 %v18219_v23, %v18271_v10  ;;  %v8626_v8 = vmax.f32 %v8104_v35, 0.0 }
 0xaf5   : > { %v8162_v30 = vpop.f32.mrf.mxu0  ;;  %10930 = vmatpush1.bf16.msra.mxu1 %v14552_v3  ;;  %10874 = vmatprep.subr.bf16.mxu0 %v14557_v44  ;;  %v14569_v3 = vld [vmem:[#allocation19 + $0x55c] ss:$12 sps:$4 sm:$0xff]   ;;  %v8638_v44 = vmax.f32 %v8108_v15, 0.0  ;;  %v8161_v46 = vadd.f32 %v8160_v39, %v18271_v10 }
 0xaf6   : > { %10882 = vmatprep.mubr.bf16.mxu0 %v18263_v41  ;;  %10931 = vmatprep.subr.bf16.mxu1 %v14560_v12  ;;  %v8163_v2 = vadd.f32 %v8162_v30, %v18216_v7  ;;  %v8159_v12 = vadd.f32 %v8158_v45, %v18216_v7  ;;  %v8224_v52 = vadd.f32 %v18154_v49, %v8151_v43  ;;  %v18293_v30 = vpop.f32.mrf.mxu1  ;;  %v14573_v49 = vld [vmem:[#allocation19 + $0x540] ss:$12 sps:$4 sm:$0xff]  }
 0xaf7   : > { %v18273_v0 = vpop.f32.mrf.mxu0  ;;  %v18291_v38 = vpack.c.bf16 %v8638_v44, %v8626_v8  ;;  %v8220_v15 = vadd.f32 %v18130_v1, %v8147_v6  ;;  %v8157_v44 = vadd.f32 %v18247_v57, %v18271_v10  ;;  %v14591_v6 = vld [vmem:[#allocation19 + $0x828] ss:$12 sps:$4 sm:$0xff]   ;;  %v18314_v57 = vld [vmem:[#allocation17 + $0x8] sm:$0xf] }
 0xaf8   : > { %10830 = vmatmul.mubr.bf16.gmra.mxu1 %v18265_v26  ;;  %10875 = vmatpush2.bf16.msra.mxu0 %v14555_v28  ;;  %v14575_v28 = vld [vmem:[#allocation19 + $0x544] ss:$12 sps:$4 sm:$0xff]   ;;  %v8236_v23 = vadd.f32 %v18213_v54, %v8163_v2  ;;  %v14593_v54 = vld [vmem:[#allocation19 + $0x82c] ss:$12 sps:$4 sm:$0xff]   ;;  %v18302_v43 = vpop.f32.mrf.mxu1 }
 0xaf9   : > { %v8168_v59 = vpop.f32.mrf.mxu0  ;;  %10839 = vmatprep.mubr.bf16.mxu1 %v18275_v60  ;;  %10932 = vmatpush1.bf16.msra.mxu1 %v14558_v13  ;;  %v14578_v13 = vld [vmem:[#allocation19 + $0x604] ss:$12 sps:$4 sm:$0xff]  }
 0xafa   : > { %10876 = vmatprep.subr.bf16.mxu0 %v14563_v27  ;;  %10933 = vmatprep.subr.bf16.mxu1 %v14566_v58  ;;  %v8232_v27 = vadd.f32 %v18191_v19, %v8159_v12  ;;  %v8568_v58 = vmax.f32 %v8224_v52, 0.0  ;;  %v8556_v19 = vmax.f32 %v8220_v15, 0.0  ;;  %v8169_v39 = vadd.f32 %v8168_v59, %v18216_v7  ;;  %v14579_v52 = vld [vmem:[#allocation19 + $0x768] ss:$12 sps:$4 sm:$0xff]  }
 0xafb   : > { %v18287_v22 = vpop.f32.mrf.mxu0  ;;  %v8234_v12 = vadd.f32 %v18201_v20, %v8161_v46  ;;  %v14584_v59 = vld [vmem:[#allocation19 + $0x754] ss:$12 sps:$4 sm:$0xff]   ;;  %v19341_v20 = vld [vmem:[#allocation32_spill] sm:$0xff] }
 0xafc   : > { %10877 = vmatpush2.bf16.msra.mxu0 %v14561_v24  ;;  %v14576_v24 = vld [vmem:[#allocation19 + $0x600] ss:$12 sps:$4 sm:$0xff]   ;;  %v18310_v8 = vpack.c.bf16 %v8568_v58, %v8556_v19 }
 0xafd   : > { %v8172_v32 = vpop.f32.mrf.mxu0  ;;  %10934 = vmatpush1.bf16.msra.mxu1 %v14564_v21  ;;  %10878 = vmatprep.subr.bf16.mxu0 %v14569_v3  ;;  %v8593_v21 = vmax.f32 %v8236_v23, 0.0  ;;  %v14581_v3 = vld [vmem:[#allocation19 + $0x76c] ss:$12 sps:$4 sm:$0xff]   ;;  %v8592_v46 = vmax.f32 %v8234_v12, 0.0 }
 0xafe   : > { %10935 = vmatprep.subr.bf16.mxu1 %v14572_v25  ;;  %v8173_v1 = vadd.f32 %v8172_v32, %v18216_v7  ;;  %v8581_v25 = vmax.f32 %v8232_v27, 0.0  ;;  %v14599_v32 = vld [vmem:[#allocation19 + $0x814] ss:$12 sps:$4 sm:$0xff]   ;;  %v18324_v27 = vrot.slane %v18314_v57, %v19341_v20 }
 0xaff   : > { %v18297_v45 = vpop.f32.mrf.mxu0 }
 0xb00   : > { %10840 = vmatmul.mubr.bf16.gmra.mxu1 %v18291_v38  ;;  %10879 = vmatpush2.bf16.msra.mxu0 %v14567_v18  ;;  %v18316_v23 = vpack.c.bf16 %v8593_v21, %v8581_v25  ;;  %v14605_v21 = vld [vmem:[#allocation19 + $0x7fc] ss:$12 sps:$4 sm:$0xff]   ;;  %v8167_v25 = vadd.f32 %v18273_v0, %v18271_v10  ;;  %v14611_v0 = vld [vmem:[#allocation19 + $0x7e4] ss:$12 sps:$4 sm:$0xff]  }
 0xb01   : > { %v8178_v35 = vpop.f32.mrf.mxu0  ;;  %10936 = vmatpush1.bf16.msra.mxu1 %v14570_v14  ;;  %10880 = vmatprep.subr.bf16.mxu0 %v14575_v28  ;;  %v8255_v14 = vpop.f32.mrf.mxu1  ;;  %v8246_v28 = vadd.f32 %v18268_v34, %v8173_v1  ;;  %v14597_v34 = vld [vmem:[#allocation19 + $0x810] ss:$12 sps:$4 sm:$0xff]  }
 0xb02   : > { %10937 = vmatprep.subr.bf16.mxu1 %v14578_v13  ;;  %19340 = vst [vmem:[#allocation63_spill] sm:$0xff] %v18316_v23  ;;  %v8230_v13 = vadd.f32 %v18178_v11, %v8157_v44  ;;  %v8171_v11 = vadd.f32 %v18287_v22, %v18271_v10  ;;  %v8179_v12 = vadd.f32 %v8178_v35, %v18216_v7 }
 0xb03   : > { %v18307_v2 = vpop.f32.mrf.mxu0  ;;  %v8617_v1 = vmax.f32 %v8246_v28, 0.0 }
 0xb04   : > { %10881 = vmatpush2.bf16.msra.mxu0 %v14573_v49  ;;  %v8242_v49 = vadd.f32 %v18243_v33, %v8169_v39  ;;  %v14587_v33 = vld [vmem:[#allocation19 + $0x73c] ss:$12 sps:$4 sm:$0xff]   ;;  %v8580_v44 = vmax.f32 %v8230_v13, 0.0  ;;  %v14585_v13 = vld [vmem:[#allocation19 + $0x738] ss:$12 sps:$4 sm:$0xff]  }
 0xb05   : > { %v8182_v18 = vpop.f32.mrf.mxu0  ;;  %10938 = vmatpush1.bf16.msra.mxu1 %v14576_v24  ;;  %10996 = vmatprep.subr.bf16.mxu0 %v14593_v54  ;;  %v14582_v54 = vld [vmem:[#allocation19 + $0x750] ss:$12 sps:$4 sm:$0xff]  }
 0xb06   : > { %10939 = vmatprep.subr.bf16.mxu1 %v14581_v3  ;;  %v8183_v3 = vadd.f32 %v8182_v18, %v18216_v7  ;;  %v8605_v22 = vmax.f32 %v8242_v49, 0.0  ;;  %v18341_v28 = vpack.c.bf16 %v8592_v46, %v8580_v44  ;;  %v8244_v18 = vadd.f32 %v18258_v5, %v8171_v11  ;;  %v14590_v49 = vld [vmem:[#allocation19 + $0x724] ss:$12 sps:$4 sm:$0xff]  }
 0xb07   : > { %v18319_v15 = vpop.f32.mrf.mxu0  ;;  %10883 = vmatmul.mubr.bf16.vlgmr.msra.gmra.mxu0 %v18310_v8  ;;  %v8240_v7 = vadd.f32 %v18229_v63, %v8167_v25  ;;  %v8252_v5 = vadd.f32 %v18293_v30, %v8179_v12  ;;  %v14596_v30 = vld [vmem:[#allocation19 + $0x70c] ss:$12 sps:$4 sm:$0xff]  }
 0xb08   : > { %v18327_v58 = vpop.f32.mrf.mxu1  ;;  %10892 = vmatprep.mubr.bf16.mxu0 %v18316_v23  ;;  %10997 = vmatpush1.bf16.msra.mxu0 %v14591_v6  ;;  %v8256_v20 = vadd.f32 %v8255_v14, %v8183_v3  ;;  %v18344_v23 = vpack.c.bf16 %v8617_v1, %v8605_v22  ;;  %v14609_v14 = vld [vmem:[#allocation19 + $0x7e0] ss:$12 sps:$4 sm:$0xff]  }
 0xb09   : > { %v8367_v24 = vpop.f32.mrf.mxu0  ;;  %10940 = vmatpush2.bf16.msra.mxu1 %v14579_v52  ;;  %10998 = vmatprep.subr.bf16.mxu0 %v14599_v32  ;;  %v14603_v32 = vld [vmem:[#allocation19 + $0x7f8] ss:$12 sps:$4 sm:$0xff]   ;;  %v14588_v1 = vld [vmem:[#allocation19 + $0x720] ss:$12 sps:$4 sm:$0xff]   ;;  %v8604_v25 = vmax.f32 %v8240_v7, 0.0 }
 0xb0a   : > { %v8294_v19 = vpop.f32.mrf.mxu1  ;;  %10941 = vmatprep.subr.bf16.mxu1 %v14584_v59  ;;  %19342 = vst [vmem:[#allocation35_spill] sm:$0xff] %v18344_v23  ;;  %v14617_v3 = vld [vmem:[#allocation19 + $0x7cc] ss:$12 sps:$4 sm:$0xff]  }
 0xb0b   : > { %v8295_v39 = vadd.f32 %v8294_v19, %v18324_v27  ;;  %v18336_v6 = vpop.f32.mrf.mxu0 }
 0xb0c   : > { %v18339_v52 = vpop.f32.mrf.mxu1  ;;  %10999 = vmatpush1.bf16.msra.mxu0 %v14597_v34 }
 0xb0d   : > { %v8371_v59 = vpop.f32.mrf.mxu0  ;;  %10942 = vmatpush2.bf16.msra.mxu1 %v14582_v54  ;;  %11000 = vmatprep.subr.bf16.mxu0 %v14605_v21  ;;  %v8368_v35 = vadd.f32 %v8367_v24, %v8295_v39  ;;  %v8616_v54 = vmax.f32 %v8244_v18, 0.0  ;;  %v8181_v21 = vadd.f32 %v18307_v2, %v18271_v10  ;;  %v8177_v39 = vadd.f32 %v18297_v45, %v18271_v10  ;;  %v14622_v10 = vld [vmem:[#allocation19 + $0x7b4] ss:$12 sps:$4 sm:$0xff]  }
 0xb0e   : > { %v8298_v19 = vpop.f32.mrf.mxu1  ;;  %10943 = vmatprep.subr.bf16.mxu1 %v14587_v33  ;;  %v8641_v33 = vmax.f32 %v8256_v20, 0.0  ;;  %v8629_v2 = vmax.f32 %v8252_v5, 0.0 }
 0xb0f   : > { %v8299_v34 = vadd.f32 %v8298_v19, %v18324_v27  ;;  %v18348_v46 = vpop.f32.mrf.mxu0  ;;  %10893 = vmatmul.mubr.bf16.gmra.mxu0 %v18341_v28  ;;  %v8559_v22 = vmax.f32 %v8368_v35, 0.0  ;;  %v8254_v20 = vadd.f32 %v18302_v43, %v8181_v21  ;;  %v14602_v35 = vld [vmem:[#allocation19 + $0x6f4] ss:$12 sps:$4 sm:$0xff]   ;;  %v14620_v21 = vld [vmem:[#allocation19 + $0x7b0] ss:$12 sps:$4 sm:$0xff]  }
 0xb10   : > { %v18352_v11 = vpop.f32.mrf.mxu1  ;;  %10902 = vmatprep.mubr.bf16.mxu0 %v18344_v23  ;;  %11001 = vmatpush1.bf16.msra.mxu0 %v14603_v32  ;;  %v18370_v7 = vpack.c.bf16 %v8641_v33, %v8629_v2  ;;  %v19345_v43 = vld [vmem:[#allocation34_spill] sm:$0xff] }
 0xb11   : > { %v8372_v63 = vadd.f32 %v8371_v59, %v8299_v34  ;;  %v18357_v24 = vpop.f32.mrf.mxu0  ;;  %10944 = vmatpush2.bf16.msra.mxu1 %v14585_v13  ;;  %11002 = vmatprep.subr.bf16.mxu0 %v14611_v0  ;;  %v14615_v59 = vld [vmem:[#allocation19 + $0x7c8] ss:$12 sps:$4 sm:$0xff]   ;;  %v18365_v13 = vpack.c.bf16 %v8616_v54, %v8604_v25  ;;  %v8250_v34 = vadd.f32 %v18282_v37, %v8177_v39  ;;  %v14600_v37 = vld [vmem:[#allocation19 + $0x6f0] ss:$12 sps:$4 sm:$0xff]  }
 0xb12   : > { %v8304_v44 = vpop.f32.mrf.mxu1  ;;  %10945 = vmatprep.subr.bf16.mxu1 %v14590_v49  ;;  %v14594_v49 = vld [vmem:[#allocation19 + $0x708] ss:$12 sps:$4 sm:$0xff]   ;;  %19344 = vst [vmem:[#allocation31_spill] sm:$0xff] %v18370_v7 }
 0xb13   : > { %v8571_v12 = vmax.f32 %v8372_v63, 0.0  ;;  %v18361_v32 = vpop.f32.mrf.mxu0  ;;  %19343 = vst [vmem:[#allocation65_spill] sm:$0xff] %v18365_v13  ;;  %v8640_v63 = vmax.f32 %v8254_v20, 0.0  ;;  %v14608_v25 = vld [vmem:[#allocation19 + $0x6dc] ss:$12 sps:$4 sm:$0xff]   ;;  %v8628_v39 = vmax.f32 %v8250_v34, 0.0 }
 0xb14   : > { %v18363_v18 = vpop.f32.mrf.mxu1  ;;  %11003 = vmatpush1.bf16.msra.mxu0 %v14609_v14  ;;  %v18379_v14 = vrot.slane %v18314_v57, %v19345_v43  ;;  %v14625_v20 = vld [vmem:[#allocation19 + $0x798] ss:$12 sps:$4 sm:$0xff]  }
 0xb15   : > { %v8381_v0 = vpop.f32.mrf.mxu0  ;;  %10946 = vmatpush2.bf16.msra.mxu1 %v14588_v1  ;;  %v18368_v19 = vpack.c.bf16 %v8571_v12, %v8559_v22  ;;  %11004 = vmatprep.subr.bf16.mxu0 %v14617_v3  ;;  %v14627_v3 = vld [vmem:[#allocation19 + $0x79c] ss:$12 sps:$4 sm:$0xff]  }
 0xb16   : > { %v8308_v45 = vpop.f32.mrf.mxu1  ;;  %10947 = vmatprep.subr.bf16.mxu1 %v14596_v30  ;;  %v8297_v33 = vadd.f32 %v18339_v52, %v18379_v14  ;;  %v8293_v2 = vadd.f32 %v18327_v58, %v18379_v14  ;;  %v14606_v52 = vld [vmem:[#allocation19 + $0x6d8] ss:$12 sps:$4 sm:$0xff]  }
 0xb17   : > { %v18373_v5 = vpop.f32.mrf.mxu0  ;;  %10903 = vmatmul.mubr.bf16.gmra.mxu0 %v18365_v13  ;;  %10955 = vmatprep.mubr.bf16.mxu1 %v18368_v19  ;;  %v8309_v22 = vadd.f32 %v8308_v45, %v18324_v27 }
 0xb18   : > { %v18381_v54 = vpop.f32.mrf.mxu1  ;;  %10912 = vmatprep.mubr.bf16.mxu0 %v18370_v7  ;;  %11005 = vmatpush1.bf16.msra.mxu0 %v14615_v59  ;;  %v8370_v34 = vadd.f32 %v18336_v6, %v8297_v33  ;;  %v14614_v7 = vld [vmem:[#allocation19 + $0x6c4] ss:$12 sps:$4 sm:$0xff]   ;;  %v8366_v58 = vadd.f32 %v18319_v15, %v8293_v2  ;;  %v8307_v33 = vadd.f32 %v18363_v18, %v18379_v14 }
 0xb19   : > { %v18384_v1 = vpop.f32.mrf.mxu0  ;;  %10948 = vmatpush2.bf16.msra.mxu1 %v14594_v49  ;;  %11006 = vmatprep.subr.bf16.mxu0 %v14622_v10  ;;  %v18393_v49 = vpack.c.bf16 %v8640_v63, %v8628_v39  ;;  %v8305_v10 = vadd.f32 %v8304_v44, %v18324_v27  ;;  %v8382_v13 = vadd.f32 %v8381_v0, %v8309_v22  ;;  %v14630_v63 = vld [vmem:[#allocation19 + $0x780] ss:$12 sps:$4 sm:$0xff]   ;;  %v14618_v39 = vld [vmem:[#allocation19 + $0x170] ss:$12 sps:$4 sm:$0xff]  }
 0xb1a   : > { %v8314_v30 = vpop.f32.mrf.mxu1  ;;  %10949 = vmatprep.subr.bf16.mxu1 %v14602_v35  ;;  %v14632_v35 = vld [vmem:[#allocation19 + $0x784] ss:$12 sps:$4 sm:$0xff]   ;;  %v8570_v6 = vmax.f32 %v8370_v34, 0.0  ;;  %v8558_v2 = vmax.f32 %v8366_v58, 0.0  ;;  %v14642_v58 = vld [vmem:[#allocation19 + $0x8d4] ss:$12 sps:$4 sm:$0xff]  }
 0xb1b   : > { %v18389_v12 = vpop.f32.mrf.mxu0  ;;  %19346 = vst [vmem:[#allocation36_spill] sm:$0xff] %v18393_v49  ;;  %v8378_v44 = vadd.f32 %v18357_v24, %v8305_v10  ;;  %v8595_v15 = vmax.f32 %v8382_v13, 0.0  ;;  %v8303_v24 = vadd.f32 %v18352_v11, %v18379_v14  ;;  %v14635_v10 = vld [vmem:[#allocation19 + $0x8e8] ss:$12 sps:$4 sm:$0xff]   ;;  %v14619_v18 = vld [vmem:[#allocation19 + $0xb0] ss:$12 sps:$4 sm:$0xff]   ;;  %v8380_v13 = vadd.f32 %v18361_v32, %v8307_v33 }
 0xb1c   : > { %v8316_v59 = vpop.f32.mrf.mxu1  ;;  %11007 = vmatpush1.bf16.msra.mxu0 %v14620_v21  ;;  %v18412_v34 = vpack.c.bf16 %v8570_v6, %v8558_v2  ;;  %v14624_v32 = vld [vmem:[#allocation19 + $0x98] ss:$12 sps:$4 sm:$0xff]   ;;  %v14628_v33 = vld [vmem:[#allocation19 + $0x140] ss:$12 sps:$4 sm:$0xff]  }
 0xb1d   : > { %10950 = vmatpush2.bf16.msra.mxu1 %v14600_v37  ;;  %11008 = vmatprep.subr.bf16.mxu0 %v14627_v3  ;;  %v8391_v43 = vpop.f32.mrf.mxu0  ;;  %v14612_v37 = vld [vmem:[#allocation19 + $0x6c0] ss:$12 sps:$4 sm:$0xff]   ;;  %v8317_v6 = vadd.f32 %v8316_v59, %v18379_v14  ;;  %v14645_v2 = vld [vmem:[#allocation19 + $0x8b8] ss:$12 sps:$4 sm:$0xff]  }
 0xb1e   : > { %v8318_v45 = vpop.f32.mrf.mxu1  ;;  %10951 = vmatprep.subr.bf16.mxu1 %v14608_v25  ;;  %v14637_v3 = vld [vmem:[#allocation19 + $0x8ec] ss:$12 sps:$4 sm:$0xff]  }
 0xb1f   : > { %10913 = vmatmul.mubr.bf16.gmra.mxu0 %v18393_v49  ;;  %v18404_v25 = vpop.f32.mrf.mxu0  ;;  %v8319_v22 = vadd.f32 %v8318_v45, %v18324_v27  ;;  %v14623_v45 = vld [vmem:[#allocation19 + $0x158] ss:$12 sps:$4 sm:$0xff]   ;;  %v14629_v59 = vld [vmem:[#allocation19 + $0x80] ss:$12 sps:$4 sm:$0xff]  }
 0xb20   : > { %v18399_v21 = vpop.f32.mrf.mxu1  ;;  %11009 = vmatpush1.bf16.msra.mxu0 %v14625_v20 }
 0xb21   : > { %10952 = vmatpush2.bf16.msra.mxu1 %v14606_v52  ;;  %11010 = vmatprep.subr.bf16.mxu0 %v14632_v35  ;;  %v8583_v52 = vmax.f32 %v8378_v44, 0.0  ;;  %v8315_v35 = vadd.f32 %v8314_v30, %v18324_v27  ;;  %v8392_v49 = vadd.f32 %v8391_v43, %v8319_v22  ;;  %v14640_v30 = vld [vmem:[#allocation19 + $0x8d0] ss:$12 sps:$4 sm:$0xff]  }
 0xb22   : > { %v8324_v0 = vpop.f32.mrf.mxu1  ;;  %10953 = vmatprep.subr.bf16.mxu1 %v14614_v7  ;;  %v8397_v7 = vpop.f32.mrf.mxu0 }
 0xb23   : > { %v18415_v23 = vpack.c.bf16 %v8595_v15, %v8583_v52  ;;  %v8388_v44 = vadd.f32 %v18384_v1, %v8315_v35  ;;  %v8313_v1 = vadd.f32 %v18381_v54, %v18379_v14 }
 0xb24   : > { %v18409_v20 = vpop.f32.mrf.mxu1  ;;  %11011 = vmatpush1.bf16.msra.mxu0 %v14630_v63  ;;  %v8376_v63 = vadd.f32 %v18348_v46, %v8303_v24  ;;  %v8399_v43 = vpop.f32.mrf.mxu0 }
 0xb25   : > { %10954 = vmatpush2.bf16.msra.mxu1 %v14612_v37  ;;  %11012 = vmatprep.subr.bf16.mxu0 %v14637_v3  ;;  %v14647_v37 = vld [vmem:[#allocation19 + $0x8bc] ss:$12 sps:$4 sm:$0xff]   ;;  %v8594_v3 = vmax.f32 %v8380_v13, 0.0  ;;  %v8607_v24 = vmax.f32 %v8388_v44, 0.0  ;;  %v14652_v13 = vld [vmem:[#allocation19 + $0x8a4] ss:$12 sps:$4 sm:$0xff]   ;;  %v8327_v44 = vadd.f32 %v18409_v20, %v18379_v14 }
 0xb26   : > { %12846 = vmatprep.subr.bf16.mxu1 %v14618_v39  ;;  %v8328_v11 = vpop.f32.mrf.mxu1  ;;  %v8619_v39 = vmax.f32 %v8392_v49, 0.0  ;;  %v8582_v22 = vmax.f32 %v8376_v63, 0.0  ;;  %v8390_v49 = vadd.f32 %v18389_v12, %v8317_v6  ;;  %v8401_v35 = vpop.f32.mrf.mxu0  ;;  %v14634_v12 = vld [vmem:[#allocation19 + $0x68] ss:$12 sps:$4 sm:$0xff]   ;;  %v14657_v63 = vld [vmem:[#allocation19 + $0x88c] ss:$12 sps:$4 sm:$0xff]   ;;  %v8323_v6 = vadd.f32 %v18399_v21, %v18379_v14 }
 0xb27   : > { %v8329_v46 = vadd.f32 %v8328_v11, %v18324_v27  ;;  %v8386_v11 = vadd.f32 %v18373_v5, %v8313_v1  ;;  %v14643_v20 = vld [vmem:[#allocation19 + $0xf8] ss:$12 sps:$4 sm:$0xff]   ;;  %v14662_v1 = vld [vmem:[#allocation19 + $0x874] ss:$12 sps:$4 sm:$0xff]   ;;  %v14660_v14 = vld [vmem:[#allocation19 + $0x870] ss:$12 sps:$4 sm:$0xff]  }
 0xb28   : > { %10956 = vmatmul.mubr.bf16.vlgmr.msra.gmra.mxu1 %v18412_v34  ;;  %11013 = vmatpush2.bf16.msra.mxu0 %v14635_v10  ;;  %v18423_v15 = vpop.f32.mrf.mxu1  ;;  %v8325_v10 = vadd.f32 %v8324_v0, %v18324_v27  ;;  %v18428_v52 = vpack.c.bf16 %v8594_v3, %v8582_v22  ;;  %v18433_v54 = vpack.c.bf16 %v8619_v39, %v8607_v24  ;;  %v14650_v27 = vld [vmem:[#allocation19 + $0x8a0] ss:$12 sps:$4 sm:$0xff]   ;;  %v14639_v39 = vld [vmem:[#allocation19 + $0x50] ss:$12 sps:$4 sm:$0xff]   ;;  %v14644_v21 = vld [vmem:[#allocation19 + $0x38] ss:$12 sps:$4 sm:$0xff]  }
 0xb29   : > { %10965 = vmatprep.mubr.bf16.mxu1 %v18415_v23  ;;  %12847 = vmatpush3.bf16.msra.mxu1 %v14619_v18  ;;  %v14633_v18 = vld [vmem:[#allocation19 + $0x128] ss:$12 sps:$4 sm:$0xff]   ;;  %v8606_v5 = vmax.f32 %v8386_v11, 0.0  ;;  %v8400_v22 = vadd.f32 %v8399_v43, %v8327_v44  ;;  %v14648_v43 = vld [vmem:[#allocation19 + $0xe0] ss:$12 sps:$4 sm:$0xff]  }
 0xb2a   : > { %12848 = vmatprep.subr.bf16.mxu1 %v14623_v45  ;;  %11014 = vmatprep.subr.bf16.mxu0 %v14642_v58  ;;  %v8402_v45 = vadd.f32 %v8401_v35, %v8329_v46  ;;  %v18431_v58 = vpop.f32.mrf.mxu1  ;;  %v8398_v0 = vadd.f32 %v8397_v7, %v8325_v10  ;;  %v14655_v7 = vld [vmem:[#allocation19 + $0x888] ss:$12 sps:$4 sm:$0xff]   ;;  %v8396_v10 = vadd.f32 %v18404_v25, %v8323_v6  ;;  %v14649_v25 = vld [vmem:[#allocation19 + $0x20] ss:$12 sps:$4 sm:$0xff]   ;;  %v14675_v44 = vld [vmem:[#allocation19 + $0x2f0] ss:$12 sps:$4 sm:$0xff]  }
 0xb2b   : > { %v14653_v11 = vld [vmem:[#allocation19 + $0xc8] ss:$12 sps:$4 sm:$0xff]   ;;  %v19348_v6 = vsub.s32 3, %v19323_v9  ;;  %v14668_v9 = vld [vmem:[#allocation19 + $0x440] ss:$12 sps:$4 sm:$0xff]  }
 0xb2c   : > { %11015 = vmatpush2.bf16.msra.mxu0 %v14640_v30  ;;  %v8618_v30 = vmax.f32 %v8390_v49, 0.0  ;;  %v18440_v3 = vpop.f32.mrf.mxu1  ;;  %v8642_v49 = vmax.f32 %v8400_v22, 0.0  ;;  %v18468_v22 = vrot.slane %v18314_v57, %v19295_v55 }
 0xb2d   : > { %12849 = vmatpush3.bf16.msra.mxu1 %v14624_v32  ;;  %11016 = vmatprep.subr.bf16.mxu0 %v14647_v37  ;;  %v14638_v32 = vld [vmem:[#allocation19 + $0x110] ss:$12 sps:$4 sm:$0xff]   ;;  %v8643_v37 = vmax.f32 %v8402_v45, 0.0 }
 0xb2e   : > { %12850 = vmatprep.subr.bf16.mxu1 %v14628_v33  ;;  %v8631_v33 = vmax.f32 %v8398_v0, 0.0  ;;  %v18444_v46 = vpack.c.bf16 %v8618_v30, %v8606_v5  ;;  %v14654_v30 = vld [vmem:[#allocation19 + $0x8] ss:$12 sps:$4 sm:$0xff]   ;;  %v14659_v5 = vld [vmem:[#allocation19 + $0x3b0] ss:$12 sps:$4 sm:$0xff]  }
 0xb30   : > { %10966 = vmatmul.mubr.bf16.gmra.mxu1 %v18428_v52  ;;  %11017 = vmatpush2.bf16.msra.mxu0 %v14645_v2  ;;  %v18446_v2 = vpop.f32.mrf.mxu1  ;;  %v18448_v24 = vpack.c.bf16 %v8643_v37, %v8631_v33  ;;  %v14663_v33 = vld [vmem:[#allocation19 + $0x458] ss:$12 sps:$4 sm:$0xff]  }
 0xb31   : > { %10975 = vmatprep.mubr.bf16.mxu1 %v18433_v54  ;;  %12851 = vmatpush3.bf16.msra.mxu1 %v14629_v59  ;;  %v14667_v59 = vld [vmem:[#allocation19 + $0x85c] ss:$12 sps:$4 sm:$0xff]  }
 0xb32   : > { %12852 = vmatprep.subr.bf16.mxu1 %v14633_v18  ;;  %11018 = vmatprep.subr.bf16.mxu0 %v14652_v13  ;;  %v18453_v35 = vpop.f32.mrf.mxu1  ;;  %v8630_v18 = vmax.f32 %v8396_v10, 0.0  ;;  %v14665_v13 = vld [vmem:[#allocation19 + $0x858] ss:$12 sps:$4 sm:$0xff]  }
 0xb33   : > { %v14664_v10 = vld [vmem:[#allocation19 + $0x398] ss:$12 sps:$4 sm:$0xff]  }
 0xb34   : > { %11019 = vmatpush2.bf16.msra.mxu0 %v14650_v27  ;;  %v18455_v45 = vpack.c.bf16 %v8642_v49, %v8630_v18  ;;  %v14672_v27 = vld [vmem:[#allocation19 + $0x844] ss:$12 sps:$4 sm:$0xff]   ;;  %v18457_v0 = vpop.f32.mrf.mxu1  ;;  %v14669_v18 = vld [vmem:[#allocation19 + $0x380] ss:$12 sps:$4 sm:$0xff]  }
 0xb35   : > { %12853 = vmatpush3.bf16.msra.mxu1 %v14634_v12  ;;  %11020 = vmatprep.subr.bf16.mxu0 %v14657_v63  ;;  %v14670_v12 = vld [vmem:[#allocation19 + $0x840] ss:$12 sps:$4 sm:$0xff]  }
 0xb36   : > { %12854 = vmatprep.subr.bf16.mxu1 %v14638_v32  ;;  %v19347_v63 = vld [vmem:[#allocation62_spill] sm:$0xff]  ;;  %v8525_v37 = vpop.f32.mrf.mxu1 }
 0xb37   : > { %v14658_v32 = vld [vmem:[#allocation19 + $0x470] ss:$12 sps:$4 sm:$0xff]  }
 0xb38   : > { %10976 = vmatmul.mubr.bf16.gmra.mxu1 %v18444_v46  ;;  %11021 = vmatpush2.bf16.msra.mxu0 %v14655_v7  ;;  %v18464_v7 = vrot.slane %v18314_v57, %v19348_v6  ;;  %v14677_v6 = vld [vmem:[#allocation19 + $0x410] ss:$12 sps:$4 sm:$0xff]  }
 0xb39   : > { %10985 = vmatprep.mubr.bf16.mxu1 %v18448_v24  ;;  %12855 = vmatpush3.bf16.msra.mxu1 %v14639_v39  ;;  %v8527_v39 = vpop.f32.mrf.mxu1 }
 0xb3a   : > { %12856 = vmatprep.subr.bf16.mxu1 %v14643_v20  ;;  %11022 = vmatprep.subr.bf16.mxu0 %v14662_v1 }
 0xb3c   : > { %11023 = vmatpush2.bf16.msra.mxu0 %v14660_v14 }
 0xb3d   : > { %12857 = vmatpush3.bf16.msra.mxu1 %v14644_v21  ;;  %11024 = vmatprep.subr.bf16.mxu0 %v14667_v59  ;;  %v18473_v21 = vpop.f32.mrf.mxu1 }
 0xb3e   : > { %12858 = vmatprep.subr.bf16.mxu1 %v14648_v43 }
 0xb40   : > { %10986 = vmatmul.mubr.bf16.gmra.mxu1 %v18455_v45  ;;  %11025 = vmatpush2.bf16.msra.mxu0 %v14665_v13 }
 0xb41   : > { %12859 = vmatpush3.bf16.msra.mxu1 %v14649_v25  ;;  %11101 = vmatprep.mubr.bf16.mxu1 %v19347_v63  ;;  %v14673_v25 = vld [vmem:[#allocation19 + $0x428] ss:$12 sps:$4 sm:$0xff]  }
 0xb42   : > { %12860 = vmatprep.subr.bf16.mxu1 %v14653_v11  ;;  %11026 = vmatprep.subr.bf16.mxu0 %v14672_v27  ;;  %v18480_v11 = vpop.f32.mrf.mxu1 }
 0xb44   : > { %11027 = vmatpush2.bf16.msra.mxu0 %v14670_v12 }
 0xb45   : > { %12861 = vmatpush3.bf16.msra.mxu1 %v14654_v30  ;;  %12886 = vmatprep.subr.bf16.mxu0 %v14675_v44 }
 0xb46   : > { %12926 = vmatprep.subr.bf16.mxu1 %v14658_v32 }
 0xb47   : > { %v8438_v20 = vpop.f32.mrf.mxu0 }
 0xb48   : > { %11102 = vmatmul.mubr.bf16.vlgmr.msra.gmra.mxu1 %v17996_v42  ;;  %v8439_v59 = vadd.f32 %v8438_v20, %v18468_v22 }
 0xb49   : > { %v8440_v1 = vpop.f32.mrf.mxu0  ;;  %11109 = vmatprep.mubr.bf16.mxu1 %v18002_v40  ;;  %12927 = vmatpush3.bf16.msra.mxu1 %v14659_v5 }
 0xb4a   : > { %v8441_v14 = vadd.f32 %v8440_v1, %v18464_v7  ;;  %12928 = vmatprep.subr.bf16.mxu1 %v14663_v33  ;;  %v8512_v27 = vadd.f32 %v18423_v15, %v8439_v59  ;;  %v8535_v33 = vpop.f32.mrf.mxu1 }
 0xb4b   : > { %v8442_v49 = vpop.f32.mrf.mxu0 }
 0xb4c   : > { %v8443_v57 = vadd.f32 %v8442_v49, %v18468_v22  ;;  %v8514_v42 = vadd.f32 %v18431_v58, %v8441_v14  ;;  %v14674_v58 = vld [vmem:[#allocation19 + $0x368] ss:$12 sps:$4 sm:$0xff]   ;;  %v8560_v20 = vmax.f32 %v8512_v27, 0.0  ;;  %v14680_v27 = vld [vmem:[#allocation19 + $0x218] ss:$12 sps:$4 sm:$0xff]  }
 0xb4d   : > { %v8444_v43 = vpop.f32.mrf.mxu0  ;;  %12929 = vmatpush3.bf16.msra.mxu1 %v14664_v10  ;;  %v14676_v10 = vld [vmem:[#allocation19 + $0x230] ss:$12 sps:$4 sm:$0xff]  }
 0xb4e   : > { %v8516_v40 = vadd.f32 %v18440_v3, %v8443_v57  ;;  %v8445_v13 = vadd.f32 %v8444_v43, %v18464_v7  ;;  %12930 = vmatprep.subr.bf16.mxu1 %v14668_v9  ;;  %v8561_v3 = vmax.f32 %v8514_v42, 0.0  ;;  %v14678_v9 = vld [vmem:[#allocation19 + $0x350] ss:$12 sps:$4 sm:$0xff]   ;;  %v14679_v43 = vld [vmem:[#allocation19 + $0x2d8] ss:$12 sps:$4 sm:$0xff]   ;;  %v8537_v42 = vpop.f32.mrf.mxu1 }
 0xb4f   : > { %v8448_v12 = vpop.f32.mrf.mxu0 }
 0xb50   : > { %v8518_v63 = vadd.f32 %v18446_v2, %v8445_v13  ;;  %11110 = vmatmul.mubr.bf16.gmra.mxu1 %v18023_v4  ;;  %v8572_v30 = vmax.f32 %v8516_v40, 0.0  ;;  %v8449_v15 = vadd.f32 %v8448_v12, %v18468_v22  ;;  %v14682_v12 = vld [vmem:[#allocation19 + $0x338] ss:$12 sps:$4 sm:$0xff]  }
 0xb51   : > { %v8450_v44 = vpop.f32.mrf.mxu0  ;;  %11117 = vmatprep.mubr.bf16.mxu1 %v18027_v50  ;;  %12931 = vmatpush3.bf16.msra.mxu1 %v14669_v18  ;;  %v14681_v18 = vld [vmem:[#allocation19 + $0x3f8] ss:$12 sps:$4 sm:$0xff]  }
 0xb52   : > { %v8573_v32 = vmax.f32 %v8518_v63, 0.0  ;;  %v8451_v5 = vadd.f32 %v8450_v44, %v18464_v7  ;;  %12932 = vmatprep.subr.bf16.mxu1 %v14673_v25  ;;  %v18491_v14 = vpack.c.bf16 %v8572_v30, %v8560_v20  ;;  %v8522_v40 = vadd.f32 %v18453_v35, %v8449_v15  ;;  %v14683_v63 = vld [vmem:[#allocation19 + $0x2c0] ss:$12 sps:$4 sm:$0xff]  }
 0xb53   : > { %v8452_v1 = vpop.f32.mrf.mxu0  ;;  %v14685_v35 = vld [vmem:[#allocation19 + $0x3e0] ss:$12 sps:$4 sm:$0xff]  }
 0xb54   : > { %v8453_v2 = vadd.f32 %v8452_v1, %v18468_v22  ;;  %v18489_v4 = vpack.c.bf16 %v8573_v32, %v8561_v3  ;;  %v8524_v59 = vadd.f32 %v18457_v0, %v8451_v5  ;;  %v8541_v3 = vpop.f32.mrf.mxu1  ;;  %v14686_v1 = vld [vmem:[#allocation19 + $0x320] ss:$12 sps:$4 sm:$0xff]  }
 0xb55   : > { %v8454_v50 = vpop.f32.mrf.mxu0  ;;  %12933 = vmatpush3.bf16.msra.mxu1 %v14674_v58 }
 0xb56   : > { %v8526_v49 = vadd.f32 %v8525_v37, %v8453_v2  ;;  %v8455_v57 = vadd.f32 %v8454_v50, %v18464_v7  ;;  %11028 = vmatprep.mubr.bf16.mxu0 %v18489_v4  ;;  %12934 = vmatprep.subr.bf16.mxu1 %v14677_v6  ;;  %v8585_v30 = vmax.f32 %v8524_v59, 0.0  ;;  %v14689_v59 = vld [vmem:[#allocation19 + $0x3c8] ss:$12 sps:$4 sm:$0xff]  }
 0xb57   : > { %v8458_v13 = vpop.f32.mrf.mxu0  ;;  %11029 = vmatmul.mubr.bf16.vlgmr.msra.gmra.mxu0 %v18491_v14 }
 0xb58   : > { %v8528_v25 = vadd.f32 %v8527_v39, %v8455_v57  ;;  %11118 = vmatmul.mubr.bf16.gmra.mxu1 %v18050_v17  ;;  %12887 = vmatpush3.bf16.msra.mxu0 %v14676_v10  ;;  %v8596_v0 = vmax.f32 %v8526_v49, 0.0  ;;  %v8584_v39 = vmax.f32 %v8522_v40, 0.0  ;;  %v8459_v17 = vadd.f32 %v8458_v13, %v18468_v22  ;;  %v8543_v49 = vpop.f32.mrf.mxu1  ;;  %v14688_v40 = vld [vmem:[#allocation19 + $0x1e8] ss:$12 sps:$4 sm:$0xff]  }
 0xb59   : > { %v8460_v37 = vpop.f32.mrf.mxu0  ;;  %11125 = vmatprep.mubr.bf16.mxu1 %v18059_v36  ;;  %12935 = vmatpush3.bf16.msra.mxu1 %v14678_v9  ;;  %v14684_v36 = vld [vmem:[#allocation19 + $0x200] ss:$12 sps:$4 sm:$0xff]   ;;  %v14687_v9 = vld [vmem:[#allocation19 + $0x2a8] ss:$12 sps:$4 sm:$0xff]  }
 0xb5a   : > { %v8597_v44 = vmax.f32 %v8528_v25, 0.0  ;;  %v8461_v58 = vadd.f32 %v8460_v37, %v18464_v7  ;;  %12888 = vmatprep.subr.bf16.mxu0 %v14679_v43  ;;  %12936 = vmatprep.subr.bf16.mxu1 %v14681_v18  ;;  %v18505_v20 = vpack.c.bf16 %v8596_v0, %v8584_v39  ;;  %v8532_v57 = vadd.f32 %v18473_v21, %v8459_v17  ;;  %v19349_v13 = vld [vmem:[#allocation67_spill] sm:$0xff]  ;;  %v14693_v21 = vld [vmem:[#allocation19 + $0x770] ss:$12 sps:$4 sm:$0xff]  }
 0xb5b   : > { %v8462_v32 = vpop.f32.mrf.mxu0  ;;  %v14690_v25 = vld [vmem:[#allocation19 + $0x308] ss:$12 sps:$4 sm:$0xff]  }
 0xb5c   : > { %v8463_v5 = vadd.f32 %v8462_v32, %v18468_v22  ;;  %12889 = vmatpush3.bf16.msra.mxu0 %v14680_v27  ;;  %v18503_v6 = vpack.c.bf16 %v8597_v44, %v8585_v30  ;;  %v8534_v2 = vadd.f32 %v18480_v11, %v8461_v58  ;;  %v14691_v27 = vld [vmem:[#allocation19 + $0x290] ss:$12 sps:$4 sm:$0xff]  }
 0xb5d   : > { %v8464_v15 = vpop.f32.mrf.mxu0  ;;  %12937 = vmatpush3.bf16.msra.mxu1 %v14682_v12  ;;  %12890 = vmatprep.subr.bf16.mxu0 %v14683_v63  ;;  %v8545_v63 = vpop.f32.mrf.mxu1  ;;  %v14694_v32 = vld [vmem:[#allocation19 + $0x6b0] ss:$12 sps:$4 sm:$0xff]  }
 0xb5e   : > { %v8536_v10 = vadd.f32 %v8535_v33, %v8463_v5  ;;  %v8465_v50 = vadd.f32 %v8464_v15, %v18464_v7  ;;  %11038 = vmatprep.mubr.bf16.mxu0 %v18503_v6  ;;  %12938 = vmatprep.subr.bf16.mxu1 %v14685_v35  ;;  %v8609_v0 = vmax.f32 %v8534_v2, 0.0  ;;  %v14692_v35 = vld [vmem:[#allocation19 + $0x1d0] ss:$12 sps:$4 sm:$0xff]   ;;  %v14697_v2 = vld [vmem:[#allocation19 + $0x758] ss:$12 sps:$4 sm:$0xff]  }
 0xb5f   : > { %v8468_v43 = vpop.f32.mrf.mxu0  ;;  %11039 = vmatmul.mubr.bf16.gmra.mxu0 %v18505_v20 }
 0xb60   : > { %v8538_v18 = vadd.f32 %v8537_v42, %v8465_v50  ;;  %11126 = vmatmul.mubr.bf16.gmra.mxu1 %v18083_v56  ;;  %12891 = vmatpush3.bf16.msra.mxu0 %v14684_v36  ;;  %v8620_v11 = vmax.f32 %v8536_v10, 0.0  ;;  %v8608_v42 = vmax.f32 %v8532_v57, 0.0  ;;  %v8469_v56 = vadd.f32 %v8468_v43, %v18468_v22 }
 0xb61   : > { %v8470_v33 = vpop.f32.mrf.mxu0  ;;  %12939 = vmatpush3.bf16.msra.mxu1 %v14686_v1  ;;  %11231 = vmatprep.mubr.bf16.mxu1 %v19349_v13  ;;  %v14695_v1 = vld [vmem:[#allocation19 + $0x278] ss:$12 sps:$4 sm:$0xff]   ;;  %v14702_v13 = vld [vmem:[#allocation19 + $0x680] ss:$12 sps:$4 sm:$0xff]  }
 0xb62   : > { %v8621_v37 = vmax.f32 %v8538_v18, 0.0  ;;  %v8471_v12 = vadd.f32 %v8470_v33, %v18464_v7  ;;  %12892 = vmatprep.subr.bf16.mxu0 %v14687_v9  ;;  %12940 = vmatprep.subr.bf16.mxu1 %v14689_v59  ;;  %v18519_v39 = vpack.c.bf16 %v8620_v11, %v8608_v42  ;;  %v8542_v10 = vadd.f32 %v8541_v3, %v8469_v56  ;;  %v14696_v9 = vld [vmem:[#allocation19 + $0x1b8] ss:$12 sps:$4 sm:$0xff]   ;;  %v14701_v18 = vld [vmem:[#allocation19 + $0x740] ss:$12 sps:$4 sm:$0xff]  }
 0xb63   : > { %v8472_v30 = vpop.f32.mrf.mxu0  ;;  %v14700_v33 = vld [vmem:[#allocation19 + $0x1a0] ss:$12 sps:$4 sm:$0xff]   ;;  %v14708_v56 = vld [vmem:[#allocation19 + $0x530] ss:$12 sps:$4 sm:$0xff]  }
 0xb64   : > { %v8473_v44 = vadd.f32 %v8472_v30, %v18468_v22  ;;  %12893 = vmatpush3.bf16.msra.mxu0 %v14688_v40  ;;  %v18517_v58 = vpack.c.bf16 %v8621_v37, %v8609_v0  ;;  %v8544_v5 = vadd.f32 %v8543_v49, %v8471_v12  ;;  %v8547_v22 = vpop.f32.mrf.mxu1  ;;  %v14698_v49 = vld [vmem:[#allocation19 + $0x698] ss:$12 sps:$4 sm:$0xff]   ;;  %v8632_v40 = vmax.f32 %v8542_v10, 0.0  ;;  %v19350_v0 = vld [vmem:[#allocation66_spill] sm:$0xff]  ;;  %v14704_v37 = vld [vmem:[#allocation19 + $0x188] ss:$12 sps:$4 sm:$0xff]  }
 0xb65   : > { %v8474_v17 = vpop.f32.mrf.mxu0  ;;  %12941 = vmatpush3.bf16.msra.mxu1 %v14690_v25  ;;  %12894 = vmatprep.subr.bf16.mxu0 %v14691_v27  ;;  %v14705_v25 = vld [vmem:[#allocation19 + $0x728] ss:$12 sps:$4 sm:$0xff]   ;;  %v14707_v12 = vld [vmem:[#allocation19 + $0x5f0] ss:$12 sps:$4 sm:$0xff]   ;;  %v14711_v30 = vld [vmem:[#allocation19 + $0x5d8] ss:$12 sps:$4 sm:$0xff]  }
 0xb66   : > { %v8546_v36 = vadd.f32 %v8545_v63, %v8473_v44  ;;  %v8475_v15 = vadd.f32 %v8474_v17, %v18464_v7  ;;  %11048 = vmatprep.mubr.bf16.mxu0 %v18517_v58  ;;  %13006 = vmatprep.subr.bf16.mxu1 %v14693_v21  ;;  %v14699_v7 = vld [vmem:[#allocation19 + $0x260] ss:$12 sps:$4 sm:$0xff]   ;;  %v8633_v57 = vmax.f32 %v8544_v5, 0.0  ;;  %v14706_v21 = vld [vmem:[#allocation19 + $0x668] ss:$12 sps:$4 sm:$0xff]  }
 0xb67   : > { %11049 = vmatmul.mubr.bf16.gmra.mxu0 %v18519_v39  ;;  %v14709_v63 = vld [vmem:[#allocation19 + $0x710] ss:$12 sps:$4 sm:$0xff]   ;;  %v14715_v5 = vld [vmem:[#allocation19 + $0x5c0] ss:$12 sps:$4 sm:$0xff]  }
 0xb68   : > { %v8548_v50 = vadd.f32 %v8547_v22, %v8475_v15  ;;  %12895 = vmatpush3.bf16.msra.mxu0 %v14692_v35  ;;  %11232 = vmatmul.mubr.bf16.vlgmr.msra.gmra.mxu1 %v18210_v47  ;;  %v8644_v59 = vmax.f32 %v8546_v36, 0.0  ;;  %v18526_v3 = vpop.f32.mrf.mxu1  ;;  %v14710_v44 = vld [vmem:[#allocation19 + $0x650] ss:$12 sps:$4 sm:$0xff]   ;;  %v14714_v36 = vld [vmem:[#allocation19 + $0x638] ss:$12 sps:$4 sm:$0xff]  }
 0xb69   : > { %11239 = vmatprep.mubr.bf16.mxu1 %v18221_v29  ;;  %13007 = vmatpush3.bf16.msra.mxu1 %v14694_v32  ;;  %v14703_v29 = vld [vmem:[#allocation19 + $0x248] ss:$12 sps:$4 sm:$0xff]   ;;  %v19351_v35 = vld [vmem:[#allocation68_spill] sm:$0xff] }
 0xb6a   : > { %v8645_v43 = vmax.f32 %v8548_v50, 0.0  ;;  %12896 = vmatprep.subr.bf16.mxu0 %v14695_v1  ;;  %13008 = vmatprep.subr.bf16.mxu1 %v14697_v2  ;;  %v18530_v47 = vpack.c.bf16 %v8644_v59, %v8632_v40  ;;  %v18534_v27 = vpop.f32.mrf.mxu1  ;;  %v19352_v32 = vld [vmem:[#allocation69_spill] sm:$0xff]  ;;  %v14717_v15 = vld [vmem:[#allocation19 + $0x6e0] ss:$12 sps:$4 sm:$0xff]   ;;  %v14732_v40 = vld [vmem:[#allocation19 + $0x830] ss:$12 sps:$4 sm:$0xff]  }
 0xb6b   : > { %v14716_v2 = vld [vmem:[#allocation19 + $0x500] ss:$12 sps:$4 sm:$0xff]   ;;  %v14719_v22 = vld [vmem:[#allocation19 + $0x5a8] ss:$12 sps:$4 sm:$0xff]  }
 0xb6c   : > { %12897 = vmatpush3.bf16.msra.mxu0 %v14696_v9  ;;  %v18528_v11 = vpack.c.bf16 %v8645_v43, %v8633_v57  ;;  %v18539_v42 = vpop.f32.mrf.mxu1  ;;  %v14718_v10 = vld [vmem:[#allocation19 + $0x620] ss:$12 sps:$4 sm:$0xff]   ;;  %v14723_v9 = vld [vmem:[#allocation19 + $0x590] ss:$12 sps:$4 sm:$0xff]   ;;  %v14722_v59 = vld [vmem:[#allocation19 + $0x608] ss:$12 sps:$4 sm:$0xff]  }
 0xb6d   : > { %13009 = vmatpush3.bf16.msra.mxu1 %v14698_v49  ;;  %12898 = vmatprep.subr.bf16.mxu0 %v14699_v7  ;;  %v14725_v7 = vld [vmem:[#allocation19 + $0x578] ss:$12 sps:$4 sm:$0xff]   ;;  %v14728_v43 = vld [vmem:[#allocation19 + $0x4a0] ss:$12 sps:$4 sm:$0xff]  }
 0xb6e   : > { %11058 = vmatprep.mubr.bf16.mxu0 %v18528_v11  ;;  %13010 = vmatprep.subr.bf16.mxu1 %v14701_v18  ;;  %v18542_v17 = vpop.f32.mrf.mxu1  ;;  %v14729_v18 = vld [vmem:[#allocation19 + $0x548] ss:$12 sps:$4 sm:$0xff]  }
 0xb6f   : > { %11059 = vmatmul.mubr.bf16.gmra.mxu0 %v18530_v47 }
 0xb70   : > { %12899 = vmatpush3.bf16.msra.mxu0 %v14700_v33  ;;  %11166 = vmatprep.mubr.bf16.mxu0 %v19350_v0  ;;  %v18547_v1 = vpop.f32.mrf.mxu1  ;;  %v14733_v33 = vld [vmem:[#allocation19 + $0x8d8] ss:$12 sps:$4 sm:$0xff]  }
 0xb71   : > { %11240 = vmatmul.mubr.bf16.gmra.mxu1 %v18240_v51  ;;  %12900 = vmatprep.subr.bf16.mxu0 %v14703_v29  ;;  %v14713_v51 = vld [vmem:[#allocation19 + $0x6f8] ss:$12 sps:$4 sm:$0xff]  }
 0xb72   : > { %11247 = vmatprep.mubr.bf16.mxu1 %v18249_v16  ;;  %13011 = vmatpush3.bf16.msra.mxu1 %v14702_v13  ;;  %v14712_v16 = vld [vmem:[#allocation19 + $0x518] ss:$12 sps:$4 sm:$0xff]   ;;  %v18550_v50 = vpop.f32.mrf.mxu1 }
 0xb73   : > { %13012 = vmatprep.subr.bf16.mxu1 %v14705_v25  ;;  %v19353_v29 = vld [vmem:[#allocation63_spill] sm:$0xff]  ;;  %v14736_v25 = vld [vmem:[#allocation19 + $0x800] ss:$12 sps:$4 sm:$0xff]  }
 0xb74   : > { %12901 = vmatpush3.bf16.msra.mxu0 %v14704_v37  ;;  %v18555_v49 = vpop.f32.mrf.mxu1 }
 0xb75   : > { %12966 = vmatprep.subr.bf16.mxu0 %v14707_v12  ;;  %v19355_v12 = vld [vmem:[#allocation35_spill] sm:$0xff] }
 0xb76   : > { %13013 = vmatpush3.bf16.msra.mxu1 %v14706_v21 }
 0xb77   : > { %11167 = vmatmul.mubr.bf16.vlgmr.msra.gmra.mxu0 %v19351_v35  ;;  %13014 = vmatprep.subr.bf16.mxu1 %v14709_v63 }
 0xb78   : > { %11174 = vmatprep.mubr.bf16.mxu0 %v19352_v32  ;;  %12967 = vmatpush3.bf16.msra.mxu0 %v14708_v56  ;;  %v14740_v56 = vld [vmem:[#allocation19 + $0x7d0] ss:$12 sps:$4 sm:$0xff]   ;;  %v14743_v32 = vld [vmem:[#allocation19 + $0x860] ss:$12 sps:$4 sm:$0xff]  }
 0xb79   : > { %11248 = vmatmul.mubr.bf16.gmra.mxu1 %v18265_v26  ;;  %12968 = vmatprep.subr.bf16.mxu0 %v14711_v30  ;;  %v14721_v26 = vld [vmem:[#allocation19 + $0x6c8] ss:$12 sps:$4 sm:$0xff]   ;;  %v14741_v30 = vld [vmem:[#allocation19 + $0x878] ss:$12 sps:$4 sm:$0xff]  }
 0xb7a   : > { %11255 = vmatprep.mubr.bf16.mxu1 %v18275_v60  ;;  %13015 = vmatpush3.bf16.msra.mxu1 %v14710_v44  ;;  %v14720_v60 = vld [vmem:[#allocation19 + $0x4e8] ss:$12 sps:$4 sm:$0xff]  }
 0xb7b   : > { %13016 = vmatprep.subr.bf16.mxu1 %v14713_v51  ;;  %v19359_v51 = vld [vmem:[#allocation31_spill] sm:$0xff] }
 0xb7c   : > { %12969 = vmatpush3.bf16.msra.mxu0 %v14712_v16 }
 0xb7d   : > { %12970 = vmatprep.subr.bf16.mxu0 %v14715_v5 }
 0xb7e   : > { %13017 = vmatpush3.bf16.msra.mxu1 %v14714_v36  ;;  %v14744_v36 = vld [vmem:[#allocation19 + $0x7a0] ss:$12 sps:$4 sm:$0xff]  }
 0xb7f   : > { %11175 = vmatmul.mubr.bf16.gmra.mxu0 %v18136_v31  ;;  %13018 = vmatprep.subr.bf16.mxu1 %v14717_v15  ;;  %v14724_v31 = vld [vmem:[#allocation19 + $0x4d0] ss:$12 sps:$4 sm:$0xff]   ;;  %v14745_v15 = vld [vmem:[#allocation19 + $0x848] ss:$12 sps:$4 sm:$0xff]  }
 0xb80   : > { %11182 = vmatprep.mubr.bf16.mxu0 %v18144_v62  ;;  %12971 = vmatpush3.bf16.msra.mxu0 %v14716_v2  ;;  %v18558_v62 = vpop.f32.mrf.mxu1 }
 0xb81   : > { %11256 = vmatmul.mubr.bf16.gmra.mxu1 %v18291_v38  ;;  %12972 = vmatprep.subr.bf16.mxu0 %v14719_v22  ;;  %v14726_v38 = vld [vmem:[#allocation19 + $0x4b8] ss:$12 sps:$4 sm:$0xff]  }
 0xb82   : > { %13019 = vmatpush3.bf16.msra.mxu1 %v14718_v10  ;;  %11361 = vmatprep.mubr.bf16.mxu1 %v18368_v19  ;;  %v14727_v19 = vld [vmem:[#allocation19 + $0x560] ss:$12 sps:$4 sm:$0xff]   ;;  %v18563_v57 = vpop.f32.mrf.mxu1 }
 0xb83   : > { %13020 = vmatprep.subr.bf16.mxu1 %v14721_v26  ;;  %v19360_v10 = vld [vmem:[#allocation36_spill] sm:$0xff]  ;;  %v14746_v26 = vld [vmem:[#allocation19 + $0x788] ss:$12 sps:$4 sm:$0xff]  }
 0xb84   : > { %12973 = vmatpush3.bf16.msra.mxu0 %v14720_v60 }
 0xb85   : > { %12974 = vmatprep.subr.bf16.mxu0 %v14723_v9 }
 0xb86   : > { %13021 = vmatpush3.bf16.msra.mxu1 %v14722_v59 }
 0xb87   : > { %11183 = vmatmul.mubr.bf16.gmra.mxu0 %v18159_v53  ;;  %v18566_v53 = vpop.f32.mrf.mxu1 }
 0xb88   : > { %11190 = vmatprep.mubr.bf16.mxu0 %v18166_v48  ;;  %12975 = vmatpush3.bf16.msra.mxu0 %v14724_v31  ;;  %v14730_v48 = vld [vmem:[#allocation19 + $0x488] ss:$12 sps:$4 sm:$0xff]  }
 0xb89   : > { %11362 = vmatmul.mubr.bf16.vlgmr.msra.gmra.mxu1 %v18412_v34  ;;  %12976 = vmatprep.subr.bf16.mxu0 %v14725_v7  ;;  %v14731_v34 = vld [vmem:[#allocation19 + $0x8f0] ss:$12 sps:$4 sm:$0xff]  }
 0xb8a   : > { %11369 = vmatprep.mubr.bf16.mxu1 %v18415_v23  ;;  %v18571_v23 = vpop.f32.mrf.mxu1 }
 0xb8c   : > { %12977 = vmatpush3.bf16.msra.mxu0 %v14726_v38 }
 0xb8d   : > { %12978 = vmatprep.subr.bf16.mxu0 %v14727_v19 }
 0xb8f   : > { %11191 = vmatmul.mubr.bf16.gmra.mxu0 %v18184_v61  ;;  %v18574_v61 = vpop.f32.mrf.mxu1 }
 0xb90   : > { %12979 = vmatpush3.bf16.msra.mxu0 %v14728_v43  ;;  %11296 = vmatprep.mubr.bf16.mxu0 %v18263_v41  ;;  %v14734_v41 = vld [vmem:[#allocation19 + $0x818] ss:$12 sps:$4 sm:$0xff]  }
 0xb91   : > { %11370 = vmatmul.mubr.bf16.gmra.mxu1 %v18428_v52  ;;  %12980 = vmatprep.subr.bf16.mxu0 %v14729_v18  ;;  %v14735_v52 = vld [vmem:[#allocation19 + $0x8c0] ss:$12 sps:$4 sm:$0xff]   ;;  %v18581_v13 = vpop.f32.mrf.mxu1 }
 0xb92   : > { %11377 = vmatprep.mubr.bf16.mxu1 %v18433_v54  ;;  %v18579_v54 = vpop.f32.mrf.mxu0 }
 0xb93   : > { %v18586_v37 = vpop.f32.mrf.mxu1 }
 0xb94   : > { %12981 = vmatpush3.bf16.msra.mxu0 %v14730_v48  ;;  %v18583_v0 = vpop.f32.mrf.mxu0  ;;  %19354 = vst [vmem:[#allocation61_spill] sm:$0xff] %v18586_v37 }
 0xb95   : > { %13046 = vmatprep.subr.bf16.mxu0 %v14731_v34  ;;  %v18592_v63 = vpop.f32.mrf.mxu1 }
 0xb96   : > { %v18590_v21 = vpop.f32.mrf.mxu0  ;;  %19356 = vst [vmem:[#allocation64_spill] sm:$0xff] %v18592_v63 }
 0xb97   : > { %11297 = vmatmul.mubr.bf16.vlgmr.msra.gmra.mxu0 %v18310_v8  ;;  %v14737_v8 = vld [vmem:[#allocation19 + $0x8a8] ss:$12 sps:$4 sm:$0xff]   ;;  %v18597_v35 = vpop.f32.mrf.mxu1 }
 0xb98   : > { %11304 = vmatprep.mubr.bf16.mxu0 %v19353_v29  ;;  %13047 = vmatpush3.bf16.msra.mxu0 %v14732_v40  ;;  %v18594_v44 = vpop.f32.mrf.mxu0  ;;  %19358 = vst [vmem:[#allocation62_spill] sm:$0xff] %v18597_v35 }
 0xb99   : > { %11378 = vmatmul.mubr.bf16.gmra.mxu1 %v18444_v46  ;;  %13048 = vmatprep.subr.bf16.mxu0 %v14733_v33  ;;  %v14738_v46 = vld [vmem:[#allocation19 + $0x7e8] ss:$12 sps:$4 sm:$0xff]  }
 0xb9a   : > { %11385 = vmatprep.mubr.bf16.mxu1 %v18448_v24  ;;  %v14739_v24 = vld [vmem:[#allocation19 + $0x890] ss:$12 sps:$4 sm:$0xff]   ;;  %v18602_v5 = vpop.f32.mrf.mxu0 }
 0xb9c   : > { %13049 = vmatpush3.bf16.msra.mxu0 %v14734_v41  ;;  %v18606_v22 = vpop.f32.mrf.mxu0 }
 0xb9d   : > { %13050 = vmatprep.subr.bf16.mxu0 %v14735_v52 }
 0xb9e   : > { %v18612_v9 = vpop.f32.mrf.mxu0 }
 0xb9f   : > { %11305 = vmatmul.mubr.bf16.gmra.mxu0 %v18341_v28  ;;  %v19357_v28 = vld [vmem:[#allocation65_spill] sm:$0xff] }
 0xba0   : > { %11312 = vmatprep.mubr.bf16.mxu0 %v19355_v12  ;;  %13051 = vmatpush3.bf16.msra.mxu0 %v14736_v25  ;;  %v18616_v31 = vpop.f32.mrf.mxu0 }
 0xba1   : > { %11386 = vmatmul.mubr.bf16.gmra.mxu1 %v18455_v45  ;;  %13052 = vmatprep.subr.bf16.mxu0 %v14737_v8  ;;  %v14742_v45 = vld [vmem:[#allocation19 + $0x7b8] ss:$12 sps:$4 sm:$0xff]  }
 0xba2   : > { %v18622_v38 = vpop.f32.mrf.mxu0 }
 0xba4   : > { %13053 = vmatpush3.bf16.msra.mxu0 %v14738_v46  ;;  %v18626_v19 = vpop.f32.mrf.mxu0 }
 0xba5   : > { %13054 = vmatprep.subr.bf16.mxu0 %v14739_v24 }
 0xba6   : > { %v18632_v18 = vpop.f32.mrf.mxu0 }
 0xba7   : > { %11313 = vmatmul.mubr.bf16.gmra.mxu0 %v19357_v28 }
 0xba8   : > { %11320 = vmatprep.mubr.bf16.mxu0 %v19359_v51  ;;  %13055 = vmatpush3.bf16.msra.mxu0 %v14740_v56  ;;  %v18600_v16 = vpop.f32.mrf.mxu1 }
 0xba9   : > { %13056 = vmatprep.subr.bf16.mxu0 %v14741_v30 }
 0xbaa   : > { %v18604_v2 = vpop.f32.mrf.mxu1 }
 0xbac   : > { %13057 = vmatpush3.bf16.msra.mxu0 %v14742_v45  ;;  %v18610_v60 = vpop.f32.mrf.mxu1 }
 0xbad   : > { %13058 = vmatprep.subr.bf16.mxu0 %v14743_v32 }
 0xbae   : > { %v18614_v59 = vpop.f32.mrf.mxu1 }
 0xbaf   : > { %11321 = vmatmul.mubr.bf16.gmra.mxu0 %v19360_v10 }
 0xbb0   : > { %13059 = vmatpush3.bf16.msra.mxu0 %v14744_v36  ;;  %11426 = vmatprep.mubr.bf16.mxu0 %v18489_v4  ;;  %v18620_v7 = vpop.f32.mrf.mxu1 }
 0xbb1   : > { %13060 = vmatprep.subr.bf16.mxu0 %v14745_v15 }
 0xbb2   : > { %v18624_v4 = vpop.f32.mrf.mxu1 }
 0xbb4   : > { %13061 = vmatpush3.bf16.msra.mxu0 %v14746_v26  ;;  %v18630_v43 = vpop.f32.mrf.mxu1 }
 0xbb6   : > { %v18634_v48 = vpop.f32.mrf.mxu1 }
 0xbb7   : > { %11427 = vmatmul.mubr.bf16.vlgmr.msra.gmra.mxu0 %v18491_v14  ;;  %v18636_v14 = vpop.f32.mrf.mxu0 }
 0xbb8   : > { %11434 = vmatprep.mubr.bf16.mxu0 %v18503_v6  ;;  %v18640_v6 = vpop.f32.mrf.mxu1 }
 0xbb9   : > { %v18642_v34 = vpop.f32.mrf.mxu0 }
 0xbba   : > { %19361 = vst [vmem:[#allocation67_spill] sm:$0xff] %v18642_v34  ;;  %v18644_v40 = vpop.f32.mrf.mxu1 }
 0xbbf   : > { %11435 = vmatmul.mubr.bf16.gmra.mxu0 %v18505_v20  ;;  %v18646_v20 = vpop.f32.mrf.mxu0 }
 0xbc0   : > { %11442 = vmatprep.mubr.bf16.mxu0 %v18517_v58  ;;  %19362 = vst [vmem:[#allocation66_spill] sm:$0xff] %v18646_v20  ;;  %v18649_v58 = vpop.f32.mrf.mxu1 }
 0xbc1   : > { %19363 = vst [vmem:[#allocation68_spill] sm:$0xff] %v18649_v58  ;;  %v18651_v33 = vpop.f32.mrf.mxu0 }
 0xbc2   : > { %19364 = vst [vmem:[#allocation69_spill] sm:$0xff] %v18651_v33  ;;  %v18653_v29 = vpop.f32.mrf.mxu1 }
 0xbc3   : > { %19365 = vst [vmem:[#allocation63_spill] sm:$0xff] %v18653_v29  ;;  %v18655_v41 = vpop.f32.mrf.mxu0 }
 0xbc4   : > { %19366 = vst [vmem:[#allocation35_spill] sm:$0xff] %v18655_v41 }
 0xbc7   : > { %11443 = vmatmul.mubr.bf16.gmra.mxu0 %v18519_v39  ;;  %v10884_v39 = vpop.f32.mrf.mxu0 }
 0xbc8   : > { %11450 = vmatprep.mubr.bf16.mxu0 %v18528_v11  ;;  %v18657_v11 = vpop.f32.mrf.mxu1 }
 0xbc9   : > { %19367 = vst [vmem:[#allocation65_spill] sm:$0xff] %v18657_v11  ;;  %v10886_v52 = vpop.f32.mrf.mxu0 }
 0xbca   : > { %v18659_v25 = vpop.f32.mrf.mxu1 }
 0xbcb   : > { %19368 = vst [vmem:[#allocation31_spill] sm:$0xff] %v18659_v25  ;;  %v10888_v8 = vpop.f32.mrf.mxu0 }
 0xbcc   : > { %v18661_v12 = vpop.f32.mrf.mxu1 }
 0xbcd   : > { %19369 = vst [vmem:[#allocation36_spill] sm:$0xff] %v18661_v12  ;;  %v18663_v46 = vpop.f32.mrf.mxu0 }
 0xbcf   : > { %11451 = vmatmul.mubr.bf16.gmra.mxu0 %v18530_v47  ;;  %v18665_v47 = vpop.f32.mrf.mxu1  ;;  %v18667_v56 = vpop.f32.mrf.mxu0 }
 0xbd0   : > { %19370 = vst [vmem:[#allocation70_spill] sm:$0xff] %v18665_v47 }
 0xbd1   : > { %v18671_v51 = vpop.f32.mrf.mxu0 }
 0xbd3   : > { %v18677_v36 = vpop.f32.mrf.mxu0 }
 0xbd5   : > { %v18683_v26 = vpop.f32.mrf.mxu0 }
 0xbd7   : > { %v18689_v12 = vpop.f32.mrf.mxu0 }
 0xbd9   : > { %v18695_v33 = vpop.f32.mrf.mxu0 }
 0xbda   : > { %19374 = vst [vmem:[#allocation74_spill] sm:$0xff] %v18695_v33  ;;  %v19385_v33 = vld [vmem:[#allocation34_spill] sm:$0xff] }
 0xbdb   : > { %v18701_v20 = vpop.f32.mrf.mxu0 }
 0xbdc   : > { %19377 = vst [vmem:[#allocation77_spill] sm:$0xff] %v18701_v20  ;;  %v19387_v20 = vld [vmem:[#allocation32_spill] sm:$0xff] }
 0xbdd   : > { %v18707_v34 = vpop.f32.mrf.mxu0 }
 0xbde   : > { %19380 = vst [vmem:[#allocation80_spill] sm:$0xff] %v18707_v34 }
 0xbe8   : > { %v10957_v24 = vpop.f32.mrf.mxu1 }
 0xbea   : > { %v10959_v30 = vpop.f32.mrf.mxu1 }
 0xbec   : > { %v18669_v28 = vpop.f32.mrf.mxu1 }
 0xbee   : > { %v18673_v45 = vpop.f32.mrf.mxu1 }
 0xbf0   : > { %v18675_v32 = vpop.f32.mrf.mxu1 }
 0xbf2   : > { %v18679_v15 = vpop.f32.mrf.mxu1 }
 0xbf4   : > { %v18681_v10 = vpop.f32.mrf.mxu1 }
 0xbf6   : > { %v18685_v55 = vpop.f32.mrf.mxu1 }
 0xbf8   : > { %v18687_v47 = vpop.f32.mrf.mxu1 }
 0xbf9   : > { %19371 = vst [vmem:[#allocation71_spill] sm:$0xff] %v18687_v47  ;;  %v18711_v47 = vld [vmem:[#allocation20] sm:$0x7] }
 0xbfa   : > { %v18691_v41 = vpop.f32.mrf.mxu1  ;;  %19382 = vst [vmem:[#allocation82_spill] sm:$0xff] %v18711_v47 }
 0xbfb   : > { %19372 = vst [vmem:[#allocation72_spill] sm:$0xff] %v18691_v41 }
 0xbfc   : > { %v18693_v25 = vpop.f32.mrf.mxu1 }
 0xbfd   : > { %19373 = vst [vmem:[#allocation73_spill] sm:$0xff] %v18693_v25  ;;  %v18715_v25 = vpop.f32.mrf.mxu0 }
 0xbfe   : > { %v18697_v35 = vpop.f32.mrf.mxu1  ;;  %19384 = vst [vmem:[#allocation84_spill] sm:$0xff] %v18715_v25 }
 0xbff   : > { %19375 = vst [vmem:[#allocation75_spill] sm:$0xff] %v18697_v35  ;;  %v18719_v35 = vrot.slane %v18711_v47, %v19385_v33  ;;  %v18729_v34 = vpop.f32.mrf.mxu0 }
 0xc00   : > { %v18699_v11 = vpop.f32.mrf.mxu1  ;;  %19389 = vst [vmem:[#allocation85_spill] sm:$0xff] %v18729_v34 }
 0xc01   : > { %19376 = vst [vmem:[#allocation76_spill] sm:$0xff] %v18699_v11 }
 0xc02   : > { %v18703_v63 = vpop.f32.mrf.mxu1 }
 0xc03   : > { %19378 = vst [vmem:[#allocation78_spill] sm:$0xff] %v18703_v63  ;;  %v18725_v63 = vrot.slane %v18711_v47, %v19387_v20  ;;  %v10670_v20 = vadd.f32 %v18539_v42, %v18719_v35 }
 0xc04   : > { %v18705_v29 = vpop.f32.mrf.mxu1 }
 0xc05   : > { %19379 = vst [vmem:[#allocation79_spill] sm:$0xff] %v18705_v29  ;;  %v10668_v25 = vadd.f32 %v18534_v27, %v18725_v63  ;;  %v10743_v27 = vadd.f32 %v18590_v21, %v10670_v20 }
 0xc06   : > { %v18709_v37 = vpop.f32.mrf.mxu1 }
 0xc07   : > { %19381 = vst [vmem:[#allocation81_spill] sm:$0xff] %v18709_v37  ;;  %v10666_v37 = vadd.f32 %v18526_v3, %v18719_v35  ;;  %v10672_v3 = vadd.f32 %v18542_v17, %v18725_v63  ;;  %v10678_v17 = vadd.f32 %v18550_v50, %v18725_v63 }
 0xc08   : > { %v18713_v41 = vpop.f32.mrf.mxu1 }
 0xc09   : > { %19383 = vst [vmem:[#allocation83_spill] sm:$0xff] %v18713_v41  ;;  %v10739_v33 = vadd.f32 %v18579_v54, %v10666_v37 }
 0xc0a   : > { %v18721_v11 = vpop.f32.mrf.mxu1 }
 0xc0b   : > { %19386 = vst [vmem:[#allocation34_spill] sm:$0xff] %v18721_v11  ;;  %v18740_v11 = vpop.f32.mrf.mxu0  ;;  %v10812_v47 = vadd.f32 %v18600_v16, %v10739_v33  ;;  %v10816_v16 = vadd.f32 %v18610_v60, %v10743_v27  ;;  %v10751_v60 = vadd.f32 %v18606_v22, %v10678_v17 }
 0xc0c   : > { %v18727_v29 = vpop.f32.mrf.mxu1 }
 0xc0d   : > { %19388 = vst [vmem:[#allocation32_spill] sm:$0xff] %v18727_v29  ;;  %v10741_v29 = vadd.f32 %v18583_v0, %v10668_v25  ;;  %v10885_v37 = vadd.f32 %v10884_v39, %v10812_v47  ;;  %v18756_v42 = vpop.f32.mrf.mxu0  ;;  %v10745_v0 = vadd.f32 %v18594_v44, %v10672_v3  ;;  %v10889_v39 = vadd.f32 %v10888_v8, %v10816_v16 }
 0xc0e   : > { %v18733_v41 = vpop.f32.mrf.mxu1  ;;  %v10680_v44 = vadd.f32 %v18555_v49, %v18719_v35  ;;  %v10682_v3 = vadd.f32 %v18558_v62, %v18725_v63  ;;  %v10824_v49 = vadd.f32 %v18624_v4, %v10751_v60  ;;  %v10686_v62 = vadd.f32 %v18563_v57, %v18719_v35 }
 0xc0f   : > { %19390 = vst [vmem:[#allocation86_spill] sm:$0xff] %v18733_v41  ;;  %v10814_v54 = vadd.f32 %v18604_v2, %v10741_v29  ;;  %v10676_v41 = vadd.f32 %v18547_v1, %v18719_v35  ;;  %v10958_v33 = vadd.f32 %v10957_v24, %v10885_v37  ;;  %v10818_v29 = vadd.f32 %v18614_v59, %v10745_v0 }
 0xc10   : > { %v18738_v58 = vpop.f32.mrf.mxu1  ;;  %v10753_v27 = vadd.f32 %v18612_v9, %v10680_v44  ;;  %v10755_v9 = vadd.f32 %v18616_v31, %v10682_v3  ;;  %v10759_v57 = vadd.f32 %v18622_v38, %v10686_v62  ;;  %v10690_v44 = vadd.f32 %v18571_v23, %v18719_v35  ;;  %v19405_v62 = vld [vmem:[#allocation61_spill] sm:$0xff] }
 0xc11   : > { %19391 = vst [vmem:[#allocation87_spill] sm:$0xff] %v18738_v58  ;;  %v10887_v25 = vadd.f32 %v10886_v52, %v10814_v54  ;;  %v10749_v21 = vadd.f32 %v18602_v5, %v10676_v41  ;;  %v10891_v50 = vadd.f32 %v18663_v46, %v10818_v29  ;;  %v10962_v5 = vadd.f32 %v18669_v28, %v10889_v39  ;;  %v19393_v41 = vld [vmem:[#allocation53_spill] sm:$0xff] }
 0xc12   : > { %v18746_v34 = vpop.f32.mrf.mxu1  ;;  %v19394_v46 = vld [vmem:[#allocation41_spill] sm:$0xff]  ;;  %v10826_v4 = vadd.f32 %v18630_v43, %v10753_v27  ;;  %v10828_v31 = vadd.f32 %v18634_v48, %v10755_v9  ;;  %v10832_v38 = vadd.f32 %v18640_v6, %v10759_v57  ;;  %v10763_v23 = vadd.f32 %v18632_v18, %v10690_v44  ;;  %v19400_v18 = vld [vmem:[#allocation68_spill] sm:$0xff] }
 0xc13   : > { %19392 = vst [vmem:[#allocation88_spill] sm:$0xff] %v18746_v34  ;;  %v10960_v1 = vadd.f32 %v10959_v30, %v10887_v25  ;;  %v10822_v52 = vadd.f32 %v18620_v7, %v10749_v21  ;;  %v10964_v54 = vadd.f32 %v18673_v45, %v10891_v50  ;;  %v10897_v45 = vadd.f32 %v18671_v51, %v10824_v49  ;;  %v19395_v25 = vld [vmem:[#allocation45_spill] sm:$0xff] }
 0xc14   : > { %v18752_v58 = vpop.f32.mrf.mxu1  ;;  %v10899_v29 = vadd.f32 %v18677_v36, %v10826_v4  ;;  %v10901_v60 = vadd.f32 %v18683_v26, %v10828_v31  ;;  %v10696_v27 = vadd.f32 %v18581_v13, %v18719_v35  ;;  %v10836_v49 = vadd.f32 %v19400_v18, %v10763_v23  ;;  %v19406_v13 = vld [vmem:[#allocation67_spill] sm:$0xff]  ;;  %v19417_v23 = vld [vmem:[#allocation62_spill] sm:$0xff]  ;;  %v19422_v18 = vld [vmem:[#allocation60_spill] sm:$0xff] }
 0xc15   : > { %v10895_v7 = vadd.f32 %v18667_v56, %v10822_v52  ;;  %v10970_v51 = vadd.f32 %v18679_v15, %v10897_v45  ;;  %v19397_v15 = vld [vmem:[#allocation52_spill] sm:$0xff]  ;;  %v10698_v9 = vadd.f32 %v19405_v62, %v18725_v63 }
 0xc16   : > { %v18760_v34 = vpop.f32.mrf.mxu1  ;;  %v10972_v36 = vadd.f32 %v18681_v10, %v10899_v29  ;;  %v10974_v26 = vadd.f32 %v18685_v55, %v10901_v60  ;;  %v19398_v10 = vld [vmem:[#allocation51_spill] sm:$0xff]  ;;  %v10769_v4 = vadd.f32 %v19406_v13, %v10696_v27  ;;  %v19411_v29 = vld [vmem:[#allocation64_spill] sm:$0xff]  ;;  %v19415_v60 = vld [vmem:[#allocation73_spill] sm:$0xff] }
 0xc17   : > { %v11030_v2 = vpop.f32.mrf.mxu0  ;;  %v10968_v16 = vadd.f32 %v18675_v32, %v10895_v7  ;;  %v19396_v32 = vld [vmem:[#allocation40_spill] sm:$0xff]  ;;  %v19403_v55 = vld [vmem:[#allocation43_spill] sm:$0xff] }
 0xc18   : > { %v11031_v47 = vadd.f32 %v11030_v2, %v10958_v33  ;;  %v18766_v20 = vpop.f32.mrf.mxu1  ;;  %v10688_v2 = vadd.f32 %v18566_v53, %v18725_v63  ;;  %v19421_v27 = vld [vmem:[#allocation75_spill] sm:$0xff]  ;;  %v19426_v62 = vld [vmem:[#allocation76_spill] sm:$0xff] }
 0xc19   : > { %v11032_v24 = vpop.f32.mrf.mxu0  ;;  %v19427_v13 = vld [vmem:[#allocation48_spill] sm:$0xff] }
 0xc1a   : > { %v11459_v59 = vadd.f32 %v11031_v47, %v19393_v41  ;;  %v11033_v8 = vadd.f32 %v11032_v24, %v10960_v1  ;;  %v18775_v30 = vpop.f32.mrf.mxu1  ;;  %v10761_v53 = vadd.f32 %v18626_v19, %v10688_v2  ;;  %v10905_v41 = vadd.f32 %v18689_v12, %v10832_v38  ;;  %v19402_v12 = vld [vmem:[#allocation71_spill] sm:$0xff]  ;;  %v19410_v2 = vld [vmem:[#allocation44_spill] sm:$0xff] }
 0xc1b   : > { %v11034_v22 = vpop.f32.mrf.mxu0  ;;  %v19414_v38 = vld [vmem:[#allocation80_spill] sm:$0xff] }
 0xc1c   : > { %11483 = vst [vmem:[%s18785_s3] sm:$0xff] %v11459_v59  ;;  %v11460_v28 = vadd.f32 %v11033_v8, %v19394_v46  ;;  %v11035_v37 = vadd.f32 %v11034_v22, %v10962_v5  ;;  %v18789_v0 = vpop.f32.mrf.mxu1  ;;  %v10692_v5 = vadd.f32 %v18574_v61, %v18725_v63  ;;  %v10834_v19 = vadd.f32 %v18644_v40, %v10761_v53  ;;  %v19401_v22 = vld [vmem:[#allocation74_spill] sm:$0xff] }
 0xc1d   : > { %v11036_v56 = vpop.f32.mrf.mxu0 }
 0xc1e   : > { %11484 = vst [vmem:[%s18785_s3 + $0x8] sm:$0xff] %v11460_v28  ;;  %v11462_v33 = vadd.f32 %v11035_v37, %v19395_v25  ;;  %v11037_v17 = vadd.f32 %v11036_v56, %v10964_v54  ;;  %v18799_v21 = vpop.f32.mrf.mxu1  ;;  %v10765_v61 = vadd.f32 %v18636_v14, %v10692_v5  ;;  %v10907_v7 = vadd.f32 %v19401_v22, %v10834_v19  ;;  %v19407_v14 = vld [vmem:[#allocation63_spill] sm:$0xff]  ;;  %v19418_v19 = vld [vmem:[#allocation69_spill] sm:$0xff] }
 0xc1f   : > { %v11040_v43 = vpop.f32.mrf.mxu0  ;;  %v10978_v54 = vadd.f32 %v19402_v12, %v10905_v41  ;;  %v19419_v41 = vld [vmem:[#allocation31_spill] sm:$0xff] }
 0xc20   : > { %11486 = vst [vmem:[%s18785_s3 + $0x18] sm:$0xff] %v11462_v33  ;;  %v11463_v39 = vadd.f32 %v11037_v17, %v19396_v32  ;;  %v11041_v1 = vadd.f32 %v11040_v43, %v10968_v16  ;;  %v18809_v47 = vpop.f32.mrf.mxu1  ;;  %v10838_v56 = vadd.f32 %v19407_v14, %v10765_v61  ;;  %v19408_v16 = vld [vmem:[#allocation77_spill] sm:$0xff]  ;;  %v19409_v33 = vld [vmem:[#allocation72_spill] sm:$0xff]  ;;  %v19412_v32 = vld [vmem:[#allocation66_spill] sm:$0xff] }
 0xc21   : > { %v11042_v48 = vpop.f32.mrf.mxu0  ;;  %v10909_v25 = vadd.f32 %v19408_v16, %v10836_v49  ;;  %v10980_v17 = vadd.f32 %v19409_v33, %v10907_v7  ;;  %v19423_v7 = vld [vmem:[#allocation35_spill] sm:$0xff] }
 0xc22   : > { %11487 = vst [vmem:[%s18785_s3 + $0x20] sm:$0xff] %v11463_v39  ;;  %v11465_v52 = vadd.f32 %v11041_v1, %v19397_v15  ;;  %v11043_v24 = vadd.f32 %v11042_v48, %v10970_v51  ;;  %v18819_v50 = vpop.f32.mrf.mxu1  ;;  %v10700_v51 = vadd.f32 %v19411_v29, %v18719_v35  ;;  %v10771_v39 = vadd.f32 %v19412_v32, %v10698_v9  ;;  %v19413_v1 = vld [vmem:[#allocation65_spill] sm:$0xff]  ;;  %v19416_v15 = vld [vmem:[#allocation55_spill] sm:$0xff] }
 0xc23   : > { %v11044_v6 = vpop.f32.mrf.mxu0  ;;  %v10842_v44 = vadd.f32 %v19413_v1, %v10769_v4  ;;  %v10911_v48 = vadd.f32 %v19414_v38, %v10838_v56  ;;  %v10702_v35 = vadd.f32 %v19417_v23, %v18725_v63  ;;  %v19431_v1 = vld [vmem:[#allocation79_spill] sm:$0xff] }
 0xc24   : > { %11489 = vst [vmem:[%s18785_s3 + $0x30] sm:$0xff] %v11465_v52  ;;  %v11466_v59 = vadd.f32 %v11043_v24, %v19398_v10  ;;  %v11045_v8 = vadd.f32 %v11044_v6, %v10972_v36  ;;  %v18829_v3 = vpop.f32.mrf.mxu1  ;;  %v10982_v36 = vadd.f32 %v19415_v60, %v10909_v25  ;;  %v10773_v6 = vadd.f32 %v19418_v19, %v10700_v51  ;;  %v19435_v19 = vld [vmem:[#allocation50_spill] sm:$0xff] }
 0xc25   : > { %19399 = vst [vmem:[#allocation53_spill] sm:$0xff] %v18829_v3  ;;  %v11046_v40 = vpop.f32.mrf.mxu0  ;;  %v10984_v61 = vadd.f32 %v19421_v27, %v10911_v48  ;;  %v10775_v12 = vadd.f32 %v19423_v7, %v10702_v35 }
 0xc26   : > { %11490 = vst [vmem:[%s18785_s3 + $0x38] sm:$0xff] %v11466_v59  ;;  %v11468_v46 = vadd.f32 %v11045_v8, %v19403_v55  ;;  %v11047_v28 = vadd.f32 %v11046_v40, %v10974_v26  ;;  %v18839_v37 = vpop.f32.mrf.mxu1  ;;  %v10844_v26 = vadd.f32 %v19419_v41, %v10771_v39  ;;  %v19420_v59 = vld [vmem:[#allocation84_spill] sm:$0xff] }
 0xc27   : > { %19404 = vst [vmem:[#allocation41_spill] sm:$0xff] %v18839_v37  ;;  %v11050_v45 = vpop.f32.mrf.mxu0  ;;  %v10915_v8 = vadd.f32 %v19420_v59, %v10842_v44  ;;  %v19436_v59 = vld [vmem:[#allocation46_spill] sm:$0xff] }
 0xc28   : > { %11492 = vst [vmem:[%s18785_s3 + $0x48] sm:$0xff] %v11468_v46  ;;  %v11469_v57 = vadd.f32 %v11047_v28, %v19410_v2  ;;  %v11051_v31 = vadd.f32 %v11050_v45, %v10978_v54  ;;  %v18849_v43 = vpop.f32.mrf.mxu1  ;;  %v19424_v54 = vld [vmem:[#allocation36_spill] sm:$0xff]  ;;  %v19425_v46 = vld [vmem:[#allocation85_spill] sm:$0xff]  ;;  %v19428_v45 = vld [vmem:[#allocation70_spill] sm:$0xff] }
 0xc29   : > { %v11052_v53 = vpop.f32.mrf.mxu0  ;;  %v10846_v63 = vadd.f32 %v19424_v54, %v10773_v6  ;;  %v10917_v28 = vadd.f32 %v19425_v46, %v10844_v26  ;;  %v10988_v9 = vadd.f32 %v19426_v62, %v10915_v8  ;;  %v10848_v16 = vadd.f32 %v19428_v45, %v10775_v12 }
 0xc2a   : > { %11493 = vst [vmem:[%s18785_s3 + $0x50] sm:$0xff] %v11469_v57  ;;  %v11471_v52 = vadd.f32 %v11051_v31, %v19416_v15  ;;  %v11053_v24 = vadd.f32 %v11052_v53, %v10980_v17  ;;  %v18859_v5 = vpop.f32.mrf.mxu1  ;;  %v19429_v17 = vld [vmem:[#allocation78_spill] sm:$0xff]  ;;  %v19432_v53 = vld [vmem:[#allocation59_spill] sm:$0xff] }
 0xc2b   : > { %v11054_v10 = vpop.f32.mrf.mxu0  ;;  %v10919_v33 = vadd.f32 %v18740_v11, %v10846_v63  ;;  %v10990_v2 = vadd.f32 %v19429_v17, %v10917_v28  ;;  %v19430_v57 = vld [vmem:[#allocation42_spill] sm:$0xff]  ;;  %v10921_v39 = vadd.f32 %v18756_v42, %v10848_v16 }
 0xc2c   : > { %11495 = vst [vmem:[%s18785_s3 + $0x60] sm:$0xff] %v11471_v52  ;;  %v11472_v49 = vadd.f32 %v11053_v24, %v19422_v18  ;;  %v11055_v40 = vadd.f32 %v11054_v10, %v10982_v36  ;;  %v18869_v22 = vpop.f32.mrf.mxu1  ;;  %v19433_v36 = vld [vmem:[#allocation81_spill] sm:$0xff]  ;;  %v19434_v52 = vld [vmem:[#allocation56_spill] sm:$0xff] }
 0xc2d   : > { %v11056_v55 = vpop.f32.mrf.mxu0  ;;  %v10992_v44 = vadd.f32 %v19431_v1, %v10919_v33  ;;  %v10994_v15 = vadd.f32 %v19433_v36, %v10921_v39 }
 0xc2e   : > { %11496 = vst [vmem:[%s18785_s3 + $0x68] sm:$0xff] %v11472_v49  ;;  %v11474_v4 = vadd.f32 %v11055_v40, %v19427_v13  ;;  %v11057_v14 = vadd.f32 %v11056_v55, %v10984_v61  ;;  %v18877_v56 = vpop.f32.mrf.mxu1 }
 0xc2f   : > { %v11060_v25 = vpop.f32.mrf.mxu0 }
 0xc30   : > { %11498 = vst [vmem:[%s18785_s3 + $0x78] sm:$0xff] %v11474_v4  ;;  %v11475_v31 = vadd.f32 %v11057_v14, %v19430_v57  ;;  %v11061_v29 = vadd.f32 %v11060_v25, %v10988_v9 }
 0xc31   : > { %v18884_v51 = vpop.f32.mrf.mxu1  ;;  %v11062_v32 = vpop.f32.mrf.mxu0 }
 0xc32   : > { %11499 = vst [vmem:[%s18785_s3 + $0x80] sm:$0xff] %v11475_v31  ;;  %v11477_v38 = vadd.f32 %v11061_v29, %v19432_v53  ;;  %v11063_v48 = vadd.f32 %v11062_v32, %v10990_v2 }
 0xc33   : > { %v18890_v11 = vpop.f32.mrf.mxu1  ;;  %v11064_v60 = vpop.f32.mrf.mxu0 }
 0xc34   : > { %11501 = vst [vmem:[%s18785_s3 + $0x90] sm:$0xff] %v11477_v38  ;;  %v11478_v24 = vadd.f32 %v11063_v48, %v19434_v52  ;;  %v11065_v23 = vadd.f32 %v11064_v60, %v10992_v44 }
 0xc35   : > { %v18895_v35 = vpop.f32.mrf.mxu1  ;;  %v11066_v42 = vpop.f32.mrf.mxu0 }
 0xc36   : > { %11502 = vst [vmem:[%s18785_s3 + $0x98] sm:$0xff] %v11478_v24  ;;  %v11480_v6 = vadd.f32 %v11065_v23, %v19435_v19  ;;  %v11067_v41 = vadd.f32 %v11066_v42, %v10994_v15  ;;  %v19447_v42 = vld [vmem:[#allocation33_spill] sm:$0xff]  ;;  %v19448_v19 = vld [vmem:[#allocation82_spill] sm:$0xff] }
 0xc37   : > { %v18899_v26 = vpop.f32.mrf.mxu1  ;;  %v12902_v10 = vpop.f32.mrf.mxu0 }
 0xc38   : > { %11504 = vst [vmem:[%s18785_s3 + $0xa8] sm:$0xff] %v11480_v6  ;;  %v11481_v8 = vadd.f32 %v11067_v41, %v19436_v59  ;;  %v18944_v6 = vrot.slane %v19448_v19, %v19447_v42  ;;  %v19449_v41 = vld [vmem:[#allocation83_spill] sm:$0xff]  ;;  %v19450_v59 = vld [vmem:[#allocation34_spill] sm:$0xff] }
 0xc39   : > { %v18903_v27 = vpop.f32.mrf.mxu1  ;;  %v12903_v61 = vpop.f32.mrf.mxu0  ;;  %v19455_v19 = vld [vmem:[#allocation87_spill] sm:$0xff] }
 0xc3a   : > { %11505 = vst [vmem:[%s18785_s3 + $0xb0] sm:$0xff] %v11481_v8  ;;  %v12864_v8 = vadd.f32 %v19450_v59, %v19449_v41 }
 0xc3b   : > { %v18906_v18 = vpop.f32.mrf.mxu1  ;;  %v12905_v49 = vpop.f32.mrf.mxu0 }
 0xc3d   : > { %v18908_v40 = vpop.f32.mrf.mxu1  ;;  %v12906_v7 = vpop.f32.mrf.mxu0 }
 0xc3e   : > { %19437 = vst [vmem:[#allocation45_spill] sm:$0xff] %v18908_v40  ;;  %v12907_v42 = vadd.f32 %v12906_v7, %v12905_v49 }
 0xc3f   : > { %v12908_v12 = vpop.f32.mrf.mxu0  ;;  %v18910_v54 = vpop.f32.mrf.mxu1 }
 0xc40   : > { %19438 = vst [vmem:[#allocation40_spill] sm:$0xff] %v18910_v54  ;;  %v19454_v54 = vld [vmem:[#allocation86_spill] sm:$0xff] }
 0xc41   : > { %v12909_v63 = vpop.f32.mrf.mxu0  ;;  %v18912_v46 = vpop.f32.mrf.mxu1 }
 0xc42   : > { %19439 = vst [vmem:[#allocation52_spill] sm:$0xff] %v18912_v46 }
 0xc43   : > { %v12911_v55 = vpop.f32.mrf.mxu0  ;;  %v18916_v9 = vpop.f32.mrf.mxu1 }
 0xc44   : > { %19440 = vst [vmem:[#allocation51_spill] sm:$0xff] %v18916_v9 }
 0xc45   : > { %v12912_v28 = vpop.f32.mrf.mxu0  ;;  %v18922_v14 = vpop.f32.mrf.mxu1 }
 0xc46   : > { %19441 = vst [vmem:[#allocation68_spill] sm:$0xff] %v18922_v14  ;;  %v12904_v14 = vadd.f32 %v12903_v61, %v12902_v10  ;;  %v12944_v61 = vadd.f32 %v18859_v5, %v18849_v43 }
 0xc47   : > { %v18914_v62 = vpop.f32.mrf.mxu0  ;;  %v18928_v25 = vpop.f32.mrf.mxu1 }
 0xc48   : > { %19443 = vst [vmem:[#allocation71_spill] sm:$0xff] %v18928_v25 }
 0xc49   : > { %v18918_v13 = vpop.f32.mrf.mxu0  ;;  %v13022_v2 = vpop.f32.mrf.mxu1 }
 0xc4b   : > { %v18920_v4 = vpop.f32.mrf.mxu0  ;;  %v13023_v29 = vpop.f32.mrf.mxu1 }
 0xc4d   : > { %v18924_v45 = vpop.f32.mrf.mxu0  ;;  %v13025_v1 = vpop.f32.mrf.mxu1 }
 0xc4f   : > { %v18926_v16 = vpop.f32.mrf.mxu0  ;;  %v13026_v38 = vpop.f32.mrf.mxu1 }
 0xc50   : > { %19442 = vst [vmem:[#allocation74_spill] sm:$0xff] %v18926_v16 }
 0xc51   : > { %v18930_v33 = vpop.f32.mrf.mxu0  ;;  %v18936_v36 = vpop.f32.mrf.mxu1 }
 0xc52   : > { %19444 = vst [vmem:[#allocation43_spill] sm:$0xff] %v18930_v33  ;;  %v19456_v33 = vld [vmem:[#allocation88_spill] sm:$0xff] }
 0xc53   : > { %v18932_v17 = vpop.f32.mrf.mxu0  ;;  %v13029_v24 = vpop.f32.mrf.mxu1  ;;  %v12870_v16 = vadd.f32 %v19456_v33, %v19455_v19  ;;  %v12873_v33 = vadd.f32 %v18760_v34, %v18752_v58 }
 0xc54   : > { %19445 = vst [vmem:[#allocation61_spill] sm:$0xff] %v18932_v17  ;;  %v19453_v17 = vld [vmem:[#allocation32_spill] sm:$0xff] }
 0xc55   : > { %v18934_v57 = vpop.f32.mrf.mxu0  ;;  %v18950_v9 = vpop.f32.mrf.mxu1  ;;  %v12867_v40 = vadd.f32 %v19454_v54, %v19453_v17  ;;  %v11112_v49 = vadd.f32 %v12870_v16, %v18944_v6  ;;  %v12950_v16 = vadd.f32 %v18890_v11, %v18884_v51  ;;  %v11115_v34 = vadd.f32 %v12873_v33, %v18944_v6 }
 0xc56   : > { %19446 = vst [vmem:[#allocation67_spill] sm:$0xff] %v18934_v57  ;;  %v11104_v57 = vadd.f32 %v12864_v8, %v18944_v6  ;;  %v12953_v51 = vadd.f32 %v18899_v26, %v18895_v35  ;;  %v12882_v35 = vadd.f32 %v18819_v50, %v18809_v47  ;;  %v12956_v26 = vadd.f32 %v18906_v18, %v18903_v27 }
 0xc57   : > { %v12982_v31 = vpop.f32.mrf.mxu0  ;;  %v18961_v41 = vpop.f32.mrf.mxu1  ;;  %v11107_v10 = vadd.f32 %v12867_v40, %v18944_v6  ;;  %v12947_v40 = vadd.f32 %v18877_v56, %v18869_v22 }
 0xc58   : > { %v11169_v3 = vadd.f32 %v12904_v14, %v11104_v57  ;;  %v13033_v47 = vadd.f32 %v18961_v41, %v18950_v9  ;;  %v11128_v18 = vadd.f32 %v12882_v35, %v18944_v6 }
 0xc59   : > { %v12983_v32 = vpop.f32.mrf.mxu0  ;;  %v11172_v54 = vadd.f32 %v12907_v42, %v11107_v10  ;;  %v18971_v7 = vpop.f32.mrf.mxu1 }
 0xc5a   : > { %v12984_v8 = vadd.f32 %v12983_v32, %v12982_v31  ;;  %v11234_v17 = vadd.f32 %v12944_v61, %v11169_v3  ;;  %v13024_v31 = vadd.f32 %v13023_v29, %v13022_v2  ;;  %v12876_v3 = vadd.f32 %v18775_v30, %v18766_v20  ;;  %v19457_v61 = vld [vmem:[#allocation54_spill] sm:$0xff] }
 0xc5b   : > { %v12985_v39 = vpop.f32.mrf.mxu0  ;;  %v11237_v32 = vadd.f32 %v12947_v40, %v11172_v54  ;;  %v13035_v42 = vpop.f32.mrf.mxu1  ;;  %v12879_v30 = vadd.f32 %v18799_v21, %v18789_v0 }
 0xc5c   : > { %v11299_v57 = vadd.f32 %v12984_v8, %v11234_v17  ;;  %v11120_v20 = vadd.f32 %v12876_v3, %v18944_v6  ;;  %v19464_v3 = vld [vmem:[#allocation40_spill] sm:$0xff] }
 0xc5d   : > { %v12986_v44 = vpop.f32.mrf.mxu0  ;;  %v13037_v11 = vpop.f32.mrf.mxu1  ;;  %v11123_v21 = vadd.f32 %v12879_v30, %v18944_v6 }
 0xc5e   : > { %v12987_v43 = vadd.f32 %v12986_v44, %v12985_v39  ;;  %v11364_v22 = vadd.f32 %v13024_v31, %v11299_v57  ;;  %v19461_v31 = vld [vmem:[#allocation53_spill] sm:$0xff] }
 0xc5f   : > { %v12988_v53 = vpop.f32.mrf.mxu0 }
 0xc60   : > { %v11302_v58 = vadd.f32 %v12987_v43, %v11237_v32  ;;  %v19462_v32 = vld [vmem:[#allocation41_spill] sm:$0xff] }
 0xc61   : > { %v12989_v48 = vpop.f32.mrf.mxu0 }
 0xc62   : > { %v12990_v19 = vadd.f32 %v12989_v48, %v12988_v53 }
 0xc63   : > { %v12991_v60 = vpop.f32.mrf.mxu0 }
 0xc65   : > { %v12992_v15 = vpop.f32.mrf.mxu0 }
 0xc66   : > { %v12993_v48 = vadd.f32 %v12992_v15, %v12991_v60  ;;  %v13038_v60 = vpop.f32.mrf.mxu1 }
 0xc67   : > { %v18938_v52 = vpop.f32.mrf.mxu0 }
 0xc69   : > { %v18940_v23 = vpop.f32.mrf.mxu0 }
 0xc6b   : > { %v18948_v25 = vpop.f32.mrf.mxu0 }
 0xc6c   : > { %19451 = vst [vmem:[#allocation63_spill] sm:$0xff] %v18948_v25 }
 0xc6d   : > { %v18952_v46 = vpop.f32.mrf.mxu0 }
 0xc6e   : > { %19452 = vst [vmem:[#allocation77_spill] sm:$0xff] %v18952_v46  ;;  %v12910_v46 = vadd.f32 %v12909_v63, %v12908_v12  ;;  %v12913_v63 = vadd.f32 %v12912_v28, %v12911_v55  ;;  %v12916_v55 = vadd.f32 %v18918_v13, %v18914_v62  ;;  %v13027_v28 = vadd.f32 %v13026_v38, %v13025_v1 }
 0xc6f   : > { %v18957_v37 = vpop.f32.mrf.mxu0  ;;  %v12919_v62 = vadd.f32 %v18924_v45, %v18920_v4  ;;  %v13030_v13 = vadd.f32 %v13029_v24, %v18936_v36  ;;  %v12996_v45 = vadd.f32 %v18940_v23, %v18938_v52  ;;  %v19458_v36 = vld [vmem:[#allocation39_spill] sm:$0xff]  ;;  %v12885_v52 = vadd.f32 %v19462_v32, %v19461_v31  ;;  %v19463_v23 = vld [vmem:[#allocation45_spill] sm:$0xff] }
 0xc70   : > { %v11177_v5 = vadd.f32 %v12910_v46, %v11112_v49  ;;  %v11180_v44 = vadd.f32 %v12913_v63, %v11115_v34  ;;  %v11367_v54 = vadd.f32 %v13027_v28, %v11302_v58  ;;  %v11185_v38 = vadd.f32 %v12916_v55, %v11120_v20  ;;  %v19469_v20 = vld [vmem:[#allocation67_spill] sm:$0xff] }
 0xc71   : > { %v18963_v59 = vpop.f32.mrf.mxu0  ;;  %v11188_v57 = vadd.f32 %v12919_v62, %v11123_v21  ;;  %v13039_v21 = vadd.f32 %v13038_v60, %v13037_v11 }
 0xc72   : > { %v11242_v39 = vadd.f32 %v12950_v16, %v11177_v5  ;;  %v11245_v49 = vadd.f32 %v12953_v51, %v11180_v44  ;;  %v19459_v5 = vld [vmem:[#allocation74_spill] sm:$0xff]  ;;  %v11250_v50 = vadd.f32 %v12956_v26, %v11185_v38  ;;  %v12959_v16 = vadd.f32 %v19464_v3, %v19463_v23  ;;  %v19473_v26 = vld [vmem:[#allocation68_spill] sm:$0xff] }
 0xc73   : > { %v18968_v25 = vpop.f32.mrf.mxu0  ;;  %v13036_v51 = vadd.f32 %v13035_v42, %v18971_v7  ;;  %v19477_v23 = vld [vmem:[#allocation38_spill] sm:$0xff] }
 0xc74   : > { %v11307_v29 = vadd.f32 %v12990_v19, %v11242_v39  ;;  %v11310_v4 = vadd.f32 %v12993_v48, %v11245_v49  ;;  %v13040_v19 = vpop.f32.mrf.mxu1  ;;  %v19467_v39 = vld [vmem:[#allocation57_spill] sm:$0xff]  ;;  %v11253_v44 = vadd.f32 %v12959_v16, %v11188_v57  ;;  %v19470_v48 = vld [vmem:[#allocation52_spill] sm:$0xff] }
 0xc75   : > { %v18973_v14 = vpop.f32.mrf.mxu0  ;;  %v19466_v34 = vld [vmem:[#allocation77_spill] sm:$0xff] }
 0xc76   : > { %v11372_v15 = vadd.f32 %v13030_v13, %v11307_v29  ;;  %v11375_v41 = vadd.f32 %v13033_v47, %v11310_v4  ;;  %v13002_v13 = vadd.f32 %v18963_v59, %v18957_v37  ;;  %v13005_v37 = vadd.f32 %v18973_v14, %v18968_v25  ;;  %v19475_v59 = vld [vmem:[#allocation58_spill] sm:$0xff] }
 0xc77   : > { %v13062_v12 = vpop.f32.mrf.mxu0 }
 0xc79   : > { %v13063_v10 = vpop.f32.mrf.mxu0 }
 0xc7a   : > { %v13064_v56 = vadd.f32 %v13063_v10, %v13062_v12  ;;  %v19460_v12 = vld [vmem:[#allocation43_spill] sm:$0xff] }
 0xc7b   : > { %v13065_v46 = vpop.f32.mrf.mxu0  ;;  %v12922_v63 = vadd.f32 %v19460_v12, %v19459_v5  ;;  %v19465_v10 = vld [vmem:[#allocation63_spill] sm:$0xff] }
 0xc7c   : > { %v11429_v2 = vadd.f32 %v13064_v56, %v11364_v22  ;;  %v12999_v58 = vadd.f32 %v19466_v34, %v19465_v10  ;;  %v11315_v56 = vadd.f32 %v12996_v45, %v11250_v50  ;;  %v19476_v50 = vld [vmem:[#allocation47_spill] sm:$0xff]  ;;  %v19478_v34 = vld [vmem:[#allocation37_spill] sm:$0xff] }
 0xc7d   : > { %v13066_v53 = vpop.f32.mrf.mxu0  ;;  %v11193_v28 = vadd.f32 %v12922_v63, %v11128_v18 }
 0xc7e   : > { %v11461_v8 = vadd.f32 %v11429_v2, %v19457_v61  ;;  %v13067_v17 = vadd.f32 %v13066_v53, %v13065_v46  ;;  %v19468_v2 = vld [vmem:[#allocation61_spill] sm:$0xff]  ;;  %v11131_v53 = vadd.f32 %v12885_v52, %v18944_v6  ;;  %v19471_v61 = vld [vmem:[#allocation51_spill] sm:$0xff]  ;;  %v11380_v49 = vadd.f32 %v13036_v51, %v11315_v56 }
 0xc7f   : > { %v13068_v1 = vpop.f32.mrf.mxu0  ;;  %v12925_v30 = vadd.f32 %v19469_v20, %v19468_v2 }
 0xc80   : > { %11485 = vst [vmem:[%s18785_s3 + $0x10] sm:$0xff] %v11461_v8  ;;  %v11432_v0 = vadd.f32 %v13067_v17, %v11367_v54  ;;  %v12962_v8 = vadd.f32 %v19471_v61, %v19470_v48  ;;  %v13041_v54 = vpop.f32.mrf.mxu1  ;;  %v11318_v17 = vadd.f32 %v12999_v58, %v11253_v44 }
 0xc81   : > { %v13069_v33 = vpop.f32.mrf.mxu0  ;;  %v11196_v42 = vadd.f32 %v12925_v30, %v11131_v53  ;;  %v13042_v57 = vadd.f32 %v13041_v54, %v13040_v19 }
 0xc82   : > { %v11464_v24 = vadd.f32 %v11432_v0, %v19458_v36  ;;  %v13070_v40 = vadd.f32 %v13069_v33, %v13068_v1  ;;  %v19472_v1 = vld [vmem:[#allocation49_spill] sm:$0xff]  ;;  %v11258_v35 = vadd.f32 %v12962_v8, %v11193_v28  ;;  %v13043_v4 = vpop.f32.mrf.mxu1  ;;  %v11383_v45 = vadd.f32 %v13039_v21, %v11318_v17 }
 0xc83   : > { %v13071_v43 = vpop.f32.mrf.mxu0 }
 0xc84   : > { %11488 = vst [vmem:[%s18785_s3 + $0x28] sm:$0xff] %v11464_v24  ;;  %v11437_v27 = vadd.f32 %v13070_v40, %v11372_v15  ;;  %v19474_v15 = vld [vmem:[#allocation71_spill] sm:$0xff]  ;;  %v11323_v24 = vadd.f32 %v13002_v13, %v11258_v35  ;;  %v13044_v12 = vpop.f32.mrf.mxu1 }
 0xc85   : > { %v13072_v22 = vpop.f32.mrf.mxu0  ;;  %v12965_v33 = vadd.f32 %v19474_v15, %v19473_v26  ;;  %v13045_v14 = vadd.f32 %v13044_v12, %v13043_v4 }
 0xc86   : > { %v11467_v9 = vadd.f32 %v11437_v27, %v19467_v39  ;;  %v13073_v46 = vadd.f32 %v13072_v22, %v13071_v43  ;;  %v11388_v18 = vadd.f32 %v13042_v57, %v11323_v24 }
 0xc87   : > { %v13074_v55 = vpop.f32.mrf.mxu0  ;;  %v11261_v43 = vadd.f32 %v12965_v33, %v11196_v42 }
 0xc88   : > { %11491 = vst [vmem:[%s18785_s3 + $0x40] sm:$0xff] %v11467_v9  ;;  %v11440_v29 = vadd.f32 %v13073_v46, %v11375_v41 }
 0xc89   : > { %v13075_v62 = vpop.f32.mrf.mxu0  ;;  %v11326_v47 = vadd.f32 %v13005_v37, %v11261_v43 }
 0xc8a   : > { %v11470_v38 = vadd.f32 %v11440_v29, %v19472_v1  ;;  %v13076_v0 = vadd.f32 %v13075_v62, %v13074_v55 }
 0xc8b   : > { %v13077_v7 = vpop.f32.mrf.mxu0  ;;  %v11391_v16 = vadd.f32 %v13045_v14, %v11326_v47 }
 0xc8c   : > { %11494 = vst [vmem:[%s18785_s3 + $0x58] sm:$0xff] %v11470_v38  ;;  %v11445_v6 = vadd.f32 %v13076_v0, %v11380_v49 }
 0xc8d   : > { %v13078_v36 = vpop.f32.mrf.mxu0 }
 0xc8e   : > { %v11473_v40 = vadd.f32 %v11445_v6, %v19475_v59  ;;  %v13079_v11 = vadd.f32 %v13078_v36, %v13077_v7 }
 0xc8f   : > { %v13080_v60 = vpop.f32.mrf.mxu0 }
 0xc90   : > { %11497 = vst [vmem:[%s18785_s3 + $0x70] sm:$0xff] %v11473_v40  ;;  %v11448_v5 = vadd.f32 %v13079_v11, %v11383_v45 }
 0xc91   : > { %v13081_v63 = vpop.f32.mrf.mxu0 }
 0xc92   : > { %v11476_v27 = vadd.f32 %v11448_v5, %v19476_v50  ;;  %v13082_v31 = vadd.f32 %v13081_v63, %v13080_v60 }
 0xc93   : > { %v13083_v25 = vpop.f32.mrf.mxu0 }
 0xc94   : > { %11500 = vst [vmem:[%s18785_s3 + $0x88] sm:$0xff] %v11476_v27  ;;  %v11453_v32 = vadd.f32 %v13082_v31, %v11388_v18 }
 0xc95   : > { %v13084_v52 = vpop.f32.mrf.mxu0 }
 0xc96   : > { %v11479_v3 = vadd.f32 %v11453_v32, %v19477_v23  ;;  %v13085_v19 = vadd.f32 %v13084_v52, %v13083_v25 }
 0xc98   : > { %11503 = vst [vmem:[%s18785_s3 + $0xa0] sm:$0xff] %v11479_v3  ;;  %v11456_v10 = vadd.f32 %v13085_v19, %v11391_v16 }
 0xc9a   : > { %v11482_v58 = vadd.f32 %v11456_v10, %v19478_v34 }
 0xc9c   : > { %11506 = vst [vmem:[%s18785_s3 + $0xb8] sm:$0xff] %v11482_v58 }
 0xc9d   : > { %15335 = shalt.err (!%p15332_p11)
}
 0xc9e   : > { %s15336_s15 = scalar_lea.hbm %s19043_s19, 3072  ;;  %s15340_s2 = scalar_lea.hbm %s19102_s12, 6144 }
 0xc9f   : > { %p15337_p10 = scmp.ne.s32.totalorder %s19043_s19, %s15336_s15  ;;  %p15341_p2 = scmp.lt.s32.totalorder %s19043_s19, %s19102_s12 }
 0xca0   : > { %p15342_p4 = scmp.lt.s32.totalorder %s15340_s2, %s15336_s15 }
 0xca1   : > { %p15338_p12 = pnand %p15337_p10, %p19479_p13 }
 0xca2   : > { %p15343_p5 = por %p15342_p4, %p15341_p2 }
 0xca3   : > { %p15339_p0 = pneg %p15338_p12 }
 0xca5   : > { %p15344_p7 = pnand %p15343_p5, %p15339_p0 }
 0xca7   : > { %15347 = shalt.err (!%p15344_p7)
}
 0xca8   : > { %s15435_s26 = smov 384   ;;  %s15436_s18 = smov 24  }
 0xca9   : > { %13400 = dma.vmem_to_hbm [thread:$0]  (%p19479_p13), %s19046_s20, 3072, %s19043_s19, %s11508_s27, %s15435_s26, %s15435_s26, %s15436_s18  }
 0xcaa PF: > { %s11537_s16 = sand.u32 1, %s15398_s21   ;;  %p19480_p6 = scmp.ne.s32.totalorder %s19198_s1, 0 }
 0xcab   : > { %p19481_p1 = scmp.ge.s32.totalorder %s15410_s24, 2  ;;  %s11538_s5 = scalar_lea.sflag [#allocation4], %s11537_s16 }
 0xcad   : > { %p13441_p3 = pnand %p19481_p1, %p19480_p6 }
 0xcaf   : > { %p13442_p8 = pneg %p13441_p3 }
 0xcb1   : > { %15393 = dma.done.wait (%p13442_p8), %s11538_s5, 3072  }
 0xcb2   : > { %15395 = vsyncadd (%p13442_p8), %s11538_s5, 4294964224  ;;  %p31_p9 = scmp.ge.s32.totalorder %s15647_s13, 4   ;;  %s19482_s21 = smov %s15402_s22 }
 0xcb3   : > { %s19483_s22 = smov %s15406_s23  ;;  %s19484_s23 = smov %s15659_s17 }
 0xcb4   : > { %s19485_s24 = smov %s15647_s13  ;;  %33 = sbr.rel (!%p31_p9) target bundleno = 18 (0x12), region = 157 }
 0xcb9   :  { %11543 = vsyncpa [#allocation3], 1 }
 0xcba   :  { %11545 = vsyncpa [#allocation3 + $0x1], 1 }
 0xcbb   :  { %11546 = vsyncpa [#allocation6], 1 }
 0xcbc   :  { %11547 = vsyncpa [#allocation9], 1 }
 0xcbd   :  { %11548 = vsyncpa [#allocation12], 1 }
 0xcbe   :  { %11549 = vsyncpa [#allocation15], 1 }
 0xcbf   :  { %11550 = vsyncpa [#allocation18], 1 }
 0xcc0   :  { %11551 = vsyncpa [#allocation21], 1 }
 0xcc1   :  { %11552 = vsyncpa [#allocation4], 1 }
 0xcc2   :  { %11554 = vsyncpa [#allocation4 + $0x1], 1 }

</bundles_post_ra>
